<compile_context>
chip_gen: v7x
topology: tpu7x:2x2x1
jax: 0.10.0
libtpu: 0.0.40
codegen_flags: <defaults>
</compile_context>

<pallas_src>
import jax
import jax.numpy as jnp
from jax.experimental import pallas as pl
from jax.experimental.pallas import tpu as pltpu


# ---------------------------------------------------------------------------
# Fused LeNet kernel: one grid step processes one block of BT images.
# ---------------------------------------------------------------------------
def _lenet_kernel(p1_ref, w1_ref, b1_ref, w2_ref, b2_ref,
                  wf1_ref, bf1_ref, wf2_ref, bf2_ref, wf3_ref, bf3_ref,
                  out_ref, x2_ref, a2_ref):
    f32 = jnp.float32
    BT = p1_ref.shape[0]

    # ---- conv1 (im2col matmul, N padded to 128) + bias + ReLU + 2x2 pool ----
    # p1_ref: (BT, 4, 144, 32): axis 1 = pooling-window position (dy, dx),
    # axis 2 = pooled output pixel h*12+w, axis 3 = 25 conv taps padded to 32.
    a1p = None
    for q in range(4):                                     # 4 window positions
        aq = jnp.dot(p1_ref[:, q].reshape(BT * 144, 32), w1_ref[...],
                     preferred_element_type=f32)           # (BT*144, 128)
        aq = jnp.maximum(aq + b1_ref[...], 0.0)            # bias + ReLU
        a1p = aq if a1p is None else jnp.maximum(a1p, aq)  # fused max-pool
    a1p = a1p.reshape(BT, 144, 128)                        # rows = h*12 + w

    # Scatter pooled rows into an NHWC (BT, 12, 12, 128) VMEM scratch so that
    # conv2's in-kernel im2col only needs contiguous tap slices.
    for h in range(12):
        x2_ref[:, h, :, :] = a1p[:, h * 12:(h + 1) * 12, :]

    # ---- conv2: in-kernel im2col as 25 lane-dense (K=128) tap matmuls ----
    acc2 = jnp.zeros((BT * 64, 128), f32)
    for i in range(5):
        for j in range(5):
            xt = x2_ref[:, i:i + 8, j:j + 8, :].reshape(BT * 64, 128)
            acc2 = acc2 + jnp.dot(xt, w2_ref[i * 5 + j],
                                  preferred_element_type=f32)
    a2 = jnp.maximum(acc2 + b2_ref[...], 0.0)              # (BT*64, 128)
    a2_ref[...] = a2.reshape(BT, 8, 8, 128)                # NHWC, OC on lanes

    # ---- 2x2 pool + fc1, fused: accumulate over the 16 pooled positions ----
    accf = jnp.zeros((BT, 128), f32)
    for h2 in range(4):
        for w2 in range(4):
            c00 = a2_ref[:, 2 * h2,     2 * w2,     :]
            c01 = a2_ref[:, 2 * h2,     2 * w2 + 1, :]
            c10 = a2_ref[:, 2 * h2 + 1, 2 * w2,     :]
            c11 = a2_ref[:, 2 * h2 + 1, 2 * w2 + 1, :]
            feat = jnp.maximum(jnp.maximum(c00, c01), jnp.maximum(c10, c11))
            accf = accf + jnp.dot(feat, wf1_ref[h2 * 4 + w2],
                                  preferred_element_type=f32)
    h1 = jnp.maximum(accf + bf1_ref[...], 0.0)             # (BT, 128), 120 real

    # ---- fc2 + ReLU, fc3 (weights VMEM-resident, N padded to 128) ----
    h2a = jnp.maximum(jnp.dot(h1, wf2_ref[...], preferred_element_type=f32)
                      + bf2_ref[...], 0.0)
    out = jnp.dot(h2a, wf3_ref[...], preferred_element_type=f32) + bf3_ref[...]
    out_ref[...] = out                                     # (BT, 128), 10 real


# ---------------------------------------------------------------------------
# One-time weight packing (lane-dense, NHWC-ordered) -- done OUTSIDE the jit.
# ---------------------------------------------------------------------------
def pack_params(params):
    f32 = jnp.float32
    # conv1: torch (6, 1, 5, 5) -> (32, 128): rows = tap i*5+j, cols = OC pad.
    w1 = params["conv1_w"].astype(f32).reshape(6, 25).T            # (25, 6)
    w1p = jnp.zeros((32, 128), f32).at[:25, :6].set(w1)
    b1p = jnp.zeros((1, 128), f32).at[0, :6].set(params["conv1_b"].astype(f32))
    # conv2: torch (16, 6, 5, 5) -> (25, 128, 128): [tap, in_ch, out_ch].
    w2 = params["conv2_w"].astype(f32).transpose(2, 3, 1, 0).reshape(25, 6, 16)
    w2p = jnp.zeros((25, 128, 128), f32).at[:, :6, :16].set(w2)
    b2p = jnp.zeros((1, 128), f32).at[0, :16].set(params["conv2_b"].astype(f32))
    # fc1: torch (120, 256) with 256 = flatten of (c=16, h2=4, w2=4) (NCHW).
    # Split per pooled spatial position s2 = h2*4 + w2 -> (16, 128, 128).
    wf1 = params["fc1_w"].astype(f32).reshape(120, 16, 4, 4)
    wf1 = wf1.transpose(2, 3, 1, 0).reshape(16, 16, 120)           # (s2, c, n)
    wf1p = jnp.zeros((16, 128, 128), f32).at[:, :16, :120].set(wf1)
    bf1p = jnp.zeros((1, 128), f32).at[0, :120].set(params["fc1_b"].astype(f32))
    # fc2 / fc3: pre-transposed to (in, out), zero-padded to 128x128.
    wf2p = jnp.zeros((128, 128), f32).at[:120, :84].set(params["fc2_w"].astype(f32).T)
    bf2p = jnp.zeros((1, 128), f32).at[0, :84].set(params["fc2_b"].astype(f32))
    wf3p = jnp.zeros((128, 128), f32).at[:84, :10].set(params["fc3_w"].astype(f32).T)
    bf3p = jnp.zeros((1, 128), f32).at[0, :10].set(params["fc3_b"].astype(f32))
    return dict(w1=w1p, b1=b1p, w2=w2p, b2=b2p, wf1=wf1p, bf1=bf1p,
                wf2=wf2p, bf2=bf2p, wf3=wf3p, bf3=bf3p)


# ---------------------------------------------------------------------------
# Forward wrapper: one pallas_call for the whole network.
# ---------------------------------------------------------------------------
def lenet_forward(img, packed, *, batch_block=8):
    """img: (B, 1, 28, 28) float32, packed: dict from pack_params()."""
    B = img.shape[0]
    BT = min(batch_block, B)
    Bp = ((B + BT - 1) // BT) * BT
    x = img[:, 0].astype(jnp.float32)                      # (B, 28, 28)
    if Bp != B:
        x = jnp.pad(x, ((0, Bp - B), (0, 0), (0, 0)))

    # conv1 patch extraction for the 1-channel input, rows pre-ordered as
    # (batch, pool-window position, pooled pixel); K padded 25 -> 32.
    # TODO(synk): conv1's single-channel tap extraction stays in XLA; conv2's
    # (6-channel, 25x-amplified) im2col is done inside the kernel.
    taps = [x[:, i:i + 24, j:j + 24] for i in range(5) for j in range(5)]
    p1 = jnp.stack(taps, axis=-1)                          # (Bp, 24, 24, 25)
    p1 = (p1.reshape(Bp, 12, 2, 12, 2, 25)
            .transpose(0, 2, 4, 1, 3, 5)                   # (b, dy, dx, h, w, tap)
            .reshape(Bp, 4, 144, 25))
    p1 = jnp.pad(p1, ((0, 0), (0, 0), (0, 0), (0, 7)))     # (Bp, 4, 144, 32)

    def _full(shape):
        return pl.BlockSpec(shape, lambda i: (0,) * len(shape))

    out = pl.pallas_call(
        _lenet_kernel,
        out_shape=jax.ShapeDtypeStruct((Bp, 128), jnp.float32),
        grid=(Bp // BT,),
        in_specs=[
            pl.BlockSpec((BT, 4, 144, 32), lambda i: (i, 0, 0, 0)),
            _full((32, 128)), _full((1, 128)),             # conv1 w / b
            _full((25, 128, 128)), _full((1, 128)),        # conv2 w / b
            _full((16, 128, 128)), _full((1, 128)),        # fc1   w / b
            _full((128, 128)), _full((1, 128)),            # fc2   w / b
            _full((128, 128)), _full((1, 128)),            # fc3   w / b
        ],
        out_specs=pl.BlockSpec((BT, 128), lambda i: (i, 0)),
        scratch_shapes=[
            pltpu.VMEM((BT, 12, 12, 128), jnp.float32),    # pooled conv1 act
            pltpu.VMEM((BT, 8, 8, 128), jnp.float32),      # conv2 act
        ],
        compiler_params=pltpu.CompilerParams(
            dimension_semantics=("parallel",)),
    )(p1, packed["w1"], packed["b1"], packed["w2"], packed["b2"],
      packed["wf1"], packed["bf1"], packed["wf2"], packed["bf2"],
      packed["wf3"], packed["bf3"])
    return out[:B, :10]


# ---------------------------------------------------------------------------
# Deterministic parameter init (PyTorch shapes; uniform(-1/sqrt(fan_in), ...))
# ---------------------------------------------------------------------------
def init_params(key):
    ks = jax.random.split(key, 10)

    def u(k, shape, fan_in):
        bound = 1.0 / (fan_in ** 0.5)
        return jax.random.uniform(k, shape, jnp.float32, -bound, bound)

    return {
        "conv1_w": u(ks[0], (6, 1, 5, 5), 1 * 5 * 5),
        "conv1_b": u(ks[1], (6,), 1 * 5 * 5),
        "conv2_w": u(ks[2], (16, 6, 5, 5), 6 * 5 * 5),
        "conv2_b": u(ks[3], (16,), 6 * 5 * 5),
        "fc1_w": u(ks[4], (120, 16 * 4 * 4), 16 * 4 * 4),   # torch Linear: (out, in)
        "fc1_b": u(ks[5], (120,), 16 * 4 * 4),
        "fc2_w": u(ks[6], (84, 120), 120),
        "fc2_b": u(ks[7], (84,), 120),
        "fc3_w": u(ks[8], (10, 84), 84),
        "fc3_b": u(ks[9], (10,), 84),
    }


# ---------------------------------------------------------------------------
# Plain-XLA reference (PyTorch semantics) for the runtime self-check.
# ---------------------------------------------------------------------------
def lenet_reference(img, params):
    hp = jax.lax.Precision.HIGHEST
    x = jax.lax.conv_general_dilated(
        img, params["conv1_w"], (1, 1), "VALID",
        dimension_numbers=("NCHW", "OIHW", "NCHW"), precision=hp)
    x = jax.nn.relu(x + params["conv1_b"][None, :, None, None])
    x = jax.lax.reduce_window(x, -jnp.inf, jax.lax.max,
                              (1, 1, 2, 2), (1, 1, 2, 2), "VALID")
    x = jax.lax.conv_general_dilated(
        x, params["conv2_w"], (1, 1), "VALID",
        dimension_numbers=("NCHW", "OIHW", "NCHW"), precision=hp)
    x = jax.nn.relu(x + params["conv2_b"][None, :, None, None])
    x = jax.lax.reduce_window(x, -jnp.inf, jax.lax.max,
                              (1, 1, 2, 2), (1, 1, 2, 2), "VALID")
    f = x.reshape(img.shape[0], -1)
    h = jax.nn.relu(jnp.dot(f, params["fc1_w"].T, precision=hp) + params["fc1_b"])
    h = jax.nn.relu(jnp.dot(h, params["fc2_w"].T, precision=hp) + params["fc2_b"])
    return jnp.dot(h, params["fc3_w"].T, precision=hp) + params["fc3_b"]


if __name__ == "__main__":
    key = jax.random.PRNGKey(0)
    pkey, xkey = jax.random.split(key)
    params = init_params(pkey)
    packed = pack_params(params)      # one-time packing, outside the jitted forward
    # LeNet's fc1 (16*4*4 inputs) implies 28x28 single-channel images.
    img = jax.random.normal(xkey, (2, 1, 28, 28), jnp.float32)

    out = jax.block_until_ready(jax.jit(lenet_forward)(img, packed))
    assert out.shape == (2, 10) and out.dtype == jnp.float32

    ref = jax.block_until_ready(jax.jit(lenet_reference)(img, params))
    err = float(jnp.max(jnp.abs(out - ref)))
    assert err < 2e-2, f"mismatch vs reference: max abs err {err}"
    print("KERNEL_OK")
</pallas_src>

<mosaic_0001>
module attributes {stable_mosaic.version = 11 : i64} {
  func.func @_lenet_kernel(%arg0: i32, %arg1: memref<2x4x144x32xf32, #tpu.memory_space<vmem>>, %arg2: memref<32x128xf32, #tpu.memory_space<vmem>>, %arg3: memref<1x128xf32, #tpu.memory_space<vmem>>, %arg4: memref<25x128x128xf32, #tpu.memory_space<vmem>>, %arg5: memref<1x128xf32, #tpu.memory_space<vmem>>, %arg6: memref<16x128x128xf32, #tpu.memory_space<vmem>>, %arg7: memref<1x128xf32, #tpu.memory_space<vmem>>, %arg8: memref<128x128xf32, #tpu.memory_space<vmem>>, %arg9: memref<1x128xf32, #tpu.memory_space<vmem>>, %arg10: memref<128x128xf32, #tpu.memory_space<vmem>>, %arg11: memref<1x128xf32, #tpu.memory_space<vmem>>, %arg12: memref<2x128xf32, #tpu.memory_space<vmem>>, %arg13: memref<2x12x12x128xf32, #tpu.memory_space<vmem>>, %arg14: memref<2x8x8x128xf32, #tpu.memory_space<vmem>>) attributes {dimension_semantics = [#tpu.dimension_semantics<parallel>], iteration_bounds = array<i64: 1>, scalar_prefetch = 0 : i64, scratch_operands = 2 : i64, tpu.core_type = #tpu.core_type<tc>, window_params = [{transform_indices = @transform_0, window_bounds = array<i64: 2, 4, 144, 32>}, {pipeline_mode = #tpu.pipeline_mode<synchronous>, transform_indices = @transform_1, window_bounds = array<i64: 32, 128>}, {pipeline_mode = #tpu.pipeline_mode<synchronous>, transform_indices = @transform_2, window_bounds = array<i64: 1, 128>}, {pipeline_mode = #tpu.pipeline_mode<synchronous>, transform_indices = @transform_3, window_bounds = array<i64: 25, 128, 128>}, {pipeline_mode = #tpu.pipeline_mode<synchronous>, transform_indices = @transform_4, window_bounds = array<i64: 1, 128>}, {pipeline_mode = #tpu.pipeline_mode<synchronous>, transform_indices = @transform_5, window_bounds = array<i64: 16, 128, 128>}, {pipeline_mode = #tpu.pipeline_mode<synchronous>, transform_indices = @transform_6, window_bounds = array<i64: 1, 128>}, {pipeline_mode = #tpu.pipeline_mode<synchronous>, transform_indices = @transform_7, window_bounds = array<i64: 128, 128>}, {pipeline_mode = #tpu.pipeline_mode<synchronous>, transform_indices = @transform_8, window_bounds = array<i64: 1, 128>}, {pipeline_mode = #tpu.pipeline_mode<synchronous>, transform_indices = @transform_9, window_bounds = array<i64: 128, 128>}, {pipeline_mode = #tpu.pipeline_mode<synchronous>, transform_indices = @transform_10, window_bounds = array<i64: 1, 128>}, {transform_indices = @transform_11, window_bounds = array<i64: 2, 128>}]} {
    %c0 = arith.constant 0 : index
    %c0_0 = arith.constant 0 : index
    %c0_1 = arith.constant 0 : index
    %c0_2 = arith.constant 0 : index
    %0 = vector.load %arg1[%c0, %c0_0, %c0_1, %c0_2] : memref<2x4x144x32xf32, #tpu.memory_space<vmem>>, vector<2x1x144x32xf32>
    %1 = vector.shape_cast %0 : vector<2x1x144x32xf32> to vector<2x144x32xf32>
    %2 = vector.shape_cast %1 : vector<2x144x32xf32> to vector<288x32xf32>
    %c0_3 = arith.constant 0 : index
    %c0_4 = arith.constant 0 : index
    %3 = vector.load %arg2[%c0_3, %c0_4] : memref<32x128xf32, #tpu.memory_space<vmem>>, vector<32x128xf32>
    %cst = arith.constant dense<0.000000e+00> : vector<288x128xf32>
    %4 = tpu.matmul %2, %3, %cst {dimension_numbers = #tpu.dot_dimension_numbers<[1], [0], [0], [1], [0, 0, 1, 1], [], []>} : vector<288x32xf32>, vector<32x128xf32>, vector<288x128xf32> -> vector<288x128xf32>
    %c0_5 = arith.constant 0 : index
    %c0_6 = arith.constant 0 : index
    %5 = vector.load %arg3[%c0_5, %c0_6] : memref<1x128xf32, #tpu.memory_space<vmem>>, vector<1x128xf32>
    %6 = vector.broadcast %5 : vector<1x128xf32> to vector<288x128xf32>
    %7 = arith.addf %4, %6 : vector<288x128xf32>
    %cst_7 = arith.constant 0.000000e+00 : f32
    %8 = vector.broadcast %cst_7 : f32 to vector<288x128xf32>
    %9 = arith.maximumf %7, %8 : vector<288x128xf32>
    %c0_8 = arith.constant 0 : index
    %c1 = arith.constant 1 : index
    %c0_9 = arith.constant 0 : index
    %c0_10 = arith.constant 0 : index
    %10 = vector.load %arg1[%c0_8, %c1, %c0_9, %c0_10] : memref<2x4x144x32xf32, #tpu.memory_space<vmem>>, vector<2x1x144x32xf32>
    %11 = vector.shape_cast %10 : vector<2x1x144x32xf32> to vector<2x144x32xf32>
    %12 = vector.shape_cast %11 : vector<2x144x32xf32> to vector<288x32xf32>
    %c0_11 = arith.constant 0 : index
    %c0_12 = arith.constant 0 : index
    %13 = vector.load %arg2[%c0_11, %c0_12] : memref<32x128xf32, #tpu.memory_space<vmem>>, vector<32x128xf32>
    %cst_13 = arith.constant dense<0.000000e+00> : vector<288x128xf32>
    %14 = tpu.matmul %12, %13, %cst_13 {dimension_numbers = #tpu.dot_dimension_numbers<[1], [0], [0], [1], [0, 0, 1, 1], [], []>} : vector<288x32xf32>, vector<32x128xf32>, vector<288x128xf32> -> vector<288x128xf32>
    %c0_14 = arith.constant 0 : index
    %c0_15 = arith.constant 0 : index
    %15 = vector.load %arg3[%c0_14, %c0_15] : memref<1x128xf32, #tpu.memory_space<vmem>>, vector<1x128xf32>
    %16 = vector.broadcast %15 : vector<1x128xf32> to vector<288x128xf32>
    %17 = arith.addf %14, %16 : vector<288x128xf32>
    %cst_16 = arith.constant 0.000000e+00 : f32
    %18 = vector.broadcast %cst_16 : f32 to vector<288x128xf32>
    %19 = arith.maximumf %17, %18 : vector<288x128xf32>
    %20 = arith.maximumf %9, %19 : vector<288x128xf32>
    %c0_17 = arith.constant 0 : index
    %c2 = arith.constant 2 : index
    %c0_18 = arith.constant 0 : index
    %c0_19 = arith.constant 0 : index
    %21 = vector.load %arg1[%c0_17, %c2, %c0_18, %c0_19] : memref<2x4x144x32xf32, #tpu.memory_space<vmem>>, vector<2x1x144x32xf32>
    %22 = vector.shape_cast %21 : vector<2x1x144x32xf32> to vector<2x144x32xf32>
    %23 = vector.shape_cast %22 : vector<2x144x32xf32> to vector<288x32xf32>
    %c0_20 = arith.constant 0 : index
    %c0_21 = arith.constant 0 : index
    %24 = vector.load %arg2[%c0_20, %c0_21] : memref<32x128xf32, #tpu.memory_space<vmem>>, vector<32x128xf32>
    %cst_22 = arith.constant dense<0.000000e+00> : vector<288x128xf32>
    %25 = tpu.matmul %23, %24, %cst_22 {dimension_numbers = #tpu.dot_dimension_numbers<[1], [0], [0], [1], [0, 0, 1, 1], [], []>} : vector<288x32xf32>, vector<32x128xf32>, vector<288x128xf32> -> vector<288x128xf32>
    %c0_23 = arith.constant 0 : index
    %c0_24 = arith.constant 0 : index
    %26 = vector.load %arg3[%c0_23, %c0_24] : memref<1x128xf32, #tpu.memory_space<vmem>>, vector<1x128xf32>
    %27 = vector.broadcast %26 : vector<1x128xf32> to vector<288x128xf32>
    %28 = arith.addf %25, %27 : vector<288x128xf32>
    %cst_25 = arith.constant 0.000000e+00 : f32
    %29 = vector.broadcast %cst_25 : f32 to vector<288x128xf32>
    %30 = arith.maximumf %28, %29 : vector<288x128xf32>
    %31 = arith.maximumf %20, %30 : vector<288x128xf32>
    %c0_26 = arith.constant 0 : index
    %c3 = arith.constant 3 : index
    %c0_27 = arith.constant 0 : index
    %c0_28 = arith.constant 0 : index
    %32 = vector.load %arg1[%c0_26, %c3, %c0_27, %c0_28] : memref<2x4x144x32xf32, #tpu.memory_space<vmem>>, vector<2x1x144x32xf32>
    %33 = vector.shape_cast %32 : vector<2x1x144x32xf32> to vector<2x144x32xf32>
    %34 = vector.shape_cast %33 : vector<2x144x32xf32> to vector<288x32xf32>
    %c0_29 = arith.constant 0 : index
    %c0_30 = arith.constant 0 : index
    %35 = vector.load %arg2[%c0_29, %c0_30] : memref<32x128xf32, #tpu.memory_space<vmem>>, vector<32x128xf32>
    %cst_31 = arith.constant dense<0.000000e+00> : vector<288x128xf32>
    %36 = tpu.matmul %34, %35, %cst_31 {dimension_numbers = #tpu.dot_dimension_numbers<[1], [0], [0], [1], [0, 0, 1, 1], [], []>} : vector<288x32xf32>, vector<32x128xf32>, vector<288x128xf32> -> vector<288x128xf32>
    %c0_32 = arith.constant 0 : index
    %c0_33 = arith.constant 0 : index
    %37 = vector.load %arg3[%c0_32, %c0_33] : memref<1x128xf32, #tpu.memory_space<vmem>>, vector<1x128xf32>
    %38 = vector.broadcast %37 : vector<1x128xf32> to vector<288x128xf32>
    %39 = arith.addf %36, %38 : vector<288x128xf32>
    %cst_34 = arith.constant 0.000000e+00 : f32
    %40 = vector.broadcast %cst_34 : f32 to vector<288x128xf32>
    %41 = arith.maximumf %39, %40 : vector<288x128xf32>
    %42 = arith.maximumf %31, %41 : vector<288x128xf32>
    %43 = vector.shape_cast %42 : vector<288x128xf32> to vector<2x144x128xf32>
    %44 = vector.extract_strided_slice %43 {offsets = [0, 0, 0], sizes = [2, 12, 128], strides = [1, 1, 1]} : vector<2x144x128xf32> to vector<2x12x128xf32>
    %c0_35 = arith.constant 0 : index
    %c0_36 = arith.constant 0 : index
    %c0_37 = arith.constant 0 : index
    %c0_38 = arith.constant 0 : index
    %45 = vector.load %arg13[%c0_35, %c0_36, %c0_37, %c0_38] : memref<2x12x12x128xf32, #tpu.memory_space<vmem>>, vector<2x1x12x128xf32>
    %46 = vector.shape_cast %45 : vector<2x1x12x128xf32> to vector<2x12x128xf32>
    %47 = vector.shape_cast %44 : vector<2x12x128xf32> to vector<2x1x12x128xf32>
    tpu.vector_store %arg13[%c0_35, %c0_36, %c0_37, %c0_38], %47 {strides = array<i32>} : memref<2x12x12x128xf32, #tpu.memory_space<vmem>>, vector<2x1x12x128xf32>,
    %48 = vector.extract_strided_slice %43 {offsets = [0, 12, 0], sizes = [2, 12, 128], strides = [1, 1, 1]} : vector<2x144x128xf32> to vector<2x12x128xf32>
    %c0_39 = arith.constant 0 : index
    %c1_40 = arith.constant 1 : index
    %c0_41 = arith.constant 0 : index
    %c0_42 = arith.constant 0 : index
    %49 = vector.load %arg13[%c0_39, %c1_40, %c0_41, %c0_42] : memref<2x12x12x128xf32, #tpu.memory_space<vmem>>, vector<2x1x12x128xf32>
    %50 = vector.shape_cast %49 : vector<2x1x12x128xf32> to vector<2x12x128xf32>
    %51 = vector.shape_cast %48 : vector<2x12x128xf32> to vector<2x1x12x128xf32>
    tpu.vector_store %arg13[%c0_39, %c1_40, %c0_41, %c0_42], %51 {strides = array<i32>} : memref<2x12x12x128xf32, #tpu.memory_space<vmem>>, vector<2x1x12x128xf32>,
    %52 = vector.extract_strided_slice %43 {offsets = [0, 24, 0], sizes = [2, 12, 128], strides = [1, 1, 1]} : vector<2x144x128xf32> to vector<2x12x128xf32>
    %c0_43 = arith.constant 0 : index
    %c2_44 = arith.constant 2 : index
    %c0_45 = arith.constant 0 : index
    %c0_46 = arith.constant 0 : index
    %53 = vector.load %arg13[%c0_43, %c2_44, %c0_45, %c0_46] : memref<2x12x12x128xf32, #tpu.memory_space<vmem>>, vector<2x1x12x128xf32>
    %54 = vector.shape_cast %53 : vector<2x1x12x128xf32> to vector<2x12x128xf32>
    %55 = vector.shape_cast %52 : vector<2x12x128xf32> to vector<2x1x12x128xf32>
    tpu.vector_store %arg13[%c0_43, %c2_44, %c0_45, %c0_46], %55 {strides = array<i32>} : memref<2x12x12x128xf32, #tpu.memory_space<vmem>>, vector<2x1x12x128xf32>,
    %56 = vector.extract_strided_slice %43 {offsets = [0, 36, 0], sizes = [2, 12, 128], strides = [1, 1, 1]} : vector<2x144x128xf32> to vector<2x12x128xf32>
    %c0_47 = arith.constant 0 : index
    %c3_48 = arith.constant 3 : index
    %c0_49 = arith.constant 0 : index
    %c0_50 = arith.constant 0 : index
    %57 = vector.load %arg13[%c0_47, %c3_48, %c0_49, %c0_50] : memref<2x12x12x128xf32, #tpu.memory_space<vmem>>, vector<2x1x12x128xf32>
    %58 = vector.shape_cast %57 : vector<2x1x12x128xf32> to vector<2x12x128xf32>
    %59 = vector.shape_cast %56 : vector<2x12x128xf32> to vector<2x1x12x128xf32>
    tpu.vector_store %arg13[%c0_47, %c3_48, %c0_49, %c0_50], %59 {strides = array<i32>} : memref<2x12x12x128xf32, #tpu.memory_space<vmem>>, vector<2x1x12x128xf32>,
    %60 = vector.extract_strided_slice %43 {offsets = [0, 48, 0], sizes = [2, 12, 128], strides = [1, 1, 1]} : vector<2x144x128xf32> to vector<2x12x128xf32>
    %c0_51 = arith.constant 0 : index
    %c4 = arith.constant 4 : index
    %c0_52 = arith.constant 0 : index
    %c0_53 = arith.constant 0 : index
    %61 = vector.load %arg13[%c0_51, %c4, %c0_52, %c0_53] : memref<2x12x12x128xf32, #tpu.memory_space<vmem>>, vector<2x1x12x128xf32>
    %62 = vector.shape_cast %61 : vector<2x1x12x128xf32> to vector<2x12x128xf32>
    %63 = vector.shape_cast %60 : vector<2x12x128xf32> to vector<2x1x12x128xf32>
    tpu.vector_store %arg13[%c0_51, %c4, %c0_52, %c0_53], %63 {strides = array<i32>} : memref<2x12x12x128xf32, #tpu.memory_space<vmem>>, vector<2x1x12x128xf32>,
    %64 = vector.extract_strided_slice %43 {offsets = [0, 60, 0], sizes = [2, 12, 128], strides = [1, 1, 1]} : vector<2x144x128xf32> to vector<2x12x128xf32>
    %c0_54 = arith.constant 0 : index
    %c5 = arith.constant 5 : index
    %c0_55 = arith.constant 0 : index
    %c0_56 = arith.constant 0 : index
    %65 = vector.load %arg13[%c0_54, %c5, %c0_55, %c0_56] : memref<2x12x12x128xf32, #tpu.memory_space<vmem>>, vector<2x1x12x128xf32>
    %66 = vector.shape_cast %65 : vector<2x1x12x128xf32> to vector<2x12x128xf32>
    %67 = vector.shape_cast %64 : vector<2x12x128xf32> to vector<2x1x12x128xf32>
    tpu.vector_store %arg13[%c0_54, %c5, %c0_55, %c0_56], %67 {strides = array<i32>} : memref<2x12x12x128xf32, #tpu.memory_space<vmem>>, vector<2x1x12x128xf32>,
    %68 = vector.extract_strided_slice %43 {offsets = [0, 72, 0], sizes = [2, 12, 128], strides = [1, 1, 1]} : vector<2x144x128xf32> to vector<2x12x128xf32>
    %c0_57 = arith.constant 0 : index
    %c6 = arith.constant 6 : index
    %c0_58 = arith.constant 0 : index
    %c0_59 = arith.constant 0 : index
    %69 = vector.load %arg13[%c0_57, %c6, %c0_58, %c0_59] : memref<2x12x12x128xf32, #tpu.memory_space<vmem>>, vector<2x1x12x128xf32>
    %70 = vector.shape_cast %69 : vector<2x1x12x128xf32> to vector<2x12x128xf32>
    %71 = vector.shape_cast %68 : vector<2x12x128xf32> to vector<2x1x12x128xf32>
    tpu.vector_store %arg13[%c0_57, %c6, %c0_58, %c0_59], %71 {strides = array<i32>} : memref<2x12x12x128xf32, #tpu.memory_space<vmem>>, vector<2x1x12x128xf32>,
    %72 = vector.extract_strided_slice %43 {offsets = [0, 84, 0], sizes = [2, 12, 128], strides = [1, 1, 1]} : vector<2x144x128xf32> to vector<2x12x128xf32>
    %c0_60 = arith.constant 0 : index
    %c7 = arith.constant 7 : index
    %c0_61 = arith.constant 0 : index
    %c0_62 = arith.constant 0 : index
    %73 = vector.load %arg13[%c0_60, %c7, %c0_61, %c0_62] : memref<2x12x12x128xf32, #tpu.memory_space<vmem>>, vector<2x1x12x128xf32>
    %74 = vector.shape_cast %73 : vector<2x1x12x128xf32> to vector<2x12x128xf32>
    %75 = vector.shape_cast %72 : vector<2x12x128xf32> to vector<2x1x12x128xf32>
    tpu.vector_store %arg13[%c0_60, %c7, %c0_61, %c0_62], %75 {strides = array<i32>} : memref<2x12x12x128xf32, #tpu.memory_space<vmem>>, vector<2x1x12x128xf32>,
    %76 = vector.extract_strided_slice %43 {offsets = [0, 96, 0], sizes = [2, 12, 128], strides = [1, 1, 1]} : vector<2x144x128xf32> to vector<2x12x128xf32>
    %c0_63 = arith.constant 0 : index
    %c8 = arith.constant 8 : index
    %c0_64 = arith.constant 0 : index
    %c0_65 = arith.constant 0 : index
    %77 = vector.load %arg13[%c0_63, %c8, %c0_64, %c0_65] : memref<2x12x12x128xf32, #tpu.memory_space<vmem>>, vector<2x1x12x128xf32>
    %78 = vector.shape_cast %77 : vector<2x1x12x128xf32> to vector<2x12x128xf32>
    %79 = vector.shape_cast %76 : vector<2x12x128xf32> to vector<2x1x12x128xf32>
    tpu.vector_store %arg13[%c0_63, %c8, %c0_64, %c0_65], %79 {strides = array<i32>} : memref<2x12x12x128xf32, #tpu.memory_space<vmem>>, vector<2x1x12x128xf32>,
    %80 = vector.extract_strided_slice %43 {offsets = [0, 108, 0], sizes = [2, 12, 128], strides = [1, 1, 1]} : vector<2x144x128xf32> to vector<2x12x128xf32>
    %c0_66 = arith.constant 0 : index
    %c9 = arith.constant 9 : index
    %c0_67 = arith.constant 0 : index
    %c0_68 = arith.constant 0 : index
    %81 = vector.load %arg13[%c0_66, %c9, %c0_67, %c0_68] : memref<2x12x12x128xf32, #tpu.memory_space<vmem>>, vector<2x1x12x128xf32>
    %82 = vector.shape_cast %81 : vector<2x1x12x128xf32> to vector<2x12x128xf32>
    %83 = vector.shape_cast %80 : vector<2x12x128xf32> to vector<2x1x12x128xf32>
    tpu.vector_store %arg13[%c0_66, %c9, %c0_67, %c0_68], %83 {strides = array<i32>} : memref<2x12x12x128xf32, #tpu.memory_space<vmem>>, vector<2x1x12x128xf32>,
    %84 = vector.extract_strided_slice %43 {offsets = [0, 120, 0], sizes = [2, 12, 128], strides = [1, 1, 1]} : vector<2x144x128xf32> to vector<2x12x128xf32>
    %c0_69 = arith.constant 0 : index
    %c10 = arith.constant 10 : index
    %c0_70 = arith.constant 0 : index
    %c0_71 = arith.constant 0 : index
    %85 = vector.load %arg13[%c0_69, %c10, %c0_70, %c0_71] : memref<2x12x12x128xf32, #tpu.memory_space<vmem>>, vector<2x1x12x128xf32>
    %86 = vector.shape_cast %85 : vector<2x1x12x128xf32> to vector<2x12x128xf32>
    %87 = vector.shape_cast %84 : vector<2x12x128xf32> to vector<2x1x12x128xf32>
    tpu.vector_store %arg13[%c0_69, %c10, %c0_70, %c0_71], %87 {strides = array<i32>} : memref<2x12x12x128xf32, #tpu.memory_space<vmem>>, vector<2x1x12x128xf32>,
    %88 = vector.extract_strided_slice %43 {offsets = [0, 132, 0], sizes = [2, 12, 128], strides = [1, 1, 1]} : vector<2x144x128xf32> to vector<2x12x128xf32>
    %c0_72 = arith.constant 0 : index
    %c11 = arith.constant 11 : index
    %c0_73 = arith.constant 0 : index
    %c0_74 = arith.constant 0 : index
    %89 = vector.load %arg13[%c0_72, %c11, %c0_73, %c0_74] : memref<2x12x12x128xf32, #tpu.memory_space<vmem>>, vector<2x1x12x128xf32>
    %90 = vector.shape_cast %89 : vector<2x1x12x128xf32> to vector<2x12x128xf32>
    %91 = vector.shape_cast %88 : vector<2x12x128xf32> to vector<2x1x12x128xf32>
    tpu.vector_store %arg13[%c0_72, %c11, %c0_73, %c0_74], %91 {strides = array<i32>} : memref<2x12x12x128xf32, #tpu.memory_space<vmem>>, vector<2x1x12x128xf32>,
    %cst_75 = arith.constant 0.000000e+00 : f32
    %92 = vector.broadcast %cst_75 : f32 to vector<128x128xf32>
    %c0_76 = arith.constant 0 : index
    %c0_77 = arith.constant 0 : index
    %c0_78 = arith.constant 0 : index
    %c0_79 = arith.constant 0 : index
    %93 = vector.load %arg13[%c0_76, %c0_77, %c0_78, %c0_79] : memref<2x12x12x128xf32, #tpu.memory_space<vmem>>, vector<2x8x8x128xf32>
    %94 = vector.shape_cast %93 : vector<2x8x8x128xf32> to vector<128x128xf32>
    %c0_80 = arith.constant 0 : index
    %c0_81 = arith.constant 0 : index
    %c0_82 = arith.constant 0 : index
    %95 = vector.load %arg4[%c0_80, %c0_81, %c0_82] : memref<25x128x128xf32, #tpu.memory_space<vmem>>, vector<1x128x128xf32>
    %96 = vector.shape_cast %95 : vector<1x128x128xf32> to vector<128x128xf32>
    %cst_83 = arith.constant dense<0.000000e+00> : vector<128x128xf32>
    %97 = tpu.matmul %94, %96, %cst_83 {dimension_numbers = #tpu.dot_dimension_numbers<[1], [0], [0], [1], [0, 0, 1, 1], [], []>} : vector<128x128xf32>, vector<128x128xf32>, vector<128x128xf32> -> vector<128x128xf32>
    %98 = arith.addf %92, %97 : vector<128x128xf32>
    %c0_84 = arith.constant 0 : index
    %c0_85 = arith.constant 0 : index
    %c1_86 = arith.constant 1 : index
    %c0_87 = arith.constant 0 : index
    %99 = vector.load %arg13[%c0_84, %c0_85, %c1_86, %c0_87] : memref<2x12x12x128xf32, #tpu.memory_space<vmem>>, vector<2x8x8x128xf32>
    %100 = vector.shape_cast %99 : vector<2x8x8x128xf32> to vector<128x128xf32>
    %c1_88 = arith.constant 1 : index
    %c0_89 = arith.constant 0 : index
    %c0_90 = arith.constant 0 : index
    %101 = vector.load %arg4[%c1_88, %c0_89, %c0_90] : memref<25x128x128xf32, #tpu.memory_space<vmem>>, vector<1x128x128xf32>
    %102 = vector.shape_cast %101 : vector<1x128x128xf32> to vector<128x128xf32>
    %cst_91 = arith.constant dense<0.000000e+00> : vector<128x128xf32>
    %103 = tpu.matmul %100, %102, %cst_91 {dimension_numbers = #tpu.dot_dimension_numbers<[1], [0], [0], [1], [0, 0, 1, 1], [], []>} : vector<128x128xf32>, vector<128x128xf32>, vector<128x128xf32> -> vector<128x128xf32>
    %104 = arith.addf %98, %103 : vector<128x128xf32>
    %c0_92 = arith.constant 0 : index
    %c0_93 = arith.constant 0 : index
    %c2_94 = arith.constant 2 : index
    %c0_95 = arith.constant 0 : index
    %105 = vector.load %arg13[%c0_92, %c0_93, %c2_94, %c0_95] : memref<2x12x12x128xf32, #tpu.memory_space<vmem>>, vector<2x8x8x128xf32>
    %106 = vector.shape_cast %105 : vector<2x8x8x128xf32> to vector<128x128xf32>
    %c2_96 = arith.constant 2 : index
    %c0_97 = arith.constant 0 : index
    %c0_98 = arith.constant 0 : index
    %107 = vector.load %arg4[%c2_96, %c0_97, %c0_98] : memref<25x128x128xf32, #tpu.memory_space<vmem>>, vector<1x128x128xf32>
    %108 = vector.shape_cast %107 : vector<1x128x128xf32> to vector<128x128xf32>
    %cst_99 = arith.constant dense<0.000000e+00> : vector<128x128xf32>
    %109 = tpu.matmul %106, %108, %cst_99 {dimension_numbers = #tpu.dot_dimension_numbers<[1], [0], [0], [1], [0, 0, 1, 1], [], []>} : vector<128x128xf32>, vector<128x128xf32>, vector<128x128xf32> -> vector<128x128xf32>
    %110 = arith.addf %104, %109 : vector<128x128xf32>
    %c0_100 = arith.constant 0 : index
    %c0_101 = arith.constant 0 : index
    %c3_102 = arith.constant 3 : index
    %c0_103 = arith.constant 0 : index
    %111 = vector.load %arg13[%c0_100, %c0_101, %c3_102, %c0_103] : memref<2x12x12x128xf32, #tpu.memory_space<vmem>>, vector<2x8x8x128xf32>
    %112 = vector.shape_cast %111 : vector<2x8x8x128xf32> to vector<128x128xf32>
    %c3_104 = arith.constant 3 : index
    %c0_105 = arith.constant 0 : index
    %c0_106 = arith.constant 0 : index
    %113 = vector.load %arg4[%c3_104, %c0_105, %c0_106] : memref<25x128x128xf32, #tpu.memory_space<vmem>>, vector<1x128x128xf32>
    %114 = vector.shape_cast %113 : vector<1x128x128xf32> to vector<128x128xf32>
    %cst_107 = arith.constant dense<0.000000e+00> : vector<128x128xf32>
    %115 = tpu.matmul %112, %114, %cst_107 {dimension_numbers = #tpu.dot_dimension_numbers<[1], [0], [0], [1], [0, 0, 1, 1], [], []>} : vector<128x128xf32>, vector<128x128xf32>, vector<128x128xf32> -> vector<128x128xf32>
    %116 = arith.addf %110, %115 : vector<128x128xf32>
    %c0_108 = arith.constant 0 : index
    %c0_109 = arith.constant 0 : index
    %c4_110 = arith.constant 4 : index
    %c0_111 = arith.constant 0 : index
    %117 = vector.load %arg13[%c0_108, %c0_109, %c4_110, %c0_111] : memref<2x12x12x128xf32, #tpu.memory_space<vmem>>, vector<2x8x8x128xf32>
    %118 = vector.shape_cast %117 : vector<2x8x8x128xf32> to vector<128x128xf32>
    %c4_112 = arith.constant 4 : index
    %c0_113 = arith.constant 0 : index
    %c0_114 = arith.constant 0 : index
    %119 = vector.load %arg4[%c4_112, %c0_113, %c0_114] : memref<25x128x128xf32, #tpu.memory_space<vmem>>, vector<1x128x128xf32>
    %120 = vector.shape_cast %119 : vector<1x128x128xf32> to vector<128x128xf32>
    %cst_115 = arith.constant dense<0.000000e+00> : vector<128x128xf32>
    %121 = tpu.matmul %118, %120, %cst_115 {dimension_numbers = #tpu.dot_dimension_numbers<[1], [0], [0], [1], [0, 0, 1, 1], [], []>} : vector<128x128xf32>, vector<128x128xf32>, vector<128x128xf32> -> vector<128x128xf32>
    %122 = arith.addf %116, %121 : vector<128x128xf32>
    %c0_116 = arith.constant 0 : index
    %c1_117 = arith.constant 1 : index
    %c0_118 = arith.constant 0 : index
    %c0_119 = arith.constant 0 : index
    %123 = vector.load %arg13[%c0_116, %c1_117, %c0_118, %c0_119] : memref<2x12x12x128xf32, #tpu.memory_space<vmem>>, vector<2x8x8x128xf32>
    %124 = vector.shape_cast %123 : vector<2x8x8x128xf32> to vector<128x128xf32>
    %c5_120 = arith.constant 5 : index
    %c0_121 = arith.constant 0 : index
    %c0_122 = arith.constant 0 : index
    %125 = vector.load %arg4[%c5_120, %c0_121, %c0_122] : memref<25x128x128xf32, #tpu.memory_space<vmem>>, vector<1x128x128xf32>
    %126 = vector.shape_cast %125 : vector<1x128x128xf32> to vector<128x128xf32>
    %cst_123 = arith.constant dense<0.000000e+00> : vector<128x128xf32>
    %127 = tpu.matmul %124, %126, %cst_123 {dimension_numbers = #tpu.dot_dimension_numbers<[1], [0], [0], [1], [0, 0, 1, 1], [], []>} : vector<128x128xf32>, vector<128x128xf32>, vector<128x128xf32> -> vector<128x128xf32>
    %128 = arith.addf %122, %127 : vector<128x128xf32>
    %c0_124 = arith.constant 0 : index
    %c1_125 = arith.constant 1 : index
    %c1_126 = arith.constant 1 : index
    %c0_127 = arith.constant 0 : index
    %129 = vector.load %arg13[%c0_124, %c1_125, %c1_126, %c0_127] : memref<2x12x12x128xf32, #tpu.memory_space<vmem>>, vector<2x8x8x128xf32>
    %130 = vector.shape_cast %129 : vector<2x8x8x128xf32> to vector<128x128xf32>
    %c6_128 = arith.constant 6 : index
    %c0_129 = arith.constant 0 : index
    %c0_130 = arith.constant 0 : index
    %131 = vector.load %arg4[%c6_128, %c0_129, %c0_130] : memref<25x128x128xf32, #tpu.memory_space<vmem>>, vector<1x128x128xf32>
    %132 = vector.shape_cast %131 : vector<1x128x128xf32> to vector<128x128xf32>
    %cst_131 = arith.constant dense<0.000000e+00> : vector<128x128xf32>
    %133 = tpu.matmul %130, %132, %cst_131 {dimension_numbers = #tpu.dot_dimension_numbers<[1], [0], [0], [1], [0, 0, 1, 1], [], []>} : vector<128x128xf32>, vector<128x128xf32>, vector<128x128xf32> -> vector<128x128xf32>
    %134 = arith.addf %128, %133 : vector<128x128xf32>
    %c0_132 = arith.constant 0 : index
    %c1_133 = arith.constant 1 : index
    %c2_134 = arith.constant 2 : index
    %c0_135 = arith.constant 0 : index
    %135 = vector.load %arg13[%c0_132, %c1_133, %c2_134, %c0_135] : memref<2x12x12x128xf32, #tpu.memory_space<vmem>>, vector<2x8x8x128xf32>
    %136 = vector.shape_cast %135 : vector<2x8x8x128xf32> to vector<128x128xf32>
    %c7_136 = arith.constant 7 : index
    %c0_137 = arith.constant 0 : index
    %c0_138 = arith.constant 0 : index
    %137 = vector.load %arg4[%c7_136, %c0_137, %c0_138] : memref<25x128x128xf32, #tpu.memory_space<vmem>>, vector<1x128x128xf32>
    %138 = vector.shape_cast %137 : vector<1x128x128xf32> to vector<128x128xf32>
    %cst_139 = arith.constant dense<0.000000e+00> : vector<128x128xf32>
    %139 = tpu.matmul %136, %138, %cst_139 {dimension_numbers = #tpu.dot_dimension_numbers<[1], [0], [0], [1], [0, 0, 1, 1], [], []>} : vector<128x128xf32>, vector<128x128xf32>, vector<128x128xf32> -> vector<128x128xf32>
    %140 = arith.addf %134, %139 : vector<128x128xf32>
    %c0_140 = arith.constant 0 : index
    %c1_141 = arith.constant 1 : index
    %c3_142 = arith.constant 3 : index
    %c0_143 = arith.constant 0 : index
    %141 = vector.load %arg13[%c0_140, %c1_141, %c3_142, %c0_143] : memref<2x12x12x128xf32, #tpu.memory_space<vmem>>, vector<2x8x8x128xf32>
    %142 = vector.shape_cast %141 : vector<2x8x8x128xf32> to vector<128x128xf32>
    %c8_144 = arith.constant 8 : index
    %c0_145 = arith.constant 0 : index
    %c0_146 = arith.constant 0 : index
    %143 = vector.load %arg4[%c8_144, %c0_145, %c0_146] : memref<25x128x128xf32, #tpu.memory_space<vmem>>, vector<1x128x128xf32>
    %144 = vector.shape_cast %143 : vector<1x128x128xf32> to vector<128x128xf32>
    %cst_147 = arith.constant dense<0.000000e+00> : vector<128x128xf32>
    %145 = tpu.matmul %142, %144, %cst_147 {dimension_numbers = #tpu.dot_dimension_numbers<[1], [0], [0], [1], [0, 0, 1, 1], [], []>} : vector<128x128xf32>, vector<128x128xf32>, vector<128x128xf32> -> vector<128x128xf32>
    %146 = arith.addf %140, %145 : vector<128x128xf32>
    %c0_148 = arith.constant 0 : index
    %c1_149 = arith.constant 1 : index
    %c4_150 = arith.constant 4 : index
    %c0_151 = arith.constant 0 : index
    %147 = vector.load %arg13[%c0_148, %c1_149, %c4_150, %c0_151] : memref<2x12x12x128xf32, #tpu.memory_space<vmem>>, vector<2x8x8x128xf32>
    %148 = vector.shape_cast %147 : vector<2x8x8x128xf32> to vector<128x128xf32>
    %c9_152 = arith.constant 9 : index
    %c0_153 = arith.constant 0 : index
    %c0_154 = arith.constant 0 : index
    %149 = vector.load %arg4[%c9_152, %c0_153, %c0_154] : memref<25x128x128xf32, #tpu.memory_space<vmem>>, vector<1x128x128xf32>
    %150 = vector.shape_cast %149 : vector<1x128x128xf32> to vector<128x128xf32>
    %cst_155 = arith.constant dense<0.000000e+00> : vector<128x128xf32>
    %151 = tpu.matmul %148, %150, %cst_155 {dimension_numbers = #tpu.dot_dimension_numbers<[1], [0], [0], [1], [0, 0, 1, 1], [], []>} : vector<128x128xf32>, vector<128x128xf32>, vector<128x128xf32> -> vector<128x128xf32>
    %152 = arith.addf %146, %151 : vector<128x128xf32>
    %c0_156 = arith.constant 0 : index
    %c2_157 = arith.constant 2 : index
    %c0_158 = arith.constant 0 : index
    %c0_159 = arith.constant 0 : index
    %153 = vector.load %arg13[%c0_156, %c2_157, %c0_158, %c0_159] : memref<2x12x12x128xf32, #tpu.memory_space<vmem>>, vector<2x8x8x128xf32>
    %154 = vector.shape_cast %153 : vector<2x8x8x128xf32> to vector<128x128xf32>
    %c10_160 = arith.constant 10 : index
    %c0_161 = arith.constant 0 : index
    %c0_162 = arith.constant 0 : index
    %155 = vector.load %arg4[%c10_160, %c0_161, %c0_162] : memref<25x128x128xf32, #tpu.memory_space<vmem>>, vector<1x128x128xf32>
    %156 = vector.shape_cast %155 : vector<1x128x128xf32> to vector<128x128xf32>
    %cst_163 = arith.constant dense<0.000000e+00> : vector<128x128xf32>
    %157 = tpu.matmul %154, %156, %cst_163 {dimension_numbers = #tpu.dot_dimension_numbers<[1], [0], [0], [1], [0, 0, 1, 1], [], []>} : vector<128x128xf32>, vector<128x128xf32>, vector<128x128xf32> -> vector<128x128xf32>
    %158 = arith.addf %152, %157 : vector<128x128xf32>
    %c0_164 = arith.constant 0 : index
    %c2_165 = arith.constant 2 : index
    %c1_166 = arith.constant 1 : index
    %c0_167 = arith.constant 0 : index
    %159 = vector.load %arg13[%c0_164, %c2_165, %c1_166, %c0_167] : memref<2x12x12x128xf32, #tpu.memory_space<vmem>>, vector<2x8x8x128xf32>
    %160 = vector.shape_cast %159 : vector<2x8x8x128xf32> to vector<128x128xf32>
    %c11_168 = arith.constant 11 : index
    %c0_169 = arith.constant 0 : index
    %c0_170 = arith.constant 0 : index
    %161 = vector.load %arg4[%c11_168, %c0_169, %c0_170] : memref<25x128x128xf32, #tpu.memory_space<vmem>>, vector<1x128x128xf32>
    %162 = vector.shape_cast %161 : vector<1x128x128xf32> to vector<128x128xf32>
    %cst_171 = arith.constant dense<0.000000e+00> : vector<128x128xf32>
    %163 = tpu.matmul %160, %162, %cst_171 {dimension_numbers = #tpu.dot_dimension_numbers<[1], [0], [0], [1], [0, 0, 1, 1], [], []>} : vector<128x128xf32>, vector<128x128xf32>, vector<128x128xf32> -> vector<128x128xf32>
    %164 = arith.addf %158, %163 : vector<128x128xf32>
    %c0_172 = arith.constant 0 : index
    %c2_173 = arith.constant 2 : index
    %c2_174 = arith.constant 2 : index
    %c0_175 = arith.constant 0 : index
    %165 = vector.load %arg13[%c0_172, %c2_173, %c2_174, %c0_175] : memref<2x12x12x128xf32, #tpu.memory_space<vmem>>, vector<2x8x8x128xf32>
    %166 = vector.shape_cast %165 : vector<2x8x8x128xf32> to vector<128x128xf32>
    %c12 = arith.constant 12 : index
    %c0_176 = arith.constant 0 : index
    %c0_177 = arith.constant 0 : index
    %167 = vector.load %arg4[%c12, %c0_176, %c0_177] : memref<25x128x128xf32, #tpu.memory_space<vmem>>, vector<1x128x128xf32>
    %168 = vector.shape_cast %167 : vector<1x128x128xf32> to vector<128x128xf32>
    %cst_178 = arith.constant dense<0.000000e+00> : vector<128x128xf32>
    %169 = tpu.matmul %166, %168, %cst_178 {dimension_numbers = #tpu.dot_dimension_numbers<[1], [0], [0], [1], [0, 0, 1, 1], [], []>} : vector<128x128xf32>, vector<128x128xf32>, vector<128x128xf32> -> vector<128x128xf32>
    %170 = arith.addf %164, %169 : vector<128x128xf32>
    %c0_179 = arith.constant 0 : index
    %c2_180 = arith.constant 2 : index
    %c3_181 = arith.constant 3 : index
    %c0_182 = arith.constant 0 : index
    %171 = vector.load %arg13[%c0_179, %c2_180, %c3_181, %c0_182] : memref<2x12x12x128xf32, #tpu.memory_space<vmem>>, vector<2x8x8x128xf32>
    %172 = vector.shape_cast %171 : vector<2x8x8x128xf32> to vector<128x128xf32>
    %c13 = arith.constant 13 : index
    %c0_183 = arith.constant 0 : index
    %c0_184 = arith.constant 0 : index
    %173 = vector.load %arg4[%c13, %c0_183, %c0_184] : memref<25x128x128xf32, #tpu.memory_space<vmem>>, vector<1x128x128xf32>
    %174 = vector.shape_cast %173 : vector<1x128x128xf32> to vector<128x128xf32>
    %cst_185 = arith.constant dense<0.000000e+00> : vector<128x128xf32>
    %175 = tpu.matmul %172, %174, %cst_185 {dimension_numbers = #tpu.dot_dimension_numbers<[1], [0], [0], [1], [0, 0, 1, 1], [], []>} : vector<128x128xf32>, vector<128x128xf32>, vector<128x128xf32> -> vector<128x128xf32>
    %176 = arith.addf %170, %175 : vector<128x128xf32>
    %c0_186 = arith.constant 0 : index
    %c2_187 = arith.constant 2 : index
    %c4_188 = arith.constant 4 : index
    %c0_189 = arith.constant 0 : index
    %177 = vector.load %arg13[%c0_186, %c2_187, %c4_188, %c0_189] : memref<2x12x12x128xf32, #tpu.memory_space<vmem>>, vector<2x8x8x128xf32>
    %178 = vector.shape_cast %177 : vector<2x8x8x128xf32> to vector<128x128xf32>
    %c14 = arith.constant 14 : index
    %c0_190 = arith.constant 0 : index
    %c0_191 = arith.constant 0 : index
    %179 = vector.load %arg4[%c14, %c0_190, %c0_191] : memref<25x128x128xf32, #tpu.memory_space<vmem>>, vector<1x128x128xf32>
    %180 = vector.shape_cast %179 : vector<1x128x128xf32> to vector<128x128xf32>
    %cst_192 = arith.constant dense<0.000000e+00> : vector<128x128xf32>
    %181 = tpu.matmul %178, %180, %cst_192 {dimension_numbers = #tpu.dot_dimension_numbers<[1], [0], [0], [1], [0, 0, 1, 1], [], []>} : vector<128x128xf32>, vector<128x128xf32>, vector<128x128xf32> -> vector<128x128xf32>
    %182 = arith.addf %176, %181 : vector<128x128xf32>
    %c0_193 = arith.constant 0 : index
    %c3_194 = arith.constant 3 : index
    %c0_195 = arith.constant 0 : index
    %c0_196 = arith.constant 0 : index
    %183 = vector.load %arg13[%c0_193, %c3_194, %c0_195, %c0_196] : memref<2x12x12x128xf32, #tpu.memory_space<vmem>>, vector<2x8x8x128xf32>
    %184 = vector.shape_cast %183 : vector<2x8x8x128xf32> to vector<128x128xf32>
    %c15 = arith.constant 15 : index
    %c0_197 = arith.constant 0 : index
    %c0_198 = arith.constant 0 : index
    %185 = vector.load %arg4[%c15, %c0_197, %c0_198] : memref<25x128x128xf32, #tpu.memory_space<vmem>>, vector<1x128x128xf32>
    %186 = vector.shape_cast %185 : vector<1x128x128xf32> to vector<128x128xf32>
    %cst_199 = arith.constant dense<0.000000e+00> : vector<128x128xf32>
    %187 = tpu.matmul %184, %186, %cst_199 {dimension_numbers = #tpu.dot_dimension_numbers<[1], [0], [0], [1], [0, 0, 1, 1], [], []>} : vector<128x128xf32>, vector<128x128xf32>, vector<128x128xf32> -> vector<128x128xf32>
    %188 = arith.addf %182, %187 : vector<128x128xf32>
    %c0_200 = arith.constant 0 : index
    %c3_201 = arith.constant 3 : index
    %c1_202 = arith.constant 1 : index
    %c0_203 = arith.constant 0 : index
    %189 = vector.load %arg13[%c0_200, %c3_201, %c1_202, %c0_203] : memref<2x12x12x128xf32, #tpu.memory_space<vmem>>, vector<2x8x8x128xf32>
    %190 = vector.shape_cast %189 : vector<2x8x8x128xf32> to vector<128x128xf32>
    %c16 = arith.constant 16 : index
    %c0_204 = arith.constant 0 : index
    %c0_205 = arith.constant 0 : index
    %191 = vector.load %arg4[%c16, %c0_204, %c0_205] : memref<25x128x128xf32, #tpu.memory_space<vmem>>, vector<1x128x128xf32>
    %192 = vector.shape_cast %191 : vector<1x128x128xf32> to vector<128x128xf32>
    %cst_206 = arith.constant dense<0.000000e+00> : vector<128x128xf32>
    %193 = tpu.matmul %190, %192, %cst_206 {dimension_numbers = #tpu.dot_dimension_numbers<[1], [0], [0], [1], [0, 0, 1, 1], [], []>} : vector<128x128xf32>, vector<128x128xf32>, vector<128x128xf32> -> vector<128x128xf32>
    %194 = arith.addf %188, %193 : vector<128x128xf32>
    %c0_207 = arith.constant 0 : index
    %c3_208 = arith.constant 3 : index
    %c2_209 = arith.constant 2 : index
    %c0_210 = arith.constant 0 : index
    %195 = vector.load %arg13[%c0_207, %c3_208, %c2_209, %c0_210] : memref<2x12x12x128xf32, #tpu.memory_space<vmem>>, vector<2x8x8x128xf32>
    %196 = vector.shape_cast %195 : vector<2x8x8x128xf32> to vector<128x128xf32>
    %c17 = arith.constant 17 : index
    %c0_211 = arith.constant 0 : index
    %c0_212 = arith.constant 0 : index
    %197 = vector.load %arg4[%c17, %c0_211, %c0_212] : memref<25x128x128xf32, #tpu.memory_space<vmem>>, vector<1x128x128xf32>
    %198 = vector.shape_cast %197 : vector<1x128x128xf32> to vector<128x128xf32>
    %cst_213 = arith.constant dense<0.000000e+00> : vector<128x128xf32>
    %199 = tpu.matmul %196, %198, %cst_213 {dimension_numbers = #tpu.dot_dimension_numbers<[1], [0], [0], [1], [0, 0, 1, 1], [], []>} : vector<128x128xf32>, vector<128x128xf32>, vector<128x128xf32> -> vector<128x128xf32>
    %200 = arith.addf %194, %199 : vector<128x128xf32>
    %c0_214 = arith.constant 0 : index
    %c3_215 = arith.constant 3 : index
    %c3_216 = arith.constant 3 : index
    %c0_217 = arith.constant 0 : index
    %201 = vector.load %arg13[%c0_214, %c3_215, %c3_216, %c0_217] : memref<2x12x12x128xf32, #tpu.memory_space<vmem>>, vector<2x8x8x128xf32>
    %202 = vector.shape_cast %201 : vector<2x8x8x128xf32> to vector<128x128xf32>
    %c18 = arith.constant 18 : index
    %c0_218 = arith.constant 0 : index
    %c0_219 = arith.constant 0 : index
    %203 = vector.load %arg4[%c18, %c0_218, %c0_219] : memref<25x128x128xf32, #tpu.memory_space<vmem>>, vector<1x128x128xf32>
    %204 = vector.shape_cast %203 : vector<1x128x128xf32> to vector<128x128xf32>
    %cst_220 = arith.constant dense<0.000000e+00> : vector<128x128xf32>
    %205 = tpu.matmul %202, %204, %cst_220 {dimension_numbers = #tpu.dot_dimension_numbers<[1], [0], [0], [1], [0, 0, 1, 1], [], []>} : vector<128x128xf32>, vector<128x128xf32>, vector<128x128xf32> -> vector<128x128xf32>
    %206 = arith.addf %200, %205 : vector<128x128xf32>
    %c0_221 = arith.constant 0 : index
    %c3_222 = arith.constant 3 : index
    %c4_223 = arith.constant 4 : index
    %c0_224 = arith.constant 0 : index
    %207 = vector.load %arg13[%c0_221, %c3_222, %c4_223, %c0_224] : memref<2x12x12x128xf32, #tpu.memory_space<vmem>>, vector<2x8x8x128xf32>
    %208 = vector.shape_cast %207 : vector<2x8x8x128xf32> to vector<128x128xf32>
    %c19 = arith.constant 19 : index
    %c0_225 = arith.constant 0 : index
    %c0_226 = arith.constant 0 : index
    %209 = vector.load %arg4[%c19, %c0_225, %c0_226] : memref<25x128x128xf32, #tpu.memory_space<vmem>>, vector<1x128x128xf32>
    %210 = vector.shape_cast %209 : vector<1x128x128xf32> to vector<128x128xf32>
    %cst_227 = arith.constant dense<0.000000e+00> : vector<128x128xf32>
    %211 = tpu.matmul %208, %210, %cst_227 {dimension_numbers = #tpu.dot_dimension_numbers<[1], [0], [0], [1], [0, 0, 1, 1], [], []>} : vector<128x128xf32>, vector<128x128xf32>, vector<128x128xf32> -> vector<128x128xf32>
    %212 = arith.addf %206, %211 : vector<128x128xf32>
    %c0_228 = arith.constant 0 : index
    %c4_229 = arith.constant 4 : index
    %c0_230 = arith.constant 0 : index
    %c0_231 = arith.constant 0 : index
    %213 = vector.load %arg13[%c0_228, %c4_229, %c0_230, %c0_231] : memref<2x12x12x128xf32, #tpu.memory_space<vmem>>, vector<2x8x8x128xf32>
    %214 = vector.shape_cast %213 : vector<2x8x8x128xf32> to vector<128x128xf32>
    %c20 = arith.constant 20 : index
    %c0_232 = arith.constant 0 : index
    %c0_233 = arith.constant 0 : index
    %215 = vector.load %arg4[%c20, %c0_232, %c0_233] : memref<25x128x128xf32, #tpu.memory_space<vmem>>, vector<1x128x128xf32>
    %216 = vector.shape_cast %215 : vector<1x128x128xf32> to vector<128x128xf32>
    %cst_234 = arith.constant dense<0.000000e+00> : vector<128x128xf32>
    %217 = tpu.matmul %214, %216, %cst_234 {dimension_numbers = #tpu.dot_dimension_numbers<[1], [0], [0], [1], [0, 0, 1, 1], [], []>} : vector<128x128xf32>, vector<128x128xf32>, vector<128x128xf32> -> vector<128x128xf32>
    %218 = arith.addf %212, %217 : vector<128x128xf32>
    %c0_235 = arith.constant 0 : index
    %c4_236 = arith.constant 4 : index
    %c1_237 = arith.constant 1 : index
    %c0_238 = arith.constant 0 : index
    %219 = vector.load %arg13[%c0_235, %c4_236, %c1_237, %c0_238] : memref<2x12x12x128xf32, #tpu.memory_space<vmem>>, vector<2x8x8x128xf32>
    %220 = vector.shape_cast %219 : vector<2x8x8x128xf32> to vector<128x128xf32>
    %c21 = arith.constant 21 : index
    %c0_239 = arith.constant 0 : index
    %c0_240 = arith.constant 0 : index
    %221 = vector.load %arg4[%c21, %c0_239, %c0_240] : memref<25x128x128xf32, #tpu.memory_space<vmem>>, vector<1x128x128xf32>
    %222 = vector.shape_cast %221 : vector<1x128x128xf32> to vector<128x128xf32>
    %cst_241 = arith.constant dense<0.000000e+00> : vector<128x128xf32>
    %223 = tpu.matmul %220, %222, %cst_241 {dimension_numbers = #tpu.dot_dimension_numbers<[1], [0], [0], [1], [0, 0, 1, 1], [], []>} : vector<128x128xf32>, vector<128x128xf32>, vector<128x128xf32> -> vector<128x128xf32>
    %224 = arith.addf %218, %223 : vector<128x128xf32>
    %c0_242 = arith.constant 0 : index
    %c4_243 = arith.constant 4 : index
    %c2_244 = arith.constant 2 : index
    %c0_245 = arith.constant 0 : index
    %225 = vector.load %arg13[%c0_242, %c4_243, %c2_244, %c0_245] : memref<2x12x12x128xf32, #tpu.memory_space<vmem>>, vector<2x8x8x128xf32>
    %226 = vector.shape_cast %225 : vector<2x8x8x128xf32> to vector<128x128xf32>
    %c22 = arith.constant 22 : index
    %c0_246 = arith.constant 0 : index
    %c0_247 = arith.constant 0 : index
    %227 = vector.load %arg4[%c22, %c0_246, %c0_247] : memref<25x128x128xf32, #tpu.memory_space<vmem>>, vector<1x128x128xf32>
    %228 = vector.shape_cast %227 : vector<1x128x128xf32> to vector<128x128xf32>
    %cst_248 = arith.constant dense<0.000000e+00> : vector<128x128xf32>
    %229 = tpu.matmul %226, %228, %cst_248 {dimension_numbers = #tpu.dot_dimension_numbers<[1], [0], [0], [1], [0, 0, 1, 1], [], []>} : vector<128x128xf32>, vector<128x128xf32>, vector<128x128xf32> -> vector<128x128xf32>
    %230 = arith.addf %224, %229 : vector<128x128xf32>
    %c0_249 = arith.constant 0 : index
    %c4_250 = arith.constant 4 : index
    %c3_251 = arith.constant 3 : index
    %c0_252 = arith.constant 0 : index
    %231 = vector.load %arg13[%c0_249, %c4_250, %c3_251, %c0_252] : memref<2x12x12x128xf32, #tpu.memory_space<vmem>>, vector<2x8x8x128xf32>
    %232 = vector.shape_cast %231 : vector<2x8x8x128xf32> to vector<128x128xf32>
    %c23 = arith.constant 23 : index
    %c0_253 = arith.constant 0 : index
    %c0_254 = arith.constant 0 : index
    %233 = vector.load %arg4[%c23, %c0_253, %c0_254] : memref<25x128x128xf32, #tpu.memory_space<vmem>>, vector<1x128x128xf32>
    %234 = vector.shape_cast %233 : vector<1x128x128xf32> to vector<128x128xf32>
    %cst_255 = arith.constant dense<0.000000e+00> : vector<128x128xf32>
    %235 = tpu.matmul %232, %234, %cst_255 {dimension_numbers = #tpu.dot_dimension_numbers<[1], [0], [0], [1], [0, 0, 1, 1], [], []>} : vector<128x128xf32>, vector<128x128xf32>, vector<128x128xf32> -> vector<128x128xf32>
    %236 = arith.addf %230, %235 : vector<128x128xf32>
    %c0_256 = arith.constant 0 : index
    %c4_257 = arith.constant 4 : index
    %c4_258 = arith.constant 4 : index
    %c0_259 = arith.constant 0 : index
    %237 = vector.load %arg13[%c0_256, %c4_257, %c4_258, %c0_259] : memref<2x12x12x128xf32, #tpu.memory_space<vmem>>, vector<2x8x8x128xf32>
    %238 = vector.shape_cast %237 : vector<2x8x8x128xf32> to vector<128x128xf32>
    %c24 = arith.constant 24 : index
    %c0_260 = arith.constant 0 : index
    %c0_261 = arith.constant 0 : index
    %239 = vector.load %arg4[%c24, %c0_260, %c0_261] : memref<25x128x128xf32, #tpu.memory_space<vmem>>, vector<1x128x128xf32>
    %240 = vector.shape_cast %239 : vector<1x128x128xf32> to vector<128x128xf32>
    %cst_262 = arith.constant dense<0.000000e+00> : vector<128x128xf32>
    %241 = tpu.matmul %238, %240, %cst_262 {dimension_numbers = #tpu.dot_dimension_numbers<[1], [0], [0], [1], [0, 0, 1, 1], [], []>} : vector<128x128xf32>, vector<128x128xf32>, vector<128x128xf32> -> vector<128x128xf32>
    %242 = arith.addf %236, %241 : vector<128x128xf32>
    %c0_263 = arith.constant 0 : index
    %c0_264 = arith.constant 0 : index
    %243 = vector.load %arg5[%c0_263, %c0_264] : memref<1x128xf32, #tpu.memory_space<vmem>>, vector<1x128xf32>
    %244 = vector.broadcast %243 : vector<1x128xf32> to vector<128x128xf32>
    %245 = arith.addf %242, %244 : vector<128x128xf32>
    %cst_265 = arith.constant 0.000000e+00 : f32
    %246 = vector.broadcast %cst_265 : f32 to vector<128x128xf32>
    %247 = arith.maximumf %245, %246 : vector<128x128xf32>
    %248 = vector.shape_cast %247 : vector<128x128xf32> to vector<2x8x8x128xf32>
    %c0_266 = arith.constant 0 : index
    %c0_267 = arith.constant 0 : index
    %c0_268 = arith.constant 0 : index
    %c0_269 = arith.constant 0 : index
    %249 = vector.load %arg14[%c0_266, %c0_267, %c0_268, %c0_269] : memref<2x8x8x128xf32, #tpu.memory_space<vmem>>, vector<2x8x8x128xf32>
    tpu.vector_store %arg14[%c0_266, %c0_267, %c0_268, %c0_269], %248 {strides = array<i32>} : memref<2x8x8x128xf32, #tpu.memory_space<vmem>>, vector<2x8x8x128xf32>,
    %cst_270 = arith.constant 0.000000e+00 : f32
    %250 = vector.broadcast %cst_270 : f32 to vector<2x128xf32>
    %c0_271 = arith.constant 0 : index
    %c0_272 = arith.constant 0 : index
    %c0_273 = arith.constant 0 : index
    %c0_274 = arith.constant 0 : index
    %251 = vector.load %arg14[%c0_271, %c0_272, %c0_273, %c0_274] : memref<2x8x8x128xf32, #tpu.memory_space<vmem>>, vector<2x1x1x128xf32>
    %252 = vector.shape_cast %251 : vector<2x1x1x128xf32> to vector<2x128xf32>
    %c0_275 = arith.constant 0 : index
    %c0_276 = arith.constant 0 : index
    %c1_277 = arith.constant 1 : index
    %c0_278 = arith.constant 0 : index
    %253 = vector.load %arg14[%c0_275, %c0_276, %c1_277, %c0_278] : memref<2x8x8x128xf32, #tpu.memory_space<vmem>>, vector<2x1x1x128xf32>
    %254 = vector.shape_cast %253 : vector<2x1x1x128xf32> to vector<2x128xf32>
    %c0_279 = arith.constant 0 : index
    %c1_280 = arith.constant 1 : index
    %c0_281 = arith.constant 0 : index
    %c0_282 = arith.constant 0 : index
    %255 = vector.load %arg14[%c0_279, %c1_280, %c0_281, %c0_282] : memref<2x8x8x128xf32, #tpu.memory_space<vmem>>, vector<2x1x1x128xf32>
    %256 = vector.shape_cast %255 : vector<2x1x1x128xf32> to vector<2x128xf32>
    %c0_283 = arith.constant 0 : index
    %c1_284 = arith.constant 1 : index
    %c1_285 = arith.constant 1 : index
    %c0_286 = arith.constant 0 : index
    %257 = vector.load %arg14[%c0_283, %c1_284, %c1_285, %c0_286] : memref<2x8x8x128xf32, #tpu.memory_space<vmem>>, vector<2x1x1x128xf32>
    %258 = vector.shape_cast %257 : vector<2x1x1x128xf32> to vector<2x128xf32>
    %259 = arith.maximumf %252, %254 : vector<2x128xf32>
    %260 = arith.maximumf %256, %258 : vector<2x128xf32>
    %261 = arith.maximumf %259, %260 : vector<2x128xf32>
    %c0_287 = arith.constant 0 : index
    %c0_288 = arith.constant 0 : index
    %c0_289 = arith.constant 0 : index
    %262 = vector.load %arg6[%c0_287, %c0_288, %c0_289] : memref<16x128x128xf32, #tpu.memory_space<vmem>>, vector<1x128x128xf32>
    %263 = vector.shape_cast %262 : vector<1x128x128xf32> to vector<128x128xf32>
    %cst_290 = arith.constant dense<0.000000e+00> : vector<2x128xf32>
    %264 = tpu.matmul %261, %263, %cst_290 {dimension_numbers = #tpu.dot_dimension_numbers<[1], [0], [0], [1], [0, 0, 1, 1], [], []>} : vector<2x128xf32>, vector<128x128xf32>, vector<2x128xf32> -> vector<2x128xf32>
    %265 = arith.addf %250, %264 : vector<2x128xf32>
    %c0_291 = arith.constant 0 : index
    %c0_292 = arith.constant 0 : index
    %c2_293 = arith.constant 2 : index
    %c0_294 = arith.constant 0 : index
    %266 = vector.load %arg14[%c0_291, %c0_292, %c2_293, %c0_294] : memref<2x8x8x128xf32, #tpu.memory_space<vmem>>, vector<2x1x1x128xf32>
    %267 = vector.shape_cast %266 : vector<2x1x1x128xf32> to vector<2x128xf32>
    %c0_295 = arith.constant 0 : index
    %c0_296 = arith.constant 0 : index
    %c3_297 = arith.constant 3 : index
    %c0_298 = arith.constant 0 : index
    %268 = vector.load %arg14[%c0_295, %c0_296, %c3_297, %c0_298] : memref<2x8x8x128xf32, #tpu.memory_space<vmem>>, vector<2x1x1x128xf32>
    %269 = vector.shape_cast %268 : vector<2x1x1x128xf32> to vector<2x128xf32>
    %c0_299 = arith.constant 0 : index
    %c1_300 = arith.constant 1 : index
    %c2_301 = arith.constant 2 : index
    %c0_302 = arith.constant 0 : index
    %270 = vector.load %arg14[%c0_299, %c1_300, %c2_301, %c0_302] : memref<2x8x8x128xf32, #tpu.memory_space<vmem>>, vector<2x1x1x128xf32>
    %271 = vector.shape_cast %270 : vector<2x1x1x128xf32> to vector<2x128xf32>
    %c0_303 = arith.constant 0 : index
    %c1_304 = arith.constant 1 : index
    %c3_305 = arith.constant 3 : index
    %c0_306 = arith.constant 0 : index
    %272 = vector.load %arg14[%c0_303, %c1_304, %c3_305, %c0_306] : memref<2x8x8x128xf32, #tpu.memory_space<vmem>>, vector<2x1x1x128xf32>
    %273 = vector.shape_cast %272 : vector<2x1x1x128xf32> to vector<2x128xf32>
    %274 = arith.maximumf %267, %269 : vector<2x128xf32>
    %275 = arith.maximumf %271, %273 : vector<2x128xf32>
    %276 = arith.maximumf %274, %275 : vector<2x128xf32>
    %c1_307 = arith.constant 1 : index
    %c0_308 = arith.constant 0 : index
    %c0_309 = arith.constant 0 : index
    %277 = vector.load %arg6[%c1_307, %c0_308, %c0_309] : memref<16x128x128xf32, #tpu.memory_space<vmem>>, vector<1x128x128xf32>
    %278 = vector.shape_cast %277 : vector<1x128x128xf32> to vector<128x128xf32>
    %cst_310 = arith.constant dense<0.000000e+00> : vector<2x128xf32>
    %279 = tpu.matmul %276, %278, %cst_310 {dimension_numbers = #tpu.dot_dimension_numbers<[1], [0], [0], [1], [0, 0, 1, 1], [], []>} : vector<2x128xf32>, vector<128x128xf32>, vector<2x128xf32> -> vector<2x128xf32>
    %280 = arith.addf %265, %279 : vector<2x128xf32>
    %c0_311 = arith.constant 0 : index
    %c0_312 = arith.constant 0 : index
    %c4_313 = arith.constant 4 : index
    %c0_314 = arith.constant 0 : index
    %281 = vector.load %arg14[%c0_311, %c0_312, %c4_313, %c0_314] : memref<2x8x8x128xf32, #tpu.memory_space<vmem>>, vector<2x1x1x128xf32>
    %282 = vector.shape_cast %281 : vector<2x1x1x128xf32> to vector<2x128xf32>
    %c0_315 = arith.constant 0 : index
    %c0_316 = arith.constant 0 : index
    %c5_317 = arith.constant 5 : index
    %c0_318 = arith.constant 0 : index
    %283 = vector.load %arg14[%c0_315, %c0_316, %c5_317, %c0_318] : memref<2x8x8x128xf32, #tpu.memory_space<vmem>>, vector<2x1x1x128xf32>
    %284 = vector.shape_cast %283 : vector<2x1x1x128xf32> to vector<2x128xf32>
    %c0_319 = arith.constant 0 : index
    %c1_320 = arith.constant 1 : index
    %c4_321 = arith.constant 4 : index
    %c0_322 = arith.constant 0 : index
    %285 = vector.load %arg14[%c0_319, %c1_320, %c4_321, %c0_322] : memref<2x8x8x128xf32, #tpu.memory_space<vmem>>, vector<2x1x1x128xf32>
    %286 = vector.shape_cast %285 : vector<2x1x1x128xf32> to vector<2x128xf32>
    %c0_323 = arith.constant 0 : index
    %c1_324 = arith.constant 1 : index
    %c5_325 = arith.constant 5 : index
    %c0_326 = arith.constant 0 : index
    %287 = vector.load %arg14[%c0_323, %c1_324, %c5_325, %c0_326] : memref<2x8x8x128xf32, #tpu.memory_space<vmem>>, vector<2x1x1x128xf32>
    %288 = vector.shape_cast %287 : vector<2x1x1x128xf32> to vector<2x128xf32>
    %289 = arith.maximumf %282, %284 : vector<2x128xf32>
    %290 = arith.maximumf %286, %288 : vector<2x128xf32>
    %291 = arith.maximumf %289, %290 : vector<2x128xf32>
    %c2_327 = arith.constant 2 : index
    %c0_328 = arith.constant 0 : index
    %c0_329 = arith.constant 0 : index
    %292 = vector.load %arg6[%c2_327, %c0_328, %c0_329] : memref<16x128x128xf32, #tpu.memory_space<vmem>>, vector<1x128x128xf32>
    %293 = vector.shape_cast %292 : vector<1x128x128xf32> to vector<128x128xf32>
    %cst_330 = arith.constant dense<0.000000e+00> : vector<2x128xf32>
    %294 = tpu.matmul %291, %293, %cst_330 {dimension_numbers = #tpu.dot_dimension_numbers<[1], [0], [0], [1], [0, 0, 1, 1], [], []>} : vector<2x128xf32>, vector<128x128xf32>, vector<2x128xf32> -> vector<2x128xf32>
    %295 = arith.addf %280, %294 : vector<2x128xf32>
    %c0_331 = arith.constant 0 : index
    %c0_332 = arith.constant 0 : index
    %c6_333 = arith.constant 6 : index
    %c0_334 = arith.constant 0 : index
    %296 = vector.load %arg14[%c0_331, %c0_332, %c6_333, %c0_334] : memref<2x8x8x128xf32, #tpu.memory_space<vmem>>, vector<2x1x1x128xf32>
    %297 = vector.shape_cast %296 : vector<2x1x1x128xf32> to vector<2x128xf32>
    %c0_335 = arith.constant 0 : index
    %c0_336 = arith.constant 0 : index
    %c7_337 = arith.constant 7 : index
    %c0_338 = arith.constant 0 : index
    %298 = vector.load %arg14[%c0_335, %c0_336, %c7_337, %c0_338] : memref<2x8x8x128xf32, #tpu.memory_space<vmem>>, vector<2x1x1x128xf32>
    %299 = vector.shape_cast %298 : vector<2x1x1x128xf32> to vector<2x128xf32>
    %c0_339 = arith.constant 0 : index
    %c1_340 = arith.constant 1 : index
    %c6_341 = arith.constant 6 : index
    %c0_342 = arith.constant 0 : index
    %300 = vector.load %arg14[%c0_339, %c1_340, %c6_341, %c0_342] : memref<2x8x8x128xf32, #tpu.memory_space<vmem>>, vector<2x1x1x128xf32>
    %301 = vector.shape_cast %300 : vector<2x1x1x128xf32> to vector<2x128xf32>
    %c0_343 = arith.constant 0 : index
    %c1_344 = arith.constant 1 : index
    %c7_345 = arith.constant 7 : index
    %c0_346 = arith.constant 0 : index
    %302 = vector.load %arg14[%c0_343, %c1_344, %c7_345, %c0_346] : memref<2x8x8x128xf32, #tpu.memory_space<vmem>>, vector<2x1x1x128xf32>
    %303 = vector.shape_cast %302 : vector<2x1x1x128xf32> to vector<2x128xf32>
    %304 = arith.maximumf %297, %299 : vector<2x128xf32>
    %305 = arith.maximumf %301, %303 : vector<2x128xf32>
    %306 = arith.maximumf %304, %305 : vector<2x128xf32>
    %c3_347 = arith.constant 3 : index
    %c0_348 = arith.constant 0 : index
    %c0_349 = arith.constant 0 : index
    %307 = vector.load %arg6[%c3_347, %c0_348, %c0_349] : memref<16x128x128xf32, #tpu.memory_space<vmem>>, vector<1x128x128xf32>
    %308 = vector.shape_cast %307 : vector<1x128x128xf32> to vector<128x128xf32>
    %cst_350 = arith.constant dense<0.000000e+00> : vector<2x128xf32>
    %309 = tpu.matmul %306, %308, %cst_350 {dimension_numbers = #tpu.dot_dimension_numbers<[1], [0], [0], [1], [0, 0, 1, 1], [], []>} : vector<2x128xf32>, vector<128x128xf32>, vector<2x128xf32> -> vector<2x128xf32>
    %310 = arith.addf %295, %309 : vector<2x128xf32>
    %c0_351 = arith.constant 0 : index
    %c2_352 = arith.constant 2 : index
    %c0_353 = arith.constant 0 : index
    %c0_354 = arith.constant 0 : index
    %311 = vector.load %arg14[%c0_351, %c2_352, %c0_353, %c0_354] : memref<2x8x8x128xf32, #tpu.memory_space<vmem>>, vector<2x1x1x128xf32>
    %312 = vector.shape_cast %311 : vector<2x1x1x128xf32> to vector<2x128xf32>
    %c0_355 = arith.constant 0 : index
    %c2_356 = arith.constant 2 : index
    %c1_357 = arith.constant 1 : index
    %c0_358 = arith.constant 0 : index
    %313 = vector.load %arg14[%c0_355, %c2_356, %c1_357, %c0_358] : memref<2x8x8x128xf32, #tpu.memory_space<vmem>>, vector<2x1x1x128xf32>
    %314 = vector.shape_cast %313 : vector<2x1x1x128xf32> to vector<2x128xf32>
    %c0_359 = arith.constant 0 : index
    %c3_360 = arith.constant 3 : index
    %c0_361 = arith.constant 0 : index
    %c0_362 = arith.constant 0 : index
    %315 = vector.load %arg14[%c0_359, %c3_360, %c0_361, %c0_362] : memref<2x8x8x128xf32, #tpu.memory_space<vmem>>, vector<2x1x1x128xf32>
    %316 = vector.shape_cast %315 : vector<2x1x1x128xf32> to vector<2x128xf32>
    %c0_363 = arith.constant 0 : index
    %c3_364 = arith.constant 3 : index
    %c1_365 = arith.constant 1 : index
    %c0_366 = arith.constant 0 : index
    %317 = vector.load %arg14[%c0_363, %c3_364, %c1_365, %c0_366] : memref<2x8x8x128xf32, #tpu.memory_space<vmem>>, vector<2x1x1x128xf32>
    %318 = vector.shape_cast %317 : vector<2x1x1x128xf32> to vector<2x128xf32>
    %319 = arith.maximumf %312, %314 : vector<2x128xf32>
    %320 = arith.maximumf %316, %318 : vector<2x128xf32>
    %321 = arith.maximumf %319, %320 : vector<2x128xf32>
    %c4_367 = arith.constant 4 : index
    %c0_368 = arith.constant 0 : index
    %c0_369 = arith.constant 0 : index
    %322 = vector.load %arg6[%c4_367, %c0_368, %c0_369] : memref<16x128x128xf32, #tpu.memory_space<vmem>>, vector<1x128x128xf32>
    %323 = vector.shape_cast %322 : vector<1x128x128xf32> to vector<128x128xf32>
    %cst_370 = arith.constant dense<0.000000e+00> : vector<2x128xf32>
    %324 = tpu.matmul %321, %323, %cst_370 {dimension_numbers = #tpu.dot_dimension_numbers<[1], [0], [0], [1], [0, 0, 1, 1], [], []>} : vector<2x128xf32>, vector<128x128xf32>, vector<2x128xf32> -> vector<2x128xf32>
    %325 = arith.addf %310, %324 : vector<2x128xf32>
    %c0_371 = arith.constant 0 : index
    %c2_372 = arith.constant 2 : index
    %c2_373 = arith.constant 2 : index
    %c0_374 = arith.constant 0 : index
    %326 = vector.load %arg14[%c0_371, %c2_372, %c2_373, %c0_374] : memref<2x8x8x128xf32, #tpu.memory_space<vmem>>, vector<2x1x1x128xf32>
    %327 = vector.shape_cast %326 : vector<2x1x1x128xf32> to vector<2x128xf32>
    %c0_375 = arith.constant 0 : index
    %c2_376 = arith.constant 2 : index
    %c3_377 = arith.constant 3 : index
    %c0_378 = arith.constant 0 : index
    %328 = vector.load %arg14[%c0_375, %c2_376, %c3_377, %c0_378] : memref<2x8x8x128xf32, #tpu.memory_space<vmem>>, vector<2x1x1x128xf32>
    %329 = vector.shape_cast %328 : vector<2x1x1x128xf32> to vector<2x128xf32>
    %c0_379 = arith.constant 0 : index
    %c3_380 = arith.constant 3 : index
    %c2_381 = arith.constant 2 : index
    %c0_382 = arith.constant 0 : index
    %330 = vector.load %arg14[%c0_379, %c3_380, %c2_381, %c0_382] : memref<2x8x8x128xf32, #tpu.memory_space<vmem>>, vector<2x1x1x128xf32>
    %331 = vector.shape_cast %330 : vector<2x1x1x128xf32> to vector<2x128xf32>
    %c0_383 = arith.constant 0 : index
    %c3_384 = arith.constant 3 : index
    %c3_385 = arith.constant 3 : index
    %c0_386 = arith.constant 0 : index
    %332 = vector.load %arg14[%c0_383, %c3_384, %c3_385, %c0_386] : memref<2x8x8x128xf32, #tpu.memory_space<vmem>>, vector<2x1x1x128xf32>
    %333 = vector.shape_cast %332 : vector<2x1x1x128xf32> to vector<2x128xf32>
    %334 = arith.maximumf %327, %329 : vector<2x128xf32>
    %335 = arith.maximumf %331, %333 : vector<2x128xf32>
    %336 = arith.maximumf %334, %335 : vector<2x128xf32>
    %c5_387 = arith.constant 5 : index
    %c0_388 = arith.constant 0 : index
    %c0_389 = arith.constant 0 : index
    %337 = vector.load %arg6[%c5_387, %c0_388, %c0_389] : memref<16x128x128xf32, #tpu.memory_space<vmem>>, vector<1x128x128xf32>
    %338 = vector.shape_cast %337 : vector<1x128x128xf32> to vector<128x128xf32>
    %cst_390 = arith.constant dense<0.000000e+00> : vector<2x128xf32>
    %339 = tpu.matmul %336, %338, %cst_390 {dimension_numbers = #tpu.dot_dimension_numbers<[1], [0], [0], [1], [0, 0, 1, 1], [], []>} : vector<2x128xf32>, vector<128x128xf32>, vector<2x128xf32> -> vector<2x128xf32>
    %340 = arith.addf %325, %339 : vector<2x128xf32>
    %c0_391 = arith.constant 0 : index
    %c2_392 = arith.constant 2 : index
    %c4_393 = arith.constant 4 : index
    %c0_394 = arith.constant 0 : index
    %341 = vector.load %arg14[%c0_391, %c2_392, %c4_393, %c0_394] : memref<2x8x8x128xf32, #tpu.memory_space<vmem>>, vector<2x1x1x128xf32>
    %342 = vector.shape_cast %341 : vector<2x1x1x128xf32> to vector<2x128xf32>
    %c0_395 = arith.constant 0 : index
    %c2_396 = arith.constant 2 : index
    %c5_397 = arith.constant 5 : index
    %c0_398 = arith.constant 0 : index
    %343 = vector.load %arg14[%c0_395, %c2_396, %c5_397, %c0_398] : memref<2x8x8x128xf32, #tpu.memory_space<vmem>>, vector<2x1x1x128xf32>
    %344 = vector.shape_cast %343 : vector<2x1x1x128xf32> to vector<2x128xf32>
    %c0_399 = arith.constant 0 : index
    %c3_400 = arith.constant 3 : index
    %c4_401 = arith.constant 4 : index
    %c0_402 = arith.constant 0 : index
    %345 = vector.load %arg14[%c0_399, %c3_400, %c4_401, %c0_402] : memref<2x8x8x128xf32, #tpu.memory_space<vmem>>, vector<2x1x1x128xf32>
    %346 = vector.shape_cast %345 : vector<2x1x1x128xf32> to vector<2x128xf32>
    %c0_403 = arith.constant 0 : index
    %c3_404 = arith.constant 3 : index
    %c5_405 = arith.constant 5 : index
    %c0_406 = arith.constant 0 : index
    %347 = vector.load %arg14[%c0_403, %c3_404, %c5_405, %c0_406] : memref<2x8x8x128xf32, #tpu.memory_space<vmem>>, vector<2x1x1x128xf32>
    %348 = vector.shape_cast %347 : vector<2x1x1x128xf32> to vector<2x128xf32>
    %349 = arith.maximumf %342, %344 : vector<2x128xf32>
    %350 = arith.maximumf %346, %348 : vector<2x128xf32>
    %351 = arith.maximumf %349, %350 : vector<2x128xf32>
    %c6_407 = arith.constant 6 : index
    %c0_408 = arith.constant 0 : index
    %c0_409 = arith.constant 0 : index
    %352 = vector.load %arg6[%c6_407, %c0_408, %c0_409] : memref<16x128x128xf32, #tpu.memory_space<vmem>>, vector<1x128x128xf32>
    %353 = vector.shape_cast %352 : vector<1x128x128xf32> to vector<128x128xf32>
    %cst_410 = arith.constant dense<0.000000e+00> : vector<2x128xf32>
    %354 = tpu.matmul %351, %353, %cst_410 {dimension_numbers = #tpu.dot_dimension_numbers<[1], [0], [0], [1], [0, 0, 1, 1], [], []>} : vector<2x128xf32>, vector<128x128xf32>, vector<2x128xf32> -> vector<2x128xf32>
    %355 = arith.addf %340, %354 : vector<2x128xf32>
    %c0_411 = arith.constant 0 : index
    %c2_412 = arith.constant 2 : index
    %c6_413 = arith.constant 6 : index
    %c0_414 = arith.constant 0 : index
    %356 = vector.load %arg14[%c0_411, %c2_412, %c6_413, %c0_414] : memref<2x8x8x128xf32, #tpu.memory_space<vmem>>, vector<2x1x1x128xf32>
    %357 = vector.shape_cast %356 : vector<2x1x1x128xf32> to vector<2x128xf32>
    %c0_415 = arith.constant 0 : index
    %c2_416 = arith.constant 2 : index
    %c7_417 = arith.constant 7 : index
    %c0_418 = arith.constant 0 : index
    %358 = vector.load %arg14[%c0_415, %c2_416, %c7_417, %c0_418] : memref<2x8x8x128xf32, #tpu.memory_space<vmem>>, vector<2x1x1x128xf32>
    %359 = vector.shape_cast %358 : vector<2x1x1x128xf32> to vector<2x128xf32>
    %c0_419 = arith.constant 0 : index
    %c3_420 = arith.constant 3 : index
    %c6_421 = arith.constant 6 : index
    %c0_422 = arith.constant 0 : index
    %360 = vector.load %arg14[%c0_419, %c3_420, %c6_421, %c0_422] : memref<2x8x8x128xf32, #tpu.memory_space<vmem>>, vector<2x1x1x128xf32>
    %361 = vector.shape_cast %360 : vector<2x1x1x128xf32> to vector<2x128xf32>
    %c0_423 = arith.constant 0 : index
    %c3_424 = arith.constant 3 : index
    %c7_425 = arith.constant 7 : index
    %c0_426 = arith.constant 0 : index
    %362 = vector.load %arg14[%c0_423, %c3_424, %c7_425, %c0_426] : memref<2x8x8x128xf32, #tpu.memory_space<vmem>>, vector<2x1x1x128xf32>
    %363 = vector.shape_cast %362 : vector<2x1x1x128xf32> to vector<2x128xf32>
    %364 = arith.maximumf %357, %359 : vector<2x128xf32>
    %365 = arith.maximumf %361, %363 : vector<2x128xf32>
    %366 = arith.maximumf %364, %365 : vector<2x128xf32>
    %c7_427 = arith.constant 7 : index
    %c0_428 = arith.constant 0 : index
    %c0_429 = arith.constant 0 : index
    %367 = vector.load %arg6[%c7_427, %c0_428, %c0_429] : memref<16x128x128xf32, #tpu.memory_space<vmem>>, vector<1x128x128xf32>
    %368 = vector.shape_cast %367 : vector<1x128x128xf32> to vector<128x128xf32>
    %cst_430 = arith.constant dense<0.000000e+00> : vector<2x128xf32>
    %369 = tpu.matmul %366, %368, %cst_430 {dimension_numbers = #tpu.dot_dimension_numbers<[1], [0], [0], [1], [0, 0, 1, 1], [], []>} : vector<2x128xf32>, vector<128x128xf32>, vector<2x128xf32> -> vector<2x128xf32>
    %370 = arith.addf %355, %369 : vector<2x128xf32>
    %c0_431 = arith.constant 0 : index
    %c4_432 = arith.constant 4 : index
    %c0_433 = arith.constant 0 : index
    %c0_434 = arith.constant 0 : index
    %371 = vector.load %arg14[%c0_431, %c4_432, %c0_433, %c0_434] : memref<2x8x8x128xf32, #tpu.memory_space<vmem>>, vector<2x1x1x128xf32>
    %372 = vector.shape_cast %371 : vector<2x1x1x128xf32> to vector<2x128xf32>
    %c0_435 = arith.constant 0 : index
    %c4_436 = arith.constant 4 : index
    %c1_437 = arith.constant 1 : index
    %c0_438 = arith.constant 0 : index
    %373 = vector.load %arg14[%c0_435, %c4_436, %c1_437, %c0_438] : memref<2x8x8x128xf32, #tpu.memory_space<vmem>>, vector<2x1x1x128xf32>
    %374 = vector.shape_cast %373 : vector<2x1x1x128xf32> to vector<2x128xf32>
    %c0_439 = arith.constant 0 : index
    %c5_440 = arith.constant 5 : index
    %c0_441 = arith.constant 0 : index
    %c0_442 = arith.constant 0 : index
    %375 = vector.load %arg14[%c0_439, %c5_440, %c0_441, %c0_442] : memref<2x8x8x128xf32, #tpu.memory_space<vmem>>, vector<2x1x1x128xf32>
    %376 = vector.shape_cast %375 : vector<2x1x1x128xf32> to vector<2x128xf32>
    %c0_443 = arith.constant 0 : index
    %c5_444 = arith.constant 5 : index
    %c1_445 = arith.constant 1 : index
    %c0_446 = arith.constant 0 : index
    %377 = vector.load %arg14[%c0_443, %c5_444, %c1_445, %c0_446] : memref<2x8x8x128xf32, #tpu.memory_space<vmem>>, vector<2x1x1x128xf32>
    %378 = vector.shape_cast %377 : vector<2x1x1x128xf32> to vector<2x128xf32>
    %379 = arith.maximumf %372, %374 : vector<2x128xf32>
    %380 = arith.maximumf %376, %378 : vector<2x128xf32>
    %381 = arith.maximumf %379, %380 : vector<2x128xf32>
    %c8_447 = arith.constant 8 : index
    %c0_448 = arith.constant 0 : index
    %c0_449 = arith.constant 0 : index
    %382 = vector.load %arg6[%c8_447, %c0_448, %c0_449] : memref<16x128x128xf32, #tpu.memory_space<vmem>>, vector<1x128x128xf32>
    %383 = vector.shape_cast %382 : vector<1x128x128xf32> to vector<128x128xf32>
    %cst_450 = arith.constant dense<0.000000e+00> : vector<2x128xf32>
    %384 = tpu.matmul %381, %383, %cst_450 {dimension_numbers = #tpu.dot_dimension_numbers<[1], [0], [0], [1], [0, 0, 1, 1], [], []>} : vector<2x128xf32>, vector<128x128xf32>, vector<2x128xf32> -> vector<2x128xf32>
    %385 = arith.addf %370, %384 : vector<2x128xf32>
    %c0_451 = arith.constant 0 : index
    %c4_452 = arith.constant 4 : index
    %c2_453 = arith.constant 2 : index
    %c0_454 = arith.constant 0 : index
    %386 = vector.load %arg14[%c0_451, %c4_452, %c2_453, %c0_454] : memref<2x8x8x128xf32, #tpu.memory_space<vmem>>, vector<2x1x1x128xf32>
    %387 = vector.shape_cast %386 : vector<2x1x1x128xf32> to vector<2x128xf32>
    %c0_455 = arith.constant 0 : index
    %c4_456 = arith.constant 4 : index
    %c3_457 = arith.constant 3 : index
    %c0_458 = arith.constant 0 : index
    %388 = vector.load %arg14[%c0_455, %c4_456, %c3_457, %c0_458] : memref<2x8x8x128xf32, #tpu.memory_space<vmem>>, vector<2x1x1x128xf32>
    %389 = vector.shape_cast %388 : vector<2x1x1x128xf32> to vector<2x128xf32>
    %c0_459 = arith.constant 0 : index
    %c5_460 = arith.constant 5 : index
    %c2_461 = arith.constant 2 : index
    %c0_462 = arith.constant 0 : index
    %390 = vector.load %arg14[%c0_459, %c5_460, %c2_461, %c0_462] : memref<2x8x8x128xf32, #tpu.memory_space<vmem>>, vector<2x1x1x128xf32>
    %391 = vector.shape_cast %390 : vector<2x1x1x128xf32> to vector<2x128xf32>
    %c0_463 = arith.constant 0 : index
    %c5_464 = arith.constant 5 : index
    %c3_465 = arith.constant 3 : index
    %c0_466 = arith.constant 0 : index
    %392 = vector.load %arg14[%c0_463, %c5_464, %c3_465, %c0_466] : memref<2x8x8x128xf32, #tpu.memory_space<vmem>>, vector<2x1x1x128xf32>
    %393 = vector.shape_cast %392 : vector<2x1x1x128xf32> to vector<2x128xf32>
    %394 = arith.maximumf %387, %389 : vector<2x128xf32>
    %395 = arith.maximumf %391, %393 : vector<2x128xf32>
    %396 = arith.maximumf %394, %395 : vector<2x128xf32>
    %c9_467 = arith.constant 9 : index
    %c0_468 = arith.constant 0 : index
    %c0_469 = arith.constant 0 : index
    %397 = vector.load %arg6[%c9_467, %c0_468, %c0_469] : memref<16x128x128xf32, #tpu.memory_space<vmem>>, vector<1x128x128xf32>
    %398 = vector.shape_cast %397 : vector<1x128x128xf32> to vector<128x128xf32>
    %cst_470 = arith.constant dense<0.000000e+00> : vector<2x128xf32>
    %399 = tpu.matmul %396, %398, %cst_470 {dimension_numbers = #tpu.dot_dimension_numbers<[1], [0], [0], [1], [0, 0, 1, 1], [], []>} : vector<2x128xf32>, vector<128x128xf32>, vector<2x128xf32> -> vector<2x128xf32>
    %400 = arith.addf %385, %399 : vector<2x128xf32>
    %c0_471 = arith.constant 0 : index
    %c4_472 = arith.constant 4 : index
    %c4_473 = arith.constant 4 : index
    %c0_474 = arith.constant 0 : index
    %401 = vector.load %arg14[%c0_471, %c4_472, %c4_473, %c0_474] : memref<2x8x8x128xf32, #tpu.memory_space<vmem>>, vector<2x1x1x128xf32>
    %402 = vector.shape_cast %401 : vector<2x1x1x128xf32> to vector<2x128xf32>
    %c0_475 = arith.constant 0 : index
    %c4_476 = arith.constant 4 : index
    %c5_477 = arith.constant 5 : index
    %c0_478 = arith.constant 0 : index
    %403 = vector.load %arg14[%c0_475, %c4_476, %c5_477, %c0_478] : memref<2x8x8x128xf32, #tpu.memory_space<vmem>>, vector<2x1x1x128xf32>
    %404 = vector.shape_cast %403 : vector<2x1x1x128xf32> to vector<2x128xf32>
    %c0_479 = arith.constant 0 : index
    %c5_480 = arith.constant 5 : index
    %c4_481 = arith.constant 4 : index
    %c0_482 = arith.constant 0 : index
    %405 = vector.load %arg14[%c0_479, %c5_480, %c4_481, %c0_482] : memref<2x8x8x128xf32, #tpu.memory_space<vmem>>, vector<2x1x1x128xf32>
    %406 = vector.shape_cast %405 : vector<2x1x1x128xf32> to vector<2x128xf32>
    %c0_483 = arith.constant 0 : index
    %c5_484 = arith.constant 5 : index
    %c5_485 = arith.constant 5 : index
    %c0_486 = arith.constant 0 : index
    %407 = vector.load %arg14[%c0_483, %c5_484, %c5_485, %c0_486] : memref<2x8x8x128xf32, #tpu.memory_space<vmem>>, vector<2x1x1x128xf32>
    %408 = vector.shape_cast %407 : vector<2x1x1x128xf32> to vector<2x128xf32>
    %409 = arith.maximumf %402, %404 : vector<2x128xf32>
    %410 = arith.maximumf %406, %408 : vector<2x128xf32>
    %411 = arith.maximumf %409, %410 : vector<2x128xf32>
    %c10_487 = arith.constant 10 : index
    %c0_488 = arith.constant 0 : index
    %c0_489 = arith.constant 0 : index
    %412 = vector.load %arg6[%c10_487, %c0_488, %c0_489] : memref<16x128x128xf32, #tpu.memory_space<vmem>>, vector<1x128x128xf32>
    %413 = vector.shape_cast %412 : vector<1x128x128xf32> to vector<128x128xf32>
    %cst_490 = arith.constant dense<0.000000e+00> : vector<2x128xf32>
    %414 = tpu.matmul %411, %413, %cst_490 {dimension_numbers = #tpu.dot_dimension_numbers<[1], [0], [0], [1], [0, 0, 1, 1], [], []>} : vector<2x128xf32>, vector<128x128xf32>, vector<2x128xf32> -> vector<2x128xf32>
    %415 = arith.addf %400, %414 : vector<2x128xf32>
    %c0_491 = arith.constant 0 : index
    %c4_492 = arith.constant 4 : index
    %c6_493 = arith.constant 6 : index
    %c0_494 = arith.constant 0 : index
    %416 = vector.load %arg14[%c0_491, %c4_492, %c6_493, %c0_494] : memref<2x8x8x128xf32, #tpu.memory_space<vmem>>, vector<2x1x1x128xf32>
    %417 = vector.shape_cast %416 : vector<2x1x1x128xf32> to vector<2x128xf32>
    %c0_495 = arith.constant 0 : index
    %c4_496 = arith.constant 4 : index
    %c7_497 = arith.constant 7 : index
    %c0_498 = arith.constant 0 : index
    %418 = vector.load %arg14[%c0_495, %c4_496, %c7_497, %c0_498] : memref<2x8x8x128xf32, #tpu.memory_space<vmem>>, vector<2x1x1x128xf32>
    %419 = vector.shape_cast %418 : vector<2x1x1x128xf32> to vector<2x128xf32>
    %c0_499 = arith.constant 0 : index
    %c5_500 = arith.constant 5 : index
    %c6_501 = arith.constant 6 : index
    %c0_502 = arith.constant 0 : index
    %420 = vector.load %arg14[%c0_499, %c5_500, %c6_501, %c0_502] : memref<2x8x8x128xf32, #tpu.memory_space<vmem>>, vector<2x1x1x128xf32>
    %421 = vector.shape_cast %420 : vector<2x1x1x128xf32> to vector<2x128xf32>
    %c0_503 = arith.constant 0 : index
    %c5_504 = arith.constant 5 : index
    %c7_505 = arith.constant 7 : index
    %c0_506 = arith.constant 0 : index
    %422 = vector.load %arg14[%c0_503, %c5_504, %c7_505, %c0_506] : memref<2x8x8x128xf32, #tpu.memory_space<vmem>>, vector<2x1x1x128xf32>
    %423 = vector.shape_cast %422 : vector<2x1x1x128xf32> to vector<2x128xf32>
    %424 = arith.maximumf %417, %419 : vector<2x128xf32>
    %425 = arith.maximumf %421, %423 : vector<2x128xf32>
    %426 = arith.maximumf %424, %425 : vector<2x128xf32>
    %c11_507 = arith.constant 11 : index
    %c0_508 = arith.constant 0 : index
    %c0_509 = arith.constant 0 : index
    %427 = vector.load %arg6[%c11_507, %c0_508, %c0_509] : memref<16x128x128xf32, #tpu.memory_space<vmem>>, vector<1x128x128xf32>
    %428 = vector.shape_cast %427 : vector<1x128x128xf32> to vector<128x128xf32>
    %cst_510 = arith.constant dense<0.000000e+00> : vector<2x128xf32>
    %429 = tpu.matmul %426, %428, %cst_510 {dimension_numbers = #tpu.dot_dimension_numbers<[1], [0], [0], [1], [0, 0, 1, 1], [], []>} : vector<2x128xf32>, vector<128x128xf32>, vector<2x128xf32> -> vector<2x128xf32>
    %430 = arith.addf %415, %429 : vector<2x128xf32>
    %c0_511 = arith.constant 0 : index
    %c6_512 = arith.constant 6 : index
    %c0_513 = arith.constant 0 : index
    %c0_514 = arith.constant 0 : index
    %431 = vector.load %arg14[%c0_511, %c6_512, %c0_513, %c0_514] : memref<2x8x8x128xf32, #tpu.memory_space<vmem>>, vector<2x1x1x128xf32>
    %432 = vector.shape_cast %431 : vector<2x1x1x128xf32> to vector<2x128xf32>
    %c0_515 = arith.constant 0 : index
    %c6_516 = arith.constant 6 : index
    %c1_517 = arith.constant 1 : index
    %c0_518 = arith.constant 0 : index
    %433 = vector.load %arg14[%c0_515, %c6_516, %c1_517, %c0_518] : memref<2x8x8x128xf32, #tpu.memory_space<vmem>>, vector<2x1x1x128xf32>
    %434 = vector.shape_cast %433 : vector<2x1x1x128xf32> to vector<2x128xf32>
    %c0_519 = arith.constant 0 : index
    %c7_520 = arith.constant 7 : index
    %c0_521 = arith.constant 0 : index
    %c0_522 = arith.constant 0 : index
    %435 = vector.load %arg14[%c0_519, %c7_520, %c0_521, %c0_522] : memref<2x8x8x128xf32, #tpu.memory_space<vmem>>, vector<2x1x1x128xf32>
    %436 = vector.shape_cast %435 : vector<2x1x1x128xf32> to vector<2x128xf32>
    %c0_523 = arith.constant 0 : index
    %c7_524 = arith.constant 7 : index
    %c1_525 = arith.constant 1 : index
    %c0_526 = arith.constant 0 : index
    %437 = vector.load %arg14[%c0_523, %c7_524, %c1_525, %c0_526] : memref<2x8x8x128xf32, #tpu.memory_space<vmem>>, vector<2x1x1x128xf32>
    %438 = vector.shape_cast %437 : vector<2x1x1x128xf32> to vector<2x128xf32>
    %439 = arith.maximumf %432, %434 : vector<2x128xf32>
    %440 = arith.maximumf %436, %438 : vector<2x128xf32>
    %441 = arith.maximumf %439, %440 : vector<2x128xf32>
    %c12_527 = arith.constant 12 : index
    %c0_528 = arith.constant 0 : index
    %c0_529 = arith.constant 0 : index
    %442 = vector.load %arg6[%c12_527, %c0_528, %c0_529] : memref<16x128x128xf32, #tpu.memory_space<vmem>>, vector<1x128x128xf32>
    %443 = vector.shape_cast %442 : vector<1x128x128xf32> to vector<128x128xf32>
    %cst_530 = arith.constant dense<0.000000e+00> : vector<2x128xf32>
    %444 = tpu.matmul %441, %443, %cst_530 {dimension_numbers = #tpu.dot_dimension_numbers<[1], [0], [0], [1], [0, 0, 1, 1], [], []>} : vector<2x128xf32>, vector<128x128xf32>, vector<2x128xf32> -> vector<2x128xf32>
    %445 = arith.addf %430, %444 : vector<2x128xf32>
    %c0_531 = arith.constant 0 : index
    %c6_532 = arith.constant 6 : index
    %c2_533 = arith.constant 2 : index
    %c0_534 = arith.constant 0 : index
    %446 = vector.load %arg14[%c0_531, %c6_532, %c2_533, %c0_534] : memref<2x8x8x128xf32, #tpu.memory_space<vmem>>, vector<2x1x1x128xf32>
    %447 = vector.shape_cast %446 : vector<2x1x1x128xf32> to vector<2x128xf32>
    %c0_535 = arith.constant 0 : index
    %c6_536 = arith.constant 6 : index
    %c3_537 = arith.constant 3 : index
    %c0_538 = arith.constant 0 : index
    %448 = vector.load %arg14[%c0_535, %c6_536, %c3_537, %c0_538] : memref<2x8x8x128xf32, #tpu.memory_space<vmem>>, vector<2x1x1x128xf32>
    %449 = vector.shape_cast %448 : vector<2x1x1x128xf32> to vector<2x128xf32>
    %c0_539 = arith.constant 0 : index
    %c7_540 = arith.constant 7 : index
    %c2_541 = arith.constant 2 : index
    %c0_542 = arith.constant 0 : index
    %450 = vector.load %arg14[%c0_539, %c7_540, %c2_541, %c0_542] : memref<2x8x8x128xf32, #tpu.memory_space<vmem>>, vector<2x1x1x128xf32>
    %451 = vector.shape_cast %450 : vector<2x1x1x128xf32> to vector<2x128xf32>
    %c0_543 = arith.constant 0 : index
    %c7_544 = arith.constant 7 : index
    %c3_545 = arith.constant 3 : index
    %c0_546 = arith.constant 0 : index
    %452 = vector.load %arg14[%c0_543, %c7_544, %c3_545, %c0_546] : memref<2x8x8x128xf32, #tpu.memory_space<vmem>>, vector<2x1x1x128xf32>
    %453 = vector.shape_cast %452 : vector<2x1x1x128xf32> to vector<2x128xf32>
    %454 = arith.maximumf %447, %449 : vector<2x128xf32>
    %455 = arith.maximumf %451, %453 : vector<2x128xf32>
    %456 = arith.maximumf %454, %455 : vector<2x128xf32>
    %c13_547 = arith.constant 13 : index
    %c0_548 = arith.constant 0 : index
    %c0_549 = arith.constant 0 : index
    %457 = vector.load %arg6[%c13_547, %c0_548, %c0_549] : memref<16x128x128xf32, #tpu.memory_space<vmem>>, vector<1x128x128xf32>
    %458 = vector.shape_cast %457 : vector<1x128x128xf32> to vector<128x128xf32>
    %cst_550 = arith.constant dense<0.000000e+00> : vector<2x128xf32>
    %459 = tpu.matmul %456, %458, %cst_550 {dimension_numbers = #tpu.dot_dimension_numbers<[1], [0], [0], [1], [0, 0, 1, 1], [], []>} : vector<2x128xf32>, vector<128x128xf32>, vector<2x128xf32> -> vector<2x128xf32>
    %460 = arith.addf %445, %459 : vector<2x128xf32>
    %c0_551 = arith.constant 0 : index
    %c6_552 = arith.constant 6 : index
    %c4_553 = arith.constant 4 : index
    %c0_554 = arith.constant 0 : index
    %461 = vector.load %arg14[%c0_551, %c6_552, %c4_553, %c0_554] : memref<2x8x8x128xf32, #tpu.memory_space<vmem>>, vector<2x1x1x128xf32>
    %462 = vector.shape_cast %461 : vector<2x1x1x128xf32> to vector<2x128xf32>
    %c0_555 = arith.constant 0 : index
    %c6_556 = arith.constant 6 : index
    %c5_557 = arith.constant 5 : index
    %c0_558 = arith.constant 0 : index
    %463 = vector.load %arg14[%c0_555, %c6_556, %c5_557, %c0_558] : memref<2x8x8x128xf32, #tpu.memory_space<vmem>>, vector<2x1x1x128xf32>
    %464 = vector.shape_cast %463 : vector<2x1x1x128xf32> to vector<2x128xf32>
    %c0_559 = arith.constant 0 : index
    %c7_560 = arith.constant 7 : index
    %c4_561 = arith.constant 4 : index
    %c0_562 = arith.constant 0 : index
    %465 = vector.load %arg14[%c0_559, %c7_560, %c4_561, %c0_562] : memref<2x8x8x128xf32, #tpu.memory_space<vmem>>, vector<2x1x1x128xf32>
    %466 = vector.shape_cast %465 : vector<2x1x1x128xf32> to vector<2x128xf32>
    %c0_563 = arith.constant 0 : index
    %c7_564 = arith.constant 7 : index
    %c5_565 = arith.constant 5 : index
    %c0_566 = arith.constant 0 : index
    %467 = vector.load %arg14[%c0_563, %c7_564, %c5_565, %c0_566] : memref<2x8x8x128xf32, #tpu.memory_space<vmem>>, vector<2x1x1x128xf32>
    %468 = vector.shape_cast %467 : vector<2x1x1x128xf32> to vector<2x128xf32>
    %469 = arith.maximumf %462, %464 : vector<2x128xf32>
    %470 = arith.maximumf %466, %468 : vector<2x128xf32>
    %471 = arith.maximumf %469, %470 : vector<2x128xf32>
    %c14_567 = arith.constant 14 : index
    %c0_568 = arith.constant 0 : index
    %c0_569 = arith.constant 0 : index
    %472 = vector.load %arg6[%c14_567, %c0_568, %c0_569] : memref<16x128x128xf32, #tpu.memory_space<vmem>>, vector<1x128x128xf32>
    %473 = vector.shape_cast %472 : vector<1x128x128xf32> to vector<128x128xf32>
    %cst_570 = arith.constant dense<0.000000e+00> : vector<2x128xf32>
    %474 = tpu.matmul %471, %473, %cst_570 {dimension_numbers = #tpu.dot_dimension_numbers<[1], [0], [0], [1], [0, 0, 1, 1], [], []>} : vector<2x128xf32>, vector<128x128xf32>, vector<2x128xf32> -> vector<2x128xf32>
    %475 = arith.addf %460, %474 : vector<2x128xf32>
    %c0_571 = arith.constant 0 : index
    %c6_572 = arith.constant 6 : index
    %c6_573 = arith.constant 6 : index
    %c0_574 = arith.constant 0 : index
    %476 = vector.load %arg14[%c0_571, %c6_572, %c6_573, %c0_574] : memref<2x8x8x128xf32, #tpu.memory_space<vmem>>, vector<2x1x1x128xf32>
    %477 = vector.shape_cast %476 : vector<2x1x1x128xf32> to vector<2x128xf32>
    %c0_575 = arith.constant 0 : index
    %c6_576 = arith.constant 6 : index
    %c7_577 = arith.constant 7 : index
    %c0_578 = arith.constant 0 : index
    %478 = vector.load %arg14[%c0_575, %c6_576, %c7_577, %c0_578] : memref<2x8x8x128xf32, #tpu.memory_space<vmem>>, vector<2x1x1x128xf32>
    %479 = vector.shape_cast %478 : vector<2x1x1x128xf32> to vector<2x128xf32>
    %c0_579 = arith.constant 0 : index
    %c7_580 = arith.constant 7 : index
    %c6_581 = arith.constant 6 : index
    %c0_582 = arith.constant 0 : index
    %480 = vector.load %arg14[%c0_579, %c7_580, %c6_581, %c0_582] : memref<2x8x8x128xf32, #tpu.memory_space<vmem>>, vector<2x1x1x128xf32>
    %481 = vector.shape_cast %480 : vector<2x1x1x128xf32> to vector<2x128xf32>
    %c0_583 = arith.constant 0 : index
    %c7_584 = arith.constant 7 : index
    %c7_585 = arith.constant 7 : index
    %c0_586 = arith.constant 0 : index
    %482 = vector.load %arg14[%c0_583, %c7_584, %c7_585, %c0_586] : memref<2x8x8x128xf32, #tpu.memory_space<vmem>>, vector<2x1x1x128xf32>
    %483 = vector.shape_cast %482 : vector<2x1x1x128xf32> to vector<2x128xf32>
    %484 = arith.maximumf %477, %479 : vector<2x128xf32>
    %485 = arith.maximumf %481, %483 : vector<2x128xf32>
    %486 = arith.maximumf %484, %485 : vector<2x128xf32>
    %c15_587 = arith.constant 15 : index
    %c0_588 = arith.constant 0 : index
    %c0_589 = arith.constant 0 : index
    %487 = vector.load %arg6[%c15_587, %c0_588, %c0_589] : memref<16x128x128xf32, #tpu.memory_space<vmem>>, vector<1x128x128xf32>
    %488 = vector.shape_cast %487 : vector<1x128x128xf32> to vector<128x128xf32>
    %cst_590 = arith.constant dense<0.000000e+00> : vector<2x128xf32>
    %489 = tpu.matmul %486, %488, %cst_590 {dimension_numbers = #tpu.dot_dimension_numbers<[1], [0], [0], [1], [0, 0, 1, 1], [], []>} : vector<2x128xf32>, vector<128x128xf32>, vector<2x128xf32> -> vector<2x128xf32>
    %490 = arith.addf %475, %489 : vector<2x128xf32>
    %c0_591 = arith.constant 0 : index
    %c0_592 = arith.constant 0 : index
    %491 = vector.load %arg7[%c0_591, %c0_592] : memref<1x128xf32, #tpu.memory_space<vmem>>, vector<1x128xf32>
    %492 = vector.broadcast %491 : vector<1x128xf32> to vector<2x128xf32>
    %493 = arith.addf %490, %492 : vector<2x128xf32>
    %cst_593 = arith.constant 0.000000e+00 : f32
    %494 = vector.broadcast %cst_593 : f32 to vector<2x128xf32>
    %495 = arith.maximumf %493, %494 : vector<2x128xf32>
    %c0_594 = arith.constant 0 : index
    %c0_595 = arith.constant 0 : index
    %496 = vector.load %arg8[%c0_594, %c0_595] : memref<128x128xf32, #tpu.memory_space<vmem>>, vector<128x128xf32>
    %cst_596 = arith.constant dense<0.000000e+00> : vector<2x128xf32>
    %497 = tpu.matmul %495, %496, %cst_596 {dimension_numbers = #tpu.dot_dimension_numbers<[1], [0], [0], [1], [0, 0, 1, 1], [], []>} : vector<2x128xf32>, vector<128x128xf32>, vector<2x128xf32> -> vector<2x128xf32>
    %c0_597 = arith.constant 0 : index
    %c0_598 = arith.constant 0 : index
    %498 = vector.load %arg9[%c0_597, %c0_598] : memref<1x128xf32, #tpu.memory_space<vmem>>, vector<1x128xf32>
    %499 = vector.broadcast %498 : vector<1x128xf32> to vector<2x128xf32>
    %500 = arith.addf %497, %499 : vector<2x128xf32>
    %cst_599 = arith.constant 0.000000e+00 : f32
    %501 = vector.broadcast %cst_599 : f32 to vector<2x128xf32>
    %502 = arith.maximumf %500, %501 : vector<2x128xf32>
    %c0_600 = arith.constant 0 : index
    %c0_601 = arith.constant 0 : index
    %503 = vector.load %arg10[%c0_600, %c0_601] : memref<128x128xf32, #tpu.memory_space<vmem>>, vector<128x128xf32>
    %cst_602 = arith.constant dense<0.000000e+00> : vector<2x128xf32>
    %504 = tpu.matmul %502, %503, %cst_602 {dimension_numbers = #tpu.dot_dimension_numbers<[1], [0], [0], [1], [0, 0, 1, 1], [], []>} : vector<2x128xf32>, vector<128x128xf32>, vector<2x128xf32> -> vector<2x128xf32>
    %c0_603 = arith.constant 0 : index
    %c0_604 = arith.constant 0 : index
    %505 = vector.load %arg11[%c0_603, %c0_604] : memref<1x128xf32, #tpu.memory_space<vmem>>, vector<1x128xf32>
    %506 = vector.broadcast %505 : vector<1x128xf32> to vector<2x128xf32>
    %507 = arith.addf %504, %506 : vector<2x128xf32>
    %c0_605 = arith.constant 0 : index
    %c0_606 = arith.constant 0 : index
    %508 = vector.load %arg12[%c0_605, %c0_606] : memref<2x128xf32, #tpu.memory_space<vmem>>, vector<2x128xf32>
    tpu.vector_store %arg12[%c0_605, %c0_606], %507 {strides = array<i32>} : memref<2x128xf32, #tpu.memory_space<vmem>>, vector<2x128xf32>,
    return
  }
  func.func @transform_0(%arg0: i32) -> (i32, i32, i32, i32) {
    %c0_i32 = arith.constant 0 : i32
    %c0_i32_0 = arith.constant 0 : i32
    %c0_i32_1 = arith.constant 0 : i32
    %c0_i32_2 = arith.constant 0 : i32
    return %arg0, %c0_i32, %c0_i32_0, %c0_i32_1 : i32, i32, i32, i32
  }
  func.func @transform_1(%arg0: i32) -> (i32, i32) {
    %c0_i32 = arith.constant 0 : i32
    %c0_i32_0 = arith.constant 0 : i32
    %c0_i32_1 = arith.constant 0 : i32
    return %c0_i32, %c0_i32_0 : i32, i32
  }
  func.func @transform_2(%arg0: i32) -> (i32, i32) {
    %c0_i32 = arith.constant 0 : i32
    %c0_i32_0 = arith.constant 0 : i32
    %c0_i32_1 = arith.constant 0 : i32
    return %c0_i32, %c0_i32_0 : i32, i32
  }
  func.func @transform_3(%arg0: i32) -> (i32, i32, i32) {
    %c0_i32 = arith.constant 0 : i32
    %c0_i32_0 = arith.constant 0 : i32
    %c0_i32_1 = arith.constant 0 : i32
    %c0_i32_2 = arith.constant 0 : i32
    return %c0_i32, %c0_i32_0, %c0_i32_1 : i32, i32, i32
  }
  func.func @transform_4(%arg0: i32) -> (i32, i32) {
    %c0_i32 = arith.constant 0 : i32
    %c0_i32_0 = arith.constant 0 : i32
    %c0_i32_1 = arith.constant 0 : i32
    return %c0_i32, %c0_i32_0 : i32, i32
  }
  func.func @transform_5(%arg0: i32) -> (i32, i32, i32) {
    %c0_i32 = arith.constant 0 : i32
    %c0_i32_0 = arith.constant 0 : i32
    %c0_i32_1 = arith.constant 0 : i32
    %c0_i32_2 = arith.constant 0 : i32
    return %c0_i32, %c0_i32_0, %c0_i32_1 : i32, i32, i32
  }
  func.func @transform_6(%arg0: i32) -> (i32, i32) {
    %c0_i32 = arith.constant 0 : i32
    %c0_i32_0 = arith.constant 0 : i32
    %c0_i32_1 = arith.constant 0 : i32
    return %c0_i32, %c0_i32_0 : i32, i32
  }
  func.func @transform_7(%arg0: i32) -> (i32, i32) {
    %c0_i32 = arith.constant 0 : i32
    %c0_i32_0 = arith.constant 0 : i32
    %c0_i32_1 = arith.constant 0 : i32
    return %c0_i32, %c0_i32_0 : i32, i32
  }
  func.func @transform_8(%arg0: i32) -> (i32, i32) {
    %c0_i32 = arith.constant 0 : i32
    %c0_i32_0 = arith.constant 0 : i32
    %c0_i32_1 = arith.constant 0 : i32
    return %c0_i32, %c0_i32_0 : i32, i32
  }
  func.func @transform_9(%arg0: i32) -> (i32, i32) {
    %c0_i32 = arith.constant 0 : i32
    %c0_i32_0 = arith.constant 0 : i32
    %c0_i32_1 = arith.constant 0 : i32
    return %c0_i32, %c0_i32_0 : i32, i32
  }
  func.func @transform_10(%arg0: i32) -> (i32, i32) {
    %c0_i32 = arith.constant 0 : i32
    %c0_i32_0 = arith.constant 0 : i32
    %c0_i32_1 = arith.constant 0 : i32
    return %c0_i32, %c0_i32_0 : i32, i32
  }
  func.func @transform_11(%arg0: i32) -> (i32, i32) {
    %c0_i32 = arith.constant 0 : i32
    %c0_i32_0 = arith.constant 0 : i32
    return %arg0, %c0_i32 : i32, i32
  }
}

</mosaic_0001>

<bundles_post_ra>
// kernel: lenet_forward.1
= control target key start
LH: loop header
LB: loop body
LE: loop exit
PB: predicated region body
PF: predicated region fallthrough
CT: control target
= control target key end

     0   :  { %vm86_vm0 = vcmask 261120   ;;  %s18965_s0 = inlined_call_operand.vmem [shape: f32[2,4,144,32], index: 0, kind: input, shape index: {}]   ;;  %s18966_s1 = inlined_call_operand.vmem [shape: f32[32,128], index: 1, kind: input, shape index: {}]   ;;  %s18967_s2 = inlined_call_operand.vmem [shape: f32[1,128], index: 2, kind: input, shape index: {}]   ;;  %s18968_s3 = inlined_call_operand.vmem [shape: f32[25,128,128], index: 3, kind: input, shape index: {}]   ;;  %s18969_s4 = inlined_call_operand.vmem [shape: f32[1,128], index: 4, kind: input, shape index: {}]   ;;  %s18970_s5 = inlined_call_operand.vmem [shape: f32[16,128,128], index: 5, kind: input, shape index: {}]   ;;  %s18971_s6 = inlined_call_operand.vmem [shape: f32[1,128], index: 6, kind: input, shape index: {}]   ;;  %s18972_s7 = inlined_call_operand.vmem [shape: f32[128,128], index: 7, kind: input, shape index: {}]   ;;  %s18973_s8 = inlined_call_operand.vmem [shape: f32[1,128], index: 8, kind: input, shape index: {}]   ;;  %s18974_s9 = inlined_call_operand.vmem [shape: f32[128,128], index: 9, kind: input, shape index: {}]   ;;  %s18975_s10 = inlined_call_operand.vmem [shape: f32[1,128], index: 10, kind: input, shape index: {}]   ;;  %s18976_s11 = inlined_call_operand.hbm [shape: f32[2,128], index: 11, kind: output, shape index: {}]  }
   0x1   :  { %v75_v0 = vld [vmem:[%s18966_s1] sm:$0xff]  ;;  %v76_v1 = vld [vmem:[%s18966_s1 + $0x8] sm:$0xff]  ;;  %v77_v2 = vld [vmem:[%s18966_s1 + $0x10] sm:$0xff] }
   0x2   :  { %v14900_v3 = vpack.c.bf16 %v76_v1, %v75_v0  ;;  %v78_v4 = vld [vmem:[%s18966_s1 + $0x18] sm:$0xff]  ;;  %v39_v5 = vld [vmem:[%s18965_s0] sm:$0xff]  ;;  %v40_v7 = vld [vmem:[%s18965_s0 + $0x8] sm:$0xff] }
   0x3   :  { %v14908_v6 = vpack.c.bf16 %v78_v4, %v77_v2  ;;  %10876 = vmatprep.mubr.msk.f32.mxu1 %vm86_vm0, %v39_v5  ;;  %v41_v8 = vld [vmem:[%s18965_s0 + $0x10] sm:$0xff]  ;;  %v42_v9 = vld [vmem:[%s18965_s0 + $0x18] sm:$0xff]  ;;  %v43_v10 = vld [vmem:[%s18965_s0 + $0x20] sm:$0xff] }
   0x4   :  { %13147 = vmatprep.subr.bf16.mxu1 %v14900_v3  ;;  %13163 = vmatprep.subr.bf16.mxu0 %v14900_v3  ;;  %v8830_v11 = vld [vmem:[%s18965_s0 + $0x120] sm:$0xff]  ;;  %v8831_v12 = vld [vmem:[%s18965_s0 + $0x128] sm:$0xff]  ;;  %v8832_v13 = vld [vmem:[%s18965_s0 + $0x130] sm:$0xff] }
   0x5   :  { %13149 = vmatpush3.bf16.msra.mxu1 %v14900_v3  ;;  %13165 = vmatpush3.bf16.msra.mxu0 %v14900_v3  ;;  %v44_v14 = vld [vmem:[%s18965_s0 + $0x28] sm:$0xff]  ;;  %v45_v15 = vld [vmem:[%s18965_s0 + $0x30] sm:$0xff]  ;;  %v8833_v16 = vld [vmem:[%s18965_s0 + $0x138] sm:$0xff] }
   0x6   :  { %13151 = vmatprep.subr.bf16.mxu1 %v14908_v6  ;;  %13167 = vmatprep.subr.bf16.mxu0 %v14908_v6  ;;  %v8834_v17 = vld [vmem:[%s18965_s0 + $0x140] sm:$0xff]  ;;  %v46_v18 = vld [vmem:[%s18965_s0 + $0x38] sm:$0xff]  ;;  %v8835_v20 = vld [vmem:[%s18965_s0 + $0x148] sm:$0xff] }
   0x7   :  { %11000 = vmatprep.mubr.msk.f32.mxu0 %vm86_vm0, %v8830_v11  ;;  %v47_v19 = vld [vmem:[%s18965_s0 + $0x40] sm:$0xff]  ;;  %v8836_v21 = vld [vmem:[%s18965_s0 + $0x150] sm:$0xff]  ;;  %v48_v22 = vld [vmem:[%s18965_s0 + $0x48] sm:$0xff] }
   0x8   :  { %v49_v23 = vld [vmem:[%s18965_s0 + $0x50] sm:$0xff]  ;;  %v8837_v24 = vld [vmem:[%s18965_s0 + $0x158] sm:$0xff]  ;;  %v8838_v25 = vld [vmem:[%s18965_s0 + $0x160] sm:$0xff] }
   0x9   :  { %13153 = vmatpush3.bf16.msra.mxu1 %v14908_v6  ;;  %13169 = vmatpush3.bf16.msra.mxu0 %v14908_v6  ;;  %v50_v26 = vld [vmem:[%s18965_s0 + $0x58] sm:$0xff]  ;;  %v51_v27 = vld [vmem:[%s18965_s0 + $0x60] sm:$0xff]  ;;  %v8839_v28 = vld [vmem:[%s18965_s0 + $0x168] sm:$0xff] }
   0xa   :  { %13155 = vmatprep.subr.bf16.mxu1 %v14900_v3  ;;  %v8840_v29 = vld [vmem:[%s18965_s0 + $0x170] sm:$0xff]  ;;  %v52_v30 = vld [vmem:[%s18965_s0 + $0x68] sm:$0xff] }
   0xc   :  { %10877 = vmatmul.mubr.msk.f32.vlgmr.msra.gmra.mrb[0].mxu1 %vm86_vm0, %v40_v7  ;;  %11001 = vmatmul.mubr.msk.f32.vlgmr.msra.gmra.mrb[0].mxu0 %vm86_vm0, %v8831_v12 }
   0xd   :  { %13157 = vmatpush3.bf16.msra.mxu1 %v14900_v3  ;;  %10879 = vmatprep.mubr.msk.f32.mxu1 %vm86_vm0, %v41_v8 }
   0xe   :  { %13159 = vmatprep.subr.bf16.mxu1 %v14908_v6  ;;  %11003 = vmatprep.mubr.msk.f32.mxu0 %vm86_vm0, %v8832_v13 }
  0x10   :  { %10880 = vmatmul.mubr.msk.f32.gmra.mrb[2].mxu1 %vm86_vm0, %v42_v9  ;;  %11004 = vmatmul.mubr.msk.f32.gmra.mrb[2].mxu0 %vm86_vm0, %v8833_v16 }
  0x11   :  { %10882 = vmatprep.mubr.msk.f32.mxu1 %vm86_vm0, %v43_v10  ;;  %13161 = vmatpush3.bf16.msra.mxu1 %v14908_v6 }
  0x12   :  { %14410 = vmatprep.subr.bf16.mxu1 %v14900_v3  ;;  %11006 = vmatprep.mubr.msk.f32.mxu0 %vm86_vm0, %v8834_v17 }
  0x14   :  { %10883 = vmatmul.mubr.msk.f32.gmra.mrb[4].mxu1 %vm86_vm0, %v44_v14  ;;  %11007 = vmatmul.mubr.msk.f32.gmra.mrb[4].mxu0 %vm86_vm0, %v8835_v20 }
  0x15   :  { %10885 = vmatprep.mubr.msk.f32.mxu1 %vm86_vm0, %v45_v15  ;;  %11009 = vmatprep.mubr.msk.f32.mxu0 %vm86_vm0, %v8836_v21 }
  0x18   :  { %10886 = vmatmul.mubr.msk.f32.gmra.mrb[6].mxu1 %vm86_vm0, %v46_v18  ;;  %11010 = vmatmul.mubr.msk.f32.gmra.mrb[6].mxu0 %vm86_vm0, %v8837_v24 }
  0x19   :  { %10888 = vmatprep.mubr.msk.f32.mxu1 %vm86_vm0, %v47_v19  ;;  %11012 = vmatprep.mubr.msk.f32.mxu0 %vm86_vm0, %v8838_v25 }
  0x1c   :  { %10889 = vmatmul.mubr.msk.f32.gmra.mrb[8].mxu1 %vm86_vm0, %v48_v22 }
  0x1d   :  { %10891 = vmatprep.mubr.msk.f32.mxu1 %vm86_vm0, %v49_v23 }
  0x20   :  { %10892 = vmatmul.mubr.msk.f32.gmra.mrb[10].mxu1 %vm86_vm0, %v50_v26 }
  0x21   :  { %10894 = vmatprep.mubr.msk.f32.mxu1 %vm86_vm0, %v51_v27 }
  0x22   :  { %16 = vsyncpa [#allocation5], 0  ;;  %v53_v31 = vld [vmem:[%s18965_s0 + $0x70] sm:$0xff]  ;;  %11013 = vmatmul.mubr.msk.f32.gmra.mrb[8].mxu0 %vm86_vm0, %v8839_v28  ;;  %v8841_v32 = vld [vmem:[%s18965_s0 + $0x178] sm:$0xff]  ;;  %vm14828_vm1 = vmmov 0   ;;  %vm6858_vm2 = vcmask 1041409  }
  0x23   :  { %11015 = vmatprep.mubr.msk.f32.mxu0 %vm86_vm0, %v8840_v29  ;;  %v8842_v33 = vld [vmem:[%s18965_s0 + $0x180] sm:$0xff]  ;;  %v54_v34 = vld [vmem:[%s18965_s0 + $0x78] sm:$0xff]  ;;  %v8843_v36 = vld [vmem:[%s18965_s0 + $0x188] sm:$0xff]  ;;  %s14830_s27 = smov [#allocation4]  }
  0x24   :  { %10895 = vmatmul.mubr.msk.f32.gmra.mrb[12].mxu1 %vm86_vm0, %v52_v30  ;;  %v55_v35 = vld [vmem:[%s18965_s0 + $0x80] sm:$0xff]  ;;  %v8844_v37 = vld [vmem:[%s18965_s0 + $0x190] sm:$0xff]  ;;  %v56_v38 = vld [vmem:[%s18965_s0 + $0x88] sm:$0xff]  ;;  %s8713_s28 = sshll.u32 %s14830_s27, 4  ;;  %s8714_s28 = int_to_ptr.vmem [resolvable:$true] %s8713_s28 }
  0x25   :  { %10897 = vmatprep.mubr.msk.f32.mxu1 %vm86_vm0, %v53_v31  ;;  %v57_v39 = vld [vmem:[%s18965_s0 + $0x240] sm:$0xff]  ;;  %v8845_v40 = vld [vmem:[%s18965_s0 + $0x198] sm:$0xff]  ;;  %v58_v41 = vld [vmem:[%s18965_s0 + $0x248] sm:$0xff]  ;;  %p14808_p1 = scmp.lt.s32.totalorder %s8714_s28, %s8714_s28 }
  0x26   :  { %11016 = vmatmul.mubr.msk.f32.gmra.mrb[10].mxu0 %vm86_vm0, %v8841_v32  ;;  %v59_v42 = vld [vmem:[%s18965_s0 + $0x250] sm:$0xff]  ;;  %v60_v43 = vld [vmem:[%s18965_s0 + $0x258] sm:$0xff]  ;;  %v61_v44 = vld [vmem:[%s18965_s0 + $0x260] sm:$0xff] }
  0x27   :  { %11018 = vmatprep.mubr.msk.f32.mxu0 %vm86_vm0, %v8842_v33  ;;  %v62_v45 = vld [vmem:[%s18965_s0 + $0x268] sm:$0xff]  ;;  %v63_v46 = vld [vmem:[%s18965_s0 + $0x270] sm:$0xff]  ;;  %v64_v47 = vld [vmem:[%s18965_s0 + $0x278] sm:$0xff] }
  0x28   :  { %10898 = vmatmul.mubr.msk.f32.gmra.mrb[14].mxu1 %vm86_vm0, %v54_v34  ;;  %v65_v48 = vld [vmem:[%s18965_s0 + $0x280] sm:$0xff]  ;;  %v66_v49 = vld [vmem:[%s18965_s0 + $0x288] sm:$0xff]  ;;  %v67_v50 = vld [vmem:[%s18965_s0 + $0x290] sm:$0xff] }
  0x29   :  { %10900 = vmatprep.mubr.msk.f32.mxu1 %vm86_vm0, %v55_v35  ;;  %v68_v51 = vld [vmem:[%s18965_s0 + $0x298] sm:$0xff]  ;;  %v69_v52 = vld [vmem:[%s18965_s0 + $0x2a0] sm:$0xff]  ;;  %v70_v53 = vld [vmem:[%s18965_s0 + $0x2a8] sm:$0xff] }
  0x2a   :  { %11019 = vmatmul.mubr.msk.f32.gmra.mrb[12].mxu0 %vm86_vm0, %v8843_v36  ;;  %v71_v54 = vld [vmem:[%s18965_s0 + $0x2b0] sm:$0xff]  ;;  %v72_v55 = vld [vmem:[%s18965_s0 + $0x2b8] sm:$0xff]  ;;  %v73_v56 = vld [vmem:[%s18965_s0 + $0x2c0] sm:$0xff] }
  0x2b   :  { %11021 = vmatprep.mubr.msk.f32.mxu0 %vm86_vm0, %v8844_v37  ;;  %v74_v57 = vld [vmem:[%s18965_s0 + $0x2c8] sm:$0xff]  ;;  %v8758_v58 = vld [vmem:[%s18965_s0 + $0x90] sm:$0xff]  ;;  %v8759_v59 = vld [vmem:[%s18965_s0 + $0x98] sm:$0xff] }
  0x2c   :  { %10901 = vmatmul.mubr.msk.f32.gmra.mrb[16].mxu1 %vm86_vm0, %v56_v38  ;;  %v8760_v60 = vld [vmem:[%s18965_s0 + $0xa0] sm:$0xff]  ;;  %v8761_v61 = vld [vmem:[%s18965_s0 + $0xa8] sm:$0xff]  ;;  %v8762_v62 = vld [vmem:[%s18965_s0 + $0xb0] sm:$0xff] }
  0x2d   :  { %10903 = vmatprep.mubr.msk.f32.mxu1 %vm86_vm0, %v57_v39  ;;  %v8763_v63 = vld [vmem:[%s18965_s0 + $0xb8] sm:$0xff]  ;;  %v8764_v0 = vld [vmem:[%s18965_s0 + $0xc0] sm:$0xff]  ;;  %v8765_v1 = vld [vmem:[%s18965_s0 + $0xc8] sm:$0xff] }
  0x2e   :  { %11022 = vmatmul.mubr.msk.f32.gmra.mrb[14].mxu0 %vm86_vm0, %v8845_v40  ;;  %v8766_v2 = vld [vmem:[%s18965_s0 + $0xd0] sm:$0xff]  ;;  %v8767_v4 = vld [vmem:[%s18965_s0 + $0xd8] sm:$0xff]  ;;  %v8768_v5 = vld [vmem:[%s18965_s0 + $0xe0] sm:$0xff] }
  0x2f   :  { %v8769_v7 = vld [vmem:[%s18965_s0 + $0xe8] sm:$0xff]  ;;  %v8770_v8 = vld [vmem:[%s18965_s0 + $0xf0] sm:$0xff]  ;;  %v8771_v9 = vld [vmem:[%s18965_s0 + $0xf8] sm:$0xff] }
  0x30   :  { %10904 = vmatmul.mubr.msk.f32.gmra.mrb[18].mxu1 %vm86_vm0, %v58_v41  ;;  %v8772_v10 = vld [vmem:[%s18965_s0 + $0x100] sm:$0xff]  ;;  %v8773_v11 = vld [vmem:[%s18965_s0 + $0x108] sm:$0xff]  ;;  %v8774_v12 = vld [vmem:[%s18965_s0 + $0x110] sm:$0xff] }
  0x31   :  { %10906 = vmatprep.mubr.msk.f32.mxu1 %vm86_vm0, %v59_v42  ;;  %v8775_v13 = vld [vmem:[%s18965_s0 + $0x118] sm:$0xff]  ;;  %v8776_v14 = vld [vmem:[%s18965_s0 + $0x2d0] sm:$0xff]  ;;  %v8778_v16 = vld [vmem:[%s18965_s0 + $0x2e0] sm:$0xff] }
  0x32   :  { %v8777_v15 = vld [vmem:[%s18965_s0 + $0x2d8] sm:$0xff]  ;;  %v8779_v17 = vld [vmem:[%s18965_s0 + $0x2e8] sm:$0xff]  ;;  %v8780_v18 = vld [vmem:[%s18965_s0 + $0x2f0] sm:$0xff] }
  0x33   :  { %v8781_v19 = vld [vmem:[%s18965_s0 + $0x2f8] sm:$0xff]  ;;  %v8782_v20 = vld [vmem:[%s18965_s0 + $0x300] sm:$0xff]  ;;  %v8783_v21 = vld [vmem:[%s18965_s0 + $0x308] sm:$0xff] }
  0x34   :  { %10907 = vmatmul.mubr.msk.f32.gmra.mrb[20].mxu1 %vm86_vm0, %v60_v43  ;;  %v8784_v22 = vld [vmem:[%s18965_s0 + $0x310] sm:$0xff]  ;;  %v8785_v23 = vld [vmem:[%s18965_s0 + $0x318] sm:$0xff]  ;;  %v8786_v24 = vld [vmem:[%s18965_s0 + $0x320] sm:$0xff] }
  0x35   :  { %10909 = vmatprep.mubr.msk.f32.mxu1 %vm86_vm0, %v61_v44  ;;  %v8787_v25 = vld [vmem:[%s18965_s0 + $0x328] sm:$0xff]  ;;  %v8788_v26 = vld [vmem:[%s18965_s0 + $0x330] sm:$0xff]  ;;  %v8789_v27 = vld [vmem:[%s18965_s0 + $0x338] sm:$0xff] }
  0x36   :  { %v8790_v28 = vld [vmem:[%s18965_s0 + $0x340] sm:$0xff]  ;;  %v8791_v29 = vld [vmem:[%s18965_s0 + $0x348] sm:$0xff]  ;;  %v8792_v30 = vld [vmem:[%s18965_s0 + $0x350] sm:$0xff] }
  0x37   :  { %v8793_v31 = vld [vmem:[%s18965_s0 + $0x358] sm:$0xff]  ;;  %v8846_v32 = vld [vmem:[%s18965_s0 + $0x1a0] sm:$0xff]  ;;  %v8847_v33 = vld [vmem:[%s18965_s0 + $0x1a8] sm:$0xff] }
  0x38   :  { %10910 = vmatmul.mubr.msk.f32.gmra.mrb[22].mxu1 %vm86_vm0, %v62_v45  ;;  %v8848_v34 = vld [vmem:[%s18965_s0 + $0x360] sm:$0xff]  ;;  %v8849_v35 = vld [vmem:[%s18965_s0 + $0x368] sm:$0xff]  ;;  %v8850_v36 = vld [vmem:[%s18965_s0 + $0x370] sm:$0xff] }
  0x39   :  { %10912 = vmatprep.mubr.msk.f32.mxu1 %vm86_vm0, %v63_v46  ;;  %v8852_v37 = vld [vmem:[%s18965_s0 + $0x380] sm:$0xff]  ;;  %v8853_v38 = vld [vmem:[%s18965_s0 + $0x388] sm:$0xff]  ;;  %v8854_v39 = vld [vmem:[%s18965_s0 + $0x390] sm:$0xff] }
  0x3a   :  { %v8856_v40 = vld [vmem:[%s18965_s0 + $0x3a0] sm:$0xff]  ;;  %v8857_v41 = vld [vmem:[%s18965_s0 + $0x3a8] sm:$0xff]  ;;  %v8858_v42 = vld [vmem:[%s18965_s0 + $0x3b0] sm:$0xff] }
  0x3b   :  { %v8859_v43 = vld [vmem:[%s18965_s0 + $0x3b8] sm:$0xff]  ;;  %v8860_v44 = vld [vmem:[%s18965_s0 + $0x3c0] sm:$0xff]  ;;  %v8861_v45 = vld [vmem:[%s18965_s0 + $0x3c8] sm:$0xff] }
  0x3c   :  { %10913 = vmatmul.mubr.msk.f32.gmra.mrb[24].mxu1 %vm86_vm0, %v64_v47  ;;  %v8862_v46 = vld [vmem:[%s18965_s0 + $0x3d0] sm:$0xff]  ;;  %v8863_v47 = vld [vmem:[%s18965_s0 + $0x3d8] sm:$0xff] }
  0x3d   :  { %10915 = vmatprep.mubr.msk.f32.mxu1 %vm86_vm0, %v65_v48  ;;  %v8864_v48 = vld [vmem:[%s18965_s0 + $0x3e0] sm:$0xff] }
  0x40   :  { %10916 = vmatmul.mubr.msk.f32.gmra.mrb[26].mxu1 %vm86_vm0, %v66_v49  ;;  %v8865_v49 = vld [vmem:[%s18965_s0 + $0x3e8] sm:$0xff] }
  0x41   :  { %10918 = vmatprep.mubr.msk.f32.mxu1 %vm86_vm0, %v67_v50  ;;  %v8902_v50 = vld [vmem:[%s18965_s0 + $0x1b0] sm:$0xff] }
  0x44   :  { %10919 = vmatmul.mubr.msk.f32.gmra.mrb[28].mxu1 %vm86_vm0, %v68_v51  ;;  %v8903_v51 = vld [vmem:[%s18965_s0 + $0x1b8] sm:$0xff] }
  0x45   :  { %10921 = vmatprep.mubr.msk.f32.mxu1 %vm86_vm0, %v69_v52  ;;  %v8904_v52 = vld [vmem:[%s18965_s0 + $0x1c0] sm:$0xff] }
  0x48   :  { %10922 = vmatmul.mubr.msk.f32.gmra.mrb[30].mxu1 %vm86_vm0, %v70_v53  ;;  %v8905_v53 = vld [vmem:[%s18965_s0 + $0x1c8] sm:$0xff] }
  0x49   :  { %10924 = vmatprep.mubr.msk.f32.mxu1 %vm86_vm0, %v71_v54  ;;  %v8906_v54 = vld [vmem:[%s18965_s0 + $0x1d0] sm:$0xff] }
  0x4c   :  { %10925 = vmatmul.mubr.msk.f32.gmra.mrb[32].mxu1 %vm86_vm0, %v72_v55  ;;  %v8907_v55 = vld [vmem:[%s18965_s0 + $0x1d8] sm:$0xff] }
  0x4d   :  { %10927 = vmatprep.mubr.msk.f32.mxu1 %vm86_vm0, %v73_v56  ;;  %v8908_v56 = vld [vmem:[%s18965_s0 + $0x1e0] sm:$0xff] }
  0x50   :  { %10928 = vmatmul.mubr.msk.f32.gmra.mrb[34].mxu1 %vm86_vm0, %v74_v57  ;;  %v8909_v57 = vld [vmem:[%s18965_s0 + $0x1e8] sm:$0xff] }
  0x51   :  { %10938 = vmatprep.mubr.msk.f32.mxu1 %vm86_vm0, %v8758_v58  ;;  %v8910_v58 = vld [vmem:[%s18965_s0 + $0x1f0] sm:$0xff] }
  0x54   :  { %10939 = vmatmul.mubr.msk.f32.vlgmr.msra.gmra.mrb[36].mxu1 %vm86_vm0, %v8759_v59  ;;  %v8911_v59 = vld [vmem:[%s18965_s0 + $0x1f8] sm:$0xff] }
  0x55   :  { %14412 = vmatpush3.bf16.msra.mxu1 %v14900_v3  ;;  %10941 = vmatprep.mubr.msk.f32.mxu1 %vm86_vm0, %v8760_v60  ;;  %v8912_v60 = vld [vmem:[%s18965_s0 + $0x200] sm:$0xff] }
  0x56   :  { %14411 = vmatprep.subr.bf16.mxu1 %v14908_v6 }
  0x58   :  { %10942 = vmatmul.mubr.msk.f32.gmra.mrb[38].mxu1 %vm86_vm0, %v8761_v61  ;;  %v8913_v61 = vld [vmem:[%s18965_s0 + $0x208] sm:$0xff] }
  0x59   :  { %10944 = vmatprep.mubr.msk.f32.mxu1 %vm86_vm0, %v8762_v62  ;;  %14413 = vmatpush3.bf16.msra.mxu1 %v14908_v6  ;;  %v8914_v62 = vld [vmem:[%s18965_s0 + $0x210] sm:$0xff] }
  0x5a   :  { %13171 = vmatprep.subr.bf16.mxu1 %v14900_v3 }
  0x5c   :  { %10945 = vmatmul.mubr.msk.f32.gmra.mrb[40].mxu1 %vm86_vm0, %v8763_v63  ;;  %v8915_v63 = vld [vmem:[%s18965_s0 + $0x218] sm:$0xff] }
  0x5d   :  { %10947 = vmatprep.mubr.msk.f32.mxu1 %vm86_vm0, %v8764_v0  ;;  %v8916_v0 = vld [vmem:[%s18965_s0 + $0x220] sm:$0xff] }
  0x60   :  { %10948 = vmatmul.mubr.msk.f32.gmra.mrb[42].mxu1 %vm86_vm0, %v8765_v1  ;;  %v8917_v1 = vld [vmem:[%s18965_s0 + $0x228] sm:$0xff] }
  0x61   :  { %10950 = vmatprep.mubr.msk.f32.mxu1 %vm86_vm0, %v8766_v2  ;;  %v8918_v2 = vld [vmem:[%s18965_s0 + $0x230] sm:$0xff] }
  0x64   :  { %10951 = vmatmul.mubr.msk.f32.gmra.mrb[44].mxu1 %vm86_vm0, %v8767_v4 }
  0x65   :  { %10953 = vmatprep.mubr.msk.f32.mxu1 %vm86_vm0, %v8768_v5 }
  0x68   :  { %10954 = vmatmul.mubr.msk.f32.gmra.mrb[46].mxu1 %vm86_vm0, %v8769_v7  ;;  %v8919_v7 = vld [vmem:[%s18965_s0 + $0x238] sm:$0xff] }
  0x69   :  { %10956 = vmatprep.mubr.msk.f32.mxu1 %vm86_vm0, %v8770_v8  ;;  %v8920_v8 = vld [vmem:[%s18965_s0 + $0x3f0] sm:$0xff] }
  0x6c   :  { %10957 = vmatmul.mubr.msk.f32.gmra.mrb[48].mxu1 %vm86_vm0, %v8771_v9 }
  0x6d   :  { %10959 = vmatprep.mubr.msk.f32.mxu1 %vm86_vm0, %v8772_v10 }
  0x70   :  { %10960 = vmatmul.mubr.msk.f32.gmra.mrb[50].mxu1 %vm86_vm0, %v8773_v11  ;;  %v8921_v11 = vld [vmem:[%s18965_s0 + $0x3f8] sm:$0xff] }
  0x71   :  { %10962 = vmatprep.mubr.msk.f32.mxu1 %vm86_vm0, %v8774_v12 }
  0x74   :  { %10963 = vmatmul.mubr.msk.f32.gmra.mrb[52].mxu1 %vm86_vm0, %v8775_v13  ;;  %v8922_v13 = vld [vmem:[%s18965_s0 + $0x400] sm:$0xff] }
  0x75   :  { %10965 = vmatprep.mubr.msk.f32.mxu1 %vm86_vm0, %v8776_v14 }
  0x78   :  { %10966 = vmatmul.mubr.msk.f32.gmra.mrb[54].mxu1 %vm86_vm0, %v8777_v15 }
  0x79   :  { %10968 = vmatprep.mubr.msk.f32.mxu1 %vm86_vm0, %v8778_v16 }
  0x7c   :  { %10969 = vmatmul.mubr.msk.f32.gmra.mrb[56].mxu1 %vm86_vm0, %v8779_v17  ;;  %v8923_v17 = vld [vmem:[%s18965_s0 + $0x408] sm:$0xff] }
  0x7d   :  { %10971 = vmatprep.mubr.msk.f32.mxu1 %vm86_vm0, %v8780_v18 }
  0x80   :  { %10972 = vmatmul.mubr.msk.f32.gmra.mrb[58].mxu1 %vm86_vm0, %v8781_v19  ;;  %v8924_v19 = vld [vmem:[%s18965_s0 + $0x410] sm:$0xff] }
  0x81   :  { %10974 = vmatprep.mubr.msk.f32.mxu1 %vm86_vm0, %v8782_v20 }
  0x84   :  { %10975 = vmatmul.mubr.msk.f32.gmra.mrb[60].mxu1 %vm86_vm0, %v8783_v21 }
  0x85   :  { %10977 = vmatprep.mubr.msk.f32.mxu1 %vm86_vm0, %v8784_v22 }
  0x88   :  { %10978 = vmatmul.mubr.msk.f32.gmra.mrb[62].mxu1 %vm86_vm0, %v8785_v23  ;;  %v8925_v23 = vld [vmem:[%s18965_s0 + $0x418] sm:$0xff] }
  0x89   :  { %10980 = vmatprep.mubr.msk.f32.mxu1 %vm86_vm0, %v8786_v24 }
  0x8c   :  { %10981 = vmatmul.mubr.msk.f32.gmra.mrb[64].mxu1 %vm86_vm0, %v8787_v25  ;;  %v8926_v25 = vld [vmem:[%s18965_s0 + $0x420] sm:$0xff] }
  0x8d   :  { %10983 = vmatprep.mubr.msk.f32.mxu1 %vm86_vm0, %v8788_v26 }
  0x90   :  { %10984 = vmatmul.mubr.msk.f32.gmra.mrb[66].mxu1 %vm86_vm0, %v8789_v27 }
  0x91   :  { %10986 = vmatprep.mubr.msk.f32.mxu1 %vm86_vm0, %v8790_v28 }
  0x94   :  { %10987 = vmatmul.mubr.msk.f32.gmra.mrb[68].mxu1 %vm86_vm0, %v8791_v29  ;;  %v8927_v29 = vld [vmem:[%s18965_s0 + $0x428] sm:$0xff] }
  0x95   :  { %10989 = vmatprep.mubr.msk.f32.mxu1 %vm86_vm0, %v8792_v30 }
  0x98   :  { %10990 = vmatmul.mubr.msk.f32.gmra.mrb[70].mxu1 %vm86_vm0, %v8793_v31  ;;  %v8928_v31 = vld [vmem:[%s18965_s0 + $0x430] sm:$0xff] }
  0x99   :  { %11024 = vmatprep.mubr.msk.f32.mxu1 %vm86_vm0, %v8846_v32 }
  0x9c   :  { %11025 = vmatmul.mubr.msk.f32.vlgmr.msra.gmra.mrb[72].mxu1 %vm86_vm0, %v8847_v33 }
  0x9d   :  { %13173 = vmatpush3.bf16.msra.mxu1 %v14900_v3  ;;  %11027 = vmatprep.mubr.msk.f32.mxu1 %vm86_vm0, %v8848_v34  ;;  %v8851_v3 = vld [vmem:[%s18965_s0 + $0x378] sm:$0xff] }
  0x9e   :  { %13175 = vmatprep.subr.bf16.mxu1 %v14908_v6 }
  0xa0   :  { %11028 = vmatmul.mubr.msk.f32.gmra.mrb[74].mxu1 %vm86_vm0, %v8849_v35  ;;  %v8929_v35 = vld [vmem:[%s18965_s0 + $0x438] sm:$0xff] }
  0xa1   :  { %11030 = vmatprep.mubr.msk.f32.mxu1 %vm86_vm0, %v8850_v36  ;;  %13177 = vmatpush3.bf16.msra.mxu1 %v14908_v6  ;;  %v8855_v6 = vld [vmem:[%s18965_s0 + $0x398] sm:$0xff] }
  0xa4   :  { %11031 = vmatmul.mubr.msk.f32.gmra.mrb[76].mxu1 %vm86_vm0, %v8851_v3  ;;  %v8930_v3 = vld [vmem:[%s18965_s0 + $0x440] sm:$0xff] }
  0xa5   :  { %11033 = vmatprep.mubr.msk.f32.mxu1 %vm86_vm0, %v8852_v37 }
  0xa8   :  { %11034 = vmatmul.mubr.msk.f32.gmra.mrb[78].mxu1 %vm86_vm0, %v8853_v38 }
  0xa9   :  { %11036 = vmatprep.mubr.msk.f32.mxu1 %vm86_vm0, %v8854_v39 }
  0xac   :  { %11037 = vmatmul.mubr.msk.f32.gmra.mrb[80].mxu1 %vm86_vm0, %v8855_v6  ;;  %v8931_v6 = vld [vmem:[%s18965_s0 + $0x448] sm:$0xff] }
  0xad   :  { %11039 = vmatprep.mubr.msk.f32.mxu1 %vm86_vm0, %v8856_v40 }
  0xb0   :  { %11040 = vmatmul.mubr.msk.f32.gmra.mrb[82].mxu1 %vm86_vm0, %v8857_v41  ;;  %v8932_v41 = vld [vmem:[%s18965_s0 + $0x450] sm:$0xff] }
  0xb1   :  { %11042 = vmatprep.mubr.msk.f32.mxu1 %vm86_vm0, %v8858_v42 }
  0xb4   :  { %11043 = vmatmul.mubr.msk.f32.gmra.mrb[84].mxu1 %vm86_vm0, %v8859_v43 }
  0xb5   :  { %11045 = vmatprep.mubr.msk.f32.mxu1 %vm86_vm0, %v8860_v44 }
  0xb8   :  { %11046 = vmatmul.mubr.msk.f32.gmra.mrb[86].mxu1 %vm86_vm0, %v8861_v45  ;;  %v8933_v45 = vld [vmem:[%s18965_s0 + $0x458] sm:$0xff] }
  0xb9   :  { %11048 = vmatprep.mubr.msk.f32.mxu1 %vm86_vm0, %v8862_v46 }
  0xbc   :  { %11049 = vmatmul.mubr.msk.f32.gmra.mrb[88].mxu1 %vm86_vm0, %v8863_v47  ;;  %v8934_v47 = vld [vmem:[%s18965_s0 + $0x460] sm:$0xff] }
  0xbd   :  { %11051 = vmatprep.mubr.msk.f32.mxu1 %vm86_vm0, %v8864_v48 }
  0xc0   :  { %11052 = vmatmul.mubr.msk.f32.gmra.mrb[90].mxu1 %vm86_vm0, %v8865_v49 }
  0xc1   :  { %11062 = vmatprep.mubr.msk.f32.mxu1 %vm86_vm0, %v8902_v50 }
  0xc4   :  { %11063 = vmatmul.mubr.msk.f32.vlgmr.msra.gmra.mrb[92].mxu1 %vm86_vm0, %v8903_v51  ;;  %v8935_v51 = vld [vmem:[%s18965_s0 + $0x468] sm:$0xff] }
  0xc5   :  { %11065 = vmatprep.mubr.msk.f32.mxu1 %vm86_vm0, %v8904_v52 }
  0xc8   :  { %11066 = vmatmul.mubr.msk.f32.gmra.mrb[94].mxu1 %vm86_vm0, %v8905_v53  ;;  %v8936_v53 = vld [vmem:[%s18965_s0 + $0x470] sm:$0xff] }
  0xc9   :  { %11068 = vmatprep.mubr.msk.f32.mxu1 %vm86_vm0, %v8906_v54 }
  0xcc   :  { %11069 = vmatmul.mubr.msk.f32.gmra.mrb[96].mxu1 %vm86_vm0, %v8907_v55 }
  0xcd   :  { %11071 = vmatprep.mubr.msk.f32.mxu1 %vm86_vm0, %v8908_v56 }
  0xd0   :  { %11072 = vmatmul.mubr.msk.f32.gmra.mrb[98].mxu1 %vm86_vm0, %v8909_v57  ;;  %v8937_v57 = vld [vmem:[%s18965_s0 + $0x478] sm:$0xff] }
  0xd1   :  { %11074 = vmatprep.mubr.msk.f32.mxu1 %vm86_vm0, %v8910_v58 }
  0xd4   :  { %11075 = vmatmul.mubr.msk.f32.gmra.mrb[100].mxu1 %vm86_vm0, %v8911_v59 }
  0xd5   :  { %11077 = vmatprep.mubr.msk.f32.mxu1 %vm86_vm0, %v8912_v60  ;;  %v8974_v60 = vld [vmem:[%s18968_s3 + $0x80] sm:$0xff] }
  0xd8   :  { %11078 = vmatmul.mubr.msk.f32.gmra.mrb[102].mxu1 %vm86_vm0, %v8913_v61  ;;  %v8975_v61 = vld [vmem:[%s18968_s3 + $0x88] sm:$0xff] }
  0xd9   :  { %11080 = vmatprep.mubr.msk.f32.mxu1 %vm86_vm0, %v8914_v62  ;;  %v13178_v62 = vpack.c.bf16 %v8975_v61, %v8974_v60  ;;  %v8985_v60 = vld [vmem:[%s18968_s3 + $0xd8] sm:$0xff] }
  0xdb   :  { %13179 = vmatprep.subr.bf16.mxu0 %v13178_v62 }
  0xdc   :  { %11081 = vmatmul.mubr.msk.f32.gmra.mrb[104].mxu1 %vm86_vm0, %v8915_v63  ;;  %13181 = vmatpush3.bf16.msra.mxu0 %v13178_v62 }
  0xdd   :  { %11083 = vmatprep.mubr.msk.f32.mxu1 %vm86_vm0, %v8916_v0 }
  0xdf   :  { %v15425_v4 = vpop.f32.mrb[0].mxu1  ;;  %v15446_v12 = vpop.f32.mrb[0].mxu0 }
  0xe0   :  { %v15427_v5 = vpop.f32.mrb[1].mxu1  ;;  %11084 = vmatmul.mubr.msk.f32.gmra.mrb[106].mxu1 %vm86_vm0, %v8917_v1  ;;  %v15451_v14 = vpop.f32.mrb[1].mxu0  ;;  %v8976_v1 = vld [vmem:[%s18968_s3 + $0x90] sm:$0xff] }
  0xe1   :  { %11086 = vmatprep.mubr.msk.f32.mxu1 %vm86_vm0, %v8918_v2  ;;  %v8977_v2 = vld [vmem:[%s18968_s3 + $0x98] sm:$0xff] }
  0xe3   :  { %v15437_v9 = vpop.f32.mrb[2].mxu1  ;;  %v15462_v18 = vpop.f32.mrb[2].mxu0 }
  0xe4   :  { %v15439_v10 = vpop.f32.mrb[3].mxu1  ;;  %11087 = vmatmul.mubr.msk.f32.gmra.mrb[108].mxu1 %vm86_vm0, %v8919_v7  ;;  %v15467_v20 = vpop.f32.mrb[3].mxu0  ;;  %v13182_v7 = vpack.c.bf16 %v8977_v2, %v8976_v1  ;;  %v8986_v2 = vld [vmem:[%s18968_s3 + $0xe0] sm:$0xff] }
  0xe5   :  { %11089 = vmatprep.mubr.msk.f32.mxu1 %vm86_vm0, %v8920_v8 }
  0xe6   :  { %13183 = vmatprep.subr.bf16.mxu0 %v13182_v7 }
  0xe7   :  { %v15453_v15 = vpop.f32.mrb[4].mxu1  ;;  %v15478_v24 = vpop.f32.mrb[4].mxu0  ;;  %13185 = vmatpush3.bf16.msra.mxu0 %v13182_v7  ;;  %v8987_v7 = vld [vmem:[%s18968_s3 + $0xe8] sm:$0xff] }
  0xe8   :  { %v15455_v16 = vpop.f32.mrb[5].mxu1  ;;  %11090 = vmatmul.mubr.msk.f32.gmra.mrb[110].mxu1 %vm86_vm0, %v8921_v11  ;;  %v15483_v26 = vpop.f32.mrb[5].mxu0 }
  0xe9   :  { %11092 = vmatprep.mubr.msk.f32.mxu1 %vm86_vm0, %v8922_v13  ;;  %v8978_v13 = vld [vmem:[%s18968_s3 + $0xa0] sm:$0xff] }
  0xeb   :  { %v15469_v21 = vpop.f32.mrb[6].mxu1  ;;  %v15494_v30 = vpop.f32.mrb[6].mxu0 }
  0xec   :  { %v15471_v22 = vpop.f32.mrb[7].mxu1  ;;  %11093 = vmatmul.mubr.msk.f32.gmra.mrb[112].mxu1 %vm86_vm0, %v8923_v17  ;;  %v15499_v32 = vpop.f32.mrb[7].mxu0  ;;  %v8979_v17 = vld [vmem:[%s18968_s3 + $0xa8] sm:$0xff] }
  0xed   :  { %11095 = vmatprep.mubr.msk.f32.mxu1 %vm86_vm0, %v8924_v19  ;;  %v13186_v19 = vpack.c.bf16 %v8979_v17, %v8978_v13  ;;  %v13202_v13 = vpack.c.bf16 %v8987_v7, %v8986_v2  ;;  %v15648_v17 = vld [vmem:[%s18967_s2] ss:$0 sm:$0xff] }
  0xee   :  { %v277_v2 = vadd.f32 %v15437_v9, %v15648_v17 }
  0xef   :  { %v15485_v27 = vpop.f32.mrb[8].mxu1  ;;  %13187 = vmatprep.subr.bf16.mxu0 %v13186_v19 }
  0xf0   :  { %v15487_v28 = vpop.f32.mrb[9].mxu1  ;;  %11096 = vmatmul.mubr.msk.f32.gmra.mrb[114].mxu1 %vm86_vm0, %v8925_v23  ;;  %13189 = vmatpush3.bf16.msra.mxu0 %v13186_v19 }
  0xf1   :  { %11098 = vmatprep.mubr.msk.f32.mxu1 %vm86_vm0, %v8926_v25 }
  0xf3   :  { %v15501_v33 = vpop.f32.mrb[10].mxu1 }
  0xf4   :  { %v15503_v34 = vpop.f32.mrb[11].mxu1  ;;  %11099 = vmatmul.mubr.msk.f32.gmra.mrb[116].mxu1 %vm86_vm0, %v8927_v29  ;;  %v8980_v29 = vld [vmem:[%s18968_s3 + $0xb0] sm:$0xff] }
  0xf5   :  { %11101 = vmatprep.mubr.msk.f32.mxu1 %vm86_vm0, %v8928_v31  ;;  %v15510_v36 = vpop.f32.mrb[8].mxu0  ;;  %v8981_v31 = vld [vmem:[%s18968_s3 + $0xb8] sm:$0xff] }
  0xf6   :  { %v15515_v37 = vpop.f32.mrb[9].mxu0 }
  0xf7   :  { %v15517_v38 = vpop.f32.mrb[12].mxu1 }
  0xf8   :  { %v15519_v39 = vpop.f32.mrb[13].mxu1  ;;  %11102 = vmatmul.mubr.msk.f32.gmra.mrb[118].mxu1 %vm86_vm0, %v8929_v35  ;;  %v13190_v35 = vpack.c.bf16 %v8981_v31, %v8980_v29  ;;  %v8988_v31 = vld [vmem:[%s18968_s3 + $0xf0] sm:$0xff] }
  0xf9   :  { %11104 = vmatprep.mubr.msk.f32.mxu1 %vm86_vm0, %v8930_v3  ;;  %v15526_v40 = vpop.f32.mrb[10].mxu0 }
  0xfa   :  { %v15531_v42 = vpop.f32.mrb[11].mxu0  ;;  %13191 = vmatprep.subr.bf16.mxu0 %v13190_v35 }
  0xfb   :  { %v15533_v43 = vpop.f32.mrb[14].mxu1  ;;  %13193 = vmatpush3.bf16.msra.mxu0 %v13190_v35  ;;  %v8989_v35 = vld [vmem:[%s18968_s3 + $0xf8] sm:$0xff] }
  0xfc   :  { %v15535_v44 = vpop.f32.mrb[15].mxu1  ;;  %11105 = vmatmul.mubr.msk.f32.gmra.mrb[120].mxu1 %vm86_vm0, %v8931_v6 }
  0xfd   :  { %11107 = vmatprep.mubr.msk.f32.mxu1 %vm86_vm0, %v8932_v41  ;;  %v15542_v46 = vpop.f32.mrb[12].mxu0  ;;  %v8982_v41 = vld [vmem:[%s18968_s3 + $0xc0] sm:$0xff] }
  0xfe   :  { %v15547_v48 = vpop.f32.mrb[13].mxu0 }
  0xff   :  { %v15549_v49 = vpop.f32.mrb[16].mxu1 }
 0x100   :  { %v15551_v50 = vpop.f32.mrb[17].mxu1  ;;  %11108 = vmatmul.mubr.msk.f32.gmra.mrb[122].mxu1 %vm86_vm0, %v8933_v45  ;;  %v8983_v45 = vld [vmem:[%s18968_s3 + $0xc8] sm:$0xff] }
 0x101   :  { %11110 = vmatprep.mubr.msk.f32.mxu1 %vm86_vm0, %v8934_v47  ;;  %v15558_v52 = vpop.f32.mrb[14].mxu0  ;;  %v13194_v47 = vpack.c.bf16 %v8983_v45, %v8982_v41  ;;  %v13206_v41 = vpack.c.bf16 %v8989_v35, %v8988_v31  ;;  %v267_v45 = vadd.f32 %v15425_v4, %v15648_v17  ;;  %v272_v4 = vadd.f32 %v15648_v17, %v15439_v10 }
 0x102   :  { %v15563_v54 = vpop.f32.mrb[15].mxu0  ;;  %v282_v10 = vadd.f32 %v15648_v17, %v15455_v16 }
 0x103   :  { %v15565_v55 = vpop.f32.mrb[18].mxu1  ;;  %13195 = vmatprep.subr.bf16.mxu0 %v13194_v47  ;;  %v441_v31 = vmax.f32 %v267_v45, 0.0 }
 0x104   :  { %v15567_v56 = vpop.f32.mrb[19].mxu1  ;;  %11111 = vmatmul.mubr.msk.f32.gmra.mrb[124].mxu1 %vm86_vm0, %v8935_v51  ;;  %13197 = vmatpush3.bf16.msra.mxu0 %v13194_v47  ;;  %v1155_v47 = vadd.f32 %v15446_v12, %v15648_v17  ;;  %v287_v12 = vadd.f32 %v15453_v15, %v15648_v17 }
 0x105   :  { %11113 = vmatprep.mubr.msk.f32.mxu1 %vm86_vm0, %v8936_v53 }
 0x107   :  { %v15574_v58 = vpop.f32.mrb[20].mxu1 }
 0x108   :  { %v15576_v59 = vpop.f32.mrb[21].mxu1  ;;  %11114 = vmatmul.mubr.msk.f32.gmra.mrb[126].mxu1 %vm86_vm0, %v8937_v57  ;;  %v8984_v57 = vld [vmem:[%s18968_s3 + $0xd0] sm:$0xff] }
 0x109   :  { %v13198_v61 = vpack.c.bf16 %v8985_v60, %v8984_v57  ;;  %v262_v57 = vadd.f32 %v15648_v17, %v15427_v5 }
 0x10b   :  { %v15585_v63 = vpop.f32.mrb[22].mxu1  ;;  %13199 = vmatprep.subr.bf16.mxu0 %v13198_v61 }
 0x10c   :  { %v15587_v0 = vpop.f32.mrb[23].mxu1  ;;  %13201 = vmatpush3.bf16.msra.mxu0 %v13198_v61  ;;  %v1150_v61 = vadd.f32 %v15648_v17, %v15451_v14  ;;  %v1165_v14 = vadd.f32 %v15462_v18, %v15648_v17 }
 0x10d   :  { %13203 = vmatprep.subr.bf16.mxu0 %v13202_v13 }
 0x10f   :  { %v15595_v8 = vpop.f32.mrb[24].mxu1 }
 0x110   :  { %v15597_v11 = vpop.f32.mrb[25].mxu1  ;;  %13205 = vmatpush3.bf16.msra.mxu0 %v13202_v13 }
 0x111   :  { %13207 = vmatprep.subr.bf16.mxu0 %v13206_v41 }
 0x113   :  { %v15605_v23 = vpop.f32.mrb[26].mxu1 }
 0x114   :  { %v15607_v25 = vpop.f32.mrb[27].mxu1  ;;  %13209 = vmatpush3.bf16.msra.mxu0 %v13206_v41  ;;  %v1160_v41 = vadd.f32 %v15648_v17, %v15467_v20  ;;  %v1175_v20 = vadd.f32 %v15478_v24, %v15648_v17  ;;  %v307_v24 = vadd.f32 %v15485_v27, %v15648_v17  ;;  %v302_v27 = vadd.f32 %v15648_v17, %v15487_v28 }
 0x116   :  { %v1330_v16 = vmax.f32 %v1160_v41, 0.0  ;;  %v1333_v41 = vmax.f32 %v1175_v20, 0.0 }
 0x117   :  { %v15615_v3 = vpop.f32.mrb[28].mxu1 }
 0x118   :  { %v15617_v6 = vpop.f32.mrb[29].mxu1 }
 0x11b   :  { %v15625_v51 = vpop.f32.mrb[30].mxu1 }
 0x11c   :  { %18978 = vst [vmem:[#allocation7_spill] sm:$0xff] %v15625_v51  ;;  %v15627_v53 = vpop.f32.mrb[31].mxu1 }
 0x11d   :  { %18979 = vst [vmem:[#allocation8_spill] sm:$0xff] %v15627_v53 }
 0x11f   :  { %v15635_v62 = vpop.f32.mrb[32].mxu1 }
 0x120   :  { %18980 = vst [vmem:[#allocation9_spill] sm:$0xff] %v15635_v62  ;;  %v15637_v1 = vpop.f32.mrb[33].mxu1  ;;  %v443_v62 = vmax.f32 %v277_v2, 0.0 }
 0x121   :  { %18981 = vst [vmem:[#allocation10_spill] sm:$0xff] %v15637_v1  ;;  %v1328_v1 = vmax.f32 %v1150_v61, 0.0 }
 0x123   :  { %v15650_v19 = vpop.f32.mrb[34].mxu1 }
 0x124   :  { %18982 = vst [vmem:[#allocation11_spill] sm:$0xff] %v15650_v19  ;;  %v15652_v29 = vpop.f32.mrb[35].mxu1  ;;  %v440_v19 = vmax.f32 %v262_v57, 0.0 }
 0x125   :  { %18983 = vst [vmem:[#allocation12_spill] sm:$0xff] %v15652_v29  ;;  %v1329_v29 = vmax.f32 %v1155_v47, 0.0  ;;  %v445_v47 = vmax.f32 %v287_v12, 0.0 }
 0x127   :  { %v10940_v60 = vpop.f32.mrb[36].mxu1 }
 0x128   :  { %v693_v7 = vadd.f32 %v10940_v60, %v15648_v17  ;;  %v687_v13 = vpop.f32.mrb[37].mxu1 }
 0x129   :  { %v688_v5 = vadd.f32 %v15648_v17, %v687_v13 }
 0x12a   :  { %v867_v35 = vmax.f32 %v693_v7, 0.0  ;;  %v442_v7 = vmax.f32 %v272_v4, 0.0  ;;  %v444_v4 = vmax.f32 %v282_v10, 0.0 }
 0x12b   :  { %v866_v9 = vmax.f32 %v688_v5, 0.0  ;;  %v10943_v60 = vpop.f32.mrb[38].mxu1  ;;  %v1331_v5 = vmax.f32 %v1165_v14, 0.0  ;;  %v292_v14 = vadd.f32 %v15648_v17, %v15471_v22  ;;  %v1180_v22 = vadd.f32 %v15648_v17, %v15499_v32 }
 0x12c   :  { %v903_v15 = vmax.f32 %v441_v31, %v867_v35  ;;  %v703_v13 = vadd.f32 %v10943_v60, %v15648_v17  ;;  %v697_v45 = vpop.f32.mrb[39].mxu1  ;;  %v1170_v35 = vadd.f32 %v15648_v17, %v15483_v26  ;;  %v1195_v32 = vadd.f32 %v15510_v36, %v15648_v17 }
 0x12d   :  { %v902_v53 = vmax.f32 %v440_v19, %v866_v9  ;;  %v698_v18 = vadd.f32 %v15648_v17, %v697_v45  ;;  %v297_v19 = vadd.f32 %v15469_v21, %v15648_v17  ;;  %v1185_v21 = vadd.f32 %v15494_v30, %v15648_v17 }
 0x12e   :  { %v15684_v57 = vmax.f32 %v903_v15, %v1329_v29  ;;  %v869_v61 = vmax.f32 %v703_v13, 0.0  ;;  %v1332_v15 = vmax.f32 %v1170_v35, 0.0  ;;  %v1334_v28 = vmax.f32 %v1180_v22, 0.0 }
 0x12f   :  { %v15688_v2 = vmax.f32 %v902_v53, %v1328_v1  ;;  %v868_v51 = vmax.f32 %v698_v18, 0.0  ;;  %v10946_v31 = vpop.f32.mrb[40].mxu1  ;;  %v447_v45 = vmax.f32 %v297_v19, 0.0  ;;  %v1335_v35 = vmax.f32 %v1185_v21, 0.0 }
 0x130   :  { %v905_v12 = vmax.f32 %v443_v62, %v869_v61  ;;  %v713_v29 = vadd.f32 %v10946_v31, %v15648_v17  ;;  %v707_v9 = vpop.f32.mrb[41].mxu1  ;;  %v446_v61 = vmax.f32 %v292_v14, 0.0  ;;  %v327_v36 = vadd.f32 %v15517_v38, %v15648_v17 }
 0x131   :  { %v904_v53 = vmax.f32 %v442_v7, %v868_v51  ;;  %v708_v1 = vadd.f32 %v15648_v17, %v707_v9  ;;  %v448_v9 = vmax.f32 %v302_v27, 0.0  ;;  %v322_v38 = vadd.f32 %v15648_v17, %v15519_v39 }
 0x132   :  { %v15700_v60 = vmax.f32 %v905_v12, %v1331_v5  ;;  %v871_v26 = vmax.f32 %v713_v29, 0.0  ;;  %v449_v5 = vmax.f32 %v307_v24, 0.0  ;;  %v1190_v29 = vadd.f32 %v15648_v17, %v15515_v37 }
 0x133   :  { %v15704_v62 = vmax.f32 %v904_v53, %v1330_v16  ;;  %v870_v10 = vmax.f32 %v708_v1, 0.0  ;;  %v10949_v13 = vpop.f32.mrb[42].mxu1  ;;  %v312_v1 = vadd.f32 %v15648_v17, %v15503_v34  ;;  %v1200_v34 = vadd.f32 %v15648_v17, %v15531_v42 }
 0x134   :  { %v907_v51 = vmax.f32 %v445_v47, %v871_v26  ;;  %v723_v7 = vadd.f32 %v10949_v13, %v15648_v17  ;;  %v717_v18 = vpop.f32.mrb[43].mxu1  ;;  %v1336_v22 = vmax.f32 %v1190_v29, 0.0  ;;  %v452_v29 = vmax.f32 %v322_v38, 0.0 }
 0x135   :  { %v906_v20 = vmax.f32 %v444_v4, %v870_v10  ;;  %v718_v30 = vadd.f32 %v15648_v17, %v717_v18  ;;  %v317_v4 = vadd.f32 %v15501_v33, %v15648_v17  ;;  %v1337_v10 = vmax.f32 %v1195_v32, 0.0 }
 0x136   :  { %v15712_v16 = vmax.f32 %v907_v51, %v1333_v41  ;;  %v873_v31 = vmax.f32 %v723_v7, 0.0  ;;  %v1205_v33 = vadd.f32 %v15526_v40, %v15648_v17  ;;  %v1338_v39 = vmax.f32 %v1200_v34, 0.0 }
 0x137   :  { %v15716_v19 = vmax.f32 %v906_v20, %v1332_v15  ;;  %v872_v12 = vmax.f32 %v718_v30, 0.0  ;;  %v10952_v47 = vpop.f32.mrb[44].mxu1  ;;  %v451_v27 = vmax.f32 %v317_v4, 0.0  ;;  %v1215_v30 = vadd.f32 %v15542_v46, %v15648_v17 }
 0x138   :  { %v909_v14 = vmax.f32 %v447_v45, %v873_v31  ;;  %v733_v24 = vadd.f32 %v10952_v47, %v15648_v17  ;;  %v727_v53 = vpop.f32.mrb[45].mxu1  ;;  %v453_v31 = vmax.f32 %v327_v36, 0.0  ;;  %v1339_v42 = vmax.f32 %v1205_v33, 0.0 }
 0x139   :  { %v908_v26 = vmax.f32 %v446_v61, %v872_v12  ;;  %v728_v41 = vadd.f32 %v15648_v17, %v727_v53  ;;  %v450_v61 = vmax.f32 %v312_v1, 0.0  ;;  %v1210_v47 = vadd.f32 %v15648_v17, %v15547_v48  ;;  %v1938_v48 = vld [vmem:[%s18968_s3 + $0x8] sm:$0xff] }
 0x13a   :  { %v15728_v21 = vmax.f32 %v909_v14, %v1335_v35  ;;  %v875_v37 = vmax.f32 %v733_v24, 0.0  ;;  %v332_v24 = vadd.f32 %v15648_v17, %v15535_v44  ;;  %v1341_v36 = vmax.f32 %v1215_v30, 0.0 }
 0x13b   :  { %v15732_v15 = vmax.f32 %v908_v26, %v1334_v28  ;;  %v874_v13 = vmax.f32 %v728_v41, 0.0  ;;  %v10955_v45 = vpop.f32.mrb[46].mxu1  ;;  %v1937_v26 = vld [vmem:[%s18968_s3] sm:$0xff] }
 0x13c   :  { %v911_v51 = vmax.f32 %v449_v5, %v875_v37  ;;  %v743_v7 = vadd.f32 %v10955_v45, %v15648_v17  ;;  %v737_v18 = vpop.f32.mrb[47].mxu1  ;;  %v1225_v37 = vadd.f32 %v15558_v52, %v15648_v17  ;;  %v1220_v45 = vadd.f32 %v15648_v17, %v15563_v54 }
 0x13d   :  { %v910_v20 = vmax.f32 %v448_v9, %v874_v13  ;;  %v738_v40 = vadd.f32 %v15648_v17, %v737_v18  ;;  %v337_v9 = vadd.f32 %v15533_v43, %v15648_v17  ;;  %v1340_v13 = vmax.f32 %v1210_v47, 0.0 }
 0x13e   :  { %v15742_v35 = vmax.f32 %v911_v51, %v1337_v10  ;;  %v877_v32 = vmax.f32 %v743_v7, 0.0  ;;  %v15764_v10 = vpack.c.bf16 %v1938_v48, %v1937_v26  ;;  %v454_v7 = vmax.f32 %v332_v24, 0.0 }
 0x13f   :  { %v15744_v12 = vmax.f32 %v910_v20, %v1336_v22  ;;  %v876_v28 = vmax.f32 %v738_v40, 0.0  ;;  %v10958_v5 = vpop.f32.mrb[48].mxu1  ;;  %v455_v51 = vmax.f32 %v337_v9, 0.0  ;;  %v1343_v30 = vmax.f32 %v1225_v37, 0.0 }
 0x140   :  { %v913_v4 = vmax.f32 %v451_v27, %v877_v32  ;;  %v753_v46 = vadd.f32 %v10958_v5, %v15648_v17  ;;  %v747_v14 = vpop.f32.mrb[49].mxu1  ;;  %13211 = vmatprep.subr.bf16.mxu0 %v15764_v10  ;;  %v342_v54 = vadd.f32 %v15648_v17, %v15551_v50  ;;  %v352_v24 = vadd.f32 %v15648_v17, %v15567_v56 }
 0x141   :  { %v912_v53 = vmax.f32 %v450_v61, %v876_v28  ;;  %v748_v1 = vadd.f32 %v15648_v17, %v747_v14  ;;  %v347_v61 = vadd.f32 %v15549_v49, %v15648_v17  ;;  %v362_v56 = vadd.f32 %v15648_v17, %v15576_v59 }
 0x142   :  { %v15760_v43 = vmax.f32 %v913_v4, %v1339_v42  ;;  %v879_v41 = vmax.f32 %v753_v46, 0.0  ;;  %v1342_v42 = vmax.f32 %v1220_v45, 0.0  ;;  %v357_v4 = vadd.f32 %v15565_v55, %v15648_v17 }
 0x143   :  { %v15766_v44 = vmax.f32 %v912_v53, %v1338_v39  ;;  %v878_v33 = vmax.f32 %v748_v1, 0.0  ;;  %v10961_v22 = vpop.f32.mrb[50].mxu1  ;;  %v457_v49 = vmax.f32 %v347_v61, 0.0  ;;  %v456_v50 = vmax.f32 %v342_v54, 0.0 }
 0x144   :  { %v915_v34 = vmax.f32 %v453_v31, %v879_v41  ;;  %v763_v27 = vadd.f32 %v10961_v22, %v15648_v17  ;;  %v757_v38 = vpop.f32.mrb[51].mxu1  ;;  %v458_v45 = vmax.f32 %v352_v24, 0.0  ;;  %v372_v59 = vadd.f32 %v15648_v17, %v15587_v0 }
 0x145   :  { %v914_v18 = vmax.f32 %v452_v29, %v878_v33  ;;  %v758_v52 = vadd.f32 %v15648_v17, %v757_v38  ;;  %v459_v33 = vmax.f32 %v357_v4, 0.0  ;;  %v382_v0 = vadd.f32 %v15648_v17, %v15597_v11 }
 0x146   :  { %v15775_v20 = vmax.f32 %v915_v34, %v1341_v36  ;;  %v881_v40 = vmax.f32 %v763_v27, 0.0  ;;  %v392_v11 = vadd.f32 %v15648_v17, %v15607_v25  ;;  %v402_v25 = vadd.f32 %v15648_v17, %v15617_v6 }
 0x147   :  { %v15779_v31 = vmax.f32 %v914_v18, %v1340_v13  ;;  %v880_v32 = vmax.f32 %v758_v52, 0.0  ;;  %v10964_v28 = vpop.f32.mrb[52].mxu1  ;;  %v367_v13 = vadd.f32 %v15574_v58, %v15648_v17  ;;  %v377_v58 = vadd.f32 %v15585_v63, %v15648_v17 }
 0x148   :  { %v917_v39 = vmax.f32 %v455_v51, %v881_v40  ;;  %v773_v5 = vadd.f32 %v10964_v28, %v15648_v17  ;;  %v767_v47 = vpop.f32.mrb[53].mxu1  ;;  %v387_v63 = vadd.f32 %v15595_v8, %v15648_v17  ;;  %v397_v8 = vadd.f32 %v15605_v23, %v15648_v17 }
 0x149   :  { %v916_v29 = vmax.f32 %v454_v7, %v880_v32  ;;  %v768_v9 = vadd.f32 %v15648_v17, %v767_v47  ;;  %v461_v61 = vmax.f32 %v367_v13, 0.0  ;;  %v407_v23 = vadd.f32 %v15615_v3, %v15648_v17 }
 0x14a   :  { %v15785_v46 = vmax.f32 %v917_v39, %v1343_v30  ;;  %v883_v14 = vmax.f32 %v773_v5, 0.0  ;;  %v460_v30 = vmax.f32 %v362_v56, 0.0 }
 0x14b   :  { %v15789_v53 = vmax.f32 %v916_v29, %v1342_v42  ;;  %v882_v1 = vmax.f32 %v768_v9, 0.0  ;;  %v10967_v36 = vpop.f32.mrb[54].mxu1  ;;  %v463_v29 = vmax.f32 %v377_v58, 0.0 }
 0x14c   :  { %v15791_v26 = vmax.f32 %v457_v49, %v883_v14  ;;  %v783_v48 = vadd.f32 %v10967_v36, %v15648_v17  ;;  %v777_v41 = vpop.f32.mrb[55].mxu1  ;;  %v462_v49 = vmax.f32 %v372_v59, 0.0 }
 0x14d   :  { %v15794_v37 = vmax.f32 %v456_v50, %v882_v1  ;;  %v778_v55 = vadd.f32 %v15648_v17, %v777_v41  ;;  %v465_v41 = vmax.f32 %v387_v63, 0.0  ;;  %v468_v63 = vmax.f32 %v402_v25, 0.0 }
 0x14e   :  { %v885_v22 = vmax.f32 %v783_v48, 0.0 }
 0x14f   :  { %v884_v34 = vmax.f32 %v778_v55, 0.0  ;;  %v10970_v27 = vpop.f32.mrb[56].mxu1 }
 0x150   :  { %v15801_v38 = vmax.f32 %v459_v33, %v885_v22  ;;  %v793_v51 = vadd.f32 %v10970_v27, %v15648_v17  ;;  %v787_v7 = vpop.f32.mrb[57].mxu1  ;;  %v464_v33 = vmax.f32 %v382_v0, 0.0 }
 0x151   :  { %v15804_v18 = vmax.f32 %v458_v45, %v884_v34  ;;  %v788_v52 = vadd.f32 %v15648_v17, %v787_v7  ;;  %v467_v7 = vmax.f32 %v397_v8, 0.0  ;;  %v18986_v8 = vld [vmem:[#allocation9_spill] sm:$0xff] }
 0x152   :  { %v887_v40 = vmax.f32 %v793_v51, 0.0 }
 0x153   :  { %v886_v54 = vmax.f32 %v788_v52, 0.0  ;;  %v10973_v32 = vpop.f32.mrb[58].mxu1 }
 0x154   :  { %v15811_v42 = vmax.f32 %v461_v61, %v887_v40  ;;  %v803_v28 = vadd.f32 %v10973_v32, %v15648_v17  ;;  %v797_v39 = vpop.f32.mrb[59].mxu1  ;;  %v466_v61 = vmax.f32 %v392_v11, 0.0 }
 0x155   :  { %v15814_v5 = vmax.f32 %v460_v30, %v886_v54  ;;  %v798_v47 = vadd.f32 %v15648_v17, %v797_v39  ;;  %v469_v39 = vmax.f32 %v407_v23, 0.0 }
 0x156   :  { %v889_v9 = vmax.f32 %v803_v28, 0.0 }
 0x157   :  { %v888_v4 = vmax.f32 %v798_v47, 0.0  ;;  %v10976_v14 = vpop.f32.mrb[60].mxu1  ;;  %v18984_v47 = vld [vmem:[#allocation7_spill] sm:$0xff] }
 0x158   :  { %v15821_v50 = vmax.f32 %v463_v29, %v889_v9  ;;  %v813_v24 = vadd.f32 %v10976_v14, %v15648_v17  ;;  %v807_v1 = vpop.f32.mrb[61].mxu1  ;;  %v417_v3 = vadd.f32 %v18984_v47, %v15648_v17  ;;  %v18985_v9 = vld [vmem:[#allocation8_spill] sm:$0xff] }
 0x159   :  { %v15824_v36 = vmax.f32 %v462_v49, %v888_v4  ;;  %v808_v48 = vadd.f32 %v15648_v17, %v807_v1  ;;  %v412_v6 = vadd.f32 %v15648_v17, %v18985_v9 }
 0x15a   :  { %v891_v55 = vmax.f32 %v813_v24, 0.0 }
 0x15b   :  { %v890_v13 = vmax.f32 %v808_v48, 0.0  ;;  %v10979_v22 = vpop.f32.mrb[62].mxu1  ;;  %v470_v11 = vmax.f32 %v412_v6, 0.0 }
 0x15c   :  { %v15831_v45 = vmax.f32 %v465_v41, %v891_v55  ;;  %v823_v56 = vadd.f32 %v10979_v22, %v15648_v17  ;;  %v817_v34 = vpop.f32.mrb[63].mxu1  ;;  %v471_v41 = vmax.f32 %v417_v3, 0.0  ;;  %v427_v55 = vadd.f32 %v18986_v8, %v15648_v17 }
 0x15d   :  { %v15834_v27 = vmax.f32 %v464_v33, %v890_v13  ;;  %v818_v51 = vadd.f32 %v15648_v17, %v817_v34  ;;  %v18987_v13 = vld [vmem:[#allocation10_spill] sm:$0xff] }
 0x15e   :  { %v893_v52 = vmax.f32 %v823_v56, 0.0  ;;  %v422_v22 = vadd.f32 %v15648_v17, %v18987_v13  ;;  %v473_v25 = vmax.f32 %v427_v55, 0.0 }
 0x15f   :  { %v892_v58 = vmax.f32 %v818_v51, 0.0  ;;  %v10982_v40 = vpop.f32.mrb[64].mxu1 }
 0x160   :  { %v15841_v30 = vmax.f32 %v467_v7, %v893_v52  ;;  %v833_v59 = vadd.f32 %v10982_v40, %v15648_v17  ;;  %v827_v54 = vpop.f32.mrb[65].mxu1 }
 0x161   :  { %v15844_v32 = vmax.f32 %v466_v61, %v892_v58  ;;  %v828_v28 = vadd.f32 %v15648_v17, %v827_v54  ;;  %v18988_v58 = vld [vmem:[#allocation11_spill] sm:$0xff]  ;;  %v472_v54 = vmax.f32 %v422_v22, 0.0 }
 0x162   :  { %v895_v29 = vmax.f32 %v833_v59, 0.0  ;;  %v437_v40 = vadd.f32 %v18988_v58, %v15648_v17 }
 0x163   :  { %v894_v49 = vmax.f32 %v828_v28, 0.0  ;;  %v10985_v0 = vpop.f32.mrb[66].mxu1  ;;  %v18989_v28 = vld [vmem:[#allocation12_spill] sm:$0xff] }
 0x164   :  { %v15851_v4 = vmax.f32 %v469_v39, %v895_v29  ;;  %v843_v14 = vadd.f32 %v10985_v0, %v15648_v17  ;;  %v837_v24 = vpop.f32.mrb[67].mxu1  ;;  %v432_v39 = vadd.f32 %v15648_v17, %v18989_v28  ;;  %v475_v0 = vmax.f32 %v437_v40, 0.0 }
 0x165   :  { %v15854_v1 = vmax.f32 %v468_v63, %v894_v49  ;;  %v838_v48 = vadd.f32 %v15648_v17, %v837_v24 }
 0x166   :  { %v897_v33 = vmax.f32 %v843_v14, 0.0  ;;  %v474_v24 = vmax.f32 %v432_v39, 0.0 }
 0x167   :  { %v896_v56 = vmax.f32 %v838_v48, 0.0  ;;  %v10988_v34 = vpop.f32.mrb[68].mxu1 }
 0x168   :  { %v15861_v51 = vmax.f32 %v471_v41, %v897_v33  ;;  %v853_v7 = vadd.f32 %v10988_v34, %v15648_v17  ;;  %v847_v23 = vpop.f32.mrb[69].mxu1 }
 0x169   :  { %v15864_v52 = vmax.f32 %v470_v11, %v896_v56  ;;  %v848_v61 = vadd.f32 %v15648_v17, %v847_v23 }
 0x16a   :  { %v899_v59 = vmax.f32 %v853_v7, 0.0 }
 0x16b   :  { %v898_v47 = vmax.f32 %v848_v61, 0.0  ;;  %v10991_v3 = vpop.f32.mrb[70].mxu1 }
 0x16c   :  { %v15871_v29 = vmax.f32 %v473_v25, %v899_v59  ;;  %v863_v63 = vadd.f32 %v10991_v3, %v15648_v17  ;;  %v857_v9 = vpop.f32.mrb[71].mxu1 }
 0x16d   :  { %v15874_v6 = vmax.f32 %v472_v54, %v898_v47  ;;  %v858_v49 = vadd.f32 %v15648_v17, %v857_v9 }
 0x16e   :  { %v901_v14 = vmax.f32 %v863_v63, 0.0 }
 0x16f   :  { %v900_v48 = vmax.f32 %v858_v49, 0.0  ;;  %v11026_v41 = vpop.f32.mrb[72].mxu1 }
 0x170   :  { %v15877_v8 = vmax.f32 %v475_v0, %v901_v14  ;;  %v1235_v55 = vadd.f32 %v11026_v41, %v15648_v17  ;;  %v1229_v33 = vpop.f32.mrb[73].mxu1 }
 0x171   :  { %v15880_v11 = vmax.f32 %v474_v24, %v900_v48  ;;  %v1230_v13 = vadd.f32 %v15648_v17, %v1229_v33 }
 0x172   :  { %v1345_v22 = vmax.f32 %v1235_v55, 0.0 }
 0x173   :  { %v1344_v56 = vmax.f32 %v1230_v13, 0.0  ;;  %v11029_v34 = vpop.f32.mrb[74].mxu1 }
 0x174   :  { %v15884_v7 = vmax.f32 %v15791_v26, %v1345_v22  ;;  %v1245_v23 = vadd.f32 %v11029_v34, %v15648_v17  ;;  %v1239_v61 = vpop.f32.mrb[75].mxu1 }
 0x175   :  { %v15888_v25 = vmax.f32 %v15794_v37, %v1344_v56  ;;  %v1240_v58 = vadd.f32 %v15648_v17, %v1239_v61 }
 0x176   :  { %v1347_v40 = vmax.f32 %v1245_v23, 0.0 }
 0x177   :  { %v1346_v59 = vmax.f32 %v1240_v58, 0.0  ;;  %v11032_v54 = vpop.f32.mrb[76].mxu1 }
 0x178   :  { %v15892_v28 = vmax.f32 %v15801_v38, %v1347_v40  ;;  %v1255_v39 = vadd.f32 %v11032_v54, %v15648_v17  ;;  %v1249_v47 = vpop.f32.mrb[77].mxu1 }
 0x179   :  { %v15896_v26 = vmax.f32 %v15804_v18, %v1346_v59  ;;  %v1250_v3 = vadd.f32 %v15648_v17, %v1249_v47 }
 0x17a   :  { %v1349_v63 = vmax.f32 %v1255_v39, 0.0 }
 0x17b   :  { %v1348_v9 = vmax.f32 %v1250_v3, 0.0  ;;  %v11035_v37 = vpop.f32.mrb[78].mxu1 }
 0x17c   :  { %v15900_v49 = vmax.f32 %v15811_v42, %v1349_v63  ;;  %v1265_v0 = vadd.f32 %v11035_v37, %v15648_v17  ;;  %v1259_v14 = vpop.f32.mrb[79].mxu1 }
 0x17d   :  { %v15904_v38 = vmax.f32 %v15814_v5, %v1348_v9  ;;  %v1260_v24 = vadd.f32 %v15648_v17, %v1259_v14 }
 0x17e   :  { %v1351_v48 = vmax.f32 %v1265_v0, 0.0 }
 0x17f   :  { %v1350_v41 = vmax.f32 %v1260_v24, 0.0  ;;  %v11038_v18 = vpop.f32.mrb[80].mxu1 }
 0x180   :  { %v15908_v55 = vmax.f32 %v15821_v50, %v1351_v48  ;;  %v1275_v33 = vadd.f32 %v11038_v18, %v15648_v17  ;;  %v1269_v13 = vpop.f32.mrb[81].mxu1 }
 0x181   :  { %v15912_v42 = vmax.f32 %v15824_v36, %v1350_v41  ;;  %v1270_v22 = vadd.f32 %v15648_v17, %v1269_v13 }
 0x182   :  { %v1353_v56 = vmax.f32 %v1275_v33, 0.0 }
 0x183   :  { %v1352_v34 = vmax.f32 %v1270_v22, 0.0  ;;  %v11041_v5 = vpop.f32.mrb[82].mxu1 }
 0x184   :  { %v15916_v23 = vmax.f32 %v15831_v45, %v1353_v56  ;;  %v1285_v61 = vadd.f32 %v11041_v5, %v15648_v17  ;;  %v1279_v58 = vpop.f32.mrb[83].mxu1 }
 0x185   :  { %v15920_v50 = vmax.f32 %v15834_v27, %v1352_v34  ;;  %v1280_v40 = vadd.f32 %v15648_v17, %v1279_v58 }
 0x186   :  { %v1355_v59 = vmax.f32 %v1285_v61, 0.0 }
 0x187   :  { %v1354_v54 = vmax.f32 %v1280_v40, 0.0  ;;  %v11044_v36 = vpop.f32.mrb[84].mxu1 }
 0x188   :  { %v15924_v39 = vmax.f32 %v15841_v30, %v1355_v59  ;;  %v1295_v47 = vadd.f32 %v11044_v36, %v15648_v17  ;;  %v1289_v3 = vpop.f32.mrb[85].mxu1 }
 0x189   :  { %v15928_v45 = vmax.f32 %v15844_v32, %v1354_v54  ;;  %v1290_v63 = vadd.f32 %v15648_v17, %v1289_v3 }
 0x18a   :  { %v1357_v9 = vmax.f32 %v1295_v47, 0.0 }
 0x18b   :  { %v1356_v37 = vmax.f32 %v1290_v63, 0.0  ;;  %v11047_v27 = vpop.f32.mrb[86].mxu1 }
 0x18c   :  { %v15932_v0 = vmax.f32 %v15851_v4, %v1357_v9  ;;  %v1305_v14 = vadd.f32 %v11047_v27, %v15648_v17  ;;  %v1299_v24 = vpop.f32.mrb[87].mxu1 }
 0x18d   :  { %v15936_v30 = vmax.f32 %v15854_v1, %v1356_v37  ;;  %v1300_v48 = vadd.f32 %v15648_v17, %v1299_v24 }
 0x18e   :  { %v1359_v41 = vmax.f32 %v1305_v14, 0.0 }
 0x18f   :  { %v1358_v18 = vmax.f32 %v1300_v48, 0.0  ;;  %v11050_v32 = vpop.f32.mrb[88].mxu1 }
 0x190   :  { %v15940_v33 = vmax.f32 %v15861_v51, %v1359_v41  ;;  %v1315_v13 = vadd.f32 %v11050_v32, %v15648_v17  ;;  %v1309_v22 = vpop.f32.mrb[89].mxu1 }
 0x191   :  { %v15944_v4 = vmax.f32 %v15864_v52, %v1358_v18  ;;  %v1310_v56 = vadd.f32 %v15648_v17, %v1309_v22 }
 0x192   :  { %v1361_v34 = vmax.f32 %v1315_v13, 0.0 }
 0x193   :  { %v1360_v5 = vmax.f32 %v1310_v56, 0.0  ;;  %v11053_v1 = vpop.f32.mrb[90].mxu1 }
 0x194   :  { %v15948_v61 = vmax.f32 %v15871_v29, %v1361_v34  ;;  %v1325_v58 = vadd.f32 %v11053_v1, %v15648_v17  ;;  %v1319_v40 = vpop.f32.mrb[91].mxu1 }
 0x195   :  { %v15952_v51 = vmax.f32 %v15874_v6, %v1360_v5  ;;  %v1320_v59 = vadd.f32 %v15648_v17, %v1319_v40 }
 0x196   :  { %v1363_v54 = vmax.f32 %v1325_v58, 0.0 }
 0x197   :  { %v1362_v36 = vmax.f32 %v1320_v59, 0.0  ;;  %v11064_v52 = vpop.f32.mrb[92].mxu1 }
 0x198   :  { %v15956_v47 = vmax.f32 %v15877_v8, %v1363_v54  ;;  %v1617_v3 = vadd.f32 %v11064_v52, %v15648_v17  ;;  %v1611_v63 = vpop.f32.mrb[93].mxu1  ;;  %v1939_v52 = vld [vmem:[%s18968_s3 + $0x10] sm:$0xff] }
 0x199   :  { %v15960_v29 = vmax.f32 %v15880_v11, %v1362_v36  ;;  %v1612_v9 = vadd.f32 %v15648_v17, %v1611_v63 }
 0x19a   :  { %v1791_v37 = vmax.f32 %v1617_v3, 0.0 }
 0x19b   :  { %v1790_v27 = vmax.f32 %v1612_v9, 0.0  ;;  %v11067_v6 = vpop.f32.mrb[94].mxu1 }
 0x19c   :  { %v1827_v14 = vmax.f32 %v15684_v57, %v1791_v37  ;;  %v1627_v24 = vadd.f32 %v11067_v6, %v15648_v17  ;;  %v1621_v48 = vpop.f32.mrb[95].mxu1 }
 0x19d   :  { %v15966_v41 = vmax.f32 %v15688_v2, %v1790_v27  ;;  %v1622_v8 = vadd.f32 %v15648_v17, %v1621_v48 }
 0x19e   :  { %1863 = vst [vmem:[#allocation2 + $0x8] ss:$8 sps:$4 sm:$0xff] %v1827_v14   ;;  %v1793_v18 = vmax.f32 %v1627_v24, 0.0 }
 0x19f   :  { %1862 = vst [vmem:[#allocation2] sm:$0xff] %v15966_v41  ;;  %v1792_v11 = vmax.f32 %v1622_v8, 0.0  ;;  %v11070_v32 = vpop.f32.mrb[96].mxu1 }
 0x1a0   :  { %v15971_v13 = vmax.f32 %v15700_v60, %v1793_v18  ;;  %v1637_v22 = vadd.f32 %v11070_v32, %v15648_v17  ;;  %v1631_v57 = vpop.f32.mrb[97].mxu1 }
 0x1a1   :  { %v15975_v56 = vmax.f32 %v15704_v62, %v1792_v11  ;;  %v1632_v2 = vadd.f32 %v15648_v17, %v1631_v57 }
 0x1a2   :  { %1872 = vst [vmem:[#allocation2 + $0x20] sm:$0xff] %v15971_v13  ;;  %v1795_v34 = vmax.f32 %v1637_v22, 0.0 }
 0x1a3   :  { %1868 = vst [vmem:[#allocation2 + $0x14] sm:$0xff] %v15975_v56  ;;  %v1794_v5 = vmax.f32 %v1632_v2, 0.0  ;;  %v11073_v1 = vpop.f32.mrb[98].mxu1 }
 0x1a4   :  { %v15981_v58 = vmax.f32 %v15712_v16, %v1795_v34  ;;  %v1647_v60 = vadd.f32 %v11073_v1, %v15648_v17  ;;  %v1641_v40 = vpop.f32.mrb[99].mxu1  ;;  %v1940_v16 = vld [vmem:[%s18968_s3 + $0x18] sm:$0xff] }
 0x1a5   :  { %v1830_v59 = vmax.f32 %v15716_v19, %v1794_v5  ;;  %v1642_v62 = vadd.f32 %v15648_v17, %v1641_v40  ;;  %v13214_v14 = vpack.c.bf16 %v1940_v16, %v1939_v52 }
 0x1a6   :  { %1878 = vst [vmem:[#allocation2 + $0x34] sm:$0xff] %v15981_v58  ;;  %v1797_v54 = vmax.f32 %v1647_v60, 0.0  ;;  %v1953_v36 = vld [vmem:[#allocation2 + $0x1] sm:$0xff] }
 0x1a7   :  { %1873 = vst [vmem:[#allocation2 + $0x28] ss:$8 sps:$4 sm:$0xff] %v1830_v59   ;;  %v1796_v3 = vmax.f32 %v1642_v62, 0.0  ;;  %v11076_v63 = vpop.f32.mrb[100].mxu1  ;;  %11148 = vmatprep.mubr.f32.mxu0 %v1953_v36 }
 0x1a8   :  { %v1833_v19 = vmax.f32 %v15728_v21, %v1797_v54  ;;  %v1657_v9 = vadd.f32 %v11076_v63, %v15648_v17  ;;  %v1651_v37 = vpop.f32.mrb[101].mxu1  ;;  %v1941_v21 = vld [vmem:[%s18968_s3 + $0x20] sm:$0xff] }
 0x1a9   :  { %v15996_v27 = vmax.f32 %v15732_v15, %v1796_v3  ;;  %v1652_v6 = vadd.f32 %v15648_v17, %v1651_v37  ;;  %v1942_v15 = vld [vmem:[%s18968_s3 + $0x28] sm:$0xff] }
 0x1aa   :  { %1883 = vst [vmem:[#allocation2 + $0x48] ss:$8 sps:$4 sm:$0xff] %v1833_v19   ;;  %v1799_v24 = vmax.f32 %v1657_v9, 0.0  ;;  %v1954_v48 = vld [vmem:[#allocation2 + $0x11] sm:$0xff]  ;;  %v13218_v60 = vpack.c.bf16 %v1942_v15, %v1941_v21 }
 0x1ab   :  { %1882 = vst [vmem:[#allocation2 + $0x40] sm:$0xff] %v15996_v27  ;;  %v1798_v8 = vmax.f32 %v1652_v6, 0.0  ;;  %v11079_v18 = vpop.f32.mrb[102].mxu1  ;;  %11149 = vmatmul.mubr.f32.vlgmr.msra.gmra.mrb[16].mxu0 %v1954_v48 }
 0x1ac   :  { %v16007_v11 = vmax.f32 %v15742_v35, %v1799_v24  ;;  %v1667_v32 = vadd.f32 %v11079_v18, %v15648_v17  ;;  %v1661_v22 = vpop.f32.mrb[103].mxu1  ;;  %13213 = vmatpush3.bf16.msra.mxu0 %v15764_v10  ;;  %v1943_v10 = vld [vmem:[%s18968_s3 + $0x30] sm:$0xff] }
 0x1ad   :  { %v16012_v57 = vmax.f32 %v15744_v12, %v1798_v8  ;;  %v1662_v2 = vadd.f32 %v15648_v17, %v1661_v22  ;;  %13215 = vmatprep.subr.bf16.mxu0 %v13214_v14  ;;  %v1944_v12 = vld [vmem:[%s18968_s3 + $0x38] sm:$0xff] }
 0x1ae   :  { %1892 = vst [vmem:[#allocation2 + $0x60] sm:$0xff] %v16007_v11  ;;  %v1801_v34 = vmax.f32 %v1667_v32, 0.0  ;;  %v1955_v5 = vld [vmem:[#allocation2 + $0x21] sm:$0xff]  ;;  %v1956_v1 = vld [vmem:[#allocation2 + $0x31] sm:$0xff]  ;;  %v13222_v63 = vpack.c.bf16 %v1944_v12, %v1943_v10 }
 0x1af   :  { %1888 = vst [vmem:[#allocation2 + $0x54] sm:$0xff] %v16012_v57  ;;  %v1800_v35 = vmax.f32 %v1662_v2, 0.0  ;;  %v11082_v40 = vpop.f32.mrb[104].mxu1  ;;  %11151 = vmatprep.mubr.f32.mxu0 %v1955_v5 }
 0x1b0   :  { %v16024_v59 = vmax.f32 %v15760_v43, %v1801_v34  ;;  %v1677_v62 = vadd.f32 %v11082_v40, %v15648_v17  ;;  %v1671_v54 = vpop.f32.mrb[105].mxu1  ;;  %11152 = vmatmul.mubr.f32.gmra.mrb[18].mxu0 %v1956_v1  ;;  %v1945_v43 = vld [vmem:[%s18968_s3 + $0x40] sm:$0xff] }
 0x1b1   :  { %v1836_v36 = vmax.f32 %v15766_v44, %v1800_v35  ;;  %v1672_v52 = vadd.f32 %v15648_v17, %v1671_v54  ;;  %13217 = vmatpush3.bf16.msra.mxu0 %v13214_v14  ;;  %v1946_v44 = vld [vmem:[%s18968_s3 + $0x48] sm:$0xff] }
 0x1b2   :  { %1898 = vst [vmem:[#allocation2 + $0x74] sm:$0xff] %v16024_v59  ;;  %v1803_v16 = vmax.f32 %v1677_v62, 0.0  ;;  %v1957_v3 = vld [vmem:[#allocation2 + $0x41] sm:$0xff]  ;;  %13219 = vmatprep.subr.bf16.mxu0 %v13218_v60  ;;  %v13226_v21 = vpack.c.bf16 %v1946_v44, %v1945_v43  ;;  %v1952_v44 = vld [vmem:[%s18968_s3 + $0x78] sm:$0xff] }
 0x1b3   :  { %1893 = vst [vmem:[#allocation2 + $0x68] ss:$8 sps:$4 sm:$0xff] %v1836_v36   ;;  %v1802_v19 = vmax.f32 %v1672_v52, 0.0  ;;  %v11085_v9 = vpop.f32.mrb[106].mxu1  ;;  %11154 = vmatprep.mubr.f32.mxu0 %v1957_v3 }
 0x1b4   :  { %v1839_v37 = vmax.f32 %v15775_v20, %v1803_v16  ;;  %v1687_v6 = vadd.f32 %v11085_v9, %v15648_v17  ;;  %v1681_v14 = vpop.f32.mrb[107].mxu1  ;;  %v1947_v20 = vld [vmem:[%s18968_s3 + $0x50] sm:$0xff] }
 0x1b5   :  { %v16039_v24 = vmax.f32 %v15779_v31, %v1802_v19  ;;  %v1682_v48 = vadd.f32 %v15648_v17, %v1681_v14  ;;  %13221 = vmatpush3.bf16.msra.mxu0 %v13218_v60  ;;  %v1948_v31 = vld [vmem:[%s18968_s3 + $0x58] sm:$0xff] }
 0x1b6   :  { %1903 = vst [vmem:[#allocation2 + $0x88] ss:$8 sps:$4 sm:$0xff] %v1839_v37   ;;  %v1805_v8 = vmax.f32 %v1687_v6, 0.0  ;;  %v1958_v18 = vld [vmem:[#allocation2 + $0x51] sm:$0xff]  ;;  %13223 = vmatprep.subr.bf16.mxu0 %v13222_v63  ;;  %v13230_v10 = vpack.c.bf16 %v1948_v31, %v1947_v20 }
 0x1b7   :  { %1902 = vst [vmem:[#allocation2 + $0x80] sm:$0xff] %v16039_v24  ;;  %v1804_v15 = vmax.f32 %v1682_v48, 0.0  ;;  %v11088_v32 = vpop.f32.mrb[108].mxu1  ;;  %11155 = vmatmul.mubr.f32.gmra.mrb[20].mxu0 %v1958_v18 }
 0x1b8   :  { %v1841_v22 = vmax.f32 %v15785_v46, %v1805_v8  ;;  %v1697_v2 = vadd.f32 %v11088_v32, %v15648_v17  ;;  %v1691_v34 = vpop.f32.mrb[109].mxu1  ;;  %v1949_v46 = vld [vmem:[%s18968_s3 + $0x60] sm:$0xff] }
 0x1b9   :  { %v1840_v5 = vmax.f32 %v15789_v53, %v1804_v15  ;;  %v1692_v1 = vadd.f32 %v15648_v17, %v1691_v34  ;;  %13225 = vmatpush3.bf16.msra.mxu0 %v13222_v63  ;;  %v1950_v53 = vld [vmem:[%s18968_s3 + $0x68] sm:$0xff] }
 0x1ba   :  { %1912 = vst [vmem:[#allocation2 + $0xa0] sm:$0xff] %v1841_v22  ;;  %v1807_v60 = vmax.f32 %v1697_v2, 0.0  ;;  %v1959_v35 = vld [vmem:[#allocation2 + $0x61] sm:$0xff]  ;;  %v1960_v40 = vld [vmem:[#allocation2 + $0x71] sm:$0xff]  ;;  %13227 = vmatprep.subr.bf16.mxu0 %v13226_v21  ;;  %v13234_v19 = vpack.c.bf16 %v1950_v53, %v1949_v46 }
 0x1bb   :  { %1908 = vst [vmem:[#allocation2 + $0x94] sm:$0xff] %v1840_v5  ;;  %v1806_v12 = vmax.f32 %v1692_v1, 0.0  ;;  %v11091_v62 = vpop.f32.mrb[110].mxu1  ;;  %11157 = vmatprep.mubr.f32.mxu0 %v1959_v35 }
 0x1bc   :  { %v1843_v54 = vmax.f32 %v15884_v7, %v1807_v60  ;;  %v1707_v36 = vadd.f32 %v11091_v62, %v15648_v17  ;;  %v1701_v52 = vpop.f32.mrb[111].mxu1  ;;  %11158 = vmatmul.mubr.f32.gmra.mrb[22].mxu0 %v1960_v40  ;;  %v1951_v7 = vld [vmem:[%s18968_s3 + $0x70] sm:$0xff] }
 0x1bd   :  { %v1842_v16 = vmax.f32 %v15888_v25, %v1806_v12  ;;  %v1702_v3 = vadd.f32 %v15648_v17, %v1701_v52  ;;  %13229 = vmatpush3.bf16.msra.mxu0 %v13226_v21  ;;  %v13238_v18 = vpack.c.bf16 %v1952_v44, %v1951_v7 }
 0x1be   :  { %1918 = vst [vmem:[#allocation2 + $0xb4] sm:$0xff] %v1843_v54  ;;  %v1809_v63 = vmax.f32 %v1707_v36, 0.0  ;;  %13231 = vmatprep.subr.bf16.mxu0 %v13230_v10 }
 0x1bf   :  { %1913 = vst [vmem:[#allocation2 + $0xa8] ss:$8 sps:$4 sm:$0xff] %v1842_v16   ;;  %v1808_v9 = vmax.f32 %v1702_v3, 0.0  ;;  %v11094_v43 = vpop.f32.mrb[112].mxu1 }
 0x1c0   :  { %v1845_v25 = vmax.f32 %v15892_v28, %v1809_v63  ;;  %v1717_v37 = vadd.f32 %v11094_v43, %v15648_v17  ;;  %v1711_v6 = vpop.f32.mrb[113].mxu1  ;;  %v8990_v28 = vld [vmem:[%s18968_s3 + $0x100] sm:$0xff] }
 0x1c1   :  { %v16072_v14 = vmax.f32 %v15896_v26, %v1808_v9  ;;  %v1712_v48 = vadd.f32 %v15648_v17, %v1711_v6  ;;  %13233 = vmatpush3.bf16.msra.mxu0 %v13230_v10  ;;  %v8991_v26 = vld [vmem:[%s18968_s3 + $0x108] sm:$0xff]  ;;  %v16088_v17 = vld [vmem:[%s18967_s2] ss:$0 sm:$0xff] }
 0x1c2   :  { %1865 = vst [vmem:[#allocation2 + $0xc8] ss:$8 sps:$4 sm:$0xff] %v1845_v25   ;;  %v1811_v8 = vmax.f32 %v1717_v37, 0.0  ;;  %13235 = vmatprep.subr.bf16.mxu0 %v13234_v19 }
 0x1c3   :  { %1864 = vst [vmem:[#allocation2 + $0xc0] sm:$0xff] %v16072_v14  ;;  %v1810_v21 = vmax.f32 %v1712_v48, 0.0  ;;  %v11097_v15 = vpop.f32.mrb[114].mxu1 }
 0x1c4   :  { %v16083_v32 = vmax.f32 %v15900_v49, %v1811_v8  ;;  %v1727_v20 = vadd.f32 %v16088_v17, %v11097_v15  ;;  %v1721_v31 = vpop.f32.mrb[115].mxu1  ;;  %v16096_v49 = vpack.c.bf16 %v8991_v26, %v8990_v28 }
 0x1c5   :  { %v16092_v22 = vmax.f32 %v15904_v38, %v1810_v21  ;;  %v1722_v2 = vadd.f32 %v16088_v17, %v1721_v31  ;;  %13237 = vmatpush3.bf16.msra.mxu0 %v13234_v19 }
 0x1c6   :  { %1874 = vst [vmem:[#allocation2 + $0xe0] sm:$0xff] %v16083_v32  ;;  %v1813_v34 = vmax.f32 %v1727_v20, 0.0  ;;  %13239 = vmatprep.subr.bf16.mxu0 %v13238_v18 }
 0x1c7   :  { %1870 = vst [vmem:[#allocation2 + $0xd4] sm:$0xff] %v16092_v22  ;;  %v1812_v5 = vmax.f32 %v1722_v2, 0.0  ;;  %v11100_v1 = vpop.f32.mrb[116].mxu1 }
 0x1c8   :  { %v16100_v60 = vmax.f32 %v15908_v55, %v1813_v34  ;;  %v1737_v35 = vadd.f32 %v16088_v17, %v11100_v1  ;;  %v1731_v38 = vpop.f32.mrb[117].mxu1 }
 0x1c9   :  { %v1848_v40 = vmax.f32 %v15912_v42, %v1812_v5  ;;  %v1732_v10 = vadd.f32 %v16088_v17, %v1731_v38  ;;  %13241 = vmatpush3.bf16.msra.mxu0 %v13238_v18 }
 0x1ca   :  { %1880 = vst [vmem:[#allocation2 + $0xf4] sm:$0xff] %v16100_v60  ;;  %v1815_v12 = vmax.f32 %v1737_v35, 0.0  ;;  %v1961_v62 = vld [vmem:[#allocation2 + $0xc1] sm:$0xff]  ;;  %13243 = vmatprep.subr.bf16.mxu0 %v16096_v49 }
 0x1cb   :  { %1875 = vst [vmem:[#allocation2 + $0xe8] ss:$8 sps:$4 sm:$0xff] %v1848_v40   ;;  %v1814_v46 = vmax.f32 %v1732_v10, 0.0  ;;  %v11103_v53 = vpop.f32.mrb[118].mxu1  ;;  %11160 = vmatprep.mubr.f32.mxu0 %v1961_v62 }
 0x1cc   :  { %v1851_v55 = vmax.f32 %v15916_v23, %v1815_v12  ;;  %v1747_v54 = vadd.f32 %v16088_v17, %v11103_v53  ;;  %v1741_v36 = vpop.f32.mrb[119].mxu1 }
 0x1cd   :  { %v16110_v42 = vmax.f32 %v15920_v50, %v1814_v46  ;;  %v1742_v52 = vadd.f32 %v16088_v17, %v1741_v36 }
 0x1ce   :  { %1885 = vst [vmem:[#allocation2 + $0x108] ss:$8 sps:$4 sm:$0xff] %v1851_v55   ;;  %v1817_v16 = vmax.f32 %v1747_v54, 0.0  ;;  %v16113_v3 = vld [vmem:[#allocation2 + $0xd1] sm:$0xff] }
 0x1cf   :  { %1884 = vst [vmem:[#allocation2 + $0x100] sm:$0xff] %v16110_v42  ;;  %v1816_v63 = vmax.f32 %v1742_v52, 0.0  ;;  %v11106_v19 = vpop.f32.mrb[120].mxu1  ;;  %11161 = vmatmul.mubr.f32.gmra.mrb[24].mxu0 %v16113_v3  ;;  %v16172_v52 = vld [vmem:[#allocation2 + $0x10] sm:$0xff] }
 0x1d0   :  { %v16118_v23 = vmax.f32 %v15924_v39, %v1817_v16  ;;  %v1757_v9 = vadd.f32 %v16088_v17, %v11106_v19  ;;  %v1751_v43 = vpop.f32.mrb[121].mxu1  ;;  %v8994_v16 = vld [vmem:[%s18968_s3 + $0x120] sm:$0xff]  ;;  %v8997_v19 = vld [vmem:[%s18968_s3 + $0x138] sm:$0xff] }
 0x1d1   :  { %v16122_v50 = vmax.f32 %v15928_v45, %v1816_v63  ;;  %v1752_v7 = vadd.f32 %v16088_v17, %v1751_v43  ;;  %v8995_v63 = vld [vmem:[%s18968_s3 + $0x128] sm:$0xff] }
 0x1d2   :  { %1894 = vst [vmem:[#allocation2 + $0x120] sm:$0xff] %v16118_v23  ;;  %v1819_v44 = vmax.f32 %v1757_v9, 0.0  ;;  %v16126_v25 = vld [vmem:[#allocation2 + $0xe1] sm:$0xff]  ;;  %v16128_v37 = vld [vmem:[#allocation2 + $0xf1] sm:$0xff] }
 0x1d3   :  { %1890 = vst [vmem:[#allocation2 + $0x114] sm:$0xff] %v16122_v50  ;;  %v1818_v6 = vmax.f32 %v1752_v7, 0.0  ;;  %v11109_v39 = vpop.f32.mrb[122].mxu1  ;;  %11163 = vmatprep.mubr.f32.mxu0 %v16126_v25  ;;  %v8998_v9 = vld [vmem:[%s18968_s3 + $0x140] sm:$0xff]  ;;  %v8999_v43 = vld [vmem:[%s18968_s3 + $0x148] sm:$0xff]  ;;  %v16203_v7 = vld [vmem:[#allocation2 + $0x70] sm:$0xff] }
 0x1d4   :  { %v16133_v48 = vmax.f32 %v15932_v0, %v1819_v44  ;;  %v1767_v45 = vadd.f32 %v16088_v17, %v11109_v39  ;;  %v1761_v8 = vpop.f32.mrb[123].mxu1  ;;  %11164 = vmatmul.mubr.f32.gmra.mrb[26].mxu0 %v16128_v37  ;;  %v9000_v44 = vld [vmem:[%s18968_s3 + $0x150] sm:$0xff] }
 0x1d5   :  { %v1854_v18 = vmax.f32 %v15936_v30, %v1818_v6  ;;  %v1762_v21 = vadd.f32 %v16088_v17, %v1761_v8  ;;  %v9001_v6 = vld [vmem:[%s18968_s3 + $0x158] sm:$0xff]  ;;  %v16213_v39 = vld [vmem:[#allocation2 + $0xd0] sm:$0xff]  ;;  %v9003_v8 = vld [vmem:[%s18968_s3 + $0x168] sm:$0xff] }
 0x1d6   :  { %1900 = vst [vmem:[#allocation2 + $0x134] sm:$0xff] %v16133_v48  ;;  %v1821_v15 = vmax.f32 %v1767_v45, 0.0  ;;  %v16140_v28 = vld [vmem:[#allocation2 + $0x101] sm:$0xff] }
 0x1d7   :  { %1895 = vst [vmem:[#allocation2 + $0x128] ss:$8 sps:$4 sm:$0xff] %v1854_v18   ;;  %v1820_v26 = vmax.f32 %v1762_v21, 0.0  ;;  %v11112_v20 = vpop.f32.mrb[124].mxu1  ;;  %11166 = vmatprep.mubr.f32.mxu0 %v16140_v28  ;;  %v9002_v45 = vld [vmem:[%s18968_s3 + $0x160] sm:$0xff]  ;;  %v16223_v18 = vld [vmem:[#allocation2 + $0xf0] sm:$0xff] }
 0x1d8   :  { %v1857_v0 = vmax.f32 %v15940_v33, %v1821_v15  ;;  %v1777_v31 = vadd.f32 %v16088_v17, %v11112_v20  ;;  %v1771_v2 = vpop.f32.mrb[125].mxu1  ;;  %v9004_v21 = vld [vmem:[%s18968_s3 + $0x170] sm:$0xff]  ;;  %v9005_v15 = vld [vmem:[%s18968_s3 + $0x178] sm:$0xff] }
 0x1d9   :  { %v16146_v34 = vmax.f32 %v15944_v4, %v1820_v26  ;;  %v1772_v30 = vadd.f32 %v16088_v17, %v1771_v2  ;;  %v13270_v26 = vpack.c.bf16 %v9005_v15, %v9004_v21  ;;  %v9020_v21 = vld [vmem:[%s18968_s3 + $0x1f0] sm:$0xff]  ;;  %v9021_v15 = vld [vmem:[%s18968_s3 + $0x1f8] sm:$0xff] }
 0x1da   :  { %1905 = vst [vmem:[#allocation2 + $0x148] ss:$8 sps:$4 sm:$0xff] %v1857_v0   ;;  %v1823_v5 = vmax.f32 %v1777_v31, 0.0  ;;  %v16149_v1 = vld [vmem:[#allocation2 + $0x111] sm:$0xff]  ;;  %v9006_v0 = vld [vmem:[%s18968_s3 + $0x180] sm:$0xff]  ;;  %v9007_v31 = vld [vmem:[%s18968_s3 + $0x188] sm:$0xff] }
 0x1db   :  { %1904 = vst [vmem:[#allocation2 + $0x140] sm:$0xff] %v16146_v34  ;;  %v1822_v35 = vmax.f32 %v1772_v30, 0.0  ;;  %v11115_v38 = vpop.f32.mrb[126].mxu1  ;;  %11167 = vmatmul.mubr.f32.gmra.mrb[28].mxu0 %v16149_v1  ;;  %v16233_v20 = vld [vmem:[#allocation2 + $0x110] sm:$0xff]  ;;  %v13274_v2 = vpack.c.bf16 %v9007_v31, %v9006_v0  ;;  %v13302_v0 = vpack.c.bf16 %v9021_v15, %v9020_v21  ;;  %v9031_v21 = vld [vmem:[%s18968_s3 + $0x248] sm:$0xff] }
 0x1dc   :  { %v1859_v33 = vmax.f32 %v15948_v61, %v1823_v5  ;;  %v1787_v40 = vadd.f32 %v16088_v17, %v11115_v38  ;;  %v1781_v10 = vpop.f32.mrb[127].mxu1  ;;  %v8992_v61 = vld [vmem:[%s18968_s3 + $0x110] sm:$0xff]  ;;  %v2276_v38 = vld [vmem:[#allocation2 + $0x2] sm:$0xff] }
 0x1dd   :  { %v1858_v4 = vmax.f32 %v15952_v51, %v1822_v35  ;;  %v1782_v12 = vadd.f32 %v16088_v17, %v1781_v10  ;;  %v8993_v51 = vld [vmem:[%s18968_s3 + $0x118] sm:$0xff]  ;;  %v9008_v5 = vld [vmem:[%s18968_s3 + $0x190] sm:$0xff]  ;;  %v9010_v10 = vld [vmem:[%s18968_s3 + $0x1a0] sm:$0xff] }
 0x1de   :  { %1914 = vst [vmem:[#allocation2 + $0x160] sm:$0xff] %v1859_v33  ;;  %v1825_v62 = vmax.f32 %v1787_v40, 0.0  ;;  %v16157_v46 = vld [vmem:[#allocation2 + $0x121] sm:$0xff]  ;;  %v16159_v53 = vld [vmem:[#allocation2 + $0x131] sm:$0xff]  ;;  %v13246_v36 = vpack.c.bf16 %v8993_v51, %v8992_v61 }
 0x1df   :  { %1910 = vst [vmem:[#allocation2 + $0x154] sm:$0xff] %v1858_v4  ;;  %v1824_v55 = vmax.f32 %v1782_v12, 0.0  ;;  %11169 = vmatprep.mubr.f32.mxu0 %v16157_v46  ;;  %v16243_v30 = vld [vmem:[#allocation2 + $0x130] sm:$0xff]  ;;  %v9009_v35 = vld [vmem:[%s18968_s3 + $0x198] sm:$0xff]  ;;  %v9011_v4 = vld [vmem:[%s18968_s3 + $0x1a8] sm:$0xff] }
 0x1e0   :  { %v1861_v17 = vmax.f32 %v15956_v47, %v1825_v62  ;;  %11170 = vmatmul.mubr.f32.gmra.mrb[30].mxu0 %v16159_v53  ;;  %v13250_v47 = vpack.c.bf16 %v8995_v63, %v8994_v16  ;;  %v13278_v33 = vpack.c.bf16 %v9009_v35, %v9008_v5  ;;  %v16252_v40 = vld [vmem:[#allocation2 + $0x12] sm:$0xff]  ;;  %v16261_v12 = vld [vmem:[#allocation2 + $0x22] sm:$0xff]  ;;  %v13282_v62 = vpack.c.bf16 %v9011_v4, %v9010_v10 }
 0x1e1   :  { %v1860_v54 = vmax.f32 %v15960_v29, %v1824_v55  ;;  %11204 = vmatprep.mubr.f32.mxu0 %v15966_v41  ;;  %v16183_v29 = vld [vmem:[#allocation2 + $0x30] sm:$0xff]  ;;  %v9013_v51 = vld [vmem:[%s18968_s3 + $0x1b8] sm:$0xff]  ;;  %v9014_v16 = vld [vmem:[%s18968_s3 + $0x1c0] sm:$0xff] }
 0x1e2   :  { %1920 = vst [vmem:[#allocation2 + $0x174] sm:$0xff] %v1861_v17  ;;  %v8996_v41 = vld [vmem:[%s18968_s3 + $0x130] sm:$0xff]  ;;  %v16273_v17 = vld [vmem:[#allocation2 + $0x42] sm:$0xff]  ;;  %v9025_v4 = vld [vmem:[%s18968_s3 + $0x218] sm:$0xff] }
 0x1e3   :  { %1915 = vst [vmem:[#allocation2 + $0x168] ss:$8 sps:$4 sm:$0xff] %v1860_v54   ;;  %v16264_v55 = vld [vmem:[#allocation2 + $0x32] sm:$0xff]  ;;  %v9015_v63 = vld [vmem:[%s18968_s3 + $0x1c8] sm:$0xff] }
 0x1e4   :  { %11205 = vmatmul.mubr.f32.vlgmr.msra.gmra.mrb[16].mxu0 %v16172_v52  ;;  %v9012_v61 = vld [vmem:[%s18968_s3 + $0x1b0] sm:$0xff]  ;;  %v9023_v5 = vld [vmem:[%s18968_s3 + $0x208] sm:$0xff] }
 0x1e5   :  { %11207 = vmatprep.mubr.f32.mxu0 %v15971_v13  ;;  %13245 = vmatpush3.bf16.msra.mxu0 %v16096_v49  ;;  %v13254_v13 = vpack.c.bf16 %v8997_v19, %v8996_v41  ;;  %v16193_v49 = vld [vmem:[#allocation2 + $0x50] sm:$0xff]  ;;  %v13286_v54 = vpack.c.bf16 %v9013_v51, %v9012_v61  ;;  %v13290_v41 = vpack.c.bf16 %v9015_v63, %v9014_v16  ;;  %v16330_v35 = vld [vmem:[#allocation2 + $0x122] sm:$0xff] }
 0x1e6   :  { %13247 = vmatprep.subr.bf16.mxu0 %v13246_v36  ;;  %v16288_v19 = vld [vmem:[#allocation2 + $0x72] sm:$0xff]  ;;  %v9027_v16 = vld [vmem:[%s18968_s3 + $0x228] sm:$0xff] }
 0x1e7   :  { %v16321_v31 = vld [vmem:[#allocation2 + $0x112] sm:$0xff]  ;;  %v16351_v63 = vld [vmem:[#allocation2 + $0x23] sm:$0xff] }
 0x1e8   :  { %11208 = vmatmul.mubr.f32.gmra.mrb[18].mxu0 %v16183_v29  ;;  %v9024_v10 = vld [vmem:[%s18968_s3 + $0x210] sm:$0xff]  ;;  %v16375_v15 = vld [vmem:[#allocation2 + $0x63] sm:$0xff] }
 0x1e9   :  { %11210 = vmatprep.mubr.f32.mxu0 %v15996_v27  ;;  %13249 = vmatpush3.bf16.msra.mxu0 %v13246_v36  ;;  %v13258_v27 = vpack.c.bf16 %v8999_v43, %v8998_v9  ;;  %v16276_v36 = vld [vmem:[#allocation2 + $0x52] sm:$0xff]  ;;  %v2284_v43 = vld [vmem:[#allocation2 + $0xc2] sm:$0xff]  ;;  %v13310_v61 = vpack.c.bf16 %v9025_v4, %v9024_v10 }
 0x1ea   :  { %13251 = vmatprep.subr.bf16.mxu0 %v13250_v47  ;;  %v9017_v9 = vld [vmem:[%s18968_s3 + $0x1d8] sm:$0xff]  ;;  %v2478_v10 = vld [vmem:[#allocation2 + $0xc3] sm:$0xff] }
 0x1eb   :  { %v16342_v51 = vld [vmem:[#allocation2 + $0x13] sm:$0xff] }
 0x1ec   :  { %11211 = vmatmul.mubr.f32.gmra.mrb[20].mxu0 %v16193_v49 }
 0x1ed   :  { %11213 = vmatprep.mubr.f32.mxu0 %v16007_v11  ;;  %13253 = vmatpush3.bf16.msra.mxu0 %v13250_v47  ;;  %v13262_v11 = vpack.c.bf16 %v9001_v6, %v9000_v44  ;;  %v16285_v47 = vld [vmem:[#allocation2 + $0x62] sm:$0xff]  ;;  %v16297_v44 = vld [vmem:[#allocation2 + $0xd2] sm:$0xff] }
 0x1ee   :  { %13255 = vmatprep.subr.bf16.mxu0 %v13254_v13  ;;  %v9018_v6 = vld [vmem:[%s18968_s3 + $0x1e0] sm:$0xff] }
 0x1f0   :  { %11214 = vmatmul.mubr.f32.gmra.mrb[22].mxu0 %v16203_v7 }
 0x1f1   :  { %11216 = vmatprep.mubr.f32.mxu0 %v16072_v14  ;;  %13257 = vmatpush3.bf16.msra.mxu0 %v13254_v13  ;;  %v13266_v14 = vpack.c.bf16 %v9003_v8, %v9002_v45  ;;  %v9016_v13 = vld [vmem:[%s18968_s3 + $0x1d0] sm:$0xff]  ;;  %v16306_v45 = vld [vmem:[#allocation2 + $0xe2] sm:$0xff] }
 0x1f2   :  { %13259 = vmatprep.subr.bf16.mxu0 %v13258_v27 }
 0x1f4   :  { %11217 = vmatmul.mubr.f32.gmra.mrb[24].mxu0 %v16213_v39 }
 0x1f5   :  { %11219 = vmatprep.mubr.f32.mxu0 %v16083_v32  ;;  %13261 = vmatpush3.bf16.msra.mxu0 %v13258_v27  ;;  %v13294_v27 = vpack.c.bf16 %v9017_v9, %v9016_v13  ;;  %v16354_v13 = vld [vmem:[#allocation2 + $0x33] sm:$0xff] }
 0x1f6   :  { %13263 = vmatprep.subr.bf16.mxu0 %v13262_v11  ;;  %v9028_v9 = vld [vmem:[%s18968_s3 + $0x230] sm:$0xff] }
 0x1f8   :  { %11220 = vmatmul.mubr.f32.gmra.mrb[26].mxu0 %v16223_v18 }
 0x1f9   :  { %11222 = vmatprep.mubr.f32.mxu0 %v16110_v42  ;;  %13265 = vmatpush3.bf16.msra.mxu0 %v13262_v11  ;;  %v9019_v11 = vld [vmem:[%s18968_s3 + $0x1e8] sm:$0xff] }
 0x1fa   :  { %13267 = vmatprep.subr.bf16.mxu0 %v13266_v14  ;;  %v13298_v8 = vpack.c.bf16 %v9019_v11, %v9018_v6  ;;  %v16366_v11 = vld [vmem:[#allocation2 + $0x53] sm:$0xff] }
 0x1fc   :  { %11223 = vmatmul.mubr.f32.gmra.mrb[28].mxu0 %v16233_v20 }
 0x1fd   :  { %11225 = vmatprep.mubr.f32.mxu0 %v16118_v23  ;;  %13269 = vmatpush3.bf16.msra.mxu0 %v13266_v14  ;;  %v16309_v14 = vld [vmem:[#allocation2 + $0xf2] sm:$0xff] }
 0x1fe   :  { %13271 = vmatprep.subr.bf16.mxu0 %v13270_v26 }
 0x200   :  { %11226 = vmatmul.mubr.f32.gmra.mrb[30].mxu0 %v16243_v30 }
 0x201   :  { %13273 = vmatpush3.bf16.msra.mxu0 %v13270_v26  ;;  %11260 = vmatprep.mubr.f32.mxu0 %v2276_v38  ;;  %v16318_v26 = vld [vmem:[#allocation2 + $0x102] sm:$0xff] }
 0x202   :  { %13275 = vmatprep.subr.bf16.mxu0 %v13274_v2 }
 0x204   :  { %11261 = vmatmul.mubr.f32.vlgmr.msra.gmra.mrb[16].mxu0 %v16252_v40 }
 0x205   :  { %11263 = vmatprep.mubr.f32.mxu0 %v16261_v12  ;;  %13277 = vmatpush3.bf16.msra.mxu0 %v13274_v2  ;;  %v9022_v2 = vld [vmem:[%s18968_s3 + $0x200] sm:$0xff] }
 0x206   :  { %13279 = vmatprep.subr.bf16.mxu0 %v13278_v33  ;;  %v13306_v38 = vpack.c.bf16 %v9023_v5, %v9022_v2  ;;  %v16378_v2 = vld [vmem:[#allocation2 + $0x73] sm:$0xff] }
 0x207   :  { %v9032_v5 = vld [vmem:[%s18968_s3 + $0x250] sm:$0xff] }
 0x208   :  { %11264 = vmatmul.mubr.f32.gmra.mrb[18].mxu0 %v16264_v55 }
 0x209   :  { %11266 = vmatprep.mubr.f32.mxu0 %v16273_v17  ;;  %13281 = vmatpush3.bf16.msra.mxu0 %v13278_v33  ;;  %v16333_v33 = vld [vmem:[#allocation2 + $0x132] sm:$0xff] }
 0x20a   :  { %13283 = vmatprep.subr.bf16.mxu0 %v13282_v62 }
 0x20c   :  { %11267 = vmatmul.mubr.f32.gmra.mrb[20].mxu0 %v16276_v36 }
 0x20d   :  { %11269 = vmatprep.mubr.f32.mxu0 %v16285_v47  ;;  %13285 = vmatpush3.bf16.msra.mxu0 %v13282_v62  ;;  %v2470_v62 = vld [vmem:[#allocation2 + $0x3] sm:$0xff] }
 0x20e   :  { %13287 = vmatprep.subr.bf16.mxu0 %v13286_v54 }
 0x210   :  { %11270 = vmatmul.mubr.f32.gmra.mrb[22].mxu0 %v16288_v19 }
 0x211   :  { %11272 = vmatprep.mubr.f32.mxu0 %v2284_v43  ;;  %13289 = vmatpush3.bf16.msra.mxu0 %v13286_v54  ;;  %v9026_v54 = vld [vmem:[%s18968_s3 + $0x220] sm:$0xff]  ;;  %v9029_v43 = vld [vmem:[%s18968_s3 + $0x238] sm:$0xff] }
 0x212   :  { %13291 = vmatprep.subr.bf16.mxu0 %v13290_v41  ;;  %v13318_v6 = vpack.c.bf16 %v9029_v43, %v9028_v9  ;;  %v16399_v9 = vld [vmem:[#allocation2 + $0xf3] sm:$0xff] }
 0x213   :  { %v9036_v43 = vld [vmem:[%s18968_s3 + $0x270] sm:$0xff] }
 0x214   :  { %11273 = vmatmul.mubr.f32.gmra.mrb[24].mxu0 %v16297_v44 }
 0x215   :  { %11275 = vmatprep.mubr.f32.mxu0 %v16306_v45  ;;  %13293 = vmatpush3.bf16.msra.mxu0 %v13290_v41  ;;  %v13314_v41 = vpack.c.bf16 %v9027_v16, %v9026_v54  ;;  %v9035_v54 = vld [vmem:[%s18968_s3 + $0x268] sm:$0xff] }
 0x216   :  { %13295 = vmatprep.subr.bf16.mxu0 %v13294_v27  ;;  %v16396_v16 = vld [vmem:[#allocation2 + $0xe3] sm:$0xff] }
 0x218   :  { %11276 = vmatmul.mubr.f32.gmra.mrb[26].mxu0 %v16309_v14 }
 0x219   :  { %11278 = vmatprep.mubr.f32.mxu0 %v16318_v26  ;;  %13297 = vmatpush3.bf16.msra.mxu0 %v13294_v27  ;;  %v16363_v27 = vld [vmem:[#allocation2 + $0x43] sm:$0xff] }
 0x21a   :  { %13299 = vmatprep.subr.bf16.mxu0 %v13298_v8 }
 0x21c   :  { %11279 = vmatmul.mubr.f32.gmra.mrb[28].mxu0 %v16321_v31 }
 0x21d   :  { %11281 = vmatprep.mubr.f32.mxu0 %v16330_v35  ;;  %13301 = vmatpush3.bf16.msra.mxu0 %v13298_v8  ;;  %v9030_v8 = vld [vmem:[%s18968_s3 + $0x240] sm:$0xff] }
 0x21e   :  { %13303 = vmatprep.subr.bf16.mxu0 %v13302_v0 }
 0x220   :  { %11282 = vmatmul.mubr.f32.gmra.mrb[30].mxu0 %v16333_v33 }
 0x221   :  { %13305 = vmatpush3.bf16.msra.mxu0 %v13302_v0  ;;  %11316 = vmatprep.mubr.f32.mxu0 %v2470_v62  ;;  %v13322_v0 = vpack.c.bf16 %v9031_v21, %v9030_v8  ;;  %v16387_v62 = vld [vmem:[#allocation2 + $0xd3] sm:$0xff]  ;;  %v16408_v8 = vld [vmem:[#allocation2 + $0x103] sm:$0xff] }
 0x222   :  { %13307 = vmatprep.subr.bf16.mxu0 %v13306_v38 }
 0x224   :  { %11317 = vmatmul.mubr.f32.vlgmr.msra.gmra.mrb[16].mxu0 %v16342_v51 }
 0x225   :  { %11319 = vmatprep.mubr.f32.mxu0 %v16351_v63  ;;  %13309 = vmatpush3.bf16.msra.mxu0 %v13306_v38  ;;  %v9033_v38 = vld [vmem:[%s18968_s3 + $0x258] sm:$0xff] }
 0x226   :  { %13311 = vmatprep.subr.bf16.mxu0 %v13310_v61  ;;  %v13326_v4 = vpack.c.bf16 %v9033_v38, %v9032_v5  ;;  %v9038_v5 = vld [vmem:[%s18968_s3 + $0x280] sm:$0xff]  ;;  %v9039_v38 = vld [vmem:[%s18968_s3 + $0x288] sm:$0xff] }
 0x228   :  { %11320 = vmatmul.mubr.f32.gmra.mrb[18].mxu0 %v16354_v13 }
 0x229   :  { %11322 = vmatprep.mubr.f32.mxu0 %v16363_v27  ;;  %13313 = vmatpush3.bf16.msra.mxu0 %v13310_v61  ;;  %v9034_v61 = vld [vmem:[%s18968_s3 + $0x260] sm:$0xff] }
 0x22a   :  { %13315 = vmatprep.subr.bf16.mxu0 %v13314_v41 }
 0x22c   :  { %11323 = vmatmul.mubr.f32.gmra.mrb[20].mxu0 %v16366_v11 }
 0x22d   :  { %11325 = vmatprep.mubr.f32.mxu0 %v16375_v15  ;;  %13317 = vmatpush3.bf16.msra.mxu0 %v13314_v41  ;;  %v13330_v41 = vpack.c.bf16 %v9035_v54, %v9034_v61  ;;  %v16423_v61 = vld [vmem:[#allocation2 + $0x133] sm:$0xff] }
 0x22e   :  { %13319 = vmatprep.subr.bf16.mxu0 %v13318_v6  ;;  %v9040_v54 = vld [vmem:[%s18968_s3 + $0x290] sm:$0xff] }
 0x230   :  { %11326 = vmatmul.mubr.f32.gmra.mrb[22].mxu0 %v16378_v2 }
 0x231   :  { %11328 = vmatprep.mubr.f32.mxu0 %v2478_v10  ;;  %13321 = vmatpush3.bf16.msra.mxu0 %v13318_v6  ;;  %v9037_v6 = vld [vmem:[%s18968_s3 + $0x278] sm:$0xff]  ;;  %v16420_v10 = vld [vmem:[#allocation2 + $0x123] sm:$0xff] }
 0x232   :  { %13323 = vmatprep.subr.bf16.mxu0 %v13322_v0  ;;  %v13334_v21 = vpack.c.bf16 %v9037_v6, %v9036_v43  ;;  %18990 = vst [vmem:[#allocation7_spill] sm:$0xff] %v16420_v10  ;;  %v9041_v43 = vld [vmem:[%s18968_s3 + $0x298] sm:$0xff]  ;;  %v2664_v6 = vld [vmem:[#allocation2 + $0x4] sm:$0xff] }
 0x234   :  { %11329 = vmatmul.mubr.f32.gmra.mrb[24].mxu0 %v16387_v62 }
 0x235   :  { %11331 = vmatprep.mubr.f32.mxu0 %v16396_v16  ;;  %13325 = vmatpush3.bf16.msra.mxu0 %v13322_v0  ;;  %v16411_v0 = vld [vmem:[#allocation2 + $0x113] sm:$0xff] }
 0x236   :  { %13327 = vmatprep.subr.bf16.mxu0 %v13326_v4 }
 0x238   :  { %11332 = vmatmul.mubr.f32.gmra.mrb[26].mxu0 %v16399_v9 }
 0x239   :  { %11334 = vmatprep.mubr.f32.mxu0 %v16408_v8  ;;  %13329 = vmatpush3.bf16.msra.mxu0 %v13326_v4  ;;  %v13338_v4 = vpack.c.bf16 %v9039_v38, %v9038_v5  ;;  %v9043_v5 = vld [vmem:[%s18968_s3 + $0x2a8] sm:$0xff] }
 0x23a   :  { %13331 = vmatprep.subr.bf16.mxu0 %v13330_v41  ;;  %v16439_v38 = vld [vmem:[#allocation2 + $0x24] sm:$0xff] }
 0x23c   :  { %11335 = vmatmul.mubr.f32.gmra.mrb[28].mxu0 %v16411_v0 }
 0x23d   :  { %11337 = vmatprep.mubr.f32.mxu0 %v16420_v10  ;;  %13333 = vmatpush3.bf16.msra.mxu0 %v13330_v41  ;;  %v13342_v10 = vpack.c.bf16 %v9041_v43, %v9040_v54  ;;  %v9042_v41 = vld [vmem:[%s18968_s3 + $0x2a0] sm:$0xff]  ;;  %v9044_v54 = vld [vmem:[%s18968_s3 + $0x2b0] sm:$0xff]  ;;  %v9045_v43 = vld [vmem:[%s18968_s3 + $0x2b8] sm:$0xff] }
 0x23e   :  { %13335 = vmatprep.subr.bf16.mxu0 %v13334_v21 }
 0x240   :  { %11338 = vmatmul.mubr.f32.gmra.mrb[30].mxu0 %v16423_v61 }
 0x241   :  { %13337 = vmatpush3.bf16.msra.mxu0 %v13334_v21  ;;  %11372 = vmatprep.mubr.f32.mxu0 %v2664_v6  ;;  %v13346_v21 = vpack.c.bf16 %v9043_v5, %v9042_v41  ;;  %v16449_v6 = vld [vmem:[#allocation2 + $0x44] sm:$0xff] }
 0x242   :  { %13339 = vmatprep.subr.bf16.mxu0 %v13338_v4  ;;  %v9047_v41 = vld [vmem:[%s18968_s3 + $0x2c8] sm:$0xff] }
 0x243   :  { %v16459_v5 = vld [vmem:[#allocation2 + $0x64] sm:$0xff] }
 0x244   :  { %11373 = vmatmul.mubr.f32.vlgmr.msra.gmra.mrb[16].mxu0 %v15975_v56  ;;  %v13350_v56 = vpack.c.bf16 %v9045_v43, %v9044_v54  ;;  %v9049_v54 = vld [vmem:[%s18968_s3 + $0x2d8] sm:$0xff]  ;;  %v2672_v43 = vld [vmem:[#allocation2 + $0xc4] sm:$0xff] }
 0x245   :  { %11375 = vmatprep.mubr.f32.mxu0 %v16439_v38  ;;  %13341 = vmatpush3.bf16.msra.mxu0 %v13338_v4  ;;  %v9046_v4 = vld [vmem:[%s18968_s3 + $0x2c0] sm:$0xff] }
 0x246   :  { %13343 = vmatprep.subr.bf16.mxu0 %v13342_v10 }
 0x248   :  { %11376 = vmatmul.mubr.f32.gmra.mrb[18].mxu0 %v15981_v58  ;;  %v13354_v58 = vpack.c.bf16 %v9047_v41, %v9046_v4  ;;  %v9051_v4 = vld [vmem:[%s18968_s3 + $0x2e8] sm:$0xff] }
 0x249   :  { %11378 = vmatprep.mubr.f32.mxu0 %v16449_v6  ;;  %13345 = vmatpush3.bf16.msra.mxu0 %v13342_v10  ;;  %v9048_v10 = vld [vmem:[%s18968_s3 + $0x2d0] sm:$0xff]  ;;  %v16476_v41 = vld [vmem:[#allocation2 + $0xe4] sm:$0xff] }
 0x24a   :  { %13347 = vmatprep.subr.bf16.mxu0 %v13346_v21 }
 0x24c   :  { %11379 = vmatmul.mubr.f32.gmra.mrb[20].mxu0 %v16012_v57  ;;  %v13358_v57 = vpack.c.bf16 %v9049_v54, %v9048_v10  ;;  %v9053_v10 = vld [vmem:[%s18968_s3 + $0x2f8] sm:$0xff]  ;;  %v16486_v54 = vld [vmem:[#allocation2 + $0x104] sm:$0xff] }
 0x24d   :  { %11381 = vmatprep.mubr.f32.mxu0 %v16459_v5  ;;  %13349 = vmatpush3.bf16.msra.mxu0 %v13346_v21  ;;  %v9050_v21 = vld [vmem:[%s18968_s3 + $0x2e0] sm:$0xff] }
 0x24e   :  { %13351 = vmatprep.subr.bf16.mxu0 %v13350_v56 }
 0x250   :  { %11382 = vmatmul.mubr.f32.gmra.mrb[22].mxu0 %v16024_v59  ;;  %v13362_v59 = vpack.c.bf16 %v9051_v4, %v9050_v21  ;;  %v16496_v21 = vld [vmem:[#allocation2 + $0x124] sm:$0xff]  ;;  %v9057_v4 = vld [vmem:[%s18968_s3 + $0x318] sm:$0xff] }
 0x251   :  { %11384 = vmatprep.mubr.f32.mxu0 %v2672_v43  ;;  %13353 = vmatpush3.bf16.msra.mxu0 %v13350_v56  ;;  %v9052_v56 = vld [vmem:[%s18968_s3 + $0x2f0] sm:$0xff]  ;;  %v9055_v43 = vld [vmem:[%s18968_s3 + $0x308] sm:$0xff] }
 0x252   :  { %13355 = vmatprep.subr.bf16.mxu0 %v13354_v58 }
 0x254   :  { %11385 = vmatmul.mubr.f32.gmra.mrb[24].mxu0 %v16092_v22  ;;  %v13366_v22 = vpack.c.bf16 %v9053_v10, %v9052_v56  ;;  %v16507_v56 = vld [vmem:[#allocation2 + $0x20] sm:$0xff]  ;;  %v9059_v10 = vld [vmem:[%s18968_s3 + $0x328] sm:$0xff] }
 0x255   :  { %11387 = vmatprep.mubr.f32.mxu0 %v16476_v41  ;;  %13357 = vmatpush3.bf16.msra.mxu0 %v13354_v58  ;;  %v9054_v58 = vld [vmem:[%s18968_s3 + $0x300] sm:$0xff] }
 0x256   :  { %13359 = vmatprep.subr.bf16.mxu0 %v13358_v57 }
 0x258   :  { %11388 = vmatmul.mubr.f32.gmra.mrb[26].mxu0 %v16100_v60  ;;  %v13370_v60 = vpack.c.bf16 %v9055_v43, %v9054_v58  ;;  %v9061_v58 = vld [vmem:[%s18968_s3 + $0x338] sm:$0xff]  ;;  %v16527_v43 = vld [vmem:[#allocation2 + $0x60] sm:$0xff] }
 0x259   :  { %11390 = vmatprep.mubr.f32.mxu0 %v16486_v54  ;;  %13361 = vmatpush3.bf16.msra.mxu0 %v13358_v57  ;;  %v9056_v57 = vld [vmem:[%s18968_s3 + $0x310] sm:$0xff] }
 0x25a   :  { %13363 = vmatprep.subr.bf16.mxu0 %v13362_v59 }
 0x25c   :  { %11391 = vmatmul.mubr.f32.gmra.mrb[28].mxu0 %v16122_v50  ;;  %v13374_v50 = vpack.c.bf16 %v9057_v4, %v9056_v57  ;;  %v9063_v57 = vld [vmem:[%s18968_s3 + $0x348] sm:$0xff]  ;;  %v9064_v4 = vld [vmem:[%s18968_s3 + $0x350] sm:$0xff] }
 0x25d   :  { %11393 = vmatprep.mubr.f32.mxu0 %v16496_v21  ;;  %13365 = vmatpush3.bf16.msra.mxu0 %v13362_v59  ;;  %v9058_v59 = vld [vmem:[%s18968_s3 + $0x320] sm:$0xff] }
 0x25e   :  { %13367 = vmatprep.subr.bf16.mxu0 %v13366_v22 }
 0x260   :  { %11394 = vmatmul.mubr.f32.gmra.mrb[30].mxu0 %v16133_v48  ;;  %v13378_v48 = vpack.c.bf16 %v9059_v10, %v9058_v59  ;;  %v9067_v10 = vld [vmem:[%s18968_s3 + $0x368] sm:$0xff] }
 0x261   :  { %13369 = vmatpush3.bf16.msra.mxu0 %v13366_v22  ;;  %11428 = vmatprep.mubr.f32.mxu0 %v16172_v52  ;;  %v16517_v52 = vld [vmem:[#allocation2 + $0x40] sm:$0xff]  ;;  %v9060_v22 = vld [vmem:[%s18968_s3 + $0x330] sm:$0xff] }
 0x262   :  { %13371 = vmatprep.subr.bf16.mxu0 %v13370_v60 }
 0x264   :  { %11429 = vmatmul.mubr.f32.vlgmr.msra.gmra.mrb[16].mxu0 %v16507_v56 }
 0x265   :  { %11431 = vmatprep.mubr.f32.mxu0 %v16183_v29  ;;  %13373 = vmatpush3.bf16.msra.mxu0 %v13370_v60  ;;  %v13382_v29 = vpack.c.bf16 %v9061_v58, %v9060_v22  ;;  %v9062_v60 = vld [vmem:[%s18968_s3 + $0x340] sm:$0xff]  ;;  %v9071_v22 = vld [vmem:[%s18968_s3 + $0x388] sm:$0xff]  ;;  %v9073_v58 = vld [vmem:[%s18968_s3 + $0x398] sm:$0xff] }
 0x266   :  { %13375 = vmatprep.subr.bf16.mxu0 %v13374_v50 }
 0x268   :  { %11432 = vmatmul.mubr.f32.gmra.mrb[18].mxu0 %v16517_v52 }
 0x269   :  { %11434 = vmatprep.mubr.f32.mxu0 %v16193_v49  ;;  %13377 = vmatpush3.bf16.msra.mxu0 %v13374_v50  ;;  %v13386_v49 = vpack.c.bf16 %v9063_v57, %v9062_v60  ;;  %v9065_v50 = vld [vmem:[%s18968_s3 + $0x358] sm:$0xff]  ;;  %v16576_v60 = vld [vmem:[#allocation2 + $0x21] sm:$0xff] }
 0x26a   :  { %13379 = vmatprep.subr.bf16.mxu0 %v13378_v48  ;;  %v13390_v59 = vpack.c.bf16 %v9065_v50, %v9064_v4  ;;  %v9075_v57 = vld [vmem:[%s18968_s3 + $0x3a8] sm:$0xff]  ;;  %v9076_v50 = vld [vmem:[%s18968_s3 + $0x3b0] sm:$0xff] }
 0x26b   :  { %v16588_v4 = vld [vmem:[#allocation2 + $0x41] sm:$0xff] }
 0x26c   :  { %11435 = vmatmul.mubr.f32.gmra.mrb[20].mxu0 %v16527_v43 }
 0x26d   :  { %11437 = vmatprep.mubr.f32.mxu0 %v16203_v7  ;;  %13381 = vmatpush3.bf16.msra.mxu0 %v13378_v48  ;;  %v9066_v7 = vld [vmem:[%s18968_s3 + $0x360] sm:$0xff]  ;;  %v9069_v48 = vld [vmem:[%s18968_s3 + $0x378] sm:$0xff] }
 0x26e   :  { %13383 = vmatprep.subr.bf16.mxu0 %v13382_v29 }
 0x270   :  { %11438 = vmatmul.mubr.f32.gmra.mrb[22].mxu0 %v16039_v24  ;;  %v13394_v24 = vpack.c.bf16 %v9067_v10, %v9066_v7  ;;  %v16597_v7 = vld [vmem:[#allocation2 + $0x51] sm:$0xff] }
 0x271   :  { %11440 = vmatprep.mubr.f32.mxu0 %v16213_v39  ;;  %13385 = vmatpush3.bf16.msra.mxu0 %v13382_v29  ;;  %v9068_v39 = vld [vmem:[%s18968_s3 + $0x370] sm:$0xff] }
 0x272   :  { %13387 = vmatprep.subr.bf16.mxu0 %v13386_v49  ;;  %v3052_v29 = vld [vmem:[#allocation2 + $0x11] sm:$0xff] }
 0x274   :  { %11441 = vmatmul.mubr.f32.gmra.mrb[24].mxu0 %v16083_v32  ;;  %v13398_v32 = vpack.c.bf16 %v9069_v48, %v9068_v39  ;;  %v9078_v39 = vld [vmem:[%s18968_s3 + $0x3c0] sm:$0xff]  ;;  %v9079_v48 = vld [vmem:[%s18968_s3 + $0x3c8] sm:$0xff] }
 0x275   :  { %11443 = vmatprep.mubr.f32.mxu0 %v16223_v18  ;;  %13389 = vmatpush3.bf16.msra.mxu0 %v13386_v49  ;;  %v9070_v18 = vld [vmem:[%s18968_s3 + $0x380] sm:$0xff]  ;;  %v16585_v49 = vld [vmem:[#allocation2 + $0x31] sm:$0xff] }
 0x276   :  { %13391 = vmatprep.subr.bf16.mxu0 %v13390_v59 }
 0x278   :  { %11444 = vmatmul.mubr.f32.gmra.mrb[26].mxu0 %v16110_v42  ;;  %v13402_v42 = vpack.c.bf16 %v9071_v22, %v9070_v18  ;;  %v13418_v18 = vpack.c.bf16 %v9079_v48, %v9078_v39  ;;  %v16612_v22 = vld [vmem:[#allocation2 + $0x81] sm:$0xff]  ;;  %v9093_v48 = vld [vmem:[%s18968_s3 + $0x438] sm:$0xff] }
 0x279   :  { %11446 = vmatprep.mubr.f32.mxu0 %v16233_v20  ;;  %13393 = vmatpush3.bf16.msra.mxu0 %v13390_v59  ;;  %v9072_v20 = vld [vmem:[%s18968_s3 + $0x390] sm:$0xff]  ;;  %v9077_v59 = vld [vmem:[%s18968_s3 + $0x3b8] sm:$0xff] }
 0x27a   :  { %13395 = vmatprep.subr.bf16.mxu0 %v13394_v24  ;;  %v13414_v10 = vpack.c.bf16 %v9077_v59, %v9076_v50  ;;  %v16646_v50 = vld [vmem:[#allocation2 + $0x141] sm:$0xff]  ;;  %v9089_v59 = vld [vmem:[%s18968_s3 + $0x418] sm:$0xff] }
 0x27c   :  { %11447 = vmatmul.mubr.f32.gmra.mrb[28].mxu0 %v16118_v23  ;;  %v13406_v23 = vpack.c.bf16 %v9073_v58, %v9072_v20  ;;  %v9081_v20 = vld [vmem:[%s18968_s3 + $0x3d8] sm:$0xff] }
 0x27d   :  { %11449 = vmatprep.mubr.f32.mxu0 %v16243_v30  ;;  %13397 = vmatpush3.bf16.msra.mxu0 %v13394_v24  ;;  %v9074_v30 = vld [vmem:[%s18968_s3 + $0x3a0] sm:$0xff] }
 0x27e   :  { %13399 = vmatprep.subr.bf16.mxu0 %v13398_v32  ;;  %v16600_v24 = vld [vmem:[#allocation2 + $0x61] sm:$0xff] }
 0x280   :  { %11450 = vmatmul.mubr.f32.gmra.mrb[30].mxu0 %v16146_v34  ;;  %v13410_v34 = vpack.c.bf16 %v9075_v57, %v9074_v30  ;;  %v9085_v57 = vld [vmem:[%s18968_s3 + $0x3f8] sm:$0xff] }
 0x281   :  { %13401 = vmatpush3.bf16.msra.mxu0 %v13398_v32  ;;  %11484 = vmatprep.mubr.f32.mxu0 %v3052_v29  ;;  %v16609_v32 = vld [vmem:[#allocation2 + $0x71] sm:$0xff]  ;;  %v9082_v29 = vld [vmem:[%s18968_s3 + $0x3e0] sm:$0xff] }
 0x282   :  { %13403 = vmatprep.subr.bf16.mxu0 %v13402_v42 }
 0x284   :  { %11485 = vmatmul.mubr.f32.vlgmr.msra.gmra.mrb[16].mxu0 %v16576_v60 }
 0x285   :  { %11487 = vmatprep.mubr.f32.mxu0 %v16585_v49  ;;  %13405 = vmatpush3.bf16.msra.mxu0 %v13402_v42  ;;  %v9080_v42 = vld [vmem:[%s18968_s3 + $0x3d0] sm:$0xff] }
 0x286   :  { %13407 = vmatprep.subr.bf16.mxu0 %v13406_v23  ;;  %v13422_v58 = vpack.c.bf16 %v9081_v20, %v9080_v42  ;;  %v16680_v42 = vld [vmem:[#allocation2 + $0x82] sm:$0xff]  ;;  %v9097_v20 = vld [vmem:[%s18968_s3 + $0x458] sm:$0xff] }
 0x288   :  { %11488 = vmatmul.mubr.f32.gmra.mrb[18].mxu0 %v16588_v4 }
 0x289   :  { %11490 = vmatprep.mubr.f32.mxu0 %v16597_v7  ;;  %13409 = vmatpush3.bf16.msra.mxu0 %v13406_v23  ;;  %v9083_v23 = vld [vmem:[%s18968_s3 + $0x3e8] sm:$0xff] }
 0x28a   :  { %13411 = vmatprep.subr.bf16.mxu0 %v13410_v34  ;;  %v13426_v30 = vpack.c.bf16 %v9083_v23, %v9082_v29  ;;  %v9101_v23 = vld [vmem:[%s18968_s3 + $0x478] sm:$0xff] }
 0x28c   :  { %11491 = vmatmul.mubr.f32.gmra.mrb[20].mxu0 %v16600_v24 }
 0x28d   :  { %11493 = vmatprep.mubr.f32.mxu0 %v16609_v32  ;;  %13413 = vmatpush3.bf16.msra.mxu0 %v13410_v34  ;;  %v9087_v34 = vld [vmem:[%s18968_s3 + $0x408] sm:$0xff] }
 0x28e   :  { %13415 = vmatprep.subr.bf16.mxu0 %v13414_v10 }
 0x290   :  { %11494 = vmatmul.mubr.f32.gmra.mrb[22].mxu0 %v16612_v22 }
 0x291   :  { %11496 = vmatprep.mubr.f32.mxu0 %v16113_v3  ;;  %13417 = vmatpush3.bf16.msra.mxu0 %v13414_v10  ;;  %v9084_v3 = vld [vmem:[%s18968_s3 + $0x3f0] sm:$0xff]  ;;  %v9091_v10 = vld [vmem:[%s18968_s3 + $0x428] sm:$0xff] }
 0x292   :  { %13419 = vmatprep.subr.bf16.mxu0 %v13418_v18 }
 0x294   :  { %11497 = vmatmul.mubr.f32.gmra.mrb[24].mxu0 %v16126_v25  ;;  %v13430_v25 = vpack.c.bf16 %v9085_v57, %v9084_v3  ;;  %v16714_v3 = vld [vmem:[#allocation2 + $0x142] sm:$0xff]  ;;  %v9105_v57 = vld [vmem:[%s18968_s3 + $0x498] sm:$0xff] }
 0x295   :  { %11499 = vmatprep.mubr.f32.mxu0 %v16128_v37  ;;  %13421 = vmatpush3.bf16.msra.mxu0 %v13418_v18  ;;  %v9086_v37 = vld [vmem:[%s18968_s3 + $0x400] sm:$0xff]  ;;  %v9095_v18 = vld [vmem:[%s18968_s3 + $0x448] sm:$0xff] }
 0x296   :  { %13423 = vmatprep.subr.bf16.mxu0 %v13422_v58 }
 0x298   :  { %11500 = vmatmul.mubr.f32.gmra.mrb[26].mxu0 %v16140_v28  ;;  %v13434_v28 = vpack.c.bf16 %v9087_v34, %v9086_v37  ;;  %v9109_v34 = vld [vmem:[%s18968_s3 + $0x4b8] sm:$0xff] }
 0x299   :  { %11502 = vmatprep.mubr.f32.mxu0 %v16149_v1  ;;  %13425 = vmatpush3.bf16.msra.mxu0 %v13422_v58  ;;  %v9088_v1 = vld [vmem:[%s18968_s3 + $0x410] sm:$0xff]  ;;  %v9099_v58 = vld [vmem:[%s18968_s3 + $0x468] sm:$0xff] }
 0x29a   :  { %13427 = vmatprep.subr.bf16.mxu0 %v13426_v30 }
 0x29c   :  { %11503 = vmatmul.mubr.f32.gmra.mrb[28].mxu0 %v16157_v46  ;;  %v13438_v46 = vpack.c.bf16 %v9089_v59, %v9088_v1  ;;  %v16748_v1 = vld [vmem:[#allocation2 + $0x83] sm:$0xff]  ;;  %v9113_v59 = vld [vmem:[%s18968_s3 + $0x4d8] sm:$0xff] }
 0x29d   :  { %11505 = vmatprep.mubr.f32.mxu0 %v16159_v53  ;;  %13429 = vmatpush3.bf16.msra.mxu0 %v13426_v30  ;;  %v9090_v53 = vld [vmem:[%s18968_s3 + $0x420] sm:$0xff]  ;;  %v9103_v30 = vld [vmem:[%s18968_s3 + $0x488] sm:$0xff] }
 0x29e   :  { %13431 = vmatprep.subr.bf16.mxu0 %v13430_v25  ;;  %v13442_v39 = vpack.c.bf16 %v9091_v10, %v9090_v53  ;;  %v9117_v10 = vld [vmem:[%s18968_s3 + $0x4f8] sm:$0xff] }
 0x2a0   :  { %11506 = vmatmul.mubr.f32.gmra.mrb[30].mxu0 %v16646_v50 }
 0x2a1   :  { %13433 = vmatpush3.bf16.msra.mxu0 %v13430_v25  ;;  %11540 = vmatprep.mubr.f32.mxu0 %v16252_v40  ;;  %v9092_v40 = vld [vmem:[%s18968_s3 + $0x430] sm:$0xff]  ;;  %v9107_v25 = vld [vmem:[%s18968_s3 + $0x4a8] sm:$0xff] }
 0x2a2   :  { %13435 = vmatprep.subr.bf16.mxu0 %v13434_v28 }
 0x2a4   :  { %11541 = vmatmul.mubr.f32.vlgmr.msra.gmra.mrb[16].mxu0 %v16261_v12  ;;  %v13446_v12 = vpack.c.bf16 %v9093_v48, %v9092_v40  ;;  %v18991_v40 = vld [vmem:[#allocation7_spill] sm:$0xff] }
 0x2a5   :  { %11543 = vmatprep.mubr.f32.mxu0 %v16264_v55  ;;  %13437 = vmatpush3.bf16.msra.mxu0 %v13434_v28  ;;  %v9094_v55 = vld [vmem:[%s18968_s3 + $0x440] sm:$0xff]  ;;  %v9111_v28 = vld [vmem:[%s18968_s3 + $0x4c8] sm:$0xff] }
 0x2a6   :  { %13439 = vmatprep.subr.bf16.mxu0 %v13438_v46  ;;  %v16782_v48 = vld [vmem:[#allocation2 + $0x143] sm:$0xff] }
 0x2a8   :  { %11544 = vmatmul.mubr.f32.gmra.mrb[18].mxu0 %v16273_v17  ;;  %v13450_v17 = vpack.c.bf16 %v9095_v18, %v9094_v55  ;;  %v3634_v55 = vld [vmem:[#allocation2 + $0x14] sm:$0xff]  ;;  %v9122_v18 = vld [vmem:[%s18968_s3 + $0x520] sm:$0xff] }
 0x2a9   :  { %11546 = vmatprep.mubr.f32.mxu0 %v16276_v36  ;;  %13441 = vmatpush3.bf16.msra.mxu0 %v13438_v46  ;;  %v9096_v36 = vld [vmem:[%s18968_s3 + $0x450] sm:$0xff]  ;;  %v9115_v46 = vld [vmem:[%s18968_s3 + $0x4e8] sm:$0xff] }
 0x2aa   :  { %13443 = vmatprep.subr.bf16.mxu0 %v13442_v39 }
 0x2ac   :  { %11547 = vmatmul.mubr.f32.gmra.mrb[20].mxu0 %v16285_v47  ;;  %v13454_v47 = vpack.c.bf16 %v9097_v20, %v9096_v36  ;;  %v16798_v36 = vld [vmem:[#allocation2 + $0x34] sm:$0xff] }
 0x2ad   :  { %11549 = vmatprep.mubr.f32.mxu0 %v16288_v19  ;;  %13445 = vmatpush3.bf16.msra.mxu0 %v13442_v39  ;;  %v9098_v19 = vld [vmem:[%s18968_s3 + $0x460] sm:$0xff]  ;;  %v9119_v39 = vld [vmem:[%s18968_s3 + $0x508] sm:$0xff] }
 0x2ae   :  { %13447 = vmatprep.subr.bf16.mxu0 %v13446_v12  ;;  %v13458_v29 = vpack.c.bf16 %v9099_v58, %v9098_v19  ;;  %v9125_v19 = vld [vmem:[%s18968_s3 + $0x538] sm:$0xff] }
 0x2af   :  { %v16808_v58 = vld [vmem:[#allocation2 + $0x54] sm:$0xff] }
 0x2b0   :  { %11550 = vmatmul.mubr.f32.gmra.mrb[22].mxu0 %v16680_v42 }
 0x2b1   :  { %11552 = vmatprep.mubr.f32.mxu0 %v16297_v44  ;;  %13449 = vmatpush3.bf16.msra.mxu0 %v13446_v12  ;;  %v9100_v44 = vld [vmem:[%s18968_s3 + $0x470] sm:$0xff]  ;;  %v9121_v12 = vld [vmem:[%s18968_s3 + $0x518] sm:$0xff] }
 0x2b2   :  { %13451 = vmatprep.subr.bf16.mxu0 %v13450_v17 }
 0x2b4   :  { %11553 = vmatmul.mubr.f32.gmra.mrb[24].mxu0 %v16306_v45  ;;  %v13462_v45 = vpack.c.bf16 %v9101_v23, %v9100_v44  ;;  %v9127_v44 = vld [vmem:[%s18968_s3 + $0x548] sm:$0xff]  ;;  %v16818_v23 = vld [vmem:[#allocation2 + $0x74] sm:$0xff] }
 0x2b5   :  { %11555 = vmatprep.mubr.f32.mxu0 %v16309_v14  ;;  %13453 = vmatpush3.bf16.msra.mxu0 %v13450_v17  ;;  %v9102_v14 = vld [vmem:[%s18968_s3 + $0x480] sm:$0xff]  ;;  %v9123_v17 = vld [vmem:[%s18968_s3 + $0x528] sm:$0xff] }
 0x2b6   :  { %13455 = vmatprep.subr.bf16.mxu0 %v13454_v47  ;;  %v13506_v20 = vpack.c.bf16 %v9123_v17, %v9122_v18  ;;  %v9146_v18 = vld [vmem:[%s18968_s3 + $0x5e0] sm:$0xff]  ;;  %v9147_v17 = vld [vmem:[%s18968_s3 + $0x5e8] sm:$0xff] }
 0x2b8   :  { %11556 = vmatmul.mubr.f32.gmra.mrb[26].mxu0 %v16318_v26  ;;  %v13466_v26 = vpack.c.bf16 %v9103_v30, %v9102_v14  ;;  %v9128_v14 = vld [vmem:[%s18968_s3 + $0x550] sm:$0xff]  ;;  %v9129_v30 = vld [vmem:[%s18968_s3 + $0x558] sm:$0xff] }
 0x2b9   :  { %11558 = vmatprep.mubr.f32.mxu0 %v16321_v31  ;;  %13457 = vmatpush3.bf16.msra.mxu0 %v13454_v47  ;;  %v9104_v31 = vld [vmem:[%s18968_s3 + $0x490] sm:$0xff] }
 0x2ba   :  { %13459 = vmatprep.subr.bf16.mxu0 %v13458_v29  ;;  %v9124_v47 = vld [vmem:[%s18968_s3 + $0x530] sm:$0xff] }
 0x2bc   :  { %11559 = vmatmul.mubr.f32.gmra.mrb[28].mxu0 %v16330_v35  ;;  %v13470_v35 = vpack.c.bf16 %v9105_v57, %v9104_v31  ;;  %v9130_v31 = vld [vmem:[%s18968_s3 + $0x560] sm:$0xff]  ;;  %v9131_v57 = vld [vmem:[%s18968_s3 + $0x568] sm:$0xff] }
 0x2bd   :  { %11561 = vmatprep.mubr.f32.mxu0 %v16333_v33  ;;  %13461 = vmatpush3.bf16.msra.mxu0 %v13458_v29  ;;  %v9106_v33 = vld [vmem:[%s18968_s3 + $0x4a0] sm:$0xff] }
 0x2be   :  { %13463 = vmatprep.subr.bf16.mxu0 %v13462_v45  ;;  %v13474_v37 = vpack.c.bf16 %v9107_v25, %v9106_v33  ;;  %v9126_v29 = vld [vmem:[%s18968_s3 + $0x540] sm:$0xff]  ;;  %v13522_v33 = vpack.c.bf16 %v9131_v57, %v9130_v31  ;;  %v9132_v25 = vld [vmem:[%s18968_s3 + $0x570] sm:$0xff] }
 0x2bf   :  { %v16947_v57 = vld [vmem:[#allocation2 + $0x150] sm:$0xff] }
 0x2c0   :  { %11562 = vmatmul.mubr.f32.gmra.mrb[30].mxu0 %v16714_v3 }
 0x2c1   :  { %13465 = vmatpush3.bf16.msra.mxu0 %v13462_v45  ;;  %11596 = vmatprep.mubr.f32.mxu0 %v16342_v51  ;;  %v9108_v51 = vld [vmem:[%s18968_s3 + $0x4b0] sm:$0xff]  ;;  %v16821_v45 = vld [vmem:[#allocation2 + $0x84] sm:$0xff] }
 0x2c2   :  { %13467 = vmatprep.subr.bf16.mxu0 %v13466_v26 }
 0x2c4   :  { %11597 = vmatmul.mubr.f32.vlgmr.msra.gmra.mrb[16].mxu0 %v16351_v63  ;;  %v13478_v63 = vpack.c.bf16 %v9109_v34, %v9108_v51  ;;  %v16847_v51 = vld [vmem:[#allocation2 + $0x114] sm:$0xff]  ;;  %v9134_v34 = vld [vmem:[%s18968_s3 + $0x580] sm:$0xff] }
 0x2c5   :  { %11599 = vmatprep.mubr.f32.mxu0 %v16354_v13  ;;  %13469 = vmatpush3.bf16.msra.mxu0 %v13466_v26  ;;  %v9110_v13 = vld [vmem:[%s18968_s3 + $0x4c0] sm:$0xff]  ;;  %v13518_v26 = vpack.c.bf16 %v9129_v30, %v9128_v14  ;;  %v16935_v14 = vld [vmem:[#allocation2 + $0x130] sm:$0xff] }
 0x2c6   :  { %13471 = vmatprep.subr.bf16.mxu0 %v13470_v35  ;;  %v9150_v30 = vld [vmem:[%s18968_s3 + $0x600] sm:$0xff] }
 0x2c8   :  { %11600 = vmatmul.mubr.f32.gmra.mrb[18].mxu0 %v16363_v27  ;;  %v13482_v27 = vpack.c.bf16 %v9111_v28, %v9110_v13  ;;  %v16857_v13 = vld [vmem:[#allocation2 + $0x134] sm:$0xff]  ;;  %v16860_v28 = vld [vmem:[#allocation2 + $0x144] sm:$0xff] }
 0x2c9   :  { %11602 = vmatprep.mubr.f32.mxu0 %v16366_v11  ;;  %13473 = vmatpush3.bf16.msra.mxu0 %v13470_v35  ;;  %v9112_v11 = vld [vmem:[%s18968_s3 + $0x4d0] sm:$0xff] }
 0x2ca   :  { %13475 = vmatprep.subr.bf16.mxu0 %v13474_v37  ;;  %v16837_v35 = vld [vmem:[#allocation2 + $0xf4] sm:$0xff] }
 0x2cc   :  { %11603 = vmatmul.mubr.f32.gmra.mrb[20].mxu0 %v16375_v15  ;;  %v13486_v15 = vpack.c.bf16 %v9113_v59, %v9112_v11  ;;  %v9137_v11 = vld [vmem:[%s18968_s3 + $0x598] sm:$0xff]  ;;  %v16870_v59 = vld [vmem:[#allocation2 + $0x30] sm:$0xff] }
 0x2cd   :  { %11605 = vmatprep.mubr.f32.mxu0 %v16378_v2  ;;  %13477 = vmatpush3.bf16.msra.mxu0 %v13474_v37  ;;  %v9114_v2 = vld [vmem:[%s18968_s3 + $0x4e0] sm:$0xff]  ;;  %v9133_v37 = vld [vmem:[%s18968_s3 + $0x578] sm:$0xff] }
 0x2ce   :  { %13479 = vmatprep.subr.bf16.mxu0 %v13478_v63  ;;  %v13490_v53 = vpack.c.bf16 %v9115_v46, %v9114_v2  ;;  %v9139_v2 = vld [vmem:[%s18968_s3 + $0x5a8] sm:$0xff] }
 0x2d0   :  { %11606 = vmatmul.mubr.f32.gmra.mrb[22].mxu0 %v16748_v1 }
 0x2d1   :  { %11608 = vmatprep.mubr.f32.mxu0 %v16387_v62  ;;  %13481 = vmatpush3.bf16.msra.mxu0 %v13478_v63  ;;  %v9116_v62 = vld [vmem:[%s18968_s3 + $0x4f0] sm:$0xff]  ;;  %v9135_v63 = vld [vmem:[%s18968_s3 + $0x588] sm:$0xff] }
 0x2d2   :  { %13483 = vmatprep.subr.bf16.mxu0 %v13482_v27 }
 0x2d4   :  { %11609 = vmatmul.mubr.f32.gmra.mrb[24].mxu0 %v16396_v16  ;;  %v13494_v16 = vpack.c.bf16 %v9117_v10, %v9116_v62  ;;  %v9141_v62 = vld [vmem:[%s18968_s3 + $0x5b8] sm:$0xff]  ;;  %v16890_v10 = vld [vmem:[#allocation2 + $0x70] sm:$0xff] }
 0x2d5   :  { %11611 = vmatprep.mubr.f32.mxu0 %v16399_v9  ;;  %13485 = vmatpush3.bf16.msra.mxu0 %v13482_v27  ;;  %v9118_v9 = vld [vmem:[%s18968_s3 + $0x500] sm:$0xff]  ;;  %v9136_v27 = vld [vmem:[%s18968_s3 + $0x590] sm:$0xff] }
 0x2d6   :  { %13487 = vmatprep.subr.bf16.mxu0 %v13486_v15 }
 0x2d8   :  { %11612 = vmatmul.mubr.f32.gmra.mrb[26].mxu0 %v16408_v8  ;;  %v13498_v8 = vpack.c.bf16 %v9119_v39, %v9118_v9  ;;  %v9143_v9 = vld [vmem:[%s18968_s3 + $0x5c8] sm:$0xff]  ;;  %v16899_v39 = vld [vmem:[#allocation2 + $0x80] sm:$0xff] }
 0x2d9   :  { %11614 = vmatprep.mubr.f32.mxu0 %v16411_v0  ;;  %13489 = vmatpush3.bf16.msra.mxu0 %v13486_v15  ;;  %v9120_v0 = vld [vmem:[%s18968_s3 + $0x510] sm:$0xff]  ;;  %v9138_v15 = vld [vmem:[%s18968_s3 + $0x5a0] sm:$0xff] }
 0x2da   :  { %13491 = vmatprep.subr.bf16.mxu0 %v13490_v53  ;;  %v13538_v46 = vpack.c.bf16 %v9139_v2, %v9138_v15  ;;  %v4030_v15 = vld [vmem:[#allocation2 + $0xe1] sm:$0xff] }
 0x2db   :  { %v9162_v2 = vld [vmem:[%s18968_s3 + $0x660] sm:$0xff] }
 0x2dc   :  { %11615 = vmatmul.mubr.f32.gmra.mrb[28].mxu0 %v18991_v40  ;;  %v16902_v40 = vld [vmem:[#allocation2 + $0x90] sm:$0xff] }
 0x2dd   :  { %11617 = vmatprep.mubr.f32.mxu0 %v16423_v61  ;;  %13493 = vmatpush3.bf16.msra.mxu0 %v13490_v53  ;;  %v13502_v61 = vpack.c.bf16 %v9121_v12, %v9120_v0  ;;  %v9140_v53 = vld [vmem:[%s18968_s3 + $0x5b0] sm:$0xff]  ;;  %v9145_v0 = vld [vmem:[%s18968_s3 + $0x5d8] sm:$0xff]  ;;  %v3836_v12 = vld [vmem:[#allocation2 + $0xe0] sm:$0xff] }
 0x2de   :  { %13495 = vmatprep.subr.bf16.mxu0 %v13494_v16 }
 0x2e0   :  { %11618 = vmatmul.mubr.f32.gmra.mrb[30].mxu0 %v16782_v48 }
 0x2e1   :  { %13497 = vmatpush3.bf16.msra.mxu0 %v13494_v16  ;;  %11652 = vmatprep.mubr.f32.mxu0 %v3634_v55  ;;  %v9142_v16 = vld [vmem:[%s18968_s3 + $0x5c0] sm:$0xff] }
 0x2e2   :  { %13499 = vmatprep.subr.bf16.mxu0 %v13498_v8 }
 0x2e4   :  { %11653 = vmatmul.mubr.f32.vlgmr.msra.gmra.mrb[16].mxu0 %v16439_v38  ;;  %v13510_v38 = vpack.c.bf16 %v9125_v19, %v9124_v47  ;;  %v13554_v47 = vpack.c.bf16 %v9147_v17, %v9146_v18  ;;  %v16923_v19 = vld [vmem:[#allocation2 + $0x110] sm:$0xff] }
 0x2e5   :  { %11655 = vmatprep.mubr.f32.mxu0 %v16798_v36  ;;  %13501 = vmatpush3.bf16.msra.mxu0 %v13498_v8  ;;  %v9144_v8 = vld [vmem:[%s18968_s3 + $0x5d0] sm:$0xff] }
 0x2e6   :  { %13503 = vmatprep.subr.bf16.mxu0 %v13502_v61  ;;  %v13550_v55 = vpack.c.bf16 %v9145_v0, %v9144_v8  ;;  %v17014_v0 = vld [vmem:[#allocation2 + $0x131] sm:$0xff] }
 0x2e7   :  { %v17024_v17 = vld [vmem:[#allocation2 + $0x151] sm:$0xff] }
 0x2e8   :  { %11656 = vmatmul.mubr.f32.gmra.mrb[18].mxu0 %v16449_v6  ;;  %v13514_v6 = vpack.c.bf16 %v9127_v44, %v9126_v29  ;;  %v9149_v29 = vld [vmem:[%s18968_s3 + $0x5f8] sm:$0xff]  ;;  %v16932_v44 = vld [vmem:[#allocation2 + $0x120] sm:$0xff] }
 0x2e9   :  { %11658 = vmatprep.mubr.f32.mxu0 %v16808_v58  ;;  %13505 = vmatpush3.bf16.msra.mxu0 %v13502_v61  ;;  %v16911_v61 = vld [vmem:[#allocation2 + $0xf0] sm:$0xff] }
 0x2ea   :  { %13507 = vmatprep.subr.bf16.mxu0 %v13506_v20 }
 0x2ec   :  { %11659 = vmatmul.mubr.f32.gmra.mrb[20].mxu0 %v16459_v5  ;;  %v3642_v5 = vld [vmem:[#allocation2 + $0xd4] sm:$0xff] }
 0x2ed   :  { %11661 = vmatprep.mubr.f32.mxu0 %v16818_v23  ;;  %13509 = vmatpush3.bf16.msra.mxu0 %v13506_v20  ;;  %v16920_v20 = vld [vmem:[#allocation2 + $0x100] sm:$0xff] }
 0x2ee   :  { %13511 = vmatprep.subr.bf16.mxu0 %v13510_v38 }
 0x2f0   :  { %11662 = vmatmul.mubr.f32.gmra.mrb[22].mxu0 %v16821_v45 }
 0x2f1   :  { %11664 = vmatprep.mubr.f32.mxu0 %v3642_v5  ;;  %13513 = vmatpush3.bf16.msra.mxu0 %v13510_v38  ;;  %v9148_v38 = vld [vmem:[%s18968_s3 + $0x5f0] sm:$0xff]  ;;  %v9151_v5 = vld [vmem:[%s18968_s3 + $0x608] sm:$0xff] }
 0x2f2   :  { %13515 = vmatprep.subr.bf16.mxu0 %v13514_v6  ;;  %v13562_v31 = vpack.c.bf16 %v9151_v5, %v9150_v30  ;;  %v9170_v30 = vld [vmem:[%s18968_s3 + $0x6a0] sm:$0xff]  ;;  %v9171_v5 = vld [vmem:[%s18968_s3 + $0x6a8] sm:$0xff] }
 0x2f4   :  { %11665 = vmatmul.mubr.f32.gmra.mrb[24].mxu0 %v16476_v41  ;;  %v13526_v41 = vpack.c.bf16 %v9133_v37, %v9132_v25  ;;  %v9153_v25 = vld [vmem:[%s18968_s3 + $0x618] sm:$0xff] }
 0x2f5   :  { %11667 = vmatprep.mubr.f32.mxu0 %v16837_v35  ;;  %13517 = vmatpush3.bf16.msra.mxu0 %v13514_v6  ;;  %v13558_v6 = vpack.c.bf16 %v9149_v29, %v9148_v38  ;;  %v9169_v38 = vld [vmem:[%s18968_s3 + $0x698] sm:$0xff]  ;;  %v4216_v29 = vld [vmem:[#allocation2 + $0x22] sm:$0xff] }
 0x2f6   :  { %13519 = vmatprep.subr.bf16.mxu0 %v13518_v26 }
 0x2f8   :  { %11668 = vmatmul.mubr.f32.gmra.mrb[26].mxu0 %v16486_v54  ;;  %v13530_v54 = vpack.c.bf16 %v9135_v63, %v9134_v34  ;;  %v9155_v34 = vld [vmem:[%s18968_s3 + $0x628] sm:$0xff] }
 0x2f9   :  { %11670 = vmatprep.mubr.f32.mxu0 %v16847_v51  ;;  %13521 = vmatpush3.bf16.msra.mxu0 %v13518_v26  ;;  %v16944_v26 = vld [vmem:[#allocation2 + $0x140] sm:$0xff] }
 0x2fa   :  { %13523 = vmatprep.subr.bf16.mxu0 %v13522_v33 }
 0x2fc   :  { %11671 = vmatmul.mubr.f32.gmra.mrb[28].mxu0 %v16496_v21  ;;  %v13534_v21 = vpack.c.bf16 %v9137_v11, %v9136_v27  ;;  %v9159_v27 = vld [vmem:[%s18968_s3 + $0x648] sm:$0xff]  ;;  %v16981_v11 = vld [vmem:[#allocation2 + $0x91] sm:$0xff] }
 0x2fd   :  { %11673 = vmatprep.mubr.f32.mxu0 %v16857_v13  ;;  %13525 = vmatpush3.bf16.msra.mxu0 %v13522_v33  ;;  %v9152_v33 = vld [vmem:[%s18968_s3 + $0x610] sm:$0xff] }
 0x2fe   :  { %13527 = vmatprep.subr.bf16.mxu0 %v13526_v41  ;;  %v13566_v37 = vpack.c.bf16 %v9153_v25, %v9152_v33  ;;  %v13602_v33 = vpack.c.bf16 %v9171_v5, %v9170_v30  ;;  %v17045_v25 = vld [vmem:[#allocation2 + $0x52] sm:$0xff] }
 0x2ff   :  { %v9184_v30 = vld [vmem:[%s18968_s3 + $0x710] sm:$0xff]  ;;  %v9185_v5 = vld [vmem:[%s18968_s3 + $0x718] sm:$0xff] }
 0x300   :  { %11674 = vmatmul.mubr.f32.gmra.mrb[30].mxu0 %v16860_v28 }
 0x301   :  { %13529 = vmatpush3.bf16.msra.mxu0 %v13526_v41  ;;  %11708 = vmatprep.mubr.f32.mxu0 %v16507_v56  ;;  %v16880_v56 = vld [vmem:[#allocation2 + $0x50] sm:$0xff]  ;;  %v9154_v41 = vld [vmem:[%s18968_s3 + $0x620] sm:$0xff] }
 0x302   :  { %13531 = vmatprep.subr.bf16.mxu0 %v13530_v54  ;;  %v13570_v63 = vpack.c.bf16 %v9155_v34, %v9154_v41  ;;  %v9173_v41 = vld [vmem:[%s18968_s3 + $0x6b8] sm:$0xff]  ;;  %v17054_v34 = vld [vmem:[#allocation2 + $0x62] sm:$0xff] }
 0x304   :  { %11709 = vmatmul.mubr.f32.vlgmr.msra.gmra.mrb[16].mxu0 %v16870_v59 }
 0x305   :  { %11711 = vmatprep.mubr.f32.mxu0 %v16517_v52  ;;  %13533 = vmatpush3.bf16.msra.mxu0 %v13530_v54  ;;  %v13542_v52 = vpack.c.bf16 %v9141_v62, %v9140_v53  ;;  %v9157_v54 = vld [vmem:[%s18968_s3 + $0x638] sm:$0xff]  ;;  %v16999_v53 = vld [vmem:[#allocation2 + $0x101] sm:$0xff] }
 0x306   :  { %13535 = vmatprep.subr.bf16.mxu0 %v13534_v21 }
 0x308   :  { %11712 = vmatmul.mubr.f32.gmra.mrb[18].mxu0 %v16880_v56 }
 0x309   :  { %11714 = vmatprep.mubr.f32.mxu0 %v16527_v43  ;;  %13537 = vmatpush3.bf16.msra.mxu0 %v13534_v21  ;;  %v13546_v43 = vpack.c.bf16 %v9143_v9, %v9142_v16  ;;  %v9161_v21 = vld [vmem:[%s18968_s3 + $0x658] sm:$0xff]  ;;  %v9164_v16 = vld [vmem:[%s18968_s3 + $0x670] sm:$0xff] }
 0x30a   :  { %13539 = vmatprep.subr.bf16.mxu0 %v13538_v46  ;;  %v9165_v9 = vld [vmem:[%s18968_s3 + $0x678] sm:$0xff] }
 0x30b   :  { %v13590_v8 = vpack.c.bf16 %v9165_v9, %v9164_v16  ;;  %v17088_v16 = vld [vmem:[#allocation2 + $0x112] sm:$0xff] }
 0x30c   :  { %11715 = vmatmul.mubr.f32.gmra.mrb[20].mxu0 %v16890_v10  ;;  %v9180_v9 = vld [vmem:[%s18968_s3 + $0x6f0] sm:$0xff] }
 0x30d   :  { %11717 = vmatprep.mubr.f32.mxu0 %v16899_v39  ;;  %13541 = vmatpush3.bf16.msra.mxu0 %v13538_v46  ;;  %v9163_v46 = vld [vmem:[%s18968_s3 + $0x668] sm:$0xff] }
 0x30e   :  { %13543 = vmatprep.subr.bf16.mxu0 %v13542_v52  ;;  %v13586_v62 = vpack.c.bf16 %v9163_v46, %v9162_v2  ;;  %v9179_v2 = vld [vmem:[%s18968_s3 + $0x6e8] sm:$0xff] }
 0x30f   :  { %v17085_v46 = vld [vmem:[#allocation2 + $0x102] sm:$0xff] }
 0x310   :  { %11718 = vmatmul.mubr.f32.gmra.mrb[22].mxu0 %v16902_v40 }
 0x311   :  { %11720 = vmatprep.mubr.f32.mxu0 %v3836_v12  ;;  %13545 = vmatpush3.bf16.msra.mxu0 %v13542_v52  ;;  %v17002_v52 = vld [vmem:[#allocation2 + $0x111] sm:$0xff]  ;;  %v9166_v12 = vld [vmem:[%s18968_s3 + $0x680] sm:$0xff] }
 0x312   :  { %13547 = vmatprep.subr.bf16.mxu0 %v13546_v43 }
 0x314   :  { %11721 = vmatmul.mubr.f32.gmra.mrb[24].mxu0 %v16911_v61 }
 0x315   :  { %11723 = vmatprep.mubr.f32.mxu0 %v16920_v20  ;;  %13549 = vmatpush3.bf16.msra.mxu0 %v13546_v43  ;;  %v17011_v43 = vld [vmem:[#allocation2 + $0x121] sm:$0xff] }
 0x316   :  { %13551 = vmatprep.subr.bf16.mxu0 %v13550_v55 }
 0x318   :  { %11724 = vmatmul.mubr.f32.gmra.mrb[26].mxu0 %v16923_v19 }
 0x319   :  { %11726 = vmatprep.mubr.f32.mxu0 %v16932_v44  ;;  %13553 = vmatpush3.bf16.msra.mxu0 %v13550_v55  ;;  %v9167_v55 = vld [vmem:[%s18968_s3 + $0x688] sm:$0xff] }
 0x31a   :  { %13555 = vmatprep.subr.bf16.mxu0 %v13554_v47  ;;  %v13594_v18 = vpack.c.bf16 %v9167_v55, %v9166_v12  ;;  %v17097_v12 = vld [vmem:[#allocation2 + $0x122] sm:$0xff] }
 0x31c   :  { %11727 = vmatmul.mubr.f32.gmra.mrb[28].mxu0 %v16935_v14 }
 0x31d   :  { %11729 = vmatprep.mubr.f32.mxu0 %v16944_v26  ;;  %13557 = vmatpush3.bf16.msra.mxu0 %v13554_v47  ;;  %v9168_v47 = vld [vmem:[%s18968_s3 + $0x690] sm:$0xff] }
 0x31e   :  { %13559 = vmatprep.subr.bf16.mxu0 %v13558_v6 }
 0x320   :  { %11730 = vmatmul.mubr.f32.gmra.mrb[30].mxu0 %v16947_v57 }
 0x321   :  { %13561 = vmatpush3.bf16.msra.mxu0 %v13558_v6  ;;  %11764 = vmatprep.mubr.f32.mxu0 %v16576_v60  ;;  %v9156_v60 = vld [vmem:[%s18968_s3 + $0x630] sm:$0xff] }
 0x322   :  { %13563 = vmatprep.subr.bf16.mxu0 %v13562_v31  ;;  %v17033_v6 = vld [vmem:[#allocation2 + $0x32] sm:$0xff] }
 0x324   :  { %11765 = vmatmul.mubr.f32.vlgmr.msra.gmra.mrb[16].mxu0 %v16585_v49  ;;  %v13574_v49 = vpack.c.bf16 %v9157_v54, %v9156_v60  ;;  %v17057_v60 = vld [vmem:[#allocation2 + $0x72] sm:$0xff]  ;;  %v9174_v54 = vld [vmem:[%s18968_s3 + $0x6c0] sm:$0xff] }
 0x325   :  { %11767 = vmatprep.mubr.f32.mxu0 %v16588_v4  ;;  %13565 = vmatpush3.bf16.msra.mxu0 %v13562_v31  ;;  %v9158_v4 = vld [vmem:[%s18968_s3 + $0x640] sm:$0xff] }
 0x326   :  { %13567 = vmatprep.subr.bf16.mxu0 %v13566_v37  ;;  %v17042_v31 = vld [vmem:[#allocation2 + $0x42] sm:$0xff] }
 0x328   :  { %11768 = vmatmul.mubr.f32.gmra.mrb[18].mxu0 %v16597_v7  ;;  %v13578_v7 = vpack.c.bf16 %v9159_v27, %v9158_v4  ;;  %v17067_v27 = vld [vmem:[#allocation2 + $0x92] sm:$0xff] }
 0x329   :  { %11770 = vmatprep.mubr.f32.mxu0 %v16600_v24  ;;  %13569 = vmatpush3.bf16.msra.mxu0 %v13566_v37  ;;  %v9160_v24 = vld [vmem:[%s18968_s3 + $0x650] sm:$0xff] }
 0x32a   :  { %13571 = vmatprep.subr.bf16.mxu0 %v13570_v63  ;;  %v9172_v37 = vld [vmem:[%s18968_s3 + $0x6b0] sm:$0xff] }
 0x32c   :  { %11771 = vmatmul.mubr.f32.gmra.mrb[20].mxu0 %v16609_v32  ;;  %v13582_v32 = vpack.c.bf16 %v9161_v21, %v9160_v24  ;;  %v9177_v24 = vld [vmem:[%s18968_s3 + $0x6d8] sm:$0xff]  ;;  %v4224_v21 = vld [vmem:[#allocation2 + $0xe2] sm:$0xff] }
 0x32d   :  { %11773 = vmatprep.mubr.f32.mxu0 %v16612_v22  ;;  %13573 = vmatpush3.bf16.msra.mxu0 %v13570_v63  ;;  %v16990_v22 = vld [vmem:[#allocation2 + $0xf1] sm:$0xff]  ;;  %v13606_v63 = vpack.c.bf16 %v9173_v41, %v9172_v37  ;;  %v9186_v41 = vld [vmem:[%s18968_s3 + $0x720] sm:$0xff] }
 0x32e   :  { %13575 = vmatprep.subr.bf16.mxu0 %v13574_v49  ;;  %v17119_v37 = vld [vmem:[#allocation2 + $0x33] sm:$0xff] }
 0x330   :  { %11774 = vmatmul.mubr.f32.gmra.mrb[22].mxu0 %v16981_v11 }
 0x331   :  { %11776 = vmatprep.mubr.f32.mxu0 %v4030_v15  ;;  %13577 = vmatpush3.bf16.msra.mxu0 %v13574_v49  ;;  %v9175_v49 = vld [vmem:[%s18968_s3 + $0x6c8] sm:$0xff]  ;;  %v17076_v15 = vld [vmem:[#allocation2 + $0xf2] sm:$0xff] }
 0x332   :  { %13579 = vmatprep.subr.bf16.mxu0 %v13578_v7  ;;  %v13610_v4 = vpack.c.bf16 %v9175_v49, %v9174_v54  ;;  %v17128_v54 = vld [vmem:[#allocation2 + $0x43] sm:$0xff] }
 0x334   :  { %11777 = vmatmul.mubr.f32.gmra.mrb[24].mxu0 %v16990_v22 }
 0x335   :  { %11779 = vmatprep.mubr.f32.mxu0 %v16999_v53  ;;  %13581 = vmatpush3.bf16.msra.mxu0 %v13578_v7  ;;  %v9176_v7 = vld [vmem:[%s18968_s3 + $0x6d0] sm:$0xff] }
 0x336   :  { %13583 = vmatprep.subr.bf16.mxu0 %v13582_v32 }
 0x338   :  { %11780 = vmatmul.mubr.f32.gmra.mrb[26].mxu0 %v17002_v52 }
 0x339   :  { %11782 = vmatprep.mubr.f32.mxu0 %v17011_v43  ;;  %13585 = vmatpush3.bf16.msra.mxu0 %v13582_v32  ;;  %v9178_v32 = vld [vmem:[%s18968_s3 + $0x6e0] sm:$0xff] }
 0x33a   :  { %13587 = vmatprep.subr.bf16.mxu0 %v13586_v62 }
 0x33c   :  { %11783 = vmatmul.mubr.f32.gmra.mrb[28].mxu0 %v17014_v0 }
 0x33d   :  { %11785 = vmatprep.mubr.f32.mxu0 %v16646_v50  ;;  %13589 = vmatpush3.bf16.msra.mxu0 %v13586_v62  ;;  %v13598_v50 = vpack.c.bf16 %v9169_v38, %v9168_v47  ;;  %v13618_v62 = vpack.c.bf16 %v9179_v2, %v9178_v32  ;;  %v9182_v47 = vld [vmem:[%s18968_s3 + $0x700] sm:$0xff]  ;;  %v9183_v38 = vld [vmem:[%s18968_s3 + $0x708] sm:$0xff]  ;;  %v17143_v32 = vld [vmem:[#allocation2 + $0x73] sm:$0xff] }
 0x33e   :  { %13591 = vmatprep.subr.bf16.mxu0 %v13590_v8  ;;  %v9190_v2 = vld [vmem:[%s18968_s3 + $0x740] sm:$0xff] }
 0x340   :  { %11786 = vmatmul.mubr.f32.gmra.mrb[30].mxu0 %v17024_v17 }
 0x341   :  { %13593 = vmatpush3.bf16.msra.mxu0 %v13590_v8  ;;  %11820 = vmatprep.mubr.f32.mxu0 %v4216_v29  ;;  %v9181_v8 = vld [vmem:[%s18968_s3 + $0x6f8] sm:$0xff]  ;;  %v13626_v29 = vpack.c.bf16 %v9183_v38, %v9182_v47  ;;  %v4418_v38 = vld [vmem:[#allocation2 + $0xe3] sm:$0xff] }
 0x342   :  { %13595 = vmatprep.subr.bf16.mxu0 %v13594_v18  ;;  %v13622_v55 = vpack.c.bf16 %v9181_v8, %v9180_v9  ;;  %v17153_v8 = vld [vmem:[#allocation2 + $0x93] sm:$0xff] }
 0x343   :  { %v9193_v47 = vld [vmem:[%s18968_s3 + $0x758] sm:$0xff] }
 0x344   :  { %11821 = vmatmul.mubr.f32.vlgmr.msra.gmra.mrb[16].mxu0 %v17033_v6 }
 0x345   :  { %11823 = vmatprep.mubr.f32.mxu0 %v17042_v31  ;;  %13597 = vmatpush3.bf16.msra.mxu0 %v13594_v18  ;;  %v17100_v18 = vld [vmem:[#allocation2 + $0x132] sm:$0xff] }
 0x346   :  { %13599 = vmatprep.subr.bf16.mxu0 %v13598_v50 }
 0x348   :  { %11824 = vmatmul.mubr.f32.gmra.mrb[18].mxu0 %v17045_v25 }
 0x349   :  { %11826 = vmatprep.mubr.f32.mxu0 %v17054_v34  ;;  %13601 = vmatpush3.bf16.msra.mxu0 %v13598_v50  ;;  %v17110_v50 = vld [vmem:[#allocation2 + $0x152] sm:$0xff] }
 0x34a   :  { %13603 = vmatprep.subr.bf16.mxu0 %v13602_v33 }
 0x34c   :  { %11827 = vmatmul.mubr.f32.gmra.mrb[20].mxu0 %v17057_v60 }
 0x34d   :  { %11829 = vmatprep.mubr.f32.mxu0 %v16680_v42  ;;  %13605 = vmatpush3.bf16.msra.mxu0 %v13602_v33  ;;  %v13614_v42 = vpack.c.bf16 %v9177_v24, %v9176_v7  ;;  %v4410_v33 = vld [vmem:[#allocation2 + $0x23] sm:$0xff]  ;;  %v9188_v7 = vld [vmem:[%s18968_s3 + $0x730] sm:$0xff]  ;;  %v9189_v24 = vld [vmem:[%s18968_s3 + $0x738] sm:$0xff] }
 0x34e   :  { %13607 = vmatprep.subr.bf16.mxu0 %v13606_v63 }
 0x350   :  { %11830 = vmatmul.mubr.f32.gmra.mrb[22].mxu0 %v17067_v27 }
 0x351   :  { %11832 = vmatprep.mubr.f32.mxu0 %v4224_v21  ;;  %13609 = vmatpush3.bf16.msra.mxu0 %v13606_v63  ;;  %v9187_v63 = vld [vmem:[%s18968_s3 + $0x728] sm:$0xff] }
 0x352   :  { %13611 = vmatprep.subr.bf16.mxu0 %v13610_v4  ;;  %v13634_v49 = vpack.c.bf16 %v9187_v63, %v9186_v41  ;;  %v17140_v21 = vld [vmem:[#allocation2 + $0x63] sm:$0xff]  ;;  %v17174_v41 = vld [vmem:[#allocation2 + $0x113] sm:$0xff] }
 0x353   :  { %v9196_v63 = vld [vmem:[%s18968_s3 + $0x770] sm:$0xff] }
 0x354   :  { %11833 = vmatmul.mubr.f32.gmra.mrb[24].mxu0 %v17076_v15 }
 0x355   :  { %11835 = vmatprep.mubr.f32.mxu0 %v17085_v46  ;;  %13613 = vmatpush3.bf16.msra.mxu0 %v13610_v4  ;;  %v17131_v4 = vld [vmem:[#allocation2 + $0x53] sm:$0xff] }
 0x356   :  { %13615 = vmatprep.subr.bf16.mxu0 %v13614_v42 }
 0x358   :  { %11836 = vmatmul.mubr.f32.gmra.mrb[26].mxu0 %v17088_v16 }
 0x359   :  { %11838 = vmatprep.mubr.f32.mxu0 %v17097_v12  ;;  %13617 = vmatpush3.bf16.msra.mxu0 %v13614_v42  ;;  %v13638_v42 = vpack.c.bf16 %v9189_v24, %v9188_v7  ;;  %v17183_v7 = vld [vmem:[#allocation2 + $0x123] sm:$0xff] }
 0x35a   :  { %13619 = vmatprep.subr.bf16.mxu0 %v13618_v62 }
 0x35c   :  { %11839 = vmatmul.mubr.f32.gmra.mrb[28].mxu0 %v17100_v18 }
 0x35d   :  { %11841 = vmatprep.mubr.f32.mxu0 %v16714_v3  ;;  %13621 = vmatpush3.bf16.msra.mxu0 %v13618_v62  ;;  %v13630_v3 = vpack.c.bf16 %v9185_v5, %v9184_v30  ;;  %v9191_v62 = vld [vmem:[%s18968_s3 + $0x748] sm:$0xff]  ;;  %v9194_v30 = vld [vmem:[%s18968_s3 + $0x760] sm:$0xff] }
 0x35e   :  { %13623 = vmatprep.subr.bf16.mxu0 %v13622_v55  ;;  %v13642_v9 = vpack.c.bf16 %v9191_v62, %v9190_v2  ;;  %v9195_v5 = vld [vmem:[%s18968_s3 + $0x768] sm:$0xff]  ;;  %v9198_v2 = vld [vmem:[%s18968_s3 + $0x780] sm:$0xff] }
 0x35f   :  { %v9199_v62 = vld [vmem:[%s18968_s3 + $0x788] sm:$0xff] }
 0x360   :  { %11842 = vmatmul.mubr.f32.gmra.mrb[30].mxu0 %v17110_v50 }
 0x361   :  { %13625 = vmatpush3.bf16.msra.mxu0 %v13622_v55  ;;  %11876 = vmatprep.mubr.f32.mxu0 %v4410_v33  ;;  %v9192_v55 = vld [vmem:[%s18968_s3 + $0x750] sm:$0xff]  ;;  %v17171_v33 = vld [vmem:[#allocation2 + $0x103] sm:$0xff] }
 0x362   :  { %13627 = vmatprep.subr.bf16.mxu0 %v13626_v29 }
 0x364   :  { %11877 = vmatmul.mubr.f32.vlgmr.msra.gmra.mrb[16].mxu0 %v17119_v37 }
 0x365   :  { %11879 = vmatprep.mubr.f32.mxu0 %v17128_v54  ;;  %13629 = vmatpush3.bf16.msra.mxu0 %v13626_v29  ;;  %v17162_v29 = vld [vmem:[#allocation2 + $0xf3] sm:$0xff] }
 0x366   :  { %13631 = vmatprep.subr.bf16.mxu0 %v13630_v3 }
 0x368   :  { %11880 = vmatmul.mubr.f32.gmra.mrb[18].mxu0 %v17131_v4 }
 0x369   :  { %11882 = vmatprep.mubr.f32.mxu0 %v17140_v21  ;;  %13633 = vmatpush3.bf16.msra.mxu0 %v13630_v3  ;;  %v13650_v3 = vpack.c.bf16 %v9195_v5, %v9194_v30  ;;  %v9202_v30 = vld [vmem:[%s18968_s3 + $0x7a0] sm:$0xff]  ;;  %v9203_v5 = vld [vmem:[%s18968_s3 + $0x7a8] sm:$0xff] }
 0x36a   :  { %13635 = vmatprep.subr.bf16.mxu0 %v13634_v49 }
 0x36c   :  { %11883 = vmatmul.mubr.f32.gmra.mrb[20].mxu0 %v17143_v32 }
 0x36d   :  { %11885 = vmatprep.mubr.f32.mxu0 %v16748_v1  ;;  %13637 = vmatpush3.bf16.msra.mxu0 %v13634_v49  ;;  %v13646_v1 = vpack.c.bf16 %v9193_v47, %v9192_v55  ;;  %v9197_v49 = vld [vmem:[%s18968_s3 + $0x778] sm:$0xff]  ;;  %v9200_v47 = vld [vmem:[%s18968_s3 + $0x790] sm:$0xff] }
 0x36e   :  { %13639 = vmatprep.subr.bf16.mxu0 %v13638_v42  ;;  %v13654_v24 = vpack.c.bf16 %v9197_v49, %v9196_v63  ;;  %v17196_v55 = vld [vmem:[#allocation2 + $0x153] sm:$0xff]  ;;  %v13666_v63 = vpack.c.bf16 %v9203_v5, %v9202_v30  ;;  %v9211_v30 = vld [vmem:[%s18968_s3 + $0x7e8] sm:$0xff] }
 0x36f   :  { %v9204_v49 = vld [vmem:[%s18968_s3 + $0x7b0] sm:$0xff]  ;;  %v17249_v5 = vld [vmem:[#allocation2 + $0x104] sm:$0xff] }
 0x370   :  { %11886 = vmatmul.mubr.f32.gmra.mrb[22].mxu0 %v17153_v8 }
 0x371   :  { %11888 = vmatprep.mubr.f32.mxu0 %v4418_v38  ;;  %13641 = vmatpush3.bf16.msra.mxu0 %v13638_v42  ;;  %v17186_v42 = vld [vmem:[#allocation2 + $0x133] sm:$0xff] }
 0x372   :  { %13643 = vmatprep.subr.bf16.mxu0 %v13642_v9  ;;  %v9201_v38 = vld [vmem:[%s18968_s3 + $0x798] sm:$0xff] }
 0x374   :  { %11889 = vmatmul.mubr.f32.gmra.mrb[24].mxu0 %v17162_v29 }
 0x375   :  { %11891 = vmatprep.mubr.f32.mxu0 %v17171_v33  ;;  %13645 = vmatpush3.bf16.msra.mxu0 %v13642_v9  ;;  %v13658_v9 = vpack.c.bf16 %v9199_v62, %v9198_v2  ;;  %v17222_v2 = vld [vmem:[#allocation2 + $0x64] sm:$0xff] }
 0x376   :  { %13647 = vmatprep.subr.bf16.mxu0 %v13646_v1  ;;  %v9206_v62 = vld [vmem:[%s18968_s3 + $0x7c0] sm:$0xff] }
 0x378   :  { %11892 = vmatmul.mubr.f32.gmra.mrb[26].mxu0 %v17174_v41 }
 0x379   :  { %11894 = vmatprep.mubr.f32.mxu0 %v17183_v7  ;;  %13649 = vmatpush3.bf16.msra.mxu0 %v13646_v1  ;;  %v4604_v1 = vld [vmem:[#allocation2 + $0x24] sm:$0xff] }
 0x37a   :  { %13651 = vmatprep.subr.bf16.mxu0 %v13650_v3 }
 0x37c   :  { %11895 = vmatmul.mubr.f32.gmra.mrb[28].mxu0 %v17186_v42 }
 0x37d   :  { %11897 = vmatprep.mubr.f32.mxu0 %v16782_v48  ;;  %13653 = vmatpush3.bf16.msra.mxu0 %v13650_v3  ;;  %v13662_v48 = vpack.c.bf16 %v9201_v38, %v9200_v47  ;;  %v17212_v3 = vld [vmem:[#allocation2 + $0x44] sm:$0xff]  ;;  %v17233_v47 = vld [vmem:[#allocation2 + $0x94] sm:$0xff] }
 0x37e   :  { %13655 = vmatprep.subr.bf16.mxu0 %v13654_v24  ;;  %v9208_v38 = vld [vmem:[%s18968_s3 + $0x7d0] sm:$0xff] }
 0x380   :  { %11898 = vmatmul.mubr.f32.gmra.mrb[30].mxu0 %v17196_v55 }
 0x381   :  { %13657 = vmatpush3.bf16.msra.mxu0 %v13654_v24  ;;  %11932 = vmatprep.mubr.f32.mxu0 %v4604_v1  ;;  %v9205_v24 = vld [vmem:[%s18968_s3 + $0x7b8] sm:$0xff] }
 0x382   :  { %13659 = vmatprep.subr.bf16.mxu0 %v13658_v9  ;;  %v9209_v1 = vld [vmem:[%s18968_s3 + $0x7d8] sm:$0xff] }
 0x384   :  { %11933 = vmatmul.mubr.f32.vlgmr.msra.gmra.mrb[16].mxu0 %v16798_v36  ;;  %v13670_v36 = vpack.c.bf16 %v9205_v24, %v9204_v49  ;;  %v9212_v49 = vld [vmem:[%s18968_s3 + $0x7f0] sm:$0xff]  ;;  %v9213_v24 = vld [vmem:[%s18968_s3 + $0x7f8] sm:$0xff] }
 0x385   :  { %11935 = vmatprep.mubr.f32.mxu0 %v17212_v3  ;;  %13661 = vmatpush3.bf16.msra.mxu0 %v13658_v9  ;;  %v9207_v9 = vld [vmem:[%s18968_s3 + $0x7c8] sm:$0xff] }
 0x386   :  { %13663 = vmatprep.subr.bf16.mxu0 %v13662_v48 }
 0x388   :  { %11936 = vmatmul.mubr.f32.gmra.mrb[18].mxu0 %v16808_v58  ;;  %v13674_v58 = vpack.c.bf16 %v9207_v9, %v9206_v62  ;;  %v9214_v62 = vld [vmem:[%s18968_s3 + $0x800] sm:$0xff]  ;;  %v9215_v9 = vld [vmem:[%s18968_s3 + $0x808] sm:$0xff] }
 0x389   :  { %11938 = vmatprep.mubr.f32.mxu0 %v17222_v2  ;;  %13665 = vmatpush3.bf16.msra.mxu0 %v13662_v48  ;;  %v4612_v48 = vld [vmem:[#allocation2 + $0xe4] sm:$0xff] }
 0x38a   :  { %13667 = vmatprep.subr.bf16.mxu0 %v13666_v63 }
 0x38c   :  { %11939 = vmatmul.mubr.f32.gmra.mrb[20].mxu0 %v16818_v23  ;;  %v13678_v23 = vpack.c.bf16 %v9209_v1, %v9208_v38  ;;  %v9216_v38 = vld [vmem:[%s18968_s3 + $0x810] sm:$0xff]  ;;  %v9217_v1 = vld [vmem:[%s18968_s3 + $0x818] sm:$0xff] }
 0x38d   :  { %11941 = vmatprep.mubr.f32.mxu0 %v16821_v45  ;;  %13669 = vmatpush3.bf16.msra.mxu0 %v13666_v63  ;;  %v9210_v45 = vld [vmem:[%s18968_s3 + $0x7e0] sm:$0xff] }
 0x38e   :  { %13671 = vmatprep.subr.bf16.mxu0 %v13670_v36  ;;  %v13682_v63 = vpack.c.bf16 %v9211_v30, %v9210_v45  ;;  %v9220_v30 = vld [vmem:[%s18968_s3 + $0x830] sm:$0xff] }
 0x390   :  { %11942 = vmatmul.mubr.f32.gmra.mrb[22].mxu0 %v17233_v47 }
 0x391   :  { %11944 = vmatprep.mubr.f32.mxu0 %v4612_v48  ;;  %13673 = vmatpush3.bf16.msra.mxu0 %v13670_v36  ;;  %v17259_v36 = vld [vmem:[#allocation2 + $0x124] sm:$0xff] }
 0x392   :  { %13675 = vmatprep.subr.bf16.mxu0 %v13674_v58  ;;  %v9218_v48 = vld [vmem:[%s18968_s3 + $0x820] sm:$0xff] }
 0x394   :  { %11945 = vmatmul.mubr.f32.gmra.mrb[24].mxu0 %v16837_v35  ;;  %v13686_v35 = vpack.c.bf16 %v9213_v24, %v9212_v49  ;;  %v9222_v49 = vld [vmem:[%s18968_s3 + $0x840] sm:$0xff]  ;;  %v9223_v24 = vld [vmem:[%s18968_s3 + $0x848] sm:$0xff] }
 0x395   :  { %11947 = vmatprep.mubr.f32.mxu0 %v17249_v5  ;;  %13677 = vmatpush3.bf16.msra.mxu0 %v13674_v58  ;;  %v17270_v58 = vld [vmem:[#allocation2 + $0x154] sm:$0xff] }
 0x396   :  { %13679 = vmatprep.subr.bf16.mxu0 %v13678_v23 }
 0x398   :  { %11948 = vmatmul.mubr.f32.gmra.mrb[26].mxu0 %v16847_v51  ;;  %v13690_v51 = vpack.c.bf16 %v9215_v9, %v9214_v62  ;;  %v17308_v62 = vld [vmem:[#allocation2 + $0xa0] sm:$0xff]  ;;  %v9225_v9 = vld [vmem:[%s18968_s3 + $0x858] sm:$0xff] }
 0x399   :  { %11950 = vmatprep.mubr.f32.mxu0 %v17259_v36  ;;  %13681 = vmatpush3.bf16.msra.mxu0 %v13678_v23  ;;  %v9219_v23 = vld [vmem:[%s18968_s3 + $0x828] sm:$0xff] }
 0x39a   :  { %13683 = vmatprep.subr.bf16.mxu0 %v13682_v63  ;;  %v13698_v45 = vpack.c.bf16 %v9219_v23, %v9218_v48  ;;  %v17342_v48 = vld [vmem:[#allocation2 + $0x160] sm:$0xff]  ;;  %v9233_v23 = vld [vmem:[%s18968_s3 + $0x898] sm:$0xff] }
 0x39c   :  { %11951 = vmatmul.mubr.f32.gmra.mrb[28].mxu0 %v16857_v13  ;;  %v13694_v13 = vpack.c.bf16 %v9217_v1, %v9216_v38  ;;  %v9229_v1 = vld [vmem:[%s18968_s3 + $0x878] sm:$0xff] }
 0x39d   :  { %11953 = vmatprep.mubr.f32.mxu0 %v16860_v28  ;;  %13685 = vmatpush3.bf16.msra.mxu0 %v13682_v63  ;;  %v17280_v28 = vld [vmem:[#allocation2 + $0x40] sm:$0xff]  ;;  %v9221_v63 = vld [vmem:[%s18968_s3 + $0x838] sm:$0xff] }
 0x39e   :  { %13687 = vmatprep.subr.bf16.mxu0 %v13686_v35 }
 0x3a0   :  { %11954 = vmatmul.mubr.f32.gmra.mrb[30].mxu0 %v17270_v58 }
 0x3a1   :  { %13689 = vmatpush3.bf16.msra.mxu0 %v13686_v35  ;;  %11988 = vmatprep.mubr.f32.mxu0 %v16870_v59  ;;  %v17290_v59 = vld [vmem:[#allocation2 + $0x60] sm:$0xff]  ;;  %v13706_v35 = vpack.c.bf16 %v9223_v24, %v9222_v49 }
 0x3a2   :  { %13691 = vmatprep.subr.bf16.mxu0 %v13690_v51  ;;  %v17363_v24 = vld [vmem:[#allocation2 + $0x61] sm:$0xff] }
 0x3a4   :  { %11989 = vmatmul.mubr.f32.vlgmr.msra.gmra.mrb[16].mxu0 %v17280_v28 }
 0x3a5   :  { %11991 = vmatprep.mubr.f32.mxu0 %v16880_v56  ;;  %13693 = vmatpush3.bf16.msra.mxu0 %v13690_v51  ;;  %v13702_v56 = vpack.c.bf16 %v9221_v63, %v9220_v30  ;;  %v9227_v51 = vld [vmem:[%s18968_s3 + $0x868] sm:$0xff]  ;;  %v9234_v30 = vld [vmem:[%s18968_s3 + $0x8a0] sm:$0xff] }
 0x3a6   :  { %13695 = vmatprep.subr.bf16.mxu0 %v13694_v13  ;;  %v9235_v63 = vld [vmem:[%s18968_s3 + $0x8a8] sm:$0xff] }
 0x3a7   :  { %v13730_v49 = vpack.c.bf16 %v9235_v63, %v9234_v30  ;;  %v9248_v30 = vld [vmem:[%s18968_s3 + $0x910] sm:$0xff]  ;;  %v9249_v63 = vld [vmem:[%s18968_s3 + $0x918] sm:$0xff] }
 0x3a8   :  { %11992 = vmatmul.mubr.f32.gmra.mrb[18].mxu0 %v17290_v59 }
 0x3a9   :  { %11994 = vmatprep.mubr.f32.mxu0 %v16890_v10  ;;  %13697 = vmatpush3.bf16.msra.mxu0 %v13694_v13  ;;  %v9224_v10 = vld [vmem:[%s18968_s3 + $0x850] sm:$0xff]  ;;  %v9231_v13 = vld [vmem:[%s18968_s3 + $0x888] sm:$0xff] }
 0x3aa   :  { %13699 = vmatprep.subr.bf16.mxu0 %v13698_v45 }
 0x3ac   :  { %11995 = vmatmul.mubr.f32.gmra.mrb[20].mxu0 %v16899_v39  ;;  %v13710_v39 = vpack.c.bf16 %v9225_v9, %v9224_v10  ;;  %v9237_v10 = vld [vmem:[%s18968_s3 + $0x8b8] sm:$0xff] }
 0x3ad   :  { %11997 = vmatprep.mubr.f32.mxu0 %v16902_v40  ;;  %13701 = vmatpush3.bf16.msra.mxu0 %v13698_v45  ;;  %v9226_v40 = vld [vmem:[%s18968_s3 + $0x860] sm:$0xff]  ;;  %v4992_v45 = vld [vmem:[#allocation2 + $0x31] sm:$0xff] }
 0x3ae   :  { %13703 = vmatprep.subr.bf16.mxu0 %v13702_v56  ;;  %v13714_v38 = vpack.c.bf16 %v9227_v51, %v9226_v40  ;;  %v17372_v9 = vld [vmem:[#allocation2 + $0x71] sm:$0xff]  ;;  %v17375_v40 = vld [vmem:[#allocation2 + $0x81] sm:$0xff] }
 0x3af   :  { %v9238_v51 = vld [vmem:[%s18968_s3 + $0x8c0] sm:$0xff] }
 0x3b0   :  { %11998 = vmatmul.mubr.f32.gmra.mrb[22].mxu0 %v17308_v62 }
 0x3b1   :  { %12000 = vmatprep.mubr.f32.mxu0 %v16911_v61  ;;  %13705 = vmatpush3.bf16.msra.mxu0 %v13702_v56  ;;  %v9228_v61 = vld [vmem:[%s18968_s3 + $0x870] sm:$0xff] }
 0x3b2   :  { %13707 = vmatprep.subr.bf16.mxu0 %v13706_v35  ;;  %v17360_v56 = vld [vmem:[#allocation2 + $0x51] sm:$0xff] }
 0x3b4   :  { %12001 = vmatmul.mubr.f32.gmra.mrb[24].mxu0 %v16920_v20  ;;  %v13718_v20 = vpack.c.bf16 %v9229_v1, %v9228_v61  ;;  %v17385_v1 = vld [vmem:[#allocation2 + $0xa1] sm:$0xff] }
 0x3b5   :  { %12003 = vmatprep.mubr.f32.mxu0 %v16923_v19  ;;  %13709 = vmatpush3.bf16.msra.mxu0 %v13706_v35  ;;  %v9230_v19 = vld [vmem:[%s18968_s3 + $0x880] sm:$0xff]  ;;  %v9236_v35 = vld [vmem:[%s18968_s3 + $0x8b0] sm:$0xff] }
 0x3b6   :  { %13711 = vmatprep.subr.bf16.mxu0 %v13710_v39 }
 0x3b8   :  { %12004 = vmatmul.mubr.f32.gmra.mrb[26].mxu0 %v16932_v44  ;;  %v13722_v44 = vpack.c.bf16 %v9231_v13, %v9230_v19  ;;  %v9241_v19 = vld [vmem:[%s18968_s3 + $0x8d8] sm:$0xff]  ;;  %v9242_v13 = vld [vmem:[%s18968_s3 + $0x8e0] sm:$0xff] }
 0x3b9   :  { %12006 = vmatprep.mubr.f32.mxu0 %v16935_v14  ;;  %13713 = vmatpush3.bf16.msra.mxu0 %v13710_v39  ;;  %v9232_v14 = vld [vmem:[%s18968_s3 + $0x890] sm:$0xff]  ;;  %v13734_v39 = vpack.c.bf16 %v9237_v10, %v9236_v35  ;;  %v9251_v35 = vld [vmem:[%s18968_s3 + $0x928] sm:$0xff] }
 0x3ba   :  { %13715 = vmatprep.subr.bf16.mxu0 %v13714_v38 }
 0x3bc   :  { %12007 = vmatmul.mubr.f32.gmra.mrb[28].mxu0 %v16944_v26  ;;  %v13726_v26 = vpack.c.bf16 %v9233_v23, %v9232_v14  ;;  %v9245_v23 = vld [vmem:[%s18968_s3 + $0x8f8] sm:$0xff] }
 0x3bd   :  { %12009 = vmatprep.mubr.f32.mxu0 %v16947_v57  ;;  %13717 = vmatpush3.bf16.msra.mxu0 %v13714_v38  ;;  %v17351_v57 = vld [vmem:[#allocation2 + $0x41] sm:$0xff] }
 0x3be   :  { %13719 = vmatprep.subr.bf16.mxu0 %v13718_v20  ;;  %v9239_v38 = vld [vmem:[%s18968_s3 + $0x8c8] sm:$0xff] }
 0x3bf   :  { %v13738_v61 = vpack.c.bf16 %v9239_v38, %v9238_v51  ;;  %v17447_v51 = vld [vmem:[#allocation2 + $0x82] sm:$0xff] }
 0x3c0   :  { %12010 = vmatmul.mubr.f32.gmra.mrb[30].mxu0 %v17342_v48  ;;  %v9255_v38 = vld [vmem:[%s18968_s3 + $0x948] sm:$0xff] }
 0x3c1   :  { %13721 = vmatpush3.bf16.msra.mxu0 %v13718_v20  ;;  %12044 = vmatprep.mubr.f32.mxu0 %v4992_v45  ;;  %v9240_v20 = vld [vmem:[%s18968_s3 + $0x8d0] sm:$0xff]  ;;  %v17411_v45 = vld [vmem:[#allocation2 + $0x141] sm:$0xff] }
 0x3c2   :  { %13723 = vmatprep.subr.bf16.mxu0 %v13722_v44 }
 0x3c4   :  { %12045 = vmatmul.mubr.f32.vlgmr.msra.gmra.mrb[16].mxu0 %v17351_v57 }
 0x3c5   :  { %12047 = vmatprep.mubr.f32.mxu0 %v17360_v56  ;;  %13725 = vmatpush3.bf16.msra.mxu0 %v13722_v44  ;;  %v9243_v44 = vld [vmem:[%s18968_s3 + $0x8e8] sm:$0xff] }
 0x3c6   :  { %13727 = vmatprep.subr.bf16.mxu0 %v13726_v26  ;;  %v13746_v14 = vpack.c.bf16 %v9243_v44, %v9242_v13  ;;  %v9261_v44 = vld [vmem:[%s18968_s3 + $0x978] sm:$0xff] }
 0x3c8   :  { %12048 = vmatmul.mubr.f32.gmra.mrb[18].mxu0 %v17363_v24 }
 0x3c9   :  { %12050 = vmatprep.mubr.f32.mxu0 %v17372_v9  ;;  %13729 = vmatpush3.bf16.msra.mxu0 %v13726_v26  ;;  %v9247_v26 = vld [vmem:[%s18968_s3 + $0x908] sm:$0xff] }
 0x3ca   :  { %13731 = vmatprep.subr.bf16.mxu0 %v13730_v49 }
 0x3cc   :  { %12051 = vmatmul.mubr.f32.gmra.mrb[20].mxu0 %v17375_v40 }
 0x3cd   :  { %12053 = vmatprep.mubr.f32.mxu0 %v16981_v11  ;;  %13733 = vmatpush3.bf16.msra.mxu0 %v13730_v49  ;;  %v13742_v11 = vpack.c.bf16 %v9241_v19, %v9240_v20  ;;  %v9250_v49 = vld [vmem:[%s18968_s3 + $0x920] sm:$0xff]  ;;  %v9257_v20 = vld [vmem:[%s18968_s3 + $0x958] sm:$0xff] }
 0x3ce   :  { %13735 = vmatprep.subr.bf16.mxu0 %v13734_v39  ;;  %v13762_v10 = vpack.c.bf16 %v9251_v35, %v9250_v49  ;;  %v9258_v19 = vld [vmem:[%s18968_s3 + $0x960] sm:$0xff]  ;;  %v9272_v49 = vld [vmem:[%s18968_s3 + $0x9d0] sm:$0xff]  ;;  %v9273_v35 = vld [vmem:[%s18968_s3 + $0x9d8] sm:$0xff] }
 0x3d0   :  { %12054 = vmatmul.mubr.f32.gmra.mrb[22].mxu0 %v17385_v1 }
 0x3d1   :  { %12056 = vmatprep.mubr.f32.mxu0 %v16990_v22  ;;  %13737 = vmatpush3.bf16.msra.mxu0 %v13734_v39  ;;  %v9244_v22 = vld [vmem:[%s18968_s3 + $0x8f0] sm:$0xff]  ;;  %v9253_v39 = vld [vmem:[%s18968_s3 + $0x938] sm:$0xff] }
 0x3d2   :  { %13739 = vmatprep.subr.bf16.mxu0 %v13738_v61 }
 0x3d4   :  { %12057 = vmatmul.mubr.f32.gmra.mrb[24].mxu0 %v16999_v53  ;;  %v13750_v53 = vpack.c.bf16 %v9245_v23, %v9244_v22  ;;  %v9263_v22 = vld [vmem:[%s18968_s3 + $0x988] sm:$0xff]  ;;  %v9264_v23 = vld [vmem:[%s18968_s3 + $0x990] sm:$0xff] }
 0x3d5   :  { %12059 = vmatprep.mubr.f32.mxu0 %v17002_v52  ;;  %13741 = vmatpush3.bf16.msra.mxu0 %v13738_v61  ;;  %v9246_v52 = vld [vmem:[%s18968_s3 + $0x900] sm:$0xff]  ;;  %v9256_v61 = vld [vmem:[%s18968_s3 + $0x950] sm:$0xff] }
 0x3d6   :  { %13743 = vmatprep.subr.bf16.mxu0 %v13742_v11 }
 0x3d8   :  { %12060 = vmatmul.mubr.f32.gmra.mrb[26].mxu0 %v17011_v43  ;;  %v13754_v43 = vpack.c.bf16 %v9247_v26, %v9246_v52  ;;  %v9266_v52 = vld [vmem:[%s18968_s3 + $0x9a0] sm:$0xff]  ;;  %v9267_v26 = vld [vmem:[%s18968_s3 + $0x9a8] sm:$0xff] }
 0x3d9   :  { %12062 = vmatprep.mubr.f32.mxu0 %v17014_v0  ;;  %13745 = vmatpush3.bf16.msra.mxu0 %v13742_v11  ;;  %v17421_v0 = vld [vmem:[#allocation2 + $0x161] sm:$0xff] }
 0x3da   :  { %13747 = vmatprep.subr.bf16.mxu0 %v13746_v14  ;;  %v9259_v11 = vld [vmem:[%s18968_s3 + $0x968] sm:$0xff] }
 0x3db   :  { %v13778_v13 = vpack.c.bf16 %v9259_v11, %v9258_v19  ;;  %v9283_v19 = vld [vmem:[%s18968_s3 + $0xa28] sm:$0xff]  ;;  %v17581_v11 = vld [vmem:[#allocation2 + $0x54] sm:$0xff] }
 0x3dc   :  { %12063 = vmatmul.mubr.f32.gmra.mrb[28].mxu0 %v17411_v45 }
 0x3dd   :  { %12065 = vmatprep.mubr.f32.mxu0 %v17024_v17  ;;  %13749 = vmatpush3.bf16.msra.mxu0 %v13746_v14  ;;  %v13758_v17 = vpack.c.bf16 %v9249_v63, %v9248_v30  ;;  %v17483_v14 = vld [vmem:[#allocation2 + $0x142] sm:$0xff]  ;;  %v9269_v30 = vld [vmem:[%s18968_s3 + $0x9b8] sm:$0xff] }
 0x3de   :  { %13751 = vmatprep.subr.bf16.mxu0 %v13750_v53  ;;  %v17519_v63 = vld [vmem:[#allocation2 + $0x83] sm:$0xff] }
 0x3e0   :  { %12066 = vmatmul.mubr.f32.gmra.mrb[30].mxu0 %v17421_v0 }
 0x3e1   :  { %13753 = vmatpush3.bf16.msra.mxu0 %v13750_v53  ;;  %12100 = vmatprep.mubr.f32.mxu0 %v17033_v6  ;;  %v9252_v6 = vld [vmem:[%s18968_s3 + $0x930] sm:$0xff]  ;;  %v9265_v53 = vld [vmem:[%s18968_s3 + $0x998] sm:$0xff] }
 0x3e2   :  { %13755 = vmatprep.subr.bf16.mxu0 %v13754_v43 }
 0x3e4   :  { %12101 = vmatmul.mubr.f32.vlgmr.msra.gmra.mrb[16].mxu0 %v17042_v31  ;;  %v13766_v31 = vpack.c.bf16 %v9253_v39, %v9252_v6  ;;  %v9275_v6 = vld [vmem:[%s18968_s3 + $0x9e8] sm:$0xff] }
 0x3e5   :  { %12103 = vmatprep.mubr.f32.mxu0 %v17045_v25  ;;  %13757 = vmatpush3.bf16.msra.mxu0 %v13754_v43  ;;  %v9254_v25 = vld [vmem:[%s18968_s3 + $0x940] sm:$0xff]  ;;  %v13794_v43 = vpack.c.bf16 %v9267_v26, %v9266_v52  ;;  %v5582_v52 = vld [vmem:[#allocation2 + $0xf4] sm:$0xff] }
 0x3e6   :  { %13759 = vmatprep.subr.bf16.mxu0 %v13758_v17  ;;  %v9290_v26 = vld [vmem:[%s18968_s3 + $0xa60] sm:$0xff] }
 0x3e8   :  { %12104 = vmatmul.mubr.f32.gmra.mrb[18].mxu0 %v17054_v34  ;;  %v13770_v34 = vpack.c.bf16 %v9255_v38, %v9254_v25  ;;  %v17555_v25 = vld [vmem:[#allocation2 + $0x143] sm:$0xff] }
 0x3e9   :  { %12106 = vmatprep.mubr.f32.mxu0 %v17057_v60  ;;  %13761 = vmatpush3.bf16.msra.mxu0 %v13758_v17  ;;  %v17457_v60 = vld [vmem:[#allocation2 + $0xa2] sm:$0xff] }
 0x3ea   :  { %13763 = vmatprep.subr.bf16.mxu0 %v13762_v10  ;;  %v9271_v17 = vld [vmem:[%s18968_s3 + $0x9c8] sm:$0xff] }
 0x3eb   :  { %v9279_v38 = vld [vmem:[%s18968_s3 + $0xa08] sm:$0xff] }
 0x3ec   :  { %12107 = vmatmul.mubr.f32.gmra.mrb[20].mxu0 %v17447_v51 }
 0x3ed   :  { %12109 = vmatprep.mubr.f32.mxu0 %v17067_v27  ;;  %13765 = vmatpush3.bf16.msra.mxu0 %v13762_v10  ;;  %v13774_v27 = vpack.c.bf16 %v9257_v20, %v9256_v61  ;;  %v9274_v10 = vld [vmem:[%s18968_s3 + $0x9e0] sm:$0xff]  ;;  %v9281_v61 = vld [vmem:[%s18968_s3 + $0xa18] sm:$0xff] }
 0x3ee   :  { %13767 = vmatprep.subr.bf16.mxu0 %v13766_v31  ;;  %v13810_v39 = vpack.c.bf16 %v9275_v6, %v9274_v10  ;;  %v5574_v20 = vld [vmem:[#allocation2 + $0x34] sm:$0xff] }
 0x3ef   :  { %v9296_v10 = vld [vmem:[%s18968_s3 + $0xa90] sm:$0xff]  ;;  %v9297_v6 = vld [vmem:[%s18968_s3 + $0xa98] sm:$0xff] }
 0x3f0   :  { %12110 = vmatmul.mubr.f32.gmra.mrb[22].mxu0 %v17457_v60 }
 0x3f1   :  { %12112 = vmatprep.mubr.f32.mxu0 %v17076_v15  ;;  %13769 = vmatpush3.bf16.msra.mxu0 %v13766_v31  ;;  %v9260_v15 = vld [vmem:[%s18968_s3 + $0x970] sm:$0xff]  ;;  %v9277_v31 = vld [vmem:[%s18968_s3 + $0x9f8] sm:$0xff] }
 0x3f2   :  { %13771 = vmatprep.subr.bf16.mxu0 %v13770_v34 }
 0x3f4   :  { %12113 = vmatmul.mubr.f32.gmra.mrb[24].mxu0 %v17085_v46  ;;  %v13782_v46 = vpack.c.bf16 %v9261_v44, %v9260_v15  ;;  %v9284_v15 = vld [vmem:[%s18968_s3 + $0xa30] sm:$0xff]  ;;  %v9285_v44 = vld [vmem:[%s18968_s3 + $0xa38] sm:$0xff] }
 0x3f5   :  { %12115 = vmatprep.mubr.f32.mxu0 %v17088_v16  ;;  %13773 = vmatpush3.bf16.msra.mxu0 %v13770_v34  ;;  %v9262_v16 = vld [vmem:[%s18968_s3 + $0x980] sm:$0xff]  ;;  %v9280_v34 = vld [vmem:[%s18968_s3 + $0xa10] sm:$0xff] }
 0x3f6   :  { %13775 = vmatprep.subr.bf16.mxu0 %v13774_v27 }
 0x3f8   :  { %12116 = vmatmul.mubr.f32.gmra.mrb[26].mxu0 %v17097_v12  ;;  %v13786_v12 = vpack.c.bf16 %v9263_v22, %v9262_v16  ;;  %v17594_v16 = vld [vmem:[#allocation2 + $0x84] sm:$0xff] }
 0x3f9   :  { %12118 = vmatprep.mubr.f32.mxu0 %v17100_v18  ;;  %13777 = vmatpush3.bf16.msra.mxu0 %v13774_v27  ;;  %v17493_v18 = vld [vmem:[#allocation2 + $0x162] sm:$0xff] }
 0x3fa   :  { %13779 = vmatprep.subr.bf16.mxu0 %v13778_v13  ;;  %v9282_v27 = vld [vmem:[%s18968_s3 + $0xa20] sm:$0xff] }
 0x3fb   :  { %v9286_v22 = vld [vmem:[%s18968_s3 + $0xa40] sm:$0xff] }
 0x3fc   :  { %12119 = vmatmul.mubr.f32.gmra.mrb[28].mxu0 %v17483_v14 }
 0x3fd   :  { %12121 = vmatprep.mubr.f32.mxu0 %v17110_v50  ;;  %13781 = vmatpush3.bf16.msra.mxu0 %v13778_v13  ;;  %v13790_v50 = vpack.c.bf16 %v9265_v53, %v9264_v23  ;;  %v13826_v13 = vpack.c.bf16 %v9283_v19, %v9282_v27  ;;  %v17604_v23 = vld [vmem:[#allocation2 + $0xa4] sm:$0xff]  ;;  %v9288_v53 = vld [vmem:[%s18968_s3 + $0xa50] sm:$0xff] }
 0x3fe   :  { %13783 = vmatprep.subr.bf16.mxu0 %v13782_v46  ;;  %v5775_v27 = vld [vmem:[#allocation2 + $0xb0] sm:$0xff] }
 0x3ff   :  { %v9304_v19 = vld [vmem:[%s18968_s3 + $0xad0] sm:$0xff] }
 0x400   :  { %12122 = vmatmul.mubr.f32.gmra.mrb[30].mxu0 %v17493_v18 }
 0x401   :  { %13785 = vmatpush3.bf16.msra.mxu0 %v13782_v46  ;;  %12156 = vmatprep.mubr.f32.mxu0 %v17119_v37  ;;  %v9268_v37 = vld [vmem:[%s18968_s3 + $0x9b0] sm:$0xff] }
 0x402   :  { %13787 = vmatprep.subr.bf16.mxu0 %v13786_v12  ;;  %v17591_v46 = vld [vmem:[#allocation2 + $0x74] sm:$0xff] }
 0x404   :  { %12157 = vmatmul.mubr.f32.vlgmr.msra.gmra.mrb[16].mxu0 %v17128_v54  ;;  %v13798_v54 = vpack.c.bf16 %v9269_v30, %v9268_v37  ;;  %v17620_v37 = vld [vmem:[#allocation2 + $0x114] sm:$0xff] }
 0x405   :  { %12159 = vmatprep.mubr.f32.mxu0 %v17131_v4  ;;  %13789 = vmatpush3.bf16.msra.mxu0 %v13786_v12  ;;  %v9270_v4 = vld [vmem:[%s18968_s3 + $0x9c0] sm:$0xff]  ;;  %v9287_v12 = vld [vmem:[%s18968_s3 + $0xa48] sm:$0xff] }
 0x406   :  { %13791 = vmatprep.subr.bf16.mxu0 %v13790_v50 }
 0x408   :  { %12160 = vmatmul.mubr.f32.gmra.mrb[18].mxu0 %v17140_v21  ;;  %v13802_v21 = vpack.c.bf16 %v9271_v17, %v9270_v4  ;;  %v9293_v4 = vld [vmem:[%s18968_s3 + $0xa78] sm:$0xff] }
 0x409   :  { %12162 = vmatprep.mubr.f32.mxu0 %v17143_v32  ;;  %13793 = vmatpush3.bf16.msra.mxu0 %v13790_v50  ;;  %v17529_v32 = vld [vmem:[#allocation2 + $0xa3] sm:$0xff]  ;;  %v9289_v50 = vld [vmem:[%s18968_s3 + $0xa58] sm:$0xff] }
 0x40a   :  { %13795 = vmatprep.subr.bf16.mxu0 %v13794_v43  ;;  %v17630_v17 = vld [vmem:[#allocation2 + $0x134] sm:$0xff] }
 0x40c   :  { %12163 = vmatmul.mubr.f32.gmra.mrb[20].mxu0 %v17519_v63 }
 0x40d   :  { %12165 = vmatprep.mubr.f32.mxu0 %v17153_v8  ;;  %13797 = vmatpush3.bf16.msra.mxu0 %v13794_v43  ;;  %v13806_v8 = vpack.c.bf16 %v9273_v35, %v9272_v49  ;;  %v9291_v43 = vld [vmem:[%s18968_s3 + $0xa68] sm:$0xff]  ;;  %v9294_v49 = vld [vmem:[%s18968_s3 + $0xa80] sm:$0xff] }
 0x40e   :  { %13799 = vmatprep.subr.bf16.mxu0 %v13798_v54  ;;  %v13842_v30 = vpack.c.bf16 %v9291_v43, %v9290_v26  ;;  %v9295_v35 = vld [vmem:[%s18968_s3 + $0xa88] sm:$0xff]  ;;  %v5781_v43 = vld [vmem:[#allocation2 + $0x150] sm:$0xff] }
 0x410   :  { %12166 = vmatmul.mubr.f32.gmra.mrb[22].mxu0 %v17529_v32 }
 0x411   :  { %12168 = vmatprep.mubr.f32.mxu0 %v17162_v29  ;;  %13801 = vmatpush3.bf16.msra.mxu0 %v13798_v54  ;;  %v9276_v29 = vld [vmem:[%s18968_s3 + $0x9f0] sm:$0xff] }
 0x412   :  { %13803 = vmatprep.subr.bf16.mxu0 %v13802_v21  ;;  %v9292_v54 = vld [vmem:[%s18968_s3 + $0xa70] sm:$0xff] }
 0x414   :  { %12169 = vmatmul.mubr.f32.gmra.mrb[24].mxu0 %v17171_v33  ;;  %v13814_v33 = vpack.c.bf16 %v9277_v31, %v9276_v29  ;;  %v9298_v29 = vld [vmem:[%s18968_s3 + $0xaa0] sm:$0xff]  ;;  %v9299_v31 = vld [vmem:[%s18968_s3 + $0xaa8] sm:$0xff] }
 0x415   :  { %12171 = vmatprep.mubr.f32.mxu0 %v17174_v41  ;;  %13805 = vmatpush3.bf16.msra.mxu0 %v13802_v21  ;;  %v9278_v41 = vld [vmem:[%s18968_s3 + $0xa00] sm:$0xff] }
 0x416   :  { %13807 = vmatprep.subr.bf16.mxu0 %v13806_v8  ;;  %v17633_v21 = vld [vmem:[#allocation2 + $0x144] sm:$0xff] }
 0x418   :  { %12172 = vmatmul.mubr.f32.gmra.mrb[26].mxu0 %v17183_v7  ;;  %v13818_v7 = vpack.c.bf16 %v9279_v38, %v9278_v41  ;;  %v5771_v41 = vld [vmem:[#allocation2 + $0x70] sm:$0xff]  ;;  %v9301_v38 = vld [vmem:[%s18968_s3 + $0xab8] sm:$0xff] }
 0x419   :  { %12174 = vmatprep.mubr.f32.mxu0 %v17186_v42  ;;  %13809 = vmatpush3.bf16.msra.mxu0 %v13806_v8  ;;  %v17565_v42 = vld [vmem:[#allocation2 + $0x163] sm:$0xff] }
 0x41a   :  { %13811 = vmatprep.subr.bf16.mxu0 %v13810_v39  ;;  %v17643_v8 = vld [vmem:[#allocation2 + $0x164] sm:$0xff] }
 0x41c   :  { %12175 = vmatmul.mubr.f32.gmra.mrb[28].mxu0 %v17555_v25 }
 0x41d   :  { %12177 = vmatprep.mubr.f32.mxu0 %v17196_v55  ;;  %13813 = vmatpush3.bf16.msra.mxu0 %v13810_v39  ;;  %v13822_v55 = vpack.c.bf16 %v9281_v61, %v9280_v34  ;;  %v5769_v39 = vld [vmem:[#allocation2 + $0x50] sm:$0xff] }
 0x41e   :  { %13815 = vmatprep.subr.bf16.mxu0 %v13814_v33  ;;  %v5773_v61 = vld [vmem:[#allocation2 + $0x90] sm:$0xff] }
 0x420   :  { %12178 = vmatmul.mubr.f32.gmra.mrb[30].mxu0 %v17565_v42 }
 0x421   :  { %13817 = vmatpush3.bf16.msra.mxu0 %v13814_v33  ;;  %12212 = vmatprep.mubr.f32.mxu0 %v5574_v20  ;;  %v13858_v33 = vpack.c.bf16 %v9299_v31, %v9298_v29  ;;  %v9303_v20 = vld [vmem:[%s18968_s3 + $0xac8] sm:$0xff]  ;;  %v14827_v29 = vmov 0.0|0.0   ;;  %v9314_v31 = vld [vmem:[%s18968_s3 + $0xb20] sm:$0xff] }
 0x422   :  { %13819 = vmatprep.subr.bf16.mxu0 %v13818_v7  ;;  %13978 = vmatprep.subr.bf16.mxu1 %v14827_v29 }
 0x424   :  { %12213 = vmatmul.mubr.f32.vlgmr.msra.gmra.mrb[16].mxu0 %v17212_v3  ;;  %v13830_v3 = vpack.c.bf16 %v9285_v44, %v9284_v15  ;;  %v5776_v15 = vld [vmem:[#allocation2 + $0x100] sm:$0xff] }
 0x425   :  { %12215 = vmatprep.mubr.f32.mxu0 %v17581_v11  ;;  %13821 = vmatpush3.bf16.msra.mxu0 %v13818_v7  ;;  %v5772_v7 = vld [vmem:[#allocation2 + $0x80] sm:$0xff] }
 0x426   :  { %13823 = vmatprep.subr.bf16.mxu0 %v13822_v55 }
 0x428   :  { %12216 = vmatmul.mubr.f32.gmra.mrb[18].mxu0 %v17222_v2  ;;  %v13834_v2 = vpack.c.bf16 %v9287_v12, %v9286_v22  ;;  %v9307_v22 = vld [vmem:[%s18968_s3 + $0xae8] sm:$0xff]  ;;  %v5778_v12 = vld [vmem:[#allocation2 + $0x120] sm:$0xff] }
 0x429   :  { %12218 = vmatprep.mubr.f32.mxu0 %v17591_v46  ;;  %13825 = vmatpush3.bf16.msra.mxu0 %v13822_v55 }
 0x42a   :  { %13827 = vmatprep.subr.bf16.mxu0 %v13826_v13 }
 0x42c   :  { %12219 = vmatmul.mubr.f32.gmra.mrb[20].mxu0 %v17594_v16 }
 0x42d   :  { %12221 = vmatprep.mubr.f32.mxu0 %v17233_v47  ;;  %13829 = vmatpush3.bf16.msra.mxu0 %v13826_v13  ;;  %v13838_v47 = vpack.c.bf16 %v9289_v50, %v9288_v53  ;;  %v9305_v13 = vld [vmem:[%s18968_s3 + $0xad8] sm:$0xff]  ;;  %v5779_v53 = vld [vmem:[#allocation2 + $0x130] sm:$0xff] }
 0x42e   :  { %13831 = vmatprep.subr.bf16.mxu0 %v13830_v3  ;;  %v13870_v44 = vpack.c.bf16 %v9305_v13, %v9304_v19  ;;  %v9308_v50 = vld [vmem:[%s18968_s3 + $0xaf0] sm:$0xff] }
 0x42f   :  { %v5969_v19 = vld [vmem:[#allocation2 + $0xb1] sm:$0xff] }
 0x430   :  { %12222 = vmatmul.mubr.f32.gmra.mrb[22].mxu0 %v17604_v23  ;;  %v9320_v13 = vld [vmem:[%s18968_s3 + $0xb50] sm:$0xff] }
 0x431   :  { %12224 = vmatprep.mubr.f32.mxu0 %v5582_v52  ;;  %13833 = vmatpush3.bf16.msra.mxu0 %v13830_v3  ;;  %v5777_v3 = vld [vmem:[#allocation2 + $0x110] sm:$0xff]  ;;  %v9309_v52 = vld [vmem:[%s18968_s3 + $0xaf8] sm:$0xff] }
 0x432   :  { %13835 = vmatprep.subr.bf16.mxu0 %v13834_v2  ;;  %v13878_v26 = vpack.c.bf16 %v9309_v52, %v9308_v50  ;;  %v9324_v50 = vld [vmem:[%s18968_s3 + $0xb70] sm:$0xff]  ;;  %v9325_v52 = vld [vmem:[%s18968_s3 + $0xb78] sm:$0xff] }
 0x434   :  { %12225 = vmatmul.mubr.f32.gmra.mrb[24].mxu0 %v17249_v5  ;;  %v13846_v5 = vpack.c.bf16 %v9293_v4, %v9292_v54  ;;  %v9311_v54 = vld [vmem:[%s18968_s3 + $0xb08] sm:$0xff] }
 0x435   :  { %12227 = vmatprep.mubr.f32.mxu0 %v17620_v37  ;;  %13837 = vmatpush3.bf16.msra.mxu0 %v13834_v2 }
 0x436   :  { %13839 = vmatprep.subr.bf16.mxu0 %v13838_v47 }
 0x438   :  { %12228 = vmatmul.mubr.f32.gmra.mrb[26].mxu0 %v17259_v36  ;;  %v13850_v36 = vpack.c.bf16 %v9295_v35, %v9294_v49  ;;  %v9312_v49 = vld [vmem:[%s18968_s3 + $0xb10] sm:$0xff]  ;;  %v9313_v35 = vld [vmem:[%s18968_s3 + $0xb18] sm:$0xff] }
 0x439   :  { %12230 = vmatprep.mubr.f32.mxu0 %v17630_v17  ;;  %13841 = vmatpush3.bf16.msra.mxu0 %v13838_v47  ;;  %v5780_v47 = vld [vmem:[#allocation2 + $0x140] sm:$0xff] }
 0x43a   :  { %13843 = vmatprep.subr.bf16.mxu0 %v13842_v30 }
 0x43c   :  { %12231 = vmatmul.mubr.f32.gmra.mrb[28].mxu0 %v17633_v21 }
 0x43d   :  { %12233 = vmatprep.mubr.f32.mxu0 %v17270_v58  ;;  %13845 = vmatpush3.bf16.msra.mxu0 %v13842_v30  ;;  %v13854_v58 = vpack.c.bf16 %v9297_v6, %v9296_v10  ;;  %v9310_v30 = vld [vmem:[%s18968_s3 + $0xb00] sm:$0xff]  ;;  %v9361_v10 = vld [vmem:[%s18970_s5 + $0x90] sm:$0xff] }
 0x43e   :  { %13847 = vmatprep.subr.bf16.mxu0 %v13846_v5  ;;  %v13882_v4 = vpack.c.bf16 %v9311_v54, %v9310_v30  ;;  %v9327_v30 = vld [vmem:[%s18968_s3 + $0xb88] sm:$0xff] }
 0x440   :  { %12234 = vmatmul.mubr.f32.gmra.mrb[30].mxu0 %v17643_v8 }
 0x441   :  { %13849 = vmatpush3.bf16.msra.mxu0 %v13846_v5  ;;  %12268 = vmatprep.mubr.f32.mxu0 %v17280_v28  ;;  %v9300_v28 = vld [vmem:[%s18968_s3 + $0xab0] sm:$0xff] }
 0x442   :  { %13851 = vmatprep.subr.bf16.mxu0 %v13850_v36  ;;  %v13862_v34 = vpack.c.bf16 %v9301_v38, %v9300_v28  ;;  %v5783_v5 = vld [vmem:[#allocation2 + $0x170] sm:$0xff]  ;;  %v9364_v28 = vld [vmem:[%s18970_s5 + $0xa8] sm:$0xff] }
 0x444   :  { %12269 = vmatmul.mubr.f32.vlgmr.msra.gmra.mrb[16].mxu0 %v5769_v39  ;;  %v13886_v39 = vpack.c.bf16 %v9313_v35, %v9312_v49  ;;  %v6156_v49 = vld [vmem:[#allocation2 + $0x42] sm:$0xff] }
 0x445   :  { %12271 = vmatprep.mubr.f32.mxu0 %v17290_v59  ;;  %13853 = vmatpush3.bf16.msra.mxu0 %v13850_v36  ;;  %v9302_v59 = vld [vmem:[%s18968_s3 + $0xac0] sm:$0xff] }
 0x446   :  { %13855 = vmatprep.subr.bf16.mxu0 %v13854_v58  ;;  %v13866_v55 = vpack.c.bf16 %v9303_v20, %v9302_v59  ;;  %v9359_v36 = vld [vmem:[%s18970_s5 + $0x80] sm:$0xff]  ;;  %v5967_v20 = vld [vmem:[#allocation2 + $0x91] sm:$0xff] }
 0x448   :  { %12272 = vmatmul.mubr.f32.gmra.mrb[18].mxu0 %v5771_v41  ;;  %v9363_v41 = vld [vmem:[%s18970_s5 + $0xa0] sm:$0xff] }
 0x449   :  { %12274 = vmatprep.mubr.f32.mxu0 %v5772_v7  ;;  %13857 = vmatpush3.bf16.msra.mxu0 %v13854_v58  ;;  %v9362_v58 = vld [vmem:[%s18970_s5 + $0x98] sm:$0xff]  ;;  %v9316_v7 = vld [vmem:[%s18968_s3 + $0xb30] sm:$0xff] }
 0x44a   :  { %13859 = vmatprep.subr.bf16.mxu0 %v13858_v33 }
 0x44c   :  { %12275 = vmatmul.mubr.f32.gmra.mrb[20].mxu0 %v5773_v61  ;;  %v9366_v61 = vld [vmem:[%s18970_s5 + $0xb8] sm:$0xff] }
 0x44d   :  { %12277 = vmatprep.mubr.f32.mxu0 %v17308_v62  ;;  %13861 = vmatpush3.bf16.msra.mxu0 %v13858_v33  ;;  %v9306_v62 = vld [vmem:[%s18968_s3 + $0xae0] sm:$0xff]  ;;  %v9315_v33 = vld [vmem:[%s18968_s3 + $0xb28] sm:$0xff] }
 0x44e   :  { %13863 = vmatprep.subr.bf16.mxu0 %v13862_v34  ;;  %v13874_v2 = vpack.c.bf16 %v9307_v22, %v9306_v62  ;;  %v13890_v38 = vpack.c.bf16 %v9315_v33, %v9314_v31  ;;  %v9322_v62 = vld [vmem:[%s18968_s3 + $0xb60] sm:$0xff]  ;;  %v9323_v22 = vld [vmem:[%s18968_s3 + $0xb68] sm:$0xff]  ;;  %v9333_v31 = vld [vmem:[%s18968_s3 + $0xbb8] sm:$0xff] }
 0x450   :  { %12278 = vmatmul.mubr.f32.gmra.mrb[22].mxu0 %v5775_v27 }
 0x451   :  { %12280 = vmatprep.mubr.f32.mxu0 %v5776_v15  ;;  %13865 = vmatpush3.bf16.msra.mxu0 %v13862_v34  ;;  %v13985_v34 = vpack.c.bf16 %v9364_v28, %v9363_v41  ;;  %v9321_v15 = vld [vmem:[%s18968_s3 + $0xb58] sm:$0xff]  ;;  %v9334_v41 = vld [vmem:[%s18968_s3 + $0xbc0] sm:$0xff]  ;;  %v9335_v28 = vld [vmem:[%s18968_s3 + $0xbc8] sm:$0xff] }
 0x452   :  { %13867 = vmatprep.subr.bf16.mxu0 %v13866_v55 }
 0x454   :  { %12281 = vmatmul.mubr.f32.gmra.mrb[24].mxu0 %v5777_v3  ;;  %v5971_v3 = vld [vmem:[#allocation2 + $0x111] sm:$0xff] }
 0x455   :  { %12283 = vmatprep.mubr.f32.mxu0 %v5778_v12  ;;  %13869 = vmatpush3.bf16.msra.mxu0 %v13866_v55  ;;  %v9319_v55 = vld [vmem:[%s18968_s3 + $0xb48] sm:$0xff] }
 0x456   :  { %13871 = vmatprep.subr.bf16.mxu0 %v13870_v44  ;;  %v5972_v12 = vld [vmem:[#allocation2 + $0x121] sm:$0xff] }
 0x458   :  { %12284 = vmatmul.mubr.f32.gmra.mrb[26].mxu0 %v5779_v53  ;;  %v5973_v53 = vld [vmem:[#allocation2 + $0x131] sm:$0xff] }
 0x459   :  { %12286 = vmatprep.mubr.f32.mxu0 %v5780_v47  ;;  %13873 = vmatpush3.bf16.msra.mxu0 %v13870_v44  ;;  %v5970_v44 = vld [vmem:[#allocation2 + $0x101] sm:$0xff]  ;;  %v13910_v47 = vpack.c.bf16 %v9325_v52, %v9324_v50 }
 0x45a   :  { %13875 = vmatprep.subr.bf16.mxu0 %v13874_v2  ;;  %v6352_v50 = vld [vmem:[#allocation2 + $0x63] sm:$0xff] }
 0x45c   :  { %12287 = vmatmul.mubr.f32.gmra.mrb[28].mxu0 %v5781_v43  ;;  %v9326_v43 = vld [vmem:[%s18968_s3 + $0xb80] sm:$0xff] }
 0x45d   :  { %12289 = vmatprep.mubr.f32.mxu0 %v17342_v48  ;;  %13877 = vmatpush3.bf16.msra.mxu0 %v13874_v2  ;;  %v9360_v48 = vld [vmem:[%s18970_s5 + $0x88] sm:$0xff]  ;;  %v13906_v2 = vpack.c.bf16 %v9323_v22, %v9322_v62  ;;  %v13914_v54 = vpack.c.bf16 %v9327_v30, %v9326_v43  ;;  %v9345_v62 = vld [vmem:[%s18968_s3 + $0xc18] sm:$0xff] }
 0x45e   :  { %13879 = vmatprep.subr.bf16.mxu0 %v13878_v26  ;;  %v13979_v6 = vpack.c.bf16 %v9360_v48, %v9359_v36  ;;  %v6157_v36 = vld [vmem:[#allocation2 + $0x52] sm:$0xff]  ;;  %v9331_v48 = vld [vmem:[%s18968_s3 + $0xba8] sm:$0xff] }
 0x45f   :  { %v6350_v22 = vld [vmem:[#allocation2 + $0x43] sm:$0xff]  ;;  %v9349_v43 = vld [vmem:[%s18968_s3 + $0xc38] sm:$0xff] }
 0x460   :  { %12290 = vmatmul.mubr.f32.gmra.mrb[30].mxu0 %v5783_v5  ;;  %13980 = vmatpush3.bf16.msra.mxu1 %v13979_v6  ;;  %v9329_v5 = vld [vmem:[%s18968_s3 + $0xb98] sm:$0xff] }
 0x461   :  { %13881 = vmatpush3.bf16.msra.mxu0 %v13878_v26  ;;  %12324 = vmatprep.mubr.f32.mxu0 %v17351_v57  ;;  %v13982_v57 = vpack.c.bf16 %v9362_v58, %v9361_v10  ;;  %v5975_v26 = vld [vmem:[#allocation2 + $0x151] sm:$0xff]  ;;  %v6158_v10 = vld [vmem:[#allocation2 + $0x62] sm:$0xff] }
 0x462   :  { %13883 = vmatprep.subr.bf16.mxu0 %v13882_v4  ;;  %13981 = vmatprep.subr.bf16.mxu1 %v14827_v29  ;;  %v6159_v58 = vld [vmem:[#allocation2 + $0x72] sm:$0xff] }
 0x464   :  { %12325 = vmatmul.mubr.f32.vlgmr.msra.gmra.mrb[16].mxu0 %v17360_v56  ;;  %v9317_v56 = vld [vmem:[%s18968_s3 + $0xb38] sm:$0xff]  ;;  %13983 = vmatpush3.bf16.msra.mxu1 %v13982_v57 }
 0x465   :  { %12327 = vmatprep.mubr.f32.mxu0 %v17363_v24  ;;  %13885 = vmatpush3.bf16.msra.mxu0 %v13882_v4  ;;  %v9365_v24 = vld [vmem:[%s18970_s5 + $0xb0] sm:$0xff]  ;;  %v13894_v59 = vpack.c.bf16 %v9317_v56, %v9316_v7  ;;  %v9337_v56 = vld [vmem:[%s18968_s3 + $0xbd8] sm:$0xff] }
 0x466   :  { %13887 = vmatprep.subr.bf16.mxu0 %v13886_v39  ;;  %13984 = vmatprep.subr.bf16.mxu1 %v14827_v29  ;;  %v13988_v27 = vpack.c.bf16 %v9366_v61, %v9365_v24  ;;  %v5977_v4 = vld [vmem:[#allocation2 + $0x171] sm:$0xff] }
 0x467   :  { %v6161_v57 = vld [vmem:[#allocation2 + $0x92] sm:$0xff] }
 0x468   :  { %12328 = vmatmul.mubr.f32.gmra.mrb[18].mxu0 %v17372_v9  ;;  %v9318_v9 = vld [vmem:[%s18968_s3 + $0xb40] sm:$0xff]  ;;  %13986 = vmatpush3.bf16.msra.mxu1 %v13985_v34  ;;  %v6163_v7 = vld [vmem:[#allocation2 + $0xb2] sm:$0xff] }
 0x469   :  { %12330 = vmatprep.mubr.f32.mxu0 %v17375_v40  ;;  %13889 = vmatpush3.bf16.msra.mxu0 %v13886_v39  ;;  %v13898_v40 = vpack.c.bf16 %v9319_v55, %v9318_v9  ;;  %v9332_v39 = vld [vmem:[%s18968_s3 + $0xbb0] sm:$0xff]  ;;  %v6164_v34 = vld [vmem:[#allocation2 + $0x102] sm:$0xff] }
 0x46a   :  { %13891 = vmatprep.subr.bf16.mxu0 %v13890_v38  ;;  %13987 = vmatprep.subr.bf16.mxu1 %v14827_v29  ;;  %v13926_v33 = vpack.c.bf16 %v9333_v31, %v9332_v39  ;;  %v6165_v61 = vld [vmem:[#allocation2 + $0x112] sm:$0xff] }
 0x46b   :  { %v6167_v55 = vld [vmem:[#allocation2 + $0x132] sm:$0xff] }
 0x46c   :  { %12331 = vmatmul.mubr.f32.gmra.mrb[20].mxu0 %v5967_v20  ;;  %13989 = vmatpush3.bf16.msra.mxu1 %v13988_v27  ;;  %v6166_v20 = vld [vmem:[#allocation2 + $0x122] sm:$0xff]  ;;  %v9340_v27 = vld [vmem:[%s18968_s3 + $0xbf0] sm:$0xff] }
 0x46d   :  { %12333 = vmatprep.mubr.f32.mxu0 %v17385_v1  ;;  %13893 = vmatpush3.bf16.msra.mxu0 %v13890_v38  ;;  %v13902_v1 = vpack.c.bf16 %v9321_v15, %v9320_v13  ;;  %v13930_v38 = vpack.c.bf16 %v9335_v28, %v9334_v41  ;;  %v6169_v13 = vld [vmem:[#allocation2 + $0x152] sm:$0xff]  ;;  %v9342_v15 = vld [vmem:[%s18968_s3 + $0xc00] sm:$0xff] }
 0x46e   :  { %13895 = vmatprep.subr.bf16.mxu0 %v13894_v59  ;;  %13990 = vmatprep.subr.bf16.mxu1 %v14827_v29  ;;  %v6361_v39 = vld [vmem:[#allocation2 + $0x133] sm:$0xff] }
 0x46f   :  { %v9356_v31 = vld [vmem:[%s18968_s3 + $0xc70] sm:$0xff] }
 0x470   :  { %12334 = vmatmul.mubr.f32.gmra.mrb[22].mxu0 %v5969_v19  ;;  %v6363_v41 = vld [vmem:[#allocation2 + $0x153] sm:$0xff] }
 0x471   :  { %12336 = vmatprep.mubr.f32.mxu0 %v5970_v44  ;;  %13897 = vmatpush3.bf16.msra.mxu0 %v13894_v59  ;;  %v9339_v59 = vld [vmem:[%s18968_s3 + $0xbe8] sm:$0xff]  ;;  %v6365_v28 = vld [vmem:[#allocation2 + $0x173] sm:$0xff] }
 0x472   :  { %13899 = vmatprep.subr.bf16.mxu0 %v13898_v40  ;;  %v9343_v44 = vld [vmem:[%s18968_s3 + $0xc08] sm:$0xff] }
 0x474   :  { %12337 = vmatmul.mubr.f32.gmra.mrb[24].mxu0 %v5971_v3  ;;  %v6171_v3 = vld [vmem:[#allocation2 + $0x172] sm:$0xff] }
 0x475   :  { %12339 = vmatprep.mubr.f32.mxu0 %v5972_v12  ;;  %13901 = vmatpush3.bf16.msra.mxu0 %v13898_v40  ;;  %v9341_v40 = vld [vmem:[%s18968_s3 + $0xbf8] sm:$0xff] }
 0x476   :  { %13903 = vmatprep.subr.bf16.mxu0 %v13902_v1  ;;  %v13942_v19 = vpack.c.bf16 %v9341_v40, %v9340_v27 }
 0x478   :  { %12340 = vmatmul.mubr.f32.gmra.mrb[26].mxu0 %v5973_v53  ;;  %v9347_v53 = vld [vmem:[%s18968_s3 + $0xc28] sm:$0xff] }
 0x479   :  { %12342 = vmatprep.mubr.f32.mxu0 %v17411_v45  ;;  %13905 = vmatpush3.bf16.msra.mxu0 %v13902_v1  ;;  %v9328_v45 = vld [vmem:[%s18968_s3 + $0xb90] sm:$0xff]  ;;  %v13946_v1 = vpack.c.bf16 %v9343_v44, %v9342_v15 }
 0x47a   :  { %13907 = vmatprep.subr.bf16.mxu0 %v13906_v2  ;;  %v13918_v35 = vpack.c.bf16 %v9329_v5, %v9328_v45  ;;  %v9351_v45 = vld [vmem:[%s18968_s3 + $0xc48] sm:$0xff] }
 0x47c   :  { %12343 = vmatmul.mubr.f32.gmra.mrb[28].mxu0 %v5975_v26  ;;  %v9348_v26 = vld [vmem:[%s18968_s3 + $0xc30] sm:$0xff] }
 0x47d   :  { %12345 = vmatprep.mubr.f32.mxu0 %v17421_v0  ;;  %13909 = vmatpush3.bf16.msra.mxu0 %v13906_v2  ;;  %v9330_v0 = vld [vmem:[%s18968_s3 + $0xba0] sm:$0xff]  ;;  %v6351_v2 = vld [vmem:[#allocation2 + $0x53] sm:$0xff]  ;;  %v13958_v30 = vpack.c.bf16 %v9349_v43, %v9348_v26 }
 0x47e   :  { %13911 = vmatprep.subr.bf16.mxu0 %v13910_v47  ;;  %v13922_v6 = vpack.c.bf16 %v9331_v48, %v9330_v0  ;;  %v6359_v48 = vld [vmem:[#allocation2 + $0x113] sm:$0xff] }
 0x480   :  { %12346 = vmatmul.mubr.f32.gmra.mrb[30].mxu0 %v5977_v4  ;;  %v9350_v4 = vld [vmem:[%s18968_s3 + $0xc40] sm:$0xff] }
 0x481   :  { %13913 = vmatpush3.bf16.msra.mxu0 %v13910_v47  ;;  %12380 = vmatprep.mubr.f32.mxu0 %v6156_v49  ;;  %v6353_v47 = vld [vmem:[#allocation2 + $0x73] sm:$0xff]  ;;  %v13962_v5 = vpack.c.bf16 %v9351_v45, %v9350_v4 }
 0x482   :  { %13915 = vmatprep.subr.bf16.mxu0 %v13914_v54  ;;  %v6357_v49 = vld [vmem:[#allocation2 + $0xb3] sm:$0xff] }
 0x484   :  { %12381 = vmatmul.mubr.f32.vlgmr.msra.gmra.mrb[16].mxu0 %v6157_v36  ;;  %v6358_v36 = vld [vmem:[#allocation2 + $0x103] sm:$0xff] }
 0x485   :  { %12383 = vmatprep.mubr.f32.mxu0 %v6158_v10  ;;  %13917 = vmatpush3.bf16.msra.mxu0 %v13914_v54  ;;  %v6355_v54 = vld [vmem:[#allocation2 + $0x93] sm:$0xff]  ;;  %v9355_v10 = vld [vmem:[%s18968_s3 + $0xc68] sm:$0xff] }
 0x486   :  { %13919 = vmatprep.subr.bf16.mxu0 %v13918_v35 }
 0x488   :  { %12384 = vmatmul.mubr.f32.gmra.mrb[18].mxu0 %v6159_v58 }
 0x489   :  { %12386 = vmatprep.mubr.f32.mxu0 %v17447_v51  ;;  %13921 = vmatpush3.bf16.msra.mxu0 %v13918_v35  ;;  %v9336_v51 = vld [vmem:[%s18968_s3 + $0xbd0] sm:$0xff]  ;;  %v9353_v35 = vld [vmem:[%s18968_s3 + $0xc58] sm:$0xff] }
 0x48a   :  { %13923 = vmatprep.subr.bf16.mxu0 %v13922_v6  ;;  %v13934_v24 = vpack.c.bf16 %v9337_v56, %v9336_v51  ;;  %v6552_v51 = vld [vmem:[#allocation2 + $0x104] sm:$0xff] }
 0x48b   :  { %v6554_v56 = vld [vmem:[#allocation2 + $0x124] sm:$0xff] }
 0x48c   :  { %12387 = vmatmul.mubr.f32.gmra.mrb[20].mxu0 %v6161_v57 }
 0x48d   :  { %12389 = vmatprep.mubr.f32.mxu0 %v17457_v60  ;;  %13925 = vmatpush3.bf16.msra.mxu0 %v13922_v6  ;;  %v9338_v60 = vld [vmem:[%s18968_s3 + $0xbe0] sm:$0xff] }
 0x48e   :  { %13927 = vmatprep.subr.bf16.mxu0 %v13926_v33  ;;  %v13938_v9 = vpack.c.bf16 %v9339_v59, %v9338_v60  ;;  %v6360_v6 = vld [vmem:[#allocation2 + $0x123] sm:$0xff]  ;;  %v9373_v60 = vld [vmem:[%s18970_s5 + $0xf0] sm:$0xff]  ;;  %v9374_v59 = vld [vmem:[%s18970_s5 + $0xf8] sm:$0xff] }
 0x490   :  { %12390 = vmatmul.mubr.f32.gmra.mrb[22].mxu0 %v6163_v7  ;;  %v6546_v7 = vld [vmem:[#allocation2 + $0x64] sm:$0xff] }
 0x491   :  { %12392 = vmatprep.mubr.f32.mxu0 %v6164_v34  ;;  %13929 = vmatpush3.bf16.msra.mxu0 %v13926_v33  ;;  %v9357_v33 = vld [vmem:[%s18968_s3 + $0xc78] sm:$0xff]  ;;  %v9371_v34 = vld [vmem:[%s18970_s5 + $0xe0] sm:$0xff] }
 0x492   :  { %13931 = vmatprep.subr.bf16.mxu0 %v13930_v38  ;;  %v13974_v57 = vpack.c.bf16 %v9357_v33, %v9356_v31 }
 0x494   :  { %12393 = vmatmul.mubr.f32.gmra.mrb[24].mxu0 %v6165_v61 }
 0x495   :  { %12395 = vmatprep.mubr.f32.mxu0 %v6166_v20  ;;  %13933 = vmatpush3.bf16.msra.mxu0 %v13930_v38  ;;  %v6544_v38 = vld [vmem:[#allocation2 + $0x44] sm:$0xff]  ;;  %v14000_v20 = vpack.c.bf16 %v9374_v59, %v9373_v60 }
 0x496   :  { %13935 = vmatprep.subr.bf16.mxu0 %v13934_v24  ;;  %v6808_v59 = vld [vmem:[%s18970_s5] sm:$0xff] }
 0x498   :  { %12396 = vmatmul.mubr.f32.gmra.mrb[26].mxu0 %v6167_v55  ;;  %v17922_v55 = vld [vmem:[%s18969_s4] ss:$0 sm:$0xff] }
 0x499   :  { %12398 = vmatprep.mubr.f32.mxu0 %v17483_v14  ;;  %13937 = vmatpush3.bf16.msra.mxu0 %v13934_v24  ;;  %v9344_v14 = vld [vmem:[%s18968_s3 + $0xc10] sm:$0xff]  ;;  %v9372_v24 = vld [vmem:[%s18970_s5 + $0xe8] sm:$0xff] }
 0x49a   :  { %13939 = vmatprep.subr.bf16.mxu0 %v13938_v9  ;;  %v13950_v12 = vpack.c.bf16 %v9345_v62, %v9344_v14  ;;  %v13997_v61 = vpack.c.bf16 %v9372_v24, %v9371_v34 }
 0x49c   :  { %12399 = vmatmul.mubr.f32.gmra.mrb[28].mxu0 %v6169_v13 }
 0x49d   :  { %12401 = vmatprep.mubr.f32.mxu0 %v17493_v18  ;;  %13941 = vmatpush3.bf16.msra.mxu0 %v13938_v9  ;;  %v9346_v18 = vld [vmem:[%s18968_s3 + $0xc20] sm:$0xff]  ;;  %v14829_v9 = vmov 0.0  }
 0x49e   :  { %13943 = vmatprep.subr.bf16.mxu0 %v13942_v19  ;;  %v13954_v52 = vpack.c.bf16 %v9347_v53, %v9346_v18  ;;  %12548 = vmatprep.mubr.msk.f32.mxu1 %vm14828_vm1, %v14829_v9 }
 0x4a0   :  { %12402 = vmatmul.mubr.f32.gmra.mrb[30].mxu0 %v6171_v3 }
 0x4a1   :  { %13945 = vmatpush3.bf16.msra.mxu0 %v13942_v19  ;;  %12436 = vmatprep.mubr.f32.mxu0 %v6350_v22 }
 0x4a2   :  { %13947 = vmatprep.subr.bf16.mxu0 %v13946_v1 }
 0x4a4   :  { %12437 = vmatmul.mubr.f32.vlgmr.msra.gmra.mrb[16].mxu0 %v6351_v2 }
 0x4a5   :  { %12439 = vmatprep.mubr.f32.mxu0 %v6352_v50  ;;  %13949 = vmatpush3.bf16.msra.mxu0 %v13946_v1 }
 0x4a6   :  { %13951 = vmatprep.subr.bf16.mxu0 %v13950_v12 }
 0x4a8   :  { %12440 = vmatmul.mubr.f32.gmra.mrb[18].mxu0 %v6353_v47 }
 0x4a9   :  { %12442 = vmatprep.mubr.f32.mxu0 %v17519_v63  ;;  %13953 = vmatpush3.bf16.msra.mxu0 %v13950_v12  ;;  %v9352_v63 = vld [vmem:[%s18968_s3 + $0xc50] sm:$0xff] }
 0x4aa   :  { %13955 = vmatprep.subr.bf16.mxu0 %v13954_v52  ;;  %v13966_v0 = vpack.c.bf16 %v9353_v35, %v9352_v63 }
 0x4ac   :  { %12443 = vmatmul.mubr.f32.gmra.mrb[20].mxu0 %v6355_v54 }
 0x4ad   :  { %12445 = vmatprep.mubr.f32.mxu0 %v17529_v32  ;;  %13957 = vmatpush3.bf16.msra.mxu0 %v13954_v52  ;;  %v9354_v32 = vld [vmem:[%s18968_s3 + $0xc60] sm:$0xff] }
 0x4ae   :  { %13959 = vmatprep.subr.bf16.mxu0 %v13958_v30  ;;  %v13970_v58 = vpack.c.bf16 %v9355_v10, %v9354_v32 }
 0x4b0   :  { %12446 = vmatmul.mubr.f32.gmra.mrb[22].mxu0 %v6357_v49 }
 0x4b1   :  { %12448 = vmatprep.mubr.f32.mxu0 %v6358_v36  ;;  %13961 = vmatpush3.bf16.msra.mxu0 %v13958_v30 }
 0x4b2   :  { %13963 = vmatprep.subr.bf16.mxu0 %v13962_v5 }
 0x4b4   :  { %12449 = vmatmul.mubr.f32.gmra.mrb[24].mxu0 %v6359_v48 }
 0x4b5   :  { %12451 = vmatprep.mubr.f32.mxu0 %v6360_v6  ;;  %13965 = vmatpush3.bf16.msra.mxu0 %v13962_v5 }
 0x4b6   :  { %13967 = vmatprep.subr.bf16.mxu0 %v13966_v0 }
 0x4b8   :  { %12452 = vmatmul.mubr.f32.gmra.mrb[26].mxu0 %v6361_v39 }
 0x4b9   :  { %12454 = vmatprep.mubr.f32.mxu0 %v17555_v25  ;;  %13969 = vmatpush3.bf16.msra.mxu0 %v13966_v0  ;;  %v6549_v25 = vld [vmem:[#allocation2 + $0x94] sm:$0xff] }
 0x4ba   :  { %13971 = vmatprep.subr.bf16.mxu0 %v13970_v58 }
 0x4bc   :  { %12455 = vmatmul.mubr.f32.gmra.mrb[28].mxu0 %v6363_v41 }
 0x4bd   :  { %12457 = vmatprep.mubr.f32.mxu0 %v17565_v42  ;;  %13973 = vmatpush3.bf16.msra.mxu0 %v13970_v58  ;;  %v6551_v42 = vld [vmem:[#allocation2 + $0xb4] sm:$0xff] }
 0x4be   :  { %13975 = vmatprep.subr.bf16.mxu0 %v13974_v57 }
 0x4c0   :  { %12458 = vmatmul.mubr.f32.gmra.mrb[30].mxu0 %v6365_v28 }
 0x4c1   :  { %13977 = vmatpush3.bf16.msra.mxu0 %v13974_v57  ;;  %12492 = vmatprep.mubr.f32.mxu0 %v6544_v38 }
 0x4c4   :  { %12493 = vmatmul.mubr.f32.vlgmr.msra.gmra.mrb[16].mxu0 %v17581_v11  ;;  %v6557_v11 = vld [vmem:[#allocation2 + $0x154] sm:$0xff] }
 0x4c5   :  { %12495 = vmatprep.mubr.f32.mxu0 %v6546_v7 }
 0x4c8   :  { %12496 = vmatmul.mubr.f32.gmra.mrb[18].mxu0 %v17591_v46  ;;  %v6559_v46 = vld [vmem:[#allocation2 + $0x174] sm:$0xff] }
 0x4c9   :  { %12498 = vmatprep.mubr.f32.mxu0 %v17594_v16  ;;  %v9367_v16 = vld [vmem:[%s18970_s5 + $0xc0] sm:$0xff] }
 0x4cc   :  { %12499 = vmatmul.mubr.f32.gmra.mrb[20].mxu0 %v6549_v25 }
 0x4cd   :  { %12501 = vmatprep.mubr.f32.mxu0 %v17604_v23  ;;  %v9368_v23 = vld [vmem:[%s18970_s5 + $0xc8] sm:$0xff] }
 0x4d0   :  { %12502 = vmatmul.mubr.f32.gmra.mrb[22].mxu0 %v6551_v42 }
 0x4d1   :  { %12504 = vmatprep.mubr.f32.mxu0 %v6552_v51 }
 0x4d4   :  { %12505 = vmatmul.mubr.f32.gmra.mrb[24].mxu0 %v17620_v37  ;;  %v13991_v37 = vpack.c.bf16 %v9368_v23, %v9367_v16 }
 0x4d5   :  { %12507 = vmatprep.mubr.f32.mxu0 %v6554_v56 }
 0x4d6   :  { %13992 = vmatpush3.bf16.msra.mxu1 %v13991_v37 }
 0x4d7   :  { %13993 = vmatprep.subr.bf16.mxu1 %v14827_v29 }
 0x4d8   :  { %12508 = vmatmul.mubr.f32.gmra.mrb[26].mxu0 %v17630_v17  ;;  %v9369_v17 = vld [vmem:[%s18970_s5 + $0xd0] sm:$0xff] }
 0x4d9   :  { %12510 = vmatprep.mubr.f32.mxu0 %v17633_v21  ;;  %v9370_v21 = vld [vmem:[%s18970_s5 + $0xd8] sm:$0xff] }
 0x4dc   :  { %12511 = vmatmul.mubr.f32.gmra.mrb[28].mxu0 %v6557_v11 }
 0x4dd   :  { %12513 = vmatprep.mubr.f32.mxu0 %v17643_v8  ;;  %v13994_v8 = vpack.c.bf16 %v9370_v21, %v9369_v17 }
 0x4df   :  { %13995 = vmatpush3.bf16.msra.mxu1 %v13994_v8 }
 0x4e0   :  { %12514 = vmatmul.mubr.f32.gmra.mrb[30].mxu0 %v6559_v46  ;;  %13996 = vmatprep.subr.bf16.mxu1 %v14827_v29 }
 0x4e3   :  { %13998 = vmatpush3.bf16.msra.mxu1 %v13997_v61 }
 0x4e4   :  { %13999 = vmatprep.subr.bf16.mxu1 %v14827_v29 }
 0x4e7   :  { %14001 = vmatpush3.bf16.msra.mxu1 %v14000_v20  ;;  %v6809_v20 = vld [vmem:[%s18970_s5 + $0x8] sm:$0xff] }
 0x4e8   :  { %14002 = vmatprep.subr.bf16.mxu1 %v14827_v29 }
 0x597   :  { %v12494_v27 = vpop.f32.mrb[16].mxu0 }
 0x598   :  { %v6746_v40 = vadd.f32 %v12494_v27, %v17922_v55  ;;  %v6643_v19 = vpop.f32.mrb[17].mxu0 }
 0x599   :  { %v6745_v13 = vadd.f32 %v17922_v55, %v6643_v19 }
 0x59a   :  { %v6762_v15 = vmax.f32 %v6746_v40, 0.0 }
 0x59b   :  { %v6761_v44 = vmax.f32 %v6745_v13, 0.0  ;;  %v12497_v1 = vpop.f32.mrb[18].mxu0 }
 0x59c   :  { %6778 = vst [vmem:[#allocation3 + $0x8] sm:$0xff] %v6762_v15  ;;  %v6748_v3 = vadd.f32 %v12497_v1, %v17922_v55  ;;  %v6653_v14 = vpop.f32.mrb[19].mxu0  ;;  %v6810_v15 = vld [vmem:[%s18970_s5 + $0x10] sm:$0xff] }
 0x59d   :  { %6777 = vst [vmem:[#allocation3] sm:$0xff] %v6761_v44  ;;  %v6747_v62 = vadd.f32 %v17922_v55, %v6653_v14  ;;  %v6811_v44 = vld [vmem:[%s18970_s5 + $0x18] sm:$0xff]  ;;  %v6812_v14 = vld [vmem:[%s18970_s5 + $0x20] sm:$0xff] }
 0x59e   :  { %v6764_v22 = vmax.f32 %v6748_v3, 0.0  ;;  %v14006_v3 = vpack.c.bf16 %v6811_v44, %v6810_v15 }
 0x59f   :  { %v6763_v12 = vmax.f32 %v6747_v62, 0.0  ;;  %v12500_v2 = vpop.f32.mrb[20].mxu0  ;;  %v6813_v62 = vld [vmem:[%s18970_s5 + $0x28] sm:$0xff] }
 0x5a0   :  { %6780 = vst [vmem:[#allocation3 + $0x18] sm:$0xff] %v6764_v22  ;;  %v6750_v18 = vadd.f32 %v12500_v2, %v17922_v55  ;;  %v6663_v53 = vpop.f32.mrb[21].mxu0  ;;  %v14009_v22 = vpack.c.bf16 %v6813_v62, %v6812_v14  ;;  %v6815_v2 = vld [vmem:[%s18970_s5 + $0x38] sm:$0xff] }
 0x5a1   :  { %6779 = vst [vmem:[#allocation3 + $0x10] sm:$0xff] %v6763_v12  ;;  %v6749_v50 = vadd.f32 %v17922_v55, %v6663_v53  ;;  %v6814_v12 = vld [vmem:[%s18970_s5 + $0x30] sm:$0xff]  ;;  %v6816_v53 = vld [vmem:[%s18970_s5 + $0x40] sm:$0xff]  ;;  %v9390_v14 = vld [vmem:[%s18970_s5 + $0x178] sm:$0xff] }
 0x5a2   :  { %v6766_v52 = vmax.f32 %v6750_v18, 0.0  ;;  %v14012_v18 = vpack.c.bf16 %v6815_v2, %v6814_v12 }
 0x5a3   :  { %v6765_v47 = vmax.f32 %v6749_v50, 0.0  ;;  %v12503_v26 = vpop.f32.mrb[22].mxu0  ;;  %v6828_v28 = vld [vmem:[#allocation3 + $0xa] sm:$0x1]  ;;  %v6830_v38 = vld [vmem:[#allocation3 + $0xb] sm:$0x1] }
 0x5a4   :  { %6782 = vst [vmem:[#allocation3 + $0x28] sm:$0xff] %v6766_v52  ;;  %v6752_v43 = vadd.f32 %v12503_v26, %v17922_v55  ;;  %v6673_v30 = vpop.f32.mrb[23].mxu0  ;;  %v6824_v25 = vld [vmem:[#allocation3 + $0x2] sm:$0x1]  ;;  %v6826_v42 = vld [vmem:[#allocation3 + $0x3] sm:$0x1]  ;;  %v6834_v61 = vmax.f32 %v6828_v28, %v6830_v38 }
 0x5a5   :  { %6781 = vst [vmem:[#allocation3 + $0x20] sm:$0xff] %v6765_v47  ;;  %v6751_v54 = vadd.f32 %v17922_v55, %v6673_v30  ;;  %v6832_v34 = vmax.f32 %v6824_v25, %v6826_v42  ;;  %v6817_v50 = vld [vmem:[%s18970_s5 + $0x48] sm:$0xff]  ;;  %v6818_v47 = vld [vmem:[%s18970_s5 + $0x50] sm:$0xff]  ;;  %v6819_v26 = vld [vmem:[%s18970_s5 + $0x58] sm:$0xff] }
 0x5a6   :  { %v6768_v4 = vmax.f32 %v6752_v43, 0.0  ;;  %v14015_v52 = vpack.c.bf16 %v6817_v50, %v6816_v53  ;;  %v9376_v28 = vld [vmem:[%s18970_s5 + $0x108] sm:$0xff]  ;;  %v9377_v42 = vld [vmem:[%s18970_s5 + $0x110] sm:$0xff]  ;;  %v7006_v62 = vld [vmem:[#allocation3 + $0x4] sm:$0x1] }
 0x5a7   :  { %v6767_v45 = vmax.f32 %v6751_v54, 0.0  ;;  %v12506_v5 = vpop.f32.mrb[24].mxu0  ;;  %v6836_v19 = vmax.f32 %v6832_v34, %v6834_v61  ;;  %v9384_v34 = vld [vmem:[%s18970_s5 + $0x148] sm:$0xff]  ;;  %v9385_v61 = vld [vmem:[%s18970_s5 + $0x150] sm:$0xff] }
 0x5a8   :  { %6784 = vst [vmem:[#allocation3 + $0x38] sm:$0xff] %v6768_v4  ;;  %v6754_v49 = vadd.f32 %v12506_v5, %v17922_v55  ;;  %v6683_v63 = vpop.f32.mrb[25].mxu0  ;;  %v6820_v5 = vld [vmem:[%s18970_s5 + $0x60] sm:$0xff]  ;;  %v7010_v12 = vld [vmem:[#allocation3 + $0xc] sm:$0x1] }
 0x5a9   :  { %6783 = vst [vmem:[#allocation3 + $0x30] sm:$0xff] %v6767_v45  ;;  %v6753_v35 = vadd.f32 %v17922_v55, %v6683_v63  ;;  %v14018_v45 = vpack.c.bf16 %v6819_v26, %v6818_v47  ;;  %v7012_v2 = vld [vmem:[#allocation3 + $0xd] sm:$0x1]  ;;  %v9391_v47 = vld [vmem:[%s18970_s5 + $0x180] sm:$0xff] }
 0x5aa   :  { %v6770_v36 = vmax.f32 %v6754_v49, 0.0  ;;  %v6821_v49 = vld [vmem:[%s18970_s5 + $0x68] sm:$0xff] }
 0x5ab   :  { %v6769_v0 = vmax.f32 %v6753_v35, 0.0  ;;  %v12509_v48 = vpop.f32.mrb[26].mxu0  ;;  %v9392_v26 = vld [vmem:[%s18970_s5 + $0x188] sm:$0xff] }
 0x5ac   :  { %6786 = vst [vmem:[#allocation3 + $0x48] sm:$0xff] %v6770_v36  ;;  %v6756_v32 = vadd.f32 %v12509_v48, %v17922_v55  ;;  %v6693_v10 = vpop.f32.mrb[27].mxu0  ;;  %v14021_v36 = vpack.c.bf16 %v6821_v49, %v6820_v5  ;;  %v6823_v48 = vld [vmem:[%s18970_s5 + $0x78] sm:$0xff] }
 0x5ad   :  { %6785 = vst [vmem:[#allocation3 + $0x40] sm:$0xff] %v6769_v0  ;;  %v6755_v6 = vadd.f32 %v17922_v55, %v6693_v10  ;;  %v6822_v0 = vld [vmem:[%s18970_s5 + $0x70] sm:$0xff]  ;;  %v6795_v10 = vld [vmem:[#allocation3 + $0x1] sm:$0x1] }
 0x5ae   :  { %v6772_v58 = vmax.f32 %v6756_v32, 0.0  ;;  %v6793_v32 = vld [vmem:[#allocation3] sm:$0x1] }
 0x5af   :  { %v6771_v39 = vmax.f32 %v6755_v6, 0.0  ;;  %v12512_v31 = vpop.f32.mrb[28].mxu0  ;;  %v6798_v6 = vld [vmem:[#allocation3 + $0x8] sm:$0x1] }
 0x5b0   :  { %6788 = vst [vmem:[#allocation3 + $0x58] sm:$0xff] %v6772_v58  ;;  %v6758_v33 = vadd.f32 %v12512_v31, %v17922_v55  ;;  %v6703_v57 = vpop.f32.mrb[29].mxu0  ;;  %v6800_v58 = vld [vmem:[#allocation3 + $0x9] sm:$0x1]  ;;  %v14024_v31 = vpack.c.bf16 %v6823_v48, %v6822_v0  ;;  %v9397_v0 = vld [vmem:[%s18970_s5 + $0x1b0] sm:$0xff]  ;;  %v9398_v48 = vld [vmem:[%s18970_s5 + $0x1b8] sm:$0xff] }
 0x5b1   :  { %6787 = vst [vmem:[#allocation3 + $0x50] sm:$0xff] %v6771_v39  ;;  %v6757_v41 = vadd.f32 %v17922_v55, %v6703_v57  ;;  %v6804_v57 = vmax.f32 %v6798_v6, %v6800_v58  ;;  %v9400_v6 = vld [vmem:[%s18970_s5 + $0x1c8] sm:$0xff] }
 0x5b2   :  { %v6774_v7 = vmax.f32 %v6758_v33, 0.0  ;;  %v6802_v33 = vmax.f32 %v6793_v32, %v6795_v10  ;;  %v14060_v32 = vpack.c.bf16 %v9398_v48, %v9397_v0  ;;  %v9399_v10 = vld [vmem:[%s18970_s5 + $0x1c0] sm:$0xff]  ;;  %v9422_v0 = vld [vmem:[%s18970_s5 + $0x278] sm:$0xff] }
 0x5b3   :  { %v6773_v51 = vmax.f32 %v6757_v41, 0.0  ;;  %v12515_v56 = vpop.f32.mrb[30].mxu0  ;;  %v6829_v11 = vld [vmem:[#allocation3 + $0x4a] sm:$0x1]  ;;  %v6831_v46 = vld [vmem:[#allocation3 + $0x4b] sm:$0x1]  ;;  %v14063_v58 = vpack.c.bf16 %v9400_v6, %v9399_v10 }
 0x5b4   :  { %6790 = vst [vmem:[#allocation3 + $0x68] sm:$0xff] %v6774_v7  ;;  %v6760_v16 = vadd.f32 %v12515_v56, %v17922_v55  ;;  %v6713_v23 = vpop.f32.mrb[31].mxu0  ;;  %v6825_v37 = vld [vmem:[#allocation3 + $0x42] sm:$0x1]  ;;  %v6827_v17 = vld [vmem:[#allocation3 + $0x43] sm:$0x1]  ;;  %v6835_v21 = vmax.f32 %v6829_v11, %v6831_v46  ;;  %v6806_v7 = vmax.f32 %v6802_v33, %v6804_v57 }
 0x5b5   :  { %6789 = vst [vmem:[#allocation3 + $0x60] sm:$0xff] %v6773_v51  ;;  %v6759_v8 = vadd.f32 %v17922_v55, %v6713_v23  ;;  %v6833_v24 = vmax.f32 %v6825_v37, %v6827_v17  ;;  %v14003_v55 = vpack.c.bf16 %v6809_v20, %v6808_v59  ;;  %v6794_v43 = vld [vmem:[#allocation3 + $0x40] sm:$0x1]  ;;  %v6796_v30 = vld [vmem:[#allocation3 + $0x41] sm:$0x1]  ;;  %v9378_v51 = vld [vmem:[%s18970_s5 + $0x118] sm:$0xff] }
 0x5b6   :  { %v6776_v60 = vmax.f32 %v6760_v16, 0.0  ;;  %v6799_v54 = vld [vmem:[#allocation3 + $0x48] sm:$0x1]  ;;  %v6801_v4 = vld [vmem:[#allocation3 + $0x49] sm:$0x1]  ;;  %v6803_v63 = vmax.f32 %v6794_v43, %v6796_v30  ;;  %v9375_v41 = vld [vmem:[%s18970_s5 + $0x100] sm:$0xff]  ;;  %v14030_v11 = vpack.c.bf16 %v9378_v51, %v9377_v42 }
 0x5b7   :  { %v6775_v27 = vmax.f32 %v6759_v8, 0.0  ;;  %v6837_v40 = vmax.f32 %v6833_v24, %v6835_v21  ;;  %v6805_v35 = vmax.f32 %v6799_v54, %v6801_v4  ;;  %v14027_v25 = vpack.c.bf16 %v9376_v28, %v9375_v41  ;;  %v9379_v46 = vld [vmem:[%s18970_s5 + $0x120] sm:$0xff]  ;;  %v9380_v16 = vld [vmem:[%s18970_s5 + $0x128] sm:$0xff]  ;;  %v9381_v37 = vld [vmem:[%s18970_s5 + $0x130] sm:$0xff] }
 0x5b8   :  { %6792 = vst [vmem:[#allocation3 + $0x78] sm:$0xff] %v6776_v60  ;;  %v14033_v23 = vpack.c.bf16 %v9380_v16, %v9379_v46  ;;  %v9382_v17 = vld [vmem:[%s18970_s5 + $0x138] sm:$0xff]  ;;  %v9383_v8 = vld [vmem:[%s18970_s5 + $0x140] sm:$0xff]  ;;  %v14051_v54 = vpack.c.bf16 %v9392_v26, %v9391_v47  ;;  %v9393_v4 = vld [vmem:[%s18970_s5 + $0x190] sm:$0xff] }
 0x5b9   :  { %6791 = vst [vmem:[#allocation3 + $0x70] sm:$0xff] %v6775_v27  ;;  %v6857_v13 = vrot.slane %v6837_v40, 7  ;;  %v6807_v39 = vmax.f32 %v6803_v63, %v6805_v35  ;;  %v14036_v21 = vpack.c.bf16 %v9382_v17, %v9381_v37  ;;  %v14039_v24 = vpack.c.bf16 %v9384_v34, %v9383_v8  ;;  %v9386_v60 = vld [vmem:[%s18970_s5 + $0x158] sm:$0xff]  ;;  %v7007_v59 = vld [vmem:[#allocation3 + $0x44] sm:$0x1]  ;;  %v9396_v35 = vld [vmem:[%s18970_s5 + $0x1a8] sm:$0xff] }
 0x5ba   :  { %v7009_v20 = vld [vmem:[#allocation3 + $0x45] sm:$0x1]  ;;  %v7011_v27 = vld [vmem:[#allocation3 + $0x4c] sm:$0x1]  ;;  %v7013_v40 = vld [vmem:[#allocation3 + $0x4d] sm:$0x1] }
 0x5bb   :  { %v6859_v1 = vsel %vm6858_vm2, %v6857_v13, %v6836_v19  ;;  %v6933_v38 = vrot.slane %v6807_v39, 7  ;;  %v14042_v19 = vpack.c.bf16 %v9386_v60, %v9385_v61  ;;  %v9387_v13 = vld [vmem:[%s18970_s5 + $0x160] sm:$0xff]  ;;  %v7015_v15 = vmax.f32 %v7007_v59, %v7009_v20  ;;  %v9401_v39 = vld [vmem:[%s18970_s5 + $0x1d0] sm:$0xff]  ;;  %v7118_v41 = vld [vmem:[#allocation3 + $0x4e] sm:$0x1] }
 0x5bc   :  { %12549 = vmatmul.mubr.f32.vlgmr.msra.gmra.mrb[128].mxu1 %v6859_v1  ;;  %v7017_v44 = vmax.f32 %v7011_v27, %v7013_v40  ;;  %v9395_v63 = vld [vmem:[%s18970_s5 + $0x1a0] sm:$0xff]  ;;  %v7120_v28 = vld [vmem:[#allocation3 + $0x4f] sm:$0x1]  ;;  %v9406_v46 = vld [vmem:[%s18970_s5 + $0x1f8] sm:$0xff] }
 0x5bd   :  { %14004 = vmatpush3.bf16.msra.mxu1 %v14003_v55  ;;  %12583 = vmatprep.mubr.msk.f32.mxu1 %vm14828_vm1, %v14829_v9  ;;  %v6934_v56 = vsel %vm6858_vm2, %v6933_v38, %v6806_v7  ;;  %v9388_v55 = vld [vmem:[%s18970_s5 + $0x168] sm:$0xff]  ;;  %v7114_v33 = vld [vmem:[#allocation3 + $0x46] sm:$0x1]  ;;  %v7116_v57 = vld [vmem:[#allocation3 + $0x47] sm:$0x1]  ;;  %v7124_v51 = vmax.f32 %v7118_v41, %v7120_v28 }
 0x5be   :  { %14005 = vmatprep.subr.bf16.mxu1 %v14827_v29  ;;  %v14045_v1 = vpack.c.bf16 %v9388_v55, %v9387_v13  ;;  %v9403_v7 = vld [vmem:[%s18970_s5 + $0x1e0] sm:$0xff]  ;;  %v7122_v42 = vmax.f32 %v7114_v33, %v7116_v57  ;;  %v7117_v37 = vld [vmem:[#allocation3 + $0xe] sm:$0x1]  ;;  %v7119_v17 = vld [vmem:[#allocation3 + $0xf] sm:$0x1] }
 0x5bf   :  { %v7113_v16 = vld [vmem:[#allocation3 + $0x6] sm:$0x1]  ;;  %v9408_v60 = vld [vmem:[%s18970_s5 + $0x208] sm:$0xff]  ;;  %v9409_v40 = vld [vmem:[%s18970_s5 + $0x210] sm:$0xff] }
 0x5c0   :  { %v9407_v61 = vld [vmem:[%s18970_s5 + $0x200] sm:$0xff]  ;;  %v7227_v47 = vld [vmem:[#allocation3 + $0x58] sm:$0x1]  ;;  %v7229_v26 = vld [vmem:[#allocation3 + $0x59] sm:$0x1] }
 0x5c1   :  { %14007 = vmatpush3.bf16.msra.mxu1 %v14006_v3  ;;  %v9389_v3 = vld [vmem:[%s18970_s5 + $0x170] sm:$0xff]  ;;  %v14075_v27 = vpack.c.bf16 %v9408_v60, %v9407_v61  ;;  %v7228_v48 = vld [vmem:[#allocation3 + $0x19] sm:$0x1]  ;;  %v7334_v61 = vld [vmem:[#allocation3 + $0x5a] sm:$0x1] }
 0x5c2   :  { %14008 = vmatprep.subr.bf16.mxu1 %v14827_v29  ;;  %v14048_v53 = vpack.c.bf16 %v9390_v14, %v9389_v3  ;;  %v9413_v3 = vld [vmem:[%s18970_s5 + $0x230] sm:$0xff]  ;;  %v9414_v14 = vld [vmem:[%s18970_s5 + $0x238] sm:$0xff] }
 0x5c3   :  { %v9425_v28 = vld [vmem:[%s18970_s5 + $0x290] sm:$0xff]  ;;  %v7336_v60 = vld [vmem:[#allocation3 + $0x5b] sm:$0x1] }
 0x5c5   :  { %14010 = vmatpush3.bf16.msra.mxu1 %v14009_v22  ;;  %v7008_v22 = vld [vmem:[#allocation3 + $0x5] sm:$0x1] }
 0x5c6   :  { %14011 = vmatprep.subr.bf16.mxu1 %v14827_v29  ;;  %v7014_v50 = vmax.f32 %v7006_v62, %v7008_v22  ;;  %v14084_v62 = vpack.c.bf16 %v9414_v14, %v9413_v3  ;;  %v9415_v22 = vld [vmem:[%s18970_s5 + $0x240] sm:$0xff]  ;;  %v9438_v3 = vld [vmem:[%s18970_s5 + $0x2f8] sm:$0xff] }
 0x5c7   :  { %v7335_v14 = vld [vmem:[#allocation3 + $0x1b] sm:$0x1] }
 0x5c9   :  { %14013 = vmatpush3.bf16.msra.mxu1 %v14012_v18  ;;  %v7019_v18 = vmax.f32 %v7015_v15, %v7017_v44  ;;  %v9411_v15 = vld [vmem:[%s18970_s5 + $0x220] sm:$0xff]  ;;  %v9412_v44 = vld [vmem:[%s18970_s5 + $0x228] sm:$0xff] }
 0x5ca   :  { %14014 = vmatprep.subr.bf16.mxu1 %v14827_v29 }
 0x5cb   :  { %v7039_v43 = vrot.slane %v7019_v18, 7  ;;  %v9417_v18 = vld [vmem:[%s18970_s5 + $0x250] sm:$0xff] }
 0x5cd   :  { %14016 = vmatpush3.bf16.msra.mxu1 %v14015_v52  ;;  %v7016_v52 = vmax.f32 %v7010_v12, %v7012_v2  ;;  %v9416_v12 = vld [vmem:[%s18970_s5 + $0x248] sm:$0xff] }
 0x5ce   :  { %14017 = vmatprep.subr.bf16.mxu1 %v14827_v29  ;;  %v14087_v2 = vpack.c.bf16 %v9416_v12, %v9415_v22 }
 0x5cf   :  { %v7018_v30 = vmax.f32 %v7014_v50, %v7016_v52  ;;  %v7222_v50 = vld [vmem:[#allocation3 + $0x50] sm:$0x1]  ;;  %v7224_v52 = vld [vmem:[#allocation3 + $0x51] sm:$0x1] }
 0x5d1   :  { %14019 = vmatpush3.bf16.msra.mxu1 %v14018_v45  ;;  %v9394_v45 = vld [vmem:[%s18970_s5 + $0x198] sm:$0xff]  ;;  %v7040_v5 = vsel %vm6858_vm2, %v7039_v43, %v7018_v30  ;;  %v9419_v30 = vld [vmem:[%s18970_s5 + $0x260] sm:$0xff] }
 0x5d2   :  { %14020 = vmatprep.subr.bf16.mxu1 %v14827_v29  ;;  %v14054_v49 = vpack.c.bf16 %v9394_v45, %v9393_v4  ;;  %v7231_v4 = vmax.f32 %v7222_v50, %v7224_v52  ;;  %v7233_v45 = vmax.f32 %v7227_v47, %v7229_v26  ;;  %v9441_v26 = vld [vmem:[%s18970_s5 + $0x310] sm:$0xff] }
 0x5d5   :  { %14022 = vmatpush3.bf16.msra.mxu1 %v14021_v36  ;;  %v14057_v36 = vpack.c.bf16 %v9396_v35, %v9395_v63  ;;  %v7223_v63 = vld [vmem:[#allocation3 + $0x11] sm:$0x1]  ;;  %v7226_v35 = vld [vmem:[#allocation3 + $0x18] sm:$0x1] }
 0x5d6   :  { %14023 = vmatprep.subr.bf16.mxu1 %v14827_v29 }
 0x5d9   :  { %14025 = vmatpush3.bf16.msra.mxu1 %v14024_v31  ;;  %v9402_v31 = vld [vmem:[%s18970_s5 + $0x1d8] sm:$0xff] }
 0x5da   :  { %14026 = vmatprep.subr.bf16.mxu1 %v14827_v29  ;;  %v14066_v38 = vpack.c.bf16 %v9402_v31, %v9401_v39  ;;  %v9423_v39 = vld [vmem:[%s18970_s5 + $0x280] sm:$0xff]  ;;  %v9424_v31 = vld [vmem:[%s18970_s5 + $0x288] sm:$0xff] }
 0x5db   :  { %v14099_v41 = vpack.c.bf16 %v9424_v31, %v9423_v39  ;;  %v7441_v39 = vld [vmem:[#allocation3 + $0x5c] sm:$0x1]  ;;  %v7443_v31 = vld [vmem:[#allocation3 + $0x5d] sm:$0x1] }
 0x5dc   :  { %12584 = vmatmul.mubr.f32.vlgmr.msra.gmra.mrb[130].mxu1 %v6934_v56 }
 0x5dd   :  { %14028 = vmatpush3.bf16.msra.mxu1 %v14027_v25  ;;  %12618 = vmatprep.mubr.msk.f32.mxu1 %vm14828_vm1, %v14829_v9  ;;  %v9404_v25 = vld [vmem:[%s18970_s5 + $0x1e8] sm:$0xff] }
 0x5de   :  { %14029 = vmatprep.subr.bf16.mxu1 %v14827_v29  ;;  %v14069_v56 = vpack.c.bf16 %v9404_v25, %v9403_v7 }
 0x5e1   :  { %14031 = vmatpush3.bf16.msra.mxu1 %v14030_v11  ;;  %v9405_v11 = vld [vmem:[%s18970_s5 + $0x1f0] sm:$0xff] }
 0x5e2   :  { %14032 = vmatprep.subr.bf16.mxu1 %v14827_v29  ;;  %v14072_v8 = vpack.c.bf16 %v9406_v46, %v9405_v11  ;;  %v9429_v11 = vld [vmem:[%s18970_s5 + $0x2b0] sm:$0xff]  ;;  %v9430_v46 = vld [vmem:[%s18970_s5 + $0x2b8] sm:$0xff] }
 0x5e5   :  { %14034 = vmatpush3.bf16.msra.mxu1 %v14033_v23  ;;  %v7115_v23 = vld [vmem:[#allocation3 + $0x7] sm:$0x1] }
 0x5e6   :  { %14035 = vmatprep.subr.bf16.mxu1 %v14827_v29  ;;  %v7121_v34 = vmax.f32 %v7113_v16, %v7115_v23  ;;  %v14108_v16 = vpack.c.bf16 %v9430_v46, %v9429_v11  ;;  %v9431_v23 = vld [vmem:[%s18970_s5 + $0x2c0] sm:$0xff]  ;;  %v9454_v11 = vld [vmem:[%s18970_s5 + $0x378] sm:$0xff] }
 0x5e7   :  { %v7442_v46 = vld [vmem:[#allocation3 + $0x1d] sm:$0x1] }
 0x5e9   :  { %14037 = vmatpush3.bf16.msra.mxu1 %v14036_v21  ;;  %v7126_v21 = vmax.f32 %v7122_v42, %v7124_v51  ;;  %v9427_v42 = vld [vmem:[%s18970_s5 + $0x2a0] sm:$0xff]  ;;  %v9428_v51 = vld [vmem:[%s18970_s5 + $0x2a8] sm:$0xff] }
 0x5ea   :  { %14038 = vmatprep.subr.bf16.mxu1 %v14827_v29 }
 0x5eb   :  { %v7146_v59 = vrot.slane %v7126_v21, 7  ;;  %v9433_v21 = vld [vmem:[%s18970_s5 + $0x2d0] sm:$0xff] }
 0x5ed   :  { %14040 = vmatpush3.bf16.msra.mxu1 %v14039_v24  ;;  %v7123_v24 = vmax.f32 %v7117_v37, %v7119_v17  ;;  %v9432_v37 = vld [vmem:[%s18970_s5 + $0x2c8] sm:$0xff] }
 0x5ee   :  { %14041 = vmatprep.subr.bf16.mxu1 %v14827_v29  ;;  %v14111_v17 = vpack.c.bf16 %v9432_v37, %v9431_v23 }
 0x5ef   :  { %v7125_v20 = vmax.f32 %v7121_v34, %v7123_v24  ;;  %v7330_v34 = vld [vmem:[#allocation3 + $0x52] sm:$0x1]  ;;  %v7332_v24 = vld [vmem:[#allocation3 + $0x53] sm:$0x1] }
 0x5f1   :  { %14043 = vmatpush3.bf16.msra.mxu1 %v14042_v19  ;;  %v9410_v19 = vld [vmem:[%s18970_s5 + $0x218] sm:$0xff]  ;;  %v7147_v13 = vsel %vm6858_vm2, %v7146_v59, %v7125_v20  ;;  %v9435_v20 = vld [vmem:[%s18970_s5 + $0x2e0] sm:$0xff] }
 0x5f2   :  { %14044 = vmatprep.subr.bf16.mxu1 %v14827_v29  ;;  %v14078_v55 = vpack.c.bf16 %v9410_v19, %v9409_v40  ;;  %v7338_v40 = vmax.f32 %v7330_v34, %v7332_v24  ;;  %v7340_v19 = vmax.f32 %v7334_v61, %v7336_v60  ;;  %v9457_v60 = vld [vmem:[%s18970_s5 + $0x390] sm:$0xff] }
 0x5f5   :  { %14046 = vmatpush3.bf16.msra.mxu1 %v14045_v1  ;;  %v14081_v1 = vpack.c.bf16 %v9412_v44, %v9411_v15  ;;  %v7331_v15 = vld [vmem:[#allocation3 + $0x13] sm:$0x1]  ;;  %v7333_v44 = vld [vmem:[#allocation3 + $0x1a] sm:$0x1] }
 0x5f6   :  { %14047 = vmatprep.subr.bf16.mxu1 %v14827_v29 }
 0x5f9   :  { %14049 = vmatpush3.bf16.msra.mxu1 %v14048_v53  ;;  %v9418_v53 = vld [vmem:[%s18970_s5 + $0x258] sm:$0xff] }
 0x5fa   :  { %14050 = vmatprep.subr.bf16.mxu1 %v14827_v29  ;;  %v14090_v43 = vpack.c.bf16 %v9418_v53, %v9417_v18  ;;  %v9439_v18 = vld [vmem:[%s18970_s5 + $0x300] sm:$0xff]  ;;  %v9440_v53 = vld [vmem:[%s18970_s5 + $0x308] sm:$0xff] }
 0x5fb   :  { %v14123_v47 = vpack.c.bf16 %v9440_v53, %v9439_v18  ;;  %v7548_v18 = vld [vmem:[#allocation3 + $0x5e] sm:$0x1]  ;;  %v7550_v53 = vld [vmem:[#allocation3 + $0x5f] sm:$0x1] }
 0x5fc   :  { %12619 = vmatmul.mubr.f32.vlgmr.msra.gmra.mrb[132].mxu1 %v7040_v5 }
 0x5fd   :  { %14052 = vmatpush3.bf16.msra.mxu1 %v14051_v54  ;;  %12653 = vmatprep.mubr.msk.f32.mxu1 %vm14828_vm1, %v14829_v9  ;;  %v9420_v54 = vld [vmem:[%s18970_s5 + $0x268] sm:$0xff] }
 0x5fe   :  { %14053 = vmatprep.subr.bf16.mxu1 %v14827_v29  ;;  %v14093_v5 = vpack.c.bf16 %v9420_v54, %v9419_v30 }
 0x601   :  { %14055 = vmatpush3.bf16.msra.mxu1 %v14054_v49  ;;  %v7221_v49 = vld [vmem:[#allocation3 + $0x10] sm:$0x1] }
 0x602   :  { %14056 = vmatprep.subr.bf16.mxu1 %v14827_v29  ;;  %v7230_v6 = vmax.f32 %v7221_v49, %v7223_v63  ;;  %v9445_v49 = vld [vmem:[%s18970_s5 + $0x330] sm:$0xff]  ;;  %v9446_v63 = vld [vmem:[%s18970_s5 + $0x338] sm:$0xff] }
 0x605   :  { %14058 = vmatpush3.bf16.msra.mxu1 %v14057_v36  ;;  %v9421_v36 = vld [vmem:[%s18970_s5 + $0x270] sm:$0xff] }
 0x606   :  { %14059 = vmatprep.subr.bf16.mxu1 %v14827_v29  ;;  %v14096_v10 = vpack.c.bf16 %v9422_v0, %v9421_v36  ;;  %v9447_v36 = vld [vmem:[%s18970_s5 + $0x340] sm:$0xff]  ;;  %v9448_v0 = vld [vmem:[%s18970_s5 + $0x348] sm:$0xff] }
 0x609   :  { %14061 = vmatpush3.bf16.msra.mxu1 %v14060_v32  ;;  %v7235_v32 = vmax.f32 %v7231_v4, %v7233_v45  ;;  %v9443_v4 = vld [vmem:[%s18970_s5 + $0x320] sm:$0xff]  ;;  %v9444_v45 = vld [vmem:[%s18970_s5 + $0x328] sm:$0xff] }
 0x60a   :  { %14062 = vmatprep.subr.bf16.mxu1 %v14827_v29 }
 0x60b   :  { %v7255_v33 = vrot.slane %v7235_v32, 7  ;;  %v9449_v32 = vld [vmem:[%s18970_s5 + $0x350] sm:$0xff] }
 0x60d   :  { %14064 = vmatpush3.bf16.msra.mxu1 %v14063_v58  ;;  %v7232_v58 = vmax.f32 %v7226_v35, %v7228_v48  ;;  %v14132_v35 = vpack.c.bf16 %v9446_v63, %v9445_v49  ;;  %v14135_v48 = vpack.c.bf16 %v9448_v0, %v9447_v36  ;;  %v7547_v49 = vld [vmem:[#allocation3 + $0x1e] sm:$0x1]  ;;  %v9469_v63 = vld [vmem:[%s18970_s5 + $0x3f0] sm:$0xff]  ;;  %v7549_v36 = vld [vmem:[#allocation3 + $0x1f] sm:$0x1] }
 0x60e   :  { %14065 = vmatprep.subr.bf16.mxu1 %v14827_v29 }
 0x60f   :  { %v7234_v57 = vmax.f32 %v7230_v6, %v7232_v58  ;;  %v7437_v6 = vld [vmem:[#allocation3 + $0x54] sm:$0x1]  ;;  %v7439_v58 = vld [vmem:[#allocation3 + $0x55] sm:$0x1] }
 0x611   :  { %14067 = vmatpush3.bf16.msra.mxu1 %v14066_v38  ;;  %v9426_v38 = vld [vmem:[%s18970_s5 + $0x298] sm:$0xff]  ;;  %v7256_v7 = vsel %vm6858_vm2, %v7255_v33, %v7234_v57  ;;  %v9451_v57 = vld [vmem:[%s18970_s5 + $0x360] sm:$0xff] }
 0x612   :  { %14068 = vmatprep.subr.bf16.mxu1 %v14827_v29  ;;  %v14102_v25 = vpack.c.bf16 %v9426_v38, %v9425_v28  ;;  %v7445_v28 = vmax.f32 %v7437_v6, %v7439_v58  ;;  %v7447_v38 = vmax.f32 %v7441_v39, %v7443_v31  ;;  %v9471_v6 = vld [vmem:[%s18970_s5 + $0x400] sm:$0xff]  ;;  %v9472_v58 = vld [vmem:[%s18970_s5 + $0x408] sm:$0xff] }
 0x615   :  { %14070 = vmatpush3.bf16.msra.mxu1 %v14069_v56  ;;  %v14105_v56 = vpack.c.bf16 %v9428_v51, %v9427_v42  ;;  %v7438_v42 = vld [vmem:[#allocation3 + $0x15] sm:$0x1]  ;;  %v7440_v51 = vld [vmem:[#allocation3 + $0x1c] sm:$0x1] }
 0x616   :  { %14071 = vmatprep.subr.bf16.mxu1 %v14827_v29 }
 0x619   :  { %14073 = vmatpush3.bf16.msra.mxu1 %v14072_v8  ;;  %v9434_v8 = vld [vmem:[%s18970_s5 + $0x2d8] sm:$0xff] }
 0x61a   :  { %14074 = vmatprep.subr.bf16.mxu1 %v14827_v29  ;;  %v14114_v59 = vpack.c.bf16 %v9434_v8, %v9433_v21  ;;  %v9455_v21 = vld [vmem:[%s18970_s5 + $0x380] sm:$0xff]  ;;  %v9456_v8 = vld [vmem:[%s18970_s5 + $0x388] sm:$0xff] }
 0x61b   :  { %v14147_v61 = vpack.c.bf16 %v9456_v8, %v9455_v21  ;;  %v7652_v21 = vld [vmem:[#allocation3 + $0x60] sm:$0x1]  ;;  %v7654_v8 = vld [vmem:[#allocation3 + $0x61] sm:$0x1] }
 0x61c   :  { %12654 = vmatmul.mubr.f32.vlgmr.msra.gmra.mrb[134].mxu1 %v7147_v13 }
 0x61d   :  { %14076 = vmatpush3.bf16.msra.mxu1 %v14075_v27  ;;  %12688 = vmatprep.mubr.msk.f32.mxu1 %vm14828_vm1, %v14829_v9  ;;  %v9436_v27 = vld [vmem:[%s18970_s5 + $0x2e8] sm:$0xff] }
 0x61e   :  { %14077 = vmatprep.subr.bf16.mxu1 %v14827_v29  ;;  %v14117_v13 = vpack.c.bf16 %v9436_v27, %v9435_v20 }
 0x621   :  { %14079 = vmatpush3.bf16.msra.mxu1 %v14078_v55  ;;  %v7329_v55 = vld [vmem:[#allocation3 + $0x12] sm:$0x1] }
 0x622   :  { %14080 = vmatprep.subr.bf16.mxu1 %v14827_v29  ;;  %v7337_v12 = vmax.f32 %v7329_v55, %v7331_v15  ;;  %v9461_v55 = vld [vmem:[%s18970_s5 + $0x3b0] sm:$0xff]  ;;  %v9462_v15 = vld [vmem:[%s18970_s5 + $0x3b8] sm:$0xff] }
 0x625   :  { %14082 = vmatpush3.bf16.msra.mxu1 %v14081_v1  ;;  %v9437_v1 = vld [vmem:[%s18970_s5 + $0x2f0] sm:$0xff] }
 0x626   :  { %14083 = vmatprep.subr.bf16.mxu1 %v14827_v29  ;;  %v14120_v22 = vpack.c.bf16 %v9438_v3, %v9437_v1  ;;  %v9463_v1 = vld [vmem:[%s18970_s5 + $0x3c0] sm:$0xff]  ;;  %v9464_v3 = vld [vmem:[%s18970_s5 + $0x3c8] sm:$0xff] }
 0x629   :  { %14085 = vmatpush3.bf16.msra.mxu1 %v14084_v62  ;;  %v7342_v62 = vmax.f32 %v7338_v40, %v7340_v19  ;;  %v9459_v40 = vld [vmem:[%s18970_s5 + $0x3a0] sm:$0xff]  ;;  %v9460_v19 = vld [vmem:[%s18970_s5 + $0x3a8] sm:$0xff] }
 0x62a   :  { %14086 = vmatprep.subr.bf16.mxu1 %v14827_v29 }
 0x62b   :  { %v7362_v50 = vrot.slane %v7342_v62, 7  ;;  %v9465_v62 = vld [vmem:[%s18970_s5 + $0x3d0] sm:$0xff] }
 0x62d   :  { %14088 = vmatpush3.bf16.msra.mxu1 %v14087_v2  ;;  %v7339_v2 = vmax.f32 %v7333_v44, %v7335_v14  ;;  %v14156_v44 = vpack.c.bf16 %v9462_v15, %v9461_v55  ;;  %v14159_v14 = vpack.c.bf16 %v9464_v3, %v9463_v1  ;;  %v7651_v15 = vld [vmem:[#allocation3 + $0x20] sm:$0x1]  ;;  %v7656_v1 = vld [vmem:[#allocation3 + $0x28] sm:$0x1]  ;;  %v9485_v3 = vld [vmem:[%s18970_s5 + $0x470] sm:$0xff] }
 0x62e   :  { %14089 = vmatprep.subr.bf16.mxu1 %v14827_v29 }
 0x62f   :  { %v7341_v52 = vmax.f32 %v7337_v12, %v7339_v2  ;;  %v7544_v12 = vld [vmem:[#allocation3 + $0x56] sm:$0x1]  ;;  %v7546_v2 = vld [vmem:[#allocation3 + $0x57] sm:$0x1] }
 0x631   :  { %14091 = vmatpush3.bf16.msra.mxu1 %v14090_v43  ;;  %v9442_v43 = vld [vmem:[%s18970_s5 + $0x318] sm:$0xff]  ;;  %v7363_v30 = vsel %vm6858_vm2, %v7362_v50, %v7341_v52  ;;  %v9467_v52 = vld [vmem:[%s18970_s5 + $0x3e0] sm:$0xff] }
 0x632   :  { %14092 = vmatprep.subr.bf16.mxu1 %v14827_v29  ;;  %v14126_v54 = vpack.c.bf16 %v9442_v43, %v9441_v26  ;;  %v7552_v43 = vmax.f32 %v7544_v12, %v7546_v2 }
 0x635   :  { %14094 = vmatpush3.bf16.msra.mxu1 %v14093_v5  ;;  %v14129_v5 = vpack.c.bf16 %v9444_v45, %v9443_v4  ;;  %v7543_v45 = vld [vmem:[#allocation3 + $0x16] sm:$0x1] }
 0x636   :  { %14095 = vmatprep.subr.bf16.mxu1 %v14827_v29 }
 0x639   :  { %14097 = vmatpush3.bf16.msra.mxu1 %v14096_v10  ;;  %v9450_v10 = vld [vmem:[%s18970_s5 + $0x358] sm:$0xff] }
 0x63a   :  { %14098 = vmatprep.subr.bf16.mxu1 %v14827_v29  ;;  %v14138_v33 = vpack.c.bf16 %v9450_v10, %v9449_v32  ;;  %v7553_v10 = vmax.f32 %v7547_v49, %v7549_v36 }
 0x63c   :  { %12689 = vmatmul.mubr.f32.vlgmr.msra.gmra.mrb[136].mxu1 %v7256_v7 }
 0x63d   :  { %14100 = vmatpush3.bf16.msra.mxu1 %v14099_v41  ;;  %12723 = vmatprep.mubr.msk.f32.mxu1 %vm14828_vm1, %v14829_v9  ;;  %v9452_v41 = vld [vmem:[%s18970_s5 + $0x368] sm:$0xff] }
 0x63e   :  { %14101 = vmatprep.subr.bf16.mxu1 %v14827_v29  ;;  %v14141_v7 = vpack.c.bf16 %v9452_v41, %v9451_v57  ;;  %v9473_v57 = vld [vmem:[%s18970_s5 + $0x410] sm:$0xff]  ;;  %v9474_v41 = vld [vmem:[%s18970_s5 + $0x418] sm:$0xff] }
 0x641   :  { %14103 = vmatpush3.bf16.msra.mxu1 %v14102_v25  ;;  %v7436_v25 = vld [vmem:[#allocation3 + $0x14] sm:$0x1] }
 0x642   :  { %14104 = vmatprep.subr.bf16.mxu1 %v14827_v29  ;;  %v7444_v37 = vmax.f32 %v7436_v25, %v7438_v42  ;;  %v9476_v25 = vld [vmem:[%s18970_s5 + $0x428] sm:$0xff] }
 0x645   :  { %14106 = vmatpush3.bf16.msra.mxu1 %v14105_v56  ;;  %v9453_v56 = vld [vmem:[%s18970_s5 + $0x370] sm:$0xff] }
 0x646   :  { %14107 = vmatprep.subr.bf16.mxu1 %v14827_v29  ;;  %v14144_v23 = vpack.c.bf16 %v9454_v11, %v9453_v56  ;;  %v9478_v56 = vld [vmem:[%s18970_s5 + $0x438] sm:$0xff] }
 0x649   :  { %14109 = vmatpush3.bf16.msra.mxu1 %v14108_v16  ;;  %v7449_v16 = vmax.f32 %v7445_v28, %v7447_v38  ;;  %v14174_v38 = vpack.c.bf16 %v9474_v41, %v9473_v57  ;;  %v9499_v41 = vld [vmem:[%s18970_s5 + $0x4e0] sm:$0xff] }
 0x64a   :  { %14110 = vmatprep.subr.bf16.mxu1 %v14827_v29 }
 0x64b   :  { %v7469_v34 = vrot.slane %v7449_v16, 7  ;;  %v9480_v16 = vld [vmem:[%s18970_s5 + $0x448] sm:$0xff] }
 0x64d   :  { %14112 = vmatpush3.bf16.msra.mxu1 %v14111_v17  ;;  %v7446_v17 = vmax.f32 %v7440_v51, %v7442_v46  ;;  %v9477_v51 = vld [vmem:[%s18970_s5 + $0x430] sm:$0xff]  ;;  %v9479_v46 = vld [vmem:[%s18970_s5 + $0x440] sm:$0xff] }
 0x64e   :  { %14113 = vmatprep.subr.bf16.mxu1 %v14827_v29  ;;  %v14180_v11 = vpack.c.bf16 %v9478_v56, %v9477_v51 }
 0x64f   :  { %v7448_v24 = vmax.f32 %v7444_v37, %v7446_v17  ;;  %v9481_v37 = vld [vmem:[%s18970_s5 + $0x450] sm:$0xff]  ;;  %v9482_v17 = vld [vmem:[%s18970_s5 + $0x458] sm:$0xff] }
 0x651   :  { %14115 = vmatpush3.bf16.msra.mxu1 %v14114_v59  ;;  %v9458_v59 = vld [vmem:[%s18970_s5 + $0x398] sm:$0xff]  ;;  %v7470_v20 = vsel %vm6858_vm2, %v7469_v34, %v7448_v24  ;;  %v7657_v34 = vld [vmem:[#allocation3 + $0x68] sm:$0x1]  ;;  %v7659_v24 = vld [vmem:[#allocation3 + $0x69] sm:$0x1] }
 0x652   :  { %14116 = vmatprep.subr.bf16.mxu1 %v14827_v29  ;;  %v14150_v27 = vpack.c.bf16 %v9458_v59, %v9457_v60  ;;  %v9483_v60 = vld [vmem:[%s18970_s5 + $0x460] sm:$0xff]  ;;  %v9484_v59 = vld [vmem:[%s18970_s5 + $0x468] sm:$0xff] }
 0x653   :  { %v14189_v55 = vpack.c.bf16 %v9484_v59, %v9483_v60  ;;  %v9504_v60 = vld [vmem:[%s18970_s5 + $0x508] sm:$0xff] }
 0x655   :  { %14118 = vmatpush3.bf16.msra.mxu1 %v14117_v13  ;;  %v14153_v13 = vpack.c.bf16 %v9460_v19, %v9459_v40  ;;  %v7663_v40 = vmax.f32 %v7657_v34, %v7659_v24 }
 0x656   :  { %14119 = vmatprep.subr.bf16.mxu1 %v14827_v29 }
 0x659   :  { %14121 = vmatpush3.bf16.msra.mxu1 %v14120_v22  ;;  %v9466_v22 = vld [vmem:[%s18970_s5 + $0x3d8] sm:$0xff] }
 0x65a   :  { %14122 = vmatprep.subr.bf16.mxu1 %v14827_v29  ;;  %v14162_v50 = vpack.c.bf16 %v9466_v22, %v9465_v62  ;;  %v7658_v62 = vld [vmem:[#allocation3 + $0x29] sm:$0x1] }
 0x65c   :  { %12724 = vmatmul.mubr.f32.vlgmr.msra.gmra.mrb[138].mxu1 %v7363_v30  ;;  %v7554_v30 = vmax.f32 %v7548_v18, %v7550_v53  ;;  %v7662_v18 = vmax.f32 %v7656_v1, %v7658_v62  ;;  %v9487_v53 = vld [vmem:[%s18970_s5 + $0x480] sm:$0xff] }
 0x65d   :  { %14124 = vmatpush3.bf16.msra.mxu1 %v14123_v47  ;;  %12758 = vmatprep.mubr.msk.f32.mxu1 %vm14828_vm1, %v14829_v9  ;;  %v9468_v47 = vld [vmem:[%s18970_s5 + $0x3e8] sm:$0xff] }
 0x65e   :  { %14125 = vmatprep.subr.bf16.mxu1 %v14827_v29  ;;  %v14165_v4 = vpack.c.bf16 %v9468_v47, %v9467_v52  ;;  %v7556_v0 = vmax.f32 %v7552_v43, %v7554_v30  ;;  %v9489_v43 = vld [vmem:[%s18970_s5 + $0x490] sm:$0xff]  ;;  %v9490_v30 = vld [vmem:[%s18970_s5 + $0x498] sm:$0xff] }
 0x660   :  { %v7576_v39 = vrot.slane %v7556_v0, 7  ;;  %v9495_v0 = vld [vmem:[%s18970_s5 + $0x4c0] sm:$0xff] }
 0x661   :  { %14127 = vmatpush3.bf16.msra.mxu1 %v14126_v54 }
 0x662   :  { %14128 = vmatprep.subr.bf16.mxu1 %v14827_v29 }
 0x665   :  { %14130 = vmatpush3.bf16.msra.mxu1 %v14129_v5  ;;  %v7545_v5 = vld [vmem:[#allocation3 + $0x17] sm:$0x1] }
 0x666   :  { %14131 = vmatprep.subr.bf16.mxu1 %v14827_v29  ;;  %v7551_v32 = vmax.f32 %v7543_v45, %v7545_v5  ;;  %v9491_v45 = vld [vmem:[%s18970_s5 + $0x4a0] sm:$0xff]  ;;  %v9492_v5 = vld [vmem:[%s18970_s5 + $0x4a8] sm:$0xff] }
 0x667   :  { %v14201_v49 = vpack.c.bf16 %v9492_v5, %v9491_v45 }
 0x668   :  { %v7555_v31 = vmax.f32 %v7551_v32, %v7553_v10  ;;  %v9497_v10 = vld [vmem:[%s18970_s5 + $0x4d0] sm:$0xff] }
 0x669   :  { %14133 = vmatpush3.bf16.msra.mxu1 %v14132_v35  ;;  %v9470_v35 = vld [vmem:[%s18970_s5 + $0x3f8] sm:$0xff] }
 0x66a   :  { %14134 = vmatprep.subr.bf16.mxu1 %v14827_v29  ;;  %v7577_v28 = vsel %vm6858_vm2, %v7576_v39, %v7555_v31  ;;  %v7762_v39 = vld [vmem:[#allocation3 + $0x63] sm:$0x1]  ;;  %v7764_v31 = vld [vmem:[#allocation3 + $0x6a] sm:$0x1] }
 0x66d   :  { %14136 = vmatpush3.bf16.msra.mxu1 %v14135_v48  ;;  %v14168_v48 = vpack.c.bf16 %v9470_v35, %v9469_v63  ;;  %v9493_v63 = vld [vmem:[%s18970_s5 + $0x4b0] sm:$0xff]  ;;  %v9494_v35 = vld [vmem:[%s18970_s5 + $0x4b8] sm:$0xff] }
 0x66e   :  { %14137 = vmatprep.subr.bf16.mxu1 %v14827_v29  ;;  %v14204_v36 = vpack.c.bf16 %v9494_v35, %v9493_v63 }
 0x671   :  { %14139 = vmatpush3.bf16.msra.mxu1 %v14138_v33  ;;  %v14171_v33 = vpack.c.bf16 %v9472_v58, %v9471_v6  ;;  %v9498_v6 = vld [vmem:[%s18970_s5 + $0x4d8] sm:$0xff]  ;;  %v7760_v58 = vld [vmem:[#allocation3 + $0x62] sm:$0x1] }
 0x672   :  { %14140 = vmatprep.subr.bf16.mxu1 %v14827_v29  ;;  %v14210_v57 = vpack.c.bf16 %v9498_v6, %v9497_v10  ;;  %v9518_v10 = vld [vmem:[%s18970_s5 + $0x578] sm:$0xff]  ;;  %v7872_v6 = vld [vmem:[#allocation3 + $0x2d] sm:$0x1] }
 0x675   :  { %14142 = vmatpush3.bf16.msra.mxu1 %v14141_v7  ;;  %v9475_v7 = vld [vmem:[%s18970_s5 + $0x420] sm:$0xff] }
 0x676   :  { %14143 = vmatprep.subr.bf16.mxu1 %v14827_v29  ;;  %v14177_v42 = vpack.c.bf16 %v9476_v25, %v9475_v7  ;;  %v7768_v7 = vmax.f32 %v7760_v58, %v7762_v39 }
 0x679   :  { %14145 = vmatpush3.bf16.msra.mxu1 %v14144_v23  ;;  %v14183_v23 = vpack.c.bf16 %v9480_v16, %v9479_v46  ;;  %v7761_v46 = vld [vmem:[#allocation3 + $0x23] sm:$0x1]  ;;  %v7763_v16 = vld [vmem:[#allocation3 + $0x2a] sm:$0x1] }
 0x67a   :  { %14146 = vmatprep.subr.bf16.mxu1 %v14827_v29 }
 0x67c   :  { %12759 = vmatmul.mubr.f32.vlgmr.msra.gmra.mrb[140].mxu1 %v7470_v20 }
 0x67d   :  { %14148 = vmatpush3.bf16.msra.mxu1 %v14147_v61  ;;  %12793 = vmatprep.mubr.msk.f32.mxu1 %vm14828_vm1, %v14829_v9  ;;  %v14186_v61 = vpack.c.bf16 %v9482_v17, %v9481_v37  ;;  %v9502_v37 = vld [vmem:[%s18970_s5 + $0x4f8] sm:$0xff]  ;;  %v7765_v17 = vld [vmem:[#allocation3 + $0x2b] sm:$0x1] }
 0x67e   :  { %14149 = vmatprep.subr.bf16.mxu1 %v14827_v29  ;;  %v7769_v24 = vmax.f32 %v7763_v16, %v7765_v17 }
 0x681   :  { %14151 = vmatpush3.bf16.msra.mxu1 %v14150_v27  ;;  %v7661_v27 = vmax.f32 %v7652_v21, %v7654_v8 }
 0x682   :  { %14152 = vmatprep.subr.bf16.mxu1 %v14827_v29 }
 0x683   :  { %v7665_v22 = vmax.f32 %v7661_v27, %v7663_v40  ;;  %v9505_v40 = vld [vmem:[%s18970_s5 + $0x510] sm:$0xff] }
 0x685   :  { %14154 = vmatpush3.bf16.msra.mxu1 %v14153_v13  ;;  %v7685_v52 = vrot.slane %v7665_v22, 7  ;;  %v9511_v22 = vld [vmem:[%s18970_s5 + $0x540] sm:$0xff] }
 0x686   :  { %14155 = vmatprep.subr.bf16.mxu1 %v14827_v29 }
 0x689   :  { %14157 = vmatpush3.bf16.msra.mxu1 %v14156_v44  ;;  %v7653_v44 = vld [vmem:[#allocation3 + $0x21] sm:$0x1] }
 0x68a   :  { %14158 = vmatprep.subr.bf16.mxu1 %v14827_v29  ;;  %v7660_v2 = vmax.f32 %v7651_v15, %v7653_v44  ;;  %v9507_v15 = vld [vmem:[%s18970_s5 + $0x520] sm:$0xff]  ;;  %v9508_v44 = vld [vmem:[%s18970_s5 + $0x528] sm:$0xff] }
 0x68b   :  { %v14225_v1 = vpack.c.bf16 %v9508_v44, %v9507_v15 }
 0x68c   :  { %v7664_v47 = vmax.f32 %v7660_v2, %v7662_v18  ;;  %v9513_v18 = vld [vmem:[%s18970_s5 + $0x550] sm:$0xff] }
 0x68d   :  { %14160 = vmatpush3.bf16.msra.mxu1 %v14159_v14  ;;  %v9486_v14 = vld [vmem:[%s18970_s5 + $0x478] sm:$0xff] }
 0x68e   :  { %14161 = vmatprep.subr.bf16.mxu1 %v14827_v29  ;;  %v14192_v12 = vpack.c.bf16 %v9486_v14, %v9485_v3  ;;  %v9509_v3 = vld [vmem:[%s18970_s5 + $0x530] sm:$0xff]  ;;  %v9510_v14 = vld [vmem:[%s18970_s5 + $0x538] sm:$0xff] }
 0x68f   :  { %v18344_v26 = vpop.f32.mrb[128].mxu1  ;;  %v14228_v62 = vpack.c.bf16 %v9510_v14, %v9509_v3 }
 0x690   :  { %v12550_v54 = vpop.f32.mrb[129].mxu1 }
 0x691   :  { %14163 = vmatpush3.bf16.msra.mxu1 %v14162_v50  ;;  %v9488_v50 = vld [vmem:[%s18970_s5 + $0x488] sm:$0xff]  ;;  %v7686_v54 = vsel %vm6858_vm2, %v7685_v52, %v7664_v47  ;;  %v7869_v52 = vld [vmem:[#allocation3 + $0x65] sm:$0x1] }
 0x692   :  { %14164 = vmatprep.subr.bf16.mxu1 %v14827_v29  ;;  %v7871_v47 = vld [vmem:[#allocation3 + $0x6c] sm:$0x1] }
 0x695   :  { %14166 = vmatpush3.bf16.msra.mxu1 %v14165_v4  ;;  %v14198_v4 = vpack.c.bf16 %v9490_v30, %v9489_v43  ;;  %v9515_v30 = vld [vmem:[%s18970_s5 + $0x560] sm:$0xff] }
 0x696   :  { %14167 = vmatprep.subr.bf16.mxu1 %v14827_v29 }
 0x699   :  { %14169 = vmatpush3.bf16.msra.mxu1 %v14168_v48  ;;  %v9496_v48 = vld [vmem:[%s18970_s5 + $0x4c8] sm:$0xff] }
 0x69a   :  { %14170 = vmatprep.subr.bf16.mxu1 %v14827_v29  ;;  %v14207_v32 = vpack.c.bf16 %v9496_v48, %v9495_v0  ;;  %v7868_v0 = vld [vmem:[#allocation3 + $0x25] sm:$0x1]  ;;  %v7870_v48 = vld [vmem:[#allocation3 + $0x2c] sm:$0x1] }
 0x69c   :  { %12794 = vmatmul.mubr.f32.vlgmr.msra.gmra.mrb[142].mxu1 %v7577_v28  ;;  %v9500_v28 = vld [vmem:[%s18970_s5 + $0x4e8] sm:$0xff] }
 0x69d   :  { %14172 = vmatpush3.bf16.msra.mxu1 %v14171_v33  ;;  %12828 = vmatprep.mubr.msk.f32.mxu1 %vm14828_vm1, %v14829_v9  ;;  %v7766_v33 = vld [vmem:[#allocation3 + $0x6b] sm:$0x1]  ;;  %v14213_v56 = vpack.c.bf16 %v9500_v28, %v9499_v41 }
 0x69e   :  { %14173 = vmatprep.subr.bf16.mxu1 %v14827_v29  ;;  %v7770_v25 = vmax.f32 %v7764_v31, %v7766_v33  ;;  %v7876_v33 = vmax.f32 %v7870_v48, %v7872_v6  ;;  %v9520_v41 = vld [vmem:[%s18970_s5 + $0x588] sm:$0xff] }
 0x6a0   :  { %v7772_v21 = vmax.f32 %v7768_v7, %v7770_v25  ;;  %v9521_v25 = vld [vmem:[%s18970_s5 + $0x590] sm:$0xff] }
 0x6a1   :  { %14175 = vmatpush3.bf16.msra.mxu1 %v14174_v38 }
 0x6a2   :  { %14176 = vmatprep.subr.bf16.mxu1 %v14827_v29  ;;  %v7792_v59 = vrot.slane %v7772_v21, 7  ;;  %v9527_v21 = vld [vmem:[%s18970_s5 + $0x5c0] sm:$0xff] }
 0x6a5   :  { %14178 = vmatpush3.bf16.msra.mxu1 %v14177_v42 }
 0x6a6   :  { %14179 = vmatprep.subr.bf16.mxu1 %v14827_v29 }
 0x6a9   :  { %14181 = vmatpush3.bf16.msra.mxu1 %v14180_v11  ;;  %v7759_v11 = vld [vmem:[#allocation3 + $0x22] sm:$0x1] }
 0x6aa   :  { %14182 = vmatprep.subr.bf16.mxu1 %v14827_v29  ;;  %v7767_v34 = vmax.f32 %v7759_v11, %v7761_v46  ;;  %v9523_v11 = vld [vmem:[%s18970_s5 + $0x5a0] sm:$0xff]  ;;  %v9524_v46 = vld [vmem:[%s18970_s5 + $0x5a8] sm:$0xff] }
 0x6ab   :  { %v14249_v16 = vpack.c.bf16 %v9524_v46, %v9523_v11 }
 0x6ad   :  { %14184 = vmatpush3.bf16.msra.mxu1 %v14183_v23  ;;  %v9501_v23 = vld [vmem:[%s18970_s5 + $0x4f0] sm:$0xff] }
 0x6ae   :  { %14185 = vmatprep.subr.bf16.mxu1 %v14827_v29  ;;  %v14216_v8 = vpack.c.bf16 %v9502_v37, %v9501_v23  ;;  %v9525_v23 = vld [vmem:[%s18970_s5 + $0x5b0] sm:$0xff]  ;;  %v9526_v37 = vld [vmem:[%s18970_s5 + $0x5b8] sm:$0xff] }
 0x6af   :  { %v7002_v20 = vpop.f32.mrb[130].mxu1  ;;  %v14252_v17 = vpack.c.bf16 %v9526_v37, %v9525_v23 }
 0x6b0   :  { %v7003_v19 = vadd.f32 %v7002_v20, %v18344_v26  ;;  %v12585_v13 = vpop.f32.mrb[131].mxu1  ;;  %v14195_v26 = vpack.c.bf16 %v9488_v50, %v9487_v53  ;;  %v7771_v20 = vmax.f32 %v7767_v34, %v7769_v24  ;;  %v9514_v53 = vld [vmem:[%s18970_s5 + $0x558] sm:$0xff]  ;;  %v7867_v50 = vld [vmem:[#allocation3 + $0x64] sm:$0x1]  ;;  %v9529_v24 = vld [vmem:[%s18970_s5 + $0x5d0] sm:$0xff] }
 0x6b1   :  { %14187 = vmatpush3.bf16.msra.mxu1 %v14186_v61  ;;  %v9503_v61 = vld [vmem:[%s18970_s5 + $0x500] sm:$0xff]  ;;  %v14234_v43 = vpack.c.bf16 %v9514_v53, %v9513_v18  ;;  %v7875_v45 = vmax.f32 %v7867_v50, %v7869_v52  ;;  %v9534_v18 = vld [vmem:[%s18970_s5 + $0x5f8] sm:$0xff]  ;;  %v7979_v53 = vld [vmem:[#allocation3 + $0x2f] sm:$0x1] }
 0x6b2   :  { %14188 = vmatprep.subr.bf16.mxu1 %v14827_v29  ;;  %v14219_v27 = vpack.c.bf16 %v9504_v60, %v9503_v61  ;;  %v7793_v13 = vsel %vm6858_vm2, %v7792_v59, %v7771_v20  ;;  %v9530_v61 = vld [vmem:[%s18970_s5 + $0x5d8] sm:$0xff]  ;;  %v7974_v60 = vld [vmem:[#allocation3 + $0x66] sm:$0x1]  ;;  %v7976_v59 = vld [vmem:[#allocation3 + $0x67] sm:$0x1] }
 0x6b3   :  { %v7978_v20 = vld [vmem:[#allocation3 + $0x6e] sm:$0x1]  ;;  %v7982_v15 = vmax.f32 %v7974_v60, %v7976_v59 }
 0x6b5   :  { %14190 = vmatpush3.bf16.msra.mxu1 %v14189_v55 }
 0x6b6   :  { %14191 = vmatprep.subr.bf16.mxu1 %v14827_v29 }
 0x6b9   :  { %14193 = vmatpush3.bf16.msra.mxu1 %v14192_v12  ;;  %v9512_v12 = vld [vmem:[%s18970_s5 + $0x548] sm:$0xff] }
 0x6ba   :  { %14194 = vmatprep.subr.bf16.mxu1 %v14827_v29  ;;  %v14231_v2 = vpack.c.bf16 %v9512_v12, %v9511_v22  ;;  %v7975_v22 = vld [vmem:[#allocation3 + $0x27] sm:$0x1]  ;;  %v7977_v12 = vld [vmem:[#allocation3 + $0x2e] sm:$0x1] }
 0x6bc   :  { %12829 = vmatmul.mubr.f32.vlgmr.msra.gmra.mrb[144].mxu1 %v7686_v54  ;;  %v9516_v54 = vld [vmem:[%s18970_s5 + $0x568] sm:$0xff] }
 0x6bd   :  { %14196 = vmatpush3.bf16.msra.mxu1 %v14195_v26  ;;  %12863 = vmatprep.mubr.msk.f32.mxu1 %vm14828_vm1, %v14829_v9  ;;  %v7873_v26 = vld [vmem:[#allocation3 + $0x6d] sm:$0x1]  ;;  %v14237_v35 = vpack.c.bf16 %v9516_v54, %v9515_v30 }
 0x6be   :  { %14197 = vmatprep.subr.bf16.mxu1 %v14827_v29  ;;  %v7877_v5 = vmax.f32 %v7871_v47, %v7873_v26  ;;  %v7983_v26 = vmax.f32 %v7977_v12, %v7979_v53  ;;  %v9536_v30 = vld [vmem:[%s18970_s5 + $0x608] sm:$0xff] }
 0x6c0   :  { %v7879_v58 = vmax.f32 %v7875_v45, %v7877_v5  ;;  %v9537_v5 = vld [vmem:[%s18970_s5 + $0x610] sm:$0xff] }
 0x6c1   :  { %14199 = vmatpush3.bf16.msra.mxu1 %v14198_v4 }
 0x6c2   :  { %14200 = vmatprep.subr.bf16.mxu1 %v14827_v29  ;;  %v7899_v28 = vrot.slane %v7879_v58, 7  ;;  %v9543_v58 = vld [vmem:[%s18970_s5 + $0x640] sm:$0xff] }
 0x6c5   :  { %14202 = vmatpush3.bf16.msra.mxu1 %v14201_v49 }
 0x6c6   :  { %14203 = vmatprep.subr.bf16.mxu1 %v14827_v29 }
 0x6c9   :  { %14205 = vmatpush3.bf16.msra.mxu1 %v14204_v36  ;;  %v7866_v36 = vld [vmem:[#allocation3 + $0x24] sm:$0x1] }
 0x6ca   :  { %14206 = vmatprep.subr.bf16.mxu1 %v14827_v29  ;;  %v7874_v31 = vmax.f32 %v7866_v36, %v7868_v0  ;;  %v9539_v36 = vld [vmem:[%s18970_s5 + $0x620] sm:$0xff]  ;;  %v9540_v0 = vld [vmem:[%s18970_s5 + $0x628] sm:$0xff] }
 0x6cb   :  { %v14273_v48 = vpack.c.bf16 %v9540_v0, %v9539_v36 }
 0x6cd   :  { %14208 = vmatpush3.bf16.msra.mxu1 %v14207_v32  ;;  %v9517_v32 = vld [vmem:[%s18970_s5 + $0x570] sm:$0xff] }
 0x6ce   :  { %14209 = vmatprep.subr.bf16.mxu1 %v14827_v29  ;;  %v14240_v39 = vpack.c.bf16 %v9518_v10, %v9517_v32  ;;  %v9541_v32 = vld [vmem:[%s18970_s5 + $0x630] sm:$0xff]  ;;  %v9542_v10 = vld [vmem:[%s18970_s5 + $0x638] sm:$0xff] }
 0x6cf   :  { %v7108_v38 = vpop.f32.mrb[132].mxu1  ;;  %v14276_v6 = vpack.c.bf16 %v9542_v10, %v9541_v32 }
 0x6d0   :  { %v7112_v42 = vadd.f32 %v7108_v38, %v7003_v19  ;;  %v12620_v51 = vpop.f32.mrb[133].mxu1  ;;  %v9506_v19 = vld [vmem:[%s18970_s5 + $0x518] sm:$0xff]  ;;  %v7878_v38 = vmax.f32 %v7874_v31, %v7876_v33  ;;  %v9545_v33 = vld [vmem:[%s18970_s5 + $0x650] sm:$0xff] }
 0x6d1   :  { %14211 = vmatpush3.bf16.msra.mxu1 %v14210_v57  ;;  %v14222_v55 = vpack.c.bf16 %v9506_v19, %v9505_v40  ;;  %v9519_v57 = vld [vmem:[%s18970_s5 + $0x580] sm:$0xff]  ;;  %v14258_v40 = vpack.c.bf16 %v9530_v61, %v9529_v24  ;;  %v9550_v24 = vld [vmem:[%s18970_s5 + $0x678] sm:$0xff] }
 0x6d2   :  { %14212 = vmatprep.subr.bf16.mxu1 %v14827_v29  ;;  %v14243_v7 = vpack.c.bf16 %v9520_v41, %v9519_v57  ;;  %v7900_v51 = vsel %vm6858_vm2, %v7899_v28, %v7878_v38  ;;  %v9531_v19 = vld [vmem:[%s18970_s5 + $0x5e0] sm:$0xff]  ;;  %v9546_v57 = vld [vmem:[%s18970_s5 + $0x658] sm:$0xff]  ;;  %v8082_v41 = vld [vmem:[#allocation3 + $0x70] sm:$0x1] }
 0x6d3   :  { %v8084_v28 = vld [vmem:[#allocation3 + $0x71] sm:$0x1]  ;;  %v8087_v38 = vld [vmem:[#allocation3 + $0x78] sm:$0x1]  ;;  %v8088_v61 = vld [vmem:[#allocation3 + $0x39] sm:$0x1] }
 0x6d4   :  { %v8091_v11 = vmax.f32 %v8082_v41, %v8084_v28 }
 0x6d5   :  { %14214 = vmatpush3.bf16.msra.mxu1 %v14213_v56 }
 0x6d6   :  { %14215 = vmatprep.subr.bf16.mxu1 %v14827_v29 }
 0x6d9   :  { %14217 = vmatpush3.bf16.msra.mxu1 %v14216_v8  ;;  %v9528_v8 = vld [vmem:[%s18970_s5 + $0x5c8] sm:$0xff] }
 0x6da   :  { %14218 = vmatprep.subr.bf16.mxu1 %v14827_v29  ;;  %v14255_v34 = vpack.c.bf16 %v9528_v8, %v9527_v21  ;;  %v8083_v21 = vld [vmem:[#allocation3 + $0x31] sm:$0x1]  ;;  %v8086_v8 = vld [vmem:[#allocation3 + $0x38] sm:$0x1] }
 0x6dc   :  { %12864 = vmatmul.mubr.f32.vlgmr.msra.gmra.mrb[146].mxu1 %v7793_v13  ;;  %v9532_v13 = vld [vmem:[%s18970_s5 + $0x5e8] sm:$0xff] }
 0x6dd   :  { %14220 = vmatpush3.bf16.msra.mxu1 %v14219_v27  ;;  %12898 = vmatprep.mubr.msk.f32.mxu1 %vm14828_vm1, %v14829_v9  ;;  %v7980_v27 = vld [vmem:[#allocation3 + $0x6f] sm:$0x1]  ;;  %v14261_v14 = vpack.c.bf16 %v9532_v13, %v9531_v19 }
 0x6de   :  { %14221 = vmatprep.subr.bf16.mxu1 %v14827_v29  ;;  %v7984_v44 = vmax.f32 %v7978_v20, %v7980_v27  ;;  %v8092_v27 = vmax.f32 %v8086_v8, %v8088_v61  ;;  %v9552_v19 = vld [vmem:[%s18970_s5 + $0x688] sm:$0xff] }
 0x6e0   :  { %v7986_v50 = vmax.f32 %v7982_v15, %v7984_v44  ;;  %v9553_v44 = vld [vmem:[%s18970_s5 + $0x690] sm:$0xff] }
 0x6e1   :  { %14223 = vmatpush3.bf16.msra.mxu1 %v14222_v55 }
 0x6e2   :  { %14224 = vmatprep.subr.bf16.mxu1 %v14827_v29  ;;  %v8006_v54 = vrot.slane %v7986_v50, 7  ;;  %v9559_v50 = vld [vmem:[%s18970_s5 + $0x6c0] sm:$0xff] }
 0x6e5   :  { %14226 = vmatpush3.bf16.msra.mxu1 %v14225_v1 }
 0x6e6   :  { %14227 = vmatprep.subr.bf16.mxu1 %v14827_v29 }
 0x6e9   :  { %14229 = vmatpush3.bf16.msra.mxu1 %v14228_v62  ;;  %v7973_v62 = vld [vmem:[#allocation3 + $0x26] sm:$0x1] }
 0x6ea   :  { %14230 = vmatprep.subr.bf16.mxu1 %v14827_v29  ;;  %v7981_v47 = vmax.f32 %v7973_v62, %v7975_v22  ;;  %v9555_v62 = vld [vmem:[%s18970_s5 + $0x6a0] sm:$0xff]  ;;  %v9556_v22 = vld [vmem:[%s18970_s5 + $0x6a8] sm:$0xff] }
 0x6eb   :  { %v14297_v12 = vpack.c.bf16 %v9556_v22, %v9555_v62 }
 0x6ed   :  { %14232 = vmatpush3.bf16.msra.mxu1 %v14231_v2  ;;  %v9533_v2 = vld [vmem:[%s18970_s5 + $0x5f0] sm:$0xff] }
 0x6ee   :  { %14233 = vmatprep.subr.bf16.mxu1 %v14827_v29  ;;  %v14264_v52 = vpack.c.bf16 %v9534_v18, %v9533_v2  ;;  %v9557_v2 = vld [vmem:[%s18970_s5 + $0x6b0] sm:$0xff]  ;;  %v9558_v18 = vld [vmem:[%s18970_s5 + $0x6b8] sm:$0xff] }
 0x6ef   :  { %v7215_v4 = vpop.f32.mrb[134].mxu1  ;;  %v14300_v53 = vpack.c.bf16 %v9558_v18, %v9557_v2 }
 0x6f0   :  { %v7219_v49 = vadd.f32 %v7215_v4, %v7112_v42  ;;  %v12655_v63 = vpop.f32.mrb[135].mxu1  ;;  %v9522_v42 = vld [vmem:[%s18970_s5 + $0x598] sm:$0xff]  ;;  %v7985_v4 = vmax.f32 %v7981_v47, %v7983_v26  ;;  %v9561_v26 = vld [vmem:[%s18970_s5 + $0x6d0] sm:$0xff] }
 0x6f1   :  { %14235 = vmatpush3.bf16.msra.mxu1 %v14234_v43  ;;  %v14246_v56 = vpack.c.bf16 %v9522_v42, %v9521_v25  ;;  %v9535_v43 = vld [vmem:[%s18970_s5 + $0x600] sm:$0xff]  ;;  %v14282_v25 = vpack.c.bf16 %v9546_v57, %v9545_v33  ;;  %v9566_v33 = vld [vmem:[%s18970_s5 + $0x6f8] sm:$0xff] }
 0x6f2   :  { %14236 = vmatprep.subr.bf16.mxu1 %v14827_v29  ;;  %v14267_v45 = vpack.c.bf16 %v9536_v30, %v9535_v43  ;;  %v8007_v63 = vsel %vm6858_vm2, %v8006_v54, %v7985_v4  ;;  %v9547_v42 = vld [vmem:[%s18970_s5 + $0x660] sm:$0xff]  ;;  %v9562_v43 = vld [vmem:[%s18970_s5 + $0x6d8] sm:$0xff]  ;;  %v8190_v30 = vld [vmem:[#allocation3 + $0x72] sm:$0x1] }
 0x6f3   :  { %v8192_v54 = vld [vmem:[#allocation3 + $0x73] sm:$0x1]  ;;  %v8194_v4 = vld [vmem:[#allocation3 + $0x7a] sm:$0x1]  ;;  %v8195_v57 = vld [vmem:[#allocation3 + $0x3b] sm:$0x1] }
 0x6f4   :  { %v8198_v36 = vmax.f32 %v8190_v30, %v8192_v54 }
 0x6f5   :  { %14238 = vmatpush3.bf16.msra.mxu1 %v14237_v35 }
 0x6f6   :  { %14239 = vmatprep.subr.bf16.mxu1 %v14827_v29 }
 0x6f9   :  { %14241 = vmatpush3.bf16.msra.mxu1 %v14240_v39  ;;  %v9544_v39 = vld [vmem:[%s18970_s5 + $0x648] sm:$0xff] }
 0x6fa   :  { %14242 = vmatprep.subr.bf16.mxu1 %v14827_v29  ;;  %v14279_v31 = vpack.c.bf16 %v9544_v39, %v9543_v58  ;;  %v8191_v58 = vld [vmem:[#allocation3 + $0x33] sm:$0x1]  ;;  %v8193_v39 = vld [vmem:[#allocation3 + $0x3a] sm:$0x1] }
 0x6fc   :  { %12899 = vmatmul.mubr.f32.vlgmr.msra.gmra.mrb[148].mxu1 %v7900_v51  ;;  %v9548_v51 = vld [vmem:[%s18970_s5 + $0x668] sm:$0xff] }
 0x6fd   :  { %14244 = vmatpush3.bf16.msra.mxu1 %v14243_v7  ;;  %12933 = vmatprep.mubr.msk.f32.mxu1 %vm14828_vm1, %v14829_v9  ;;  %v8089_v7 = vld [vmem:[#allocation3 + $0x79] sm:$0x1]  ;;  %v14285_v37 = vpack.c.bf16 %v9548_v51, %v9547_v42  ;;  %v9568_v42 = vld [vmem:[%s18970_s5 + $0x708] sm:$0xff] }
 0x6fe   :  { %14245 = vmatprep.subr.bf16.mxu1 %v14827_v29  ;;  %v8093_v46 = vmax.f32 %v8087_v38, %v8089_v7  ;;  %v8199_v7 = vmax.f32 %v8193_v39, %v8195_v57 }
 0x700   :  { %v8095_v60 = vmax.f32 %v8091_v11, %v8093_v46  ;;  %v9569_v46 = vld [vmem:[%s18970_s5 + $0x710] sm:$0xff] }
 0x701   :  { %14247 = vmatpush3.bf16.msra.mxu1 %v14246_v56 }
 0x702   :  { %14248 = vmatprep.subr.bf16.mxu1 %v14827_v29  ;;  %v8115_v13 = vrot.slane %v8095_v60, 7  ;;  %v9575_v60 = vld [vmem:[%s18970_s5 + $0x740] sm:$0xff] }
 0x705   :  { %14250 = vmatpush3.bf16.msra.mxu1 %v14249_v16 }
 0x706   :  { %14251 = vmatprep.subr.bf16.mxu1 %v14827_v29 }
 0x709   :  { %14253 = vmatpush3.bf16.msra.mxu1 %v14252_v17  ;;  %v8081_v17 = vld [vmem:[#allocation3 + $0x30] sm:$0x1] }
 0x70a   :  { %14254 = vmatprep.subr.bf16.mxu1 %v14827_v29  ;;  %v8090_v20 = vmax.f32 %v8081_v17, %v8083_v21  ;;  %v9571_v17 = vld [vmem:[%s18970_s5 + $0x720] sm:$0xff]  ;;  %v9572_v21 = vld [vmem:[%s18970_s5 + $0x728] sm:$0xff] }
 0x70b   :  { %v14321_v8 = vpack.c.bf16 %v9572_v21, %v9571_v17 }
 0x70d   :  { %14256 = vmatpush3.bf16.msra.mxu1 %v14255_v34  ;;  %v9549_v34 = vld [vmem:[%s18970_s5 + $0x670] sm:$0xff] }
 0x70e   :  { %14257 = vmatprep.subr.bf16.mxu1 %v14827_v29  ;;  %v14288_v59 = vpack.c.bf16 %v9550_v24, %v9549_v34  ;;  %v9573_v34 = vld [vmem:[%s18970_s5 + $0x730] sm:$0xff]  ;;  %v9574_v24 = vld [vmem:[%s18970_s5 + $0x738] sm:$0xff] }
 0x70f   :  { %v7324_v55 = vpop.f32.mrb[136].mxu1  ;;  %v14324_v61 = vpack.c.bf16 %v9574_v24, %v9573_v34 }
 0x710   :  { %v7328_v1 = vadd.f32 %v7324_v55, %v7219_v49  ;;  %v12690_v3 = vpop.f32.mrb[137].mxu1  ;;  %v9538_v49 = vld [vmem:[%s18970_s5 + $0x618] sm:$0xff]  ;;  %v8094_v55 = vmax.f32 %v8090_v20, %v8092_v27  ;;  %v9577_v27 = vld [vmem:[%s18970_s5 + $0x750] sm:$0xff] }
 0x711   :  { %14259 = vmatpush3.bf16.msra.mxu1 %v14258_v40  ;;  %v14270_v35 = vpack.c.bf16 %v9538_v49, %v9537_v5  ;;  %v9551_v40 = vld [vmem:[%s18970_s5 + $0x680] sm:$0xff]  ;;  %v14306_v5 = vpack.c.bf16 %v9562_v43, %v9561_v26  ;;  %v9582_v26 = vld [vmem:[%s18970_s5 + $0x778] sm:$0xff] }
 0x712   :  { %14260 = vmatprep.subr.bf16.mxu1 %v14827_v29  ;;  %v14291_v15 = vpack.c.bf16 %v9552_v19, %v9551_v40  ;;  %v8116_v3 = vsel %vm6858_vm2, %v8115_v13, %v8094_v55  ;;  %v9563_v49 = vld [vmem:[%s18970_s5 + $0x6e0] sm:$0xff]  ;;  %v9578_v40 = vld [vmem:[%s18970_s5 + $0x758] sm:$0xff]  ;;  %v8297_v19 = vld [vmem:[#allocation3 + $0x74] sm:$0x1] }
 0x713   :  { %v8299_v13 = vld [vmem:[#allocation3 + $0x75] sm:$0x1]  ;;  %v8301_v55 = vld [vmem:[#allocation3 + $0x7c] sm:$0x1]  ;;  %v8302_v43 = vld [vmem:[#allocation3 + $0x3d] sm:$0x1] }
 0x714   :  { %v8305_v62 = vmax.f32 %v8297_v19, %v8299_v13 }
 0x715   :  { %14262 = vmatpush3.bf16.msra.mxu1 %v14261_v14 }
 0x716   :  { %14263 = vmatprep.subr.bf16.mxu1 %v14827_v29 }
 0x719   :  { %14265 = vmatpush3.bf16.msra.mxu1 %v14264_v52  ;;  %v9560_v52 = vld [vmem:[%s18970_s5 + $0x6c8] sm:$0xff] }
 0x71a   :  { %14266 = vmatprep.subr.bf16.mxu1 %v14827_v29  ;;  %v14303_v47 = vpack.c.bf16 %v9560_v52, %v9559_v50  ;;  %v8298_v50 = vld [vmem:[#allocation3 + $0x35] sm:$0x1]  ;;  %v8300_v52 = vld [vmem:[#allocation3 + $0x3c] sm:$0x1] }
 0x71c   :  { %12934 = vmatmul.mubr.f32.vlgmr.msra.gmra.mrb[150].mxu1 %v8007_v63  ;;  %v9564_v63 = vld [vmem:[%s18970_s5 + $0x6e8] sm:$0xff] }
 0x71d   :  { %14268 = vmatpush3.bf16.msra.mxu1 %v14267_v45  ;;  %12968 = vmatprep.mubr.msk.f32.mxu1 %vm14828_vm1, %v14829_v9  ;;  %v8196_v45 = vld [vmem:[#allocation3 + $0x7b] sm:$0x1]  ;;  %v14309_v10 = vpack.c.bf16 %v9564_v63, %v9563_v49  ;;  %v9584_v49 = vld [vmem:[%s18970_s5 + $0x788] sm:$0xff] }
 0x71e   :  { %14269 = vmatprep.subr.bf16.mxu1 %v14827_v29  ;;  %v8200_v0 = vmax.f32 %v8194_v4, %v8196_v45  ;;  %v8306_v45 = vmax.f32 %v8300_v52, %v8302_v43  ;;  %v8521_v52 = vld [vmem:[%s18972_s7 + $0x10] sm:$0xff] }
 0x720   :  { %v8202_v41 = vmax.f32 %v8198_v36, %v8200_v0  ;;  %v9585_v0 = vld [vmem:[%s18970_s5 + $0x790] sm:$0xff] }
 0x721   :  { %14271 = vmatpush3.bf16.msra.mxu1 %v14270_v35 }
 0x722   :  { %14272 = vmatprep.subr.bf16.mxu1 %v14827_v29  ;;  %v8222_v51 = vrot.slane %v8202_v41, 7  ;;  %v9591_v41 = vld [vmem:[%s18970_s5 + $0x7c0] sm:$0xff] }
 0x725   :  { %14274 = vmatpush3.bf16.msra.mxu1 %v14273_v48 }
 0x726   :  { %14275 = vmatprep.subr.bf16.mxu1 %v14827_v29 }
 0x729   :  { %14277 = vmatpush3.bf16.msra.mxu1 %v14276_v6  ;;  %v8189_v6 = vld [vmem:[#allocation3 + $0x32] sm:$0x1] }
 0x72a   :  { %14278 = vmatprep.subr.bf16.mxu1 %v14827_v29  ;;  %v8197_v38 = vmax.f32 %v8189_v6, %v8191_v58  ;;  %v9587_v6 = vld [vmem:[%s18970_s5 + $0x7a0] sm:$0xff]  ;;  %v9588_v58 = vld [vmem:[%s18970_s5 + $0x7a8] sm:$0xff] }
 0x72b   :  { %v14345_v39 = vpack.c.bf16 %v9588_v58, %v9587_v6 }
 0x72d   :  { %14280 = vmatpush3.bf16.msra.mxu1 %v14279_v31  ;;  %v9565_v31 = vld [vmem:[%s18970_s5 + $0x6f0] sm:$0xff] }
 0x72e   :  { %14281 = vmatprep.subr.bf16.mxu1 %v14827_v29  ;;  %v14312_v28 = vpack.c.bf16 %v9566_v33, %v9565_v31  ;;  %v9589_v31 = vld [vmem:[%s18970_s5 + $0x7b0] sm:$0xff]  ;;  %v9590_v33 = vld [vmem:[%s18970_s5 + $0x7b8] sm:$0xff] }
 0x72f   :  { %v7431_v56 = vpop.f32.mrb[138].mxu1  ;;  %v14348_v57 = vpack.c.bf16 %v9590_v33, %v9589_v31  ;;  %v8532_v31 = vld [vmem:[%s18972_s7 + $0x68] sm:$0xff]  ;;  %v8533_v33 = vld [vmem:[%s18972_s7 + $0x70] sm:$0xff] }
 0x730   :  { %v7435_v16 = vadd.f32 %v7431_v56, %v7328_v1  ;;  %v12725_v23 = vpop.f32.mrb[139].mxu1  ;;  %v9554_v1 = vld [vmem:[%s18970_s5 + $0x698] sm:$0xff]  ;;  %v8201_v56 = vmax.f32 %v8197_v38, %v8199_v7  ;;  %v9593_v7 = vld [vmem:[%s18970_s5 + $0x7d0] sm:$0xff] }
 0x731   :  { %14283 = vmatpush3.bf16.msra.mxu1 %v14282_v25  ;;  %v14294_v14 = vpack.c.bf16 %v9554_v1, %v9553_v44  ;;  %v9567_v25 = vld [vmem:[%s18970_s5 + $0x700] sm:$0xff]  ;;  %v14330_v44 = vpack.c.bf16 %v9578_v40, %v9577_v27  ;;  %v9598_v27 = vld [vmem:[%s18970_s5 + $0x7f8] sm:$0xff] }
 0x732   :  { %14284 = vmatprep.subr.bf16.mxu1 %v14827_v29  ;;  %v14315_v11 = vpack.c.bf16 %v9568_v42, %v9567_v25  ;;  %v8223_v23 = vsel %vm6858_vm2, %v8222_v51, %v8201_v56  ;;  %v9579_v1 = vld [vmem:[%s18970_s5 + $0x760] sm:$0xff]  ;;  %v9594_v25 = vld [vmem:[%s18970_s5 + $0x7d8] sm:$0xff]  ;;  %v8404_v42 = vld [vmem:[#allocation3 + $0x76] sm:$0x1] }
 0x733   :  { %v8406_v51 = vld [vmem:[#allocation3 + $0x77] sm:$0x1]  ;;  %v8408_v56 = vld [vmem:[#allocation3 + $0x7e] sm:$0x1]  ;;  %v8409_v40 = vld [vmem:[#allocation3 + $0x3f] sm:$0x1] }
 0x734   :  { %v8412_v17 = vmax.f32 %v8404_v42, %v8406_v51 }
 0x735   :  { %14286 = vmatpush3.bf16.msra.mxu1 %v14285_v37 }
 0x736   :  { %14287 = vmatprep.subr.bf16.mxu1 %v14827_v29 }
 0x739   :  { %14289 = vmatpush3.bf16.msra.mxu1 %v14288_v59  ;;  %v9576_v59 = vld [vmem:[%s18970_s5 + $0x748] sm:$0xff] }
 0x73a   :  { %14290 = vmatprep.subr.bf16.mxu1 %v14827_v29  ;;  %v14327_v20 = vpack.c.bf16 %v9576_v59, %v9575_v60  ;;  %v8405_v60 = vld [vmem:[#allocation3 + $0x37] sm:$0x1]  ;;  %v8407_v59 = vld [vmem:[#allocation3 + $0x3e] sm:$0x1] }
 0x73c   :  { %12969 = vmatmul.mubr.f32.vlgmr.msra.gmra.mrb[152].mxu1 %v8116_v3  ;;  %v9580_v3 = vld [vmem:[%s18970_s5 + $0x768] sm:$0xff] }
 0x73d   :  { %14292 = vmatpush3.bf16.msra.mxu1 %v14291_v15  ;;  %13003 = vmatprep.mubr.msk.f32.mxu1 %vm14828_vm1, %v14829_v9  ;;  %v8303_v15 = vld [vmem:[#allocation3 + $0x7d] sm:$0x1]  ;;  %v14333_v18 = vpack.c.bf16 %v9580_v3, %v9579_v1 }
 0x73e   :  { %14293 = vmatprep.subr.bf16.mxu1 %v14827_v29  ;;  %v8307_v22 = vmax.f32 %v8301_v55, %v8303_v15  ;;  %v8413_v15 = vmax.f32 %v8407_v59, %v8409_v40  ;;  %v8615_v59 = vld [vmem:[%s18974_s9 + $0x10] sm:$0xff]  ;;  %v8617_v40 = vld [vmem:[%s18974_s9 + $0x20] sm:$0xff] }
 0x740   :  { %v8309_v30 = vmax.f32 %v8305_v62, %v8307_v22 }
 0x741   :  { %14295 = vmatpush3.bf16.msra.mxu1 %v14294_v14 }
 0x742   :  { %14296 = vmatprep.subr.bf16.mxu1 %v14827_v29  ;;  %v8329_v63 = vrot.slane %v8309_v30, 7  ;;  %v8523_v30 = vld [vmem:[%s18972_s7 + $0x20] sm:$0xff] }
 0x745   :  { %14298 = vmatpush3.bf16.msra.mxu1 %v14297_v12 }
 0x746   :  { %14299 = vmatprep.subr.bf16.mxu1 %v14827_v29 }
 0x749   :  { %14301 = vmatpush3.bf16.msra.mxu1 %v14300_v53  ;;  %v8296_v53 = vld [vmem:[#allocation3 + $0x34] sm:$0x1] }
 0x74a   :  { %14302 = vmatprep.subr.bf16.mxu1 %v14827_v29  ;;  %v8304_v4 = vmax.f32 %v8296_v53, %v8298_v50  ;;  %v8519_v53 = vld [vmem:[%s18972_s7] sm:$0xff]  ;;  %v8520_v50 = vld [vmem:[%s18972_s7 + $0x8] sm:$0xff] }
 0x74d   :  { %14304 = vmatpush3.bf16.msra.mxu1 %v14303_v47  ;;  %v9581_v47 = vld [vmem:[%s18970_s5 + $0x770] sm:$0xff] }
 0x74e   :  { %14305 = vmatprep.subr.bf16.mxu1 %v14827_v29  ;;  %v14336_v54 = vpack.c.bf16 %v9582_v26, %v9581_v47  ;;  %v14363_v47 = vpack.c.bf16 %v8520_v50, %v8519_v53  ;;  %v8522_v26 = vld [vmem:[%s18972_s7 + $0x18] sm:$0xff]  ;;  %v8627_v53 = vld [vmem:[%s18974_s9 + $0x70] sm:$0xff] }
 0x74f   :  { %v7538_v35 = vpop.f32.mrb[140].mxu1  ;;  %v14366_v43 = vpack.c.bf16 %v8522_v26, %v8521_v52  ;;  %v8628_v50 = vld [vmem:[%s18974_s9 + $0x78] sm:$0xff] }
 0x750   :  { %v7542_v48 = vadd.f32 %v7538_v35, %v7435_v16  ;;  %v12760_v32 = vpop.f32.mrb[141].mxu1  ;;  %v9570_v16 = vld [vmem:[%s18970_s5 + $0x718] sm:$0xff]  ;;  %v8308_v35 = vmax.f32 %v8304_v4, %v8306_v45  ;;  %v8525_v45 = vld [vmem:[%s18972_s7 + $0x30] sm:$0xff]  ;;  %v14408_v52 = vpack.c.bf16 %v8628_v50, %v8627_v53 }
 0x751   :  { %14307 = vmatpush3.bf16.msra.mxu1 %v14306_v5  ;;  %v14318_v37 = vpack.c.bf16 %v9570_v16, %v9569_v46  ;;  %v9583_v5 = vld [vmem:[%s18970_s5 + $0x780] sm:$0xff]  ;;  %v14354_v46 = vpack.c.bf16 %v9594_v25, %v9593_v7 }
 0x752   :  { %14308 = vmatprep.subr.bf16.mxu1 %v14827_v29  ;;  %v14339_v36 = vpack.c.bf16 %v9584_v49, %v9583_v5  ;;  %v8330_v32 = vsel %vm6858_vm2, %v8329_v63, %v8308_v35  ;;  %v9595_v16 = vld [vmem:[%s18970_s5 + $0x7e0] sm:$0xff]  ;;  %v8526_v5 = vld [vmem:[%s18972_s7 + $0x38] sm:$0xff]  ;;  %v8528_v35 = vld [vmem:[%s18972_s7 + $0x48] sm:$0xff] }
 0x753   :  { %v14372_v49 = vpack.c.bf16 %v8526_v5, %v8525_v45  ;;  %v8527_v63 = vld [vmem:[%s18972_s7 + $0x40] sm:$0xff] }
 0x755   :  { %14310 = vmatpush3.bf16.msra.mxu1 %v14309_v10 }
 0x756   :  { %14311 = vmatprep.subr.bf16.mxu1 %v14827_v29 }
 0x759   :  { %14313 = vmatpush3.bf16.msra.mxu1 %v14312_v28  ;;  %v9592_v28 = vld [vmem:[%s18970_s5 + $0x7c8] sm:$0xff] }
 0x75a   :  { %14314 = vmatprep.subr.bf16.mxu1 %v14827_v29  ;;  %v14351_v38 = vpack.c.bf16 %v9592_v28, %v9591_v41  ;;  %v8534_v41 = vld [vmem:[%s18972_s7 + $0x78] sm:$0xff] }
 0x75b   :  { %v14384_v28 = vpack.c.bf16 %v8534_v41, %v8533_v33 }
 0x75c   :  { %13004 = vmatmul.mubr.f32.vlgmr.msra.gmra.mrb[154].mxu1 %v8223_v23  ;;  %v9596_v23 = vld [vmem:[%s18970_s5 + $0x7e8] sm:$0xff] }
 0x75d   :  { %14316 = vmatpush3.bf16.msra.mxu1 %v14315_v11  ;;  %13038 = vmatprep.mubr.msk.f32.mxu1 %vm14828_vm1, %v14829_v9  ;;  %v8410_v11 = vld [vmem:[#allocation3 + $0x7f] sm:$0x1]  ;;  %v14357_v24 = vpack.c.bf16 %v9596_v23, %v9595_v16 }
 0x75e   :  { %14317 = vmatprep.subr.bf16.mxu1 %v14827_v29  ;;  %v8414_v21 = vmax.f32 %v8408_v56, %v8410_v11 }
 0x760   :  { %v8416_v19 = vmax.f32 %v8412_v17, %v8414_v21 }
 0x761   :  { %14319 = vmatpush3.bf16.msra.mxu1 %v14318_v37 }
 0x762   :  { %14320 = vmatprep.subr.bf16.mxu1 %v14827_v29 }
 0x765   :  { %14322 = vmatpush3.bf16.msra.mxu1 %v14321_v8 }
 0x766   :  { %14323 = vmatprep.subr.bf16.mxu1 %v14827_v29 }
 0x769   :  { %14325 = vmatpush3.bf16.msra.mxu1 %v14324_v61  ;;  %v8403_v61 = vld [vmem:[#allocation3 + $0x36] sm:$0x1] }
 0x76a   :  { %14326 = vmatprep.subr.bf16.mxu1 %v14827_v29  ;;  %v8411_v55 = vmax.f32 %v8403_v61, %v8405_v60 }
 0x76c   :  { %v8415_v1 = vmax.f32 %v8411_v55, %v8413_v15  ;;  %v8619_v55 = vld [vmem:[%s18974_s9 + $0x30] sm:$0xff] }
 0x76d   :  { %14328 = vmatpush3.bf16.msra.mxu1 %v14327_v20  ;;  %v9597_v20 = vld [vmem:[%s18970_s5 + $0x7f0] sm:$0xff] }
 0x76e   :  { %14329 = vmatprep.subr.bf16.mxu1 %v14827_v29  ;;  %v14360_v13 = vpack.c.bf16 %v9598_v27, %v9597_v20  ;;  %v8616_v20 = vld [vmem:[%s18974_s9 + $0x18] sm:$0xff] }
 0x76f   :  { %v7645_v14 = vpop.f32.mrb[142].mxu1  ;;  %v14390_v27 = vpack.c.bf16 %v8616_v20, %v8615_v59 }
 0x770   :  { %v7649_v12 = vadd.f32 %v7645_v14, %v7542_v48  ;;  %v12795_v2 = vpop.f32.mrb[143].mxu1  ;;  %v9586_v48 = vld [vmem:[%s18970_s5 + $0x798] sm:$0xff] }
 0x771   :  { %14331 = vmatpush3.bf16.msra.mxu1 %v14330_v44  ;;  %v14342_v10 = vpack.c.bf16 %v9586_v48, %v9585_v0  ;;  %v8436_v44 = vrot.slane %v8416_v19, 7  ;;  %v8529_v0 = vld [vmem:[%s18972_s7 + $0x50] sm:$0xff]  ;;  %v8530_v48 = vld [vmem:[%s18972_s7 + $0x58] sm:$0xff]  ;;  %v8618_v19 = vld [vmem:[%s18974_s9 + $0x28] sm:$0xff] }
 0x772   :  { %14332 = vmatprep.subr.bf16.mxu1 %v14827_v29 }
 0x773   :  { %v8437_v3 = vsel %vm6858_vm2, %v8436_v44, %v8415_v1  ;;  %v8621_v44 = vld [vmem:[%s18974_s9 + $0x40] sm:$0xff]  ;;  %v8622_v1 = vld [vmem:[%s18974_s9 + $0x48] sm:$0xff] }
 0x775   :  { %14334 = vmatpush3.bf16.msra.mxu1 %v14333_v18 }
 0x776   :  { %14335 = vmatprep.subr.bf16.mxu1 %v14827_v29 }
 0x779   :  { %14337 = vmatpush3.bf16.msra.mxu1 %v14336_v54  ;;  %v8524_v54 = vld [vmem:[%s18972_s7 + $0x28] sm:$0xff] }
 0x77a   :  { %14338 = vmatprep.subr.bf16.mxu1 %v14827_v29  ;;  %v14369_v4 = vpack.c.bf16 %v8524_v54, %v8523_v30 }
 0x77c   :  { %13039 = vmatmul.mubr.f32.vlgmr.msra.gmra.mrb[156].mxu1 %v8330_v32  ;;  %v14378_v32 = vpack.c.bf16 %v8530_v48, %v8529_v0 }
 0x77d   :  { %14340 = vmatpush3.bf16.msra.mxu1 %v14339_v36  ;;  %13073 = vmatprep.mubr.msk.f32.mxu1 %vm14828_vm1, %v14829_v9  ;;  %v14375_v36 = vpack.c.bf16 %v8528_v35, %v8527_v63 }
 0x77e   :  { %14341 = vmatprep.subr.bf16.mxu1 %v14827_v29 }
 0x781   :  { %14343 = vmatpush3.bf16.msra.mxu1 %v14342_v10 }
 0x782   :  { %14344 = vmatprep.subr.bf16.mxu1 %v14827_v29 }
 0x785   :  { %14346 = vmatpush3.bf16.msra.mxu1 %v14345_v39  ;;  %v8531_v39 = vld [vmem:[%s18972_s7 + $0x60] sm:$0xff] }
 0x786   :  { %14347 = vmatprep.subr.bf16.mxu1 %v14827_v29 }
 0x789   :  { %14349 = vmatpush3.bf16.msra.mxu1 %v14348_v57  ;;  %v14381_v57 = vpack.c.bf16 %v8532_v31, %v8531_v39 }
 0x78a   :  { %14350 = vmatprep.subr.bf16.mxu1 %v14827_v29 }
 0x78d   :  { %14352 = vmatpush3.bf16.msra.mxu1 %v14351_v38 }
 0x78e   :  { %14353 = vmatprep.subr.bf16.mxu1 %v14827_v29 }
 0x78f   :  { %v7754_v37 = vpop.f32.mrb[144].mxu1 }
 0x790   :  { %v7758_v8 = vadd.f32 %v7754_v37, %v7649_v12  ;;  %v12830_v34 = vpop.f32.mrb[145].mxu1  ;;  %v9599_v37 = vld [vmem:[%s18971_s6] ss:$0 sm:$0xff] }
 0x791   :  { %14355 = vmatpush3.bf16.msra.mxu1 %v14354_v46  ;;  %v8614_v34 = vld [vmem:[%s18974_s9 + $0x8] sm:$0xff] }
 0x792   :  { %14356 = vmatprep.subr.bf16.mxu1 %v14827_v29 }
 0x795   :  { %14358 = vmatpush3.bf16.msra.mxu1 %v14357_v24 }
 0x796   :  { %14359 = vmatprep.subr.bf16.mxu1 %v14827_v29 }
 0x799   :  { %14361 = vmatpush3.bf16.msra.mxu1 %v14360_v13  ;;  %v14393_v13 = vpack.c.bf16 %v8618_v19, %v8617_v40 }
 0x79a   :  { %14362 = vmatprep.subr.bf16.mxu1 %v14827_v29 }
 0x79c   :  { %13074 = vmatmul.mubr.f32.vlgmr.msra.gmra.mrb[158].mxu1 %v8437_v3  ;;  %v14399_v3 = vpack.c.bf16 %v8622_v1, %v8621_v44 }
 0x79d   :  { %13108 = vmatprep.mubr.msk.f32.mxu1 %vm14828_vm1, %v14829_v9  ;;  %14364 = vmatpush3.bf16.msra.mxu1 %v14363_v47  ;;  %v9600_v47 = vld [vmem:[%s18973_s8] ss:$0 sm:$0xff] }
 0x79e   :  { %14365 = vmatprep.subr.bf16.mxu1 %v14827_v29 }
 0x7a1   :  { %14367 = vmatpush3.bf16.msra.mxu1 %v14366_v43 }
 0x7a2   :  { %14368 = vmatprep.subr.bf16.mxu1 %v14827_v29 }
 0x7a5   :  { %14370 = vmatpush3.bf16.msra.mxu1 %v14369_v4 }
 0x7a6   :  { %14371 = vmatprep.subr.bf16.mxu1 %v14827_v29 }
 0x7a9   :  { %14373 = vmatpush3.bf16.msra.mxu1 %v14372_v49 }
 0x7aa   :  { %14374 = vmatprep.subr.bf16.mxu1 %v14827_v29 }
 0x7ad   :  { %14376 = vmatpush3.bf16.msra.mxu1 %v14375_v36 }
 0x7ae   :  { %14377 = vmatprep.subr.bf16.mxu1 %v14827_v29 }
 0x7af   :  { %v7861_v14 = vpop.f32.mrb[146].mxu1 }
 0x7b0   :  { %v7865_v62 = vadd.f32 %v7861_v14, %v7758_v8  ;;  %v12865_v22 = vpop.f32.mrb[147].mxu1  ;;  %v8613_v8 = vld [vmem:[%s18974_s9] sm:$0xff]  ;;  %v8623_v14 = vld [vmem:[%s18974_s9 + $0x50] sm:$0xff] }
 0x7b1   :  { %14379 = vmatpush3.bf16.msra.mxu1 %v14378_v32  ;;  %v14387_v61 = vpack.c.bf16 %v8614_v34, %v8613_v8 }
 0x7b2   :  { %14380 = vmatprep.subr.bf16.mxu1 %v14827_v29 }
 0x7b5   :  { %14382 = vmatpush3.bf16.msra.mxu1 %v14381_v57 }
 0x7b6   :  { %14383 = vmatprep.subr.bf16.mxu1 %v14827_v29 }
 0x7b9   :  { %14385 = vmatpush3.bf16.msra.mxu1 %v14384_v28 }
 0x7ba   :  { %14386 = vmatprep.subr.bf16.mxu1 %v14827_v29 }
 0x7cf   :  { %v7968_v12 = vpop.f32.mrb[148].mxu1 }
 0x7d0   :  { %v7972_v2 = vadd.f32 %v7968_v12, %v7865_v62  ;;  %v12900_v18 = vpop.f32.mrb[149].mxu1  ;;  %v8624_v62 = vld [vmem:[%s18974_s9 + $0x58] sm:$0xff]  ;;  %v8625_v12 = vld [vmem:[%s18974_s9 + $0x60] sm:$0xff] }
 0x7d1   :  { %v14402_v22 = vpack.c.bf16 %v8624_v62, %v8623_v14 }
 0x7ef   :  { %v8075_v10 = vpop.f32.mrb[150].mxu1 }
 0x7f0   :  { %v8079_v6 = vadd.f32 %v8075_v10, %v7972_v2  ;;  %v12935_v58 = vpop.f32.mrb[151].mxu1  ;;  %v8626_v2 = vld [vmem:[%s18974_s9 + $0x68] sm:$0xff] }
 0x7f1   :  { %v14405_v18 = vpack.c.bf16 %v8626_v2, %v8625_v12 }
 0x80f   :  { %v8184_v38 = vpop.f32.mrb[152].mxu1 }
 0x810   :  { %v8188_v7 = vadd.f32 %v8184_v38, %v8079_v6  ;;  %v12970_v25 = vpop.f32.mrb[153].mxu1 }
 0x82f   :  { %v8291_v42 = vpop.f32.mrb[154].mxu1 }
 0x830   :  { %v8295_v51 = vadd.f32 %v8291_v42, %v8188_v7  ;;  %v13005_v56 = vpop.f32.mrb[155].mxu1 }
 0x84f   :  { %v8398_v11 = vpop.f32.mrb[156].mxu1 }
 0x850   :  { %v8402_v46 = vadd.f32 %v8398_v11, %v8295_v51  ;;  %v13040_v16 = vpop.f32.mrb[157].mxu1 }
 0x86f   :  { %v8505_v23 = vpop.f32.mrb[158].mxu1 }
 0x870   :  { %v8509_v17 = vadd.f32 %v8505_v23, %v8402_v46  ;;  %v13075_v21 = vpop.f32.mrb[159].mxu1 }
 0x872   :  { %v8517_v24 = vadd.f32 %v9599_v37, %v8509_v17 }
 0x874   :  { %v8518_v60 = vmax.f32 %v8517_v24, 0.0 }
 0x876   :  { %13109 = vmatmul.mubr.f32.vlgmr.msra.gmra.mrb[160].mxu1 %v8518_v60 }
 0x877   :  { %14388 = vmatpush3.bf16.msra.mxu1 %v14387_v61  ;;  %13143 = vmatprep.mubr.msk.f32.mxu1 %vm14828_vm1, %v14829_v9  ;;  %v8620_v9 = vld [vmem:[%s18974_s9 + $0x38] sm:$0xff]  ;;  %s14803_s9 = scalar_lea.vmem %s8714_s28, 32 }
 0x878   :  { %14389 = vmatprep.subr.bf16.mxu1 %v14827_v29  ;;  %v14396_v15 = vpack.c.bf16 %v8620_v9, %v8619_v55  ;;  %p14804_p0 = scmp.ne.s32.totalorder %s8714_s28, %s14803_s9  ;;  %p14809_p2 = scmp.lt.s32.totalorder %s14803_s9, %s14803_s9 }
 0x87a   :  { %p14810_p3 = por %p14809_p2, %p14808_p1 }
 0x87b   :  { %14391 = vmatpush3.bf16.msra.mxu1 %v14390_v27 }
 0x87c   :  { %14392 = vmatprep.subr.bf16.mxu1 %v14827_v29  ;;  %p14811_p4 = pnand %p14810_p3, %p14804_p0 }
 0x87f   :  { %14394 = vmatpush3.bf16.msra.mxu1 %v14393_v13 }
 0x880   :  { %14395 = vmatprep.subr.bf16.mxu1 %v14827_v29 }
 0x883   :  { %14397 = vmatpush3.bf16.msra.mxu1 %v14396_v15 }
 0x884   :  { %14398 = vmatprep.subr.bf16.mxu1 %v14827_v29 }
 0x887   :  { %14400 = vmatpush3.bf16.msra.mxu1 %v14399_v3 }
 0x888   :  { %14401 = vmatprep.subr.bf16.mxu1 %v14827_v29 }
 0x88b   :  { %14403 = vmatpush3.bf16.msra.mxu1 %v14402_v22 }
 0x88c   :  { %14404 = vmatprep.subr.bf16.mxu1 %v14827_v29 }
 0x88f   :  { %14406 = vmatpush3.bf16.msra.mxu1 %v14405_v18 }
 0x890   :  { %14407 = vmatprep.subr.bf16.mxu1 %v14827_v29  ;;  %v9601_v29 = vld [vmem:[%s18975_s10] ss:$0 sm:$0xff] }
 0x893   :  { %14409 = vmatpush3.bf16.msra.mxu1 %v14408_v52 }
 0x949   :  { %v8608_v26 = vpop.f32.mrb[160].mxu1 }
 0x94a   :  { %v8609_v43 = vadd.f32 %v9600_v47, %v8608_v26  ;;  %v13110_v30 = vpop.f32.mrb[161].mxu1 }
 0x94c   :  { %v8612_v54 = vmax.f32 %v8609_v43, 0.0 }
 0x94e   :  { %13144 = vmatmul.mubr.f32.vlgmr.msra.gmra.mrb[162].mxu1 %v8612_v54 }
 0xa21   :  { %v8702_v4 = vpop.f32.mrb[162].mxu1 }
 0xa22   :  { %v8703_v45 = vadd.f32 %v9601_v29, %v8702_v4  ;;  %v13145_v5 = vpop.f32.mrb[163].mxu1 }
 0xa24   :  { %8706 = vst [vmem:[#allocation4] sm:$0x3] %v8703_v45 }
 0xa25   :  { %14814 = shalt.err (!%p14811_p4)
}
 0xa26   :  { %s14815_s30 = scalar_lea.hbm %s18976_s11, 32 }
 0xa27   :  { %p14816_p5 = scmp.ne.s32.totalorder %s18976_s11, %s14815_s30  ;;  %p14819_p6 = scmp.lt.u32.totalorder %s14815_s30, %s18976_s11 }
 0xa29   :  { %p14821_p7 = pnand %p14819_p6, %p14816_p5 }
 0xa2b   :  { %14824 = shalt.err (!%p14821_p7)
}
 0xa2c   :  { %8716 = dma.vmem_to_hbm [thread:$0]  %s8714_s28, 32, %s18976_s11, [#allocation5]  }
 0xa2d   :  { %14825 = dma.done.wait [#allocation5], 32  }
 0xa2e   :  { %14826 = vsyncadd [#allocation5], 4294967264 }
 0xa2f   :  { %8720 = vsyncpa [#allocation5], 1 }

</bundles_post_ra>
